<compile_context>
chip_gen: v5e
topology: v5e:2x2
jax: 0.10.0
libtpu: 0.0.40
codegen_flags: <defaults>
</compile_context>

<pallas_src>
import functools

import jax
import jax.numpy as jnp
from jax import lax
from jax.experimental import pallas as pl
from jax.experimental.pallas import tpu as pltpu


# ---------------------------------------------------------------------------
# Kernel
# ---------------------------------------------------------------------------
def _encoder_kernel(*refs, num_ds, num_res, width, cmax, pad_lo, use_vpu_1x1):
    """One grid step == NB batch elements, lane-dense (C, NB*H*W) layout.

    refs layout (positional):
      inputs : x, masks, [w_ds_i, b_ds_i] * num_ds, wpre, bpre, w3, b3, w1, b1
      outputs: o
      scratch: pad (cmax, pad_lo + NL + W + 1) f32,  patch (9*cmax, NL) f32
    """
    n_in = 2 + 2 * num_ds + 6
    x_ref, mask_ref = refs[0], refs[1]
    ds_refs = refs[2:2 + 2 * num_ds]
    wpre_ref, bpre_ref, w3_ref, b3_ref, w1_ref, b1_ref = refs[2 + 2 * num_ds:n_in]
    o_ref = refs[n_in]
    pad_ref = refs[n_in + 1]
    patch_ref = refs[n_in + 2]

    nl = x_ref.shape[-1]          # NB * H*W lanes handled this grid step
    w = width                     # spatial width at the final resolution

    # Zero only the two halo strips once per step; the interior is rewritten
    # by every conv.  Do NOT gate this on program_id==0: with a "parallel"
    # grid axis the second TensorCore would read stale VMEM in the halo.
    zeros_strip = jnp.zeros((cmax, w + 1), jnp.float32)
    pad_ref[:, pad_lo - (w + 1):pad_lo] = zeros_strip
    pad_ref[:, pad_lo + nl:pad_lo + nl + w + 1] = zeros_strip

    def conv3x3(a, w_pk, b):
        """SAME 3x3 conv as a single im2col matmul.

        a: (cin, nl) f32   w_pk: (cout, 9*cin) bf16   b: (cout, 1) f32.
        """
        cin = a.shape[0]
        pad_ref[0:cin, pad_lo:pad_lo + nl] = a
        k = 0
        for dy in (-1, 0, 1):
            for dx in (-1, 0, 1):
                s = dy * w + dx
                # TODO(synk): the dx=+-1 taps could be derived from 3 dy-slabs
                # with pltpu.roll (XLU slot) instead of 9 window loads.
                t = pad_ref[0:cin, pad_lo + s:pad_lo + s + nl]
                if dy != 0 or dx != 0:
                    t = t * mask_ref[k:k + 1, :]
                patch_ref[k * cin:(k + 1) * cin, :] = t
                k += 1
        patch = patch_ref[0:9 * cin, :].astype(jnp.bfloat16)
        return jnp.dot(w_pk, patch, preferred_element_type=jnp.float32) + b

    # --- fused downsampling stack (each stride-2 4x4 conv re-expressed as an
    #     equivalent 3x3 conv on space-to-depth channels), bias + ReLU.
    h = x_ref[...]
    for i in range(num_ds):
        h = jnp.maximum(conv3x3(h, ds_refs[2 * i][...], ds_refs[2 * i + 1][...]), 0.0)

    # --- encoder's final 3x3 conv (no activation before the residual stack).
    h = conv3x3(h, wpre_ref[...], bpre_ref[...])

    # --- residual stack: h = h + Conv1x1(ReLU(Conv3x3(ReLU(h))))
    for l in range(num_res):
        y = conv3x3(jnp.maximum(h, 0.0), w3_ref[l], b3_ref[l])
        y = jnp.maximum(y, 0.0)
        if use_vpu_1x1:
            # Tiny contraction depth: Cr broadcast multiply-adds on the VPU.
            w1l = w1_ref[l]                              # (C, Cr) f32
            upd = b1_ref[l]                              # (C, 1)
            for r in range(w1l.shape[-1]):
                upd = upd + w1l[:, r:r + 1] * y[r:r + 1, :]
            h = h + upd
        else:
            h = h + jnp.dot(w1_ref[l].astype(jnp.bfloat16),
                            y.astype(jnp.bfloat16),
                            preferred_element_type=jnp.float32) + b1_ref[l]

    o_ref[...] = jnp.maximum(h, 0.0)                     # final ReLU


# ---------------------------------------------------------------------------
# Host-side weight re-packing helpers
# ---------------------------------------------------------------------------
def _pack_im2col(w_hwio):
    """(3, 3, cin, cout) HWIO -> (cout, 9*cin), tap-major (dy, dx, cin)."""
    kh, kw, cin, cout = w_hwio.shape
    return jnp.transpose(w_hwio, (3, 0, 1, 2)).reshape(cout, kh * kw * cin)


def _stride2_conv_as_3x3(w_hwio, f):
    """Re-express a stride-2 / kernel-4 / pad-1 conv as an exactly equivalent
    stride-1 3x3 SAME conv on space-to-depth representations.

    Input channels of the equivalent conv :  f*f*cin   ordered (py, px, ci)
    Output channels                       :  g*g*cout  ordered (p,  q,  co),  g = f // 2
    """
    kh, kw, cin, cout = w_hwio.shape
    g = f // 2
    w_eq = jnp.zeros((3, 3, f * f * cin, g * g * cout), w_hwio.dtype)
    for p in range(g):
        for ky in range(kh):
            my = 2 * p + ky - 1
            dy, py = my // f, my % f
            for q in range(g):
                for kx in range(kw):
                    mx = 2 * q + kx - 1
                    dx, px = mx // f, mx % f
                    w_eq = w_eq.at[
                        dy + 1, dx + 1,
                        (py * f + px) * cin:(py * f + px + 1) * cin,
                        (p * g + q) * cout:(p * g + q + 1) * cout,
                    ].set(w_hwio[ky, kx])
    return w_eq


# ---------------------------------------------------------------------------
# Wrapper
# ---------------------------------------------------------------------------
@functools.partial(jax.jit, static_argnames=("block_batch",))
def residual_encoder_v2_pallas(x, ds_ws, ds_bs, wpre, bpre, w3, b3, w1, b1,
                               *, block_batch=None):
    """Fused ResidualEncoderV2 forward.

    x     : (N, Cin, H, W)
    ds_ws : list of (4, 4, cin_i, cout_i) HWIO stride-2 conv weights
    ds_bs : list of (cout_i,) biases
    wpre  : (3, 3, C, C) HWIO        bpre: (C,)
    w3    : (L, 3, 3, C, Cr) HWIO    b3:   (L, Cr)
    w1    : (L, Cr, C) (in, out)     b1:   (L, C)
    Returns (N, C, H / 2**nd, W / 2**nd).
    """
    N, cin0, H, W = x.shape
    nd = len(ds_ws)
    F = 2 ** nd
    if H % F or W % F:
        raise ValueError("spatial dims must be divisible by 2**num_downsampling_layers")
    Ho, Wo = H // F, W // F
    HW = Ho * Wo
    C = wpre.shape[-1]
    L, Cr = w3.shape[0], w3.shape[-1]

    # ---- batch folding: NB elements per grid step, >= 2 grid steps when possible.
    if block_batch is None:
        block_batch = 1
        for d in range(1, N + 1):
            if N % d == 0 and d <= 8 and (N // d >= 2 or N == 1):
                block_batch = d
    NB = block_batch
    if N % NB:
        raise ValueError("block_batch must divide the batch size")
    NL = NB * HW
    num_steps = N // NB

    # ---- space-to-depth the input down to the final spatial resolution, and
    #      put the batch on lanes: (F*F*Cin, N*HW).
    xf = x.astype(jnp.float32)
    xs = xf.reshape(N, cin0, Ho, F, Wo, F)
    xs = jnp.transpose(xs, (0, 3, 5, 1, 2, 4)).reshape(N, F * F * cin0, HW)
    x_flat = jnp.transpose(xs, (1, 0, 2)).reshape(F * F * cin0, N * HW)

    # ---- pack every conv as a (cout, 9*cin) im2col matrix (bf16 for the MXU).
    ds_packed = []
    cin_list = [F * F * cin0]
    f = F
    for wds, bds in zip(ds_ws, ds_bs):
        g = f // 2
        w_eq = _stride2_conv_as_3x3(wds, f)
        co = w_eq.shape[-1]
        ds_packed.append((_pack_im2col(w_eq).astype(jnp.bfloat16),
                          jnp.tile(bds, g * g).reshape(co, 1).astype(jnp.float32)))
        cin_list.append(co)
        f = g
    assert f == 1 and cin_list[-1] == C

    wpre_p = _pack_im2col(wpre).astype(jnp.bfloat16)
    bpre_p = bpre.reshape(C, 1).astype(jnp.float32)
    w3_p = jnp.stack([_pack_im2col(w3[l]) for l in range(L)]).astype(jnp.bfloat16)
    b3_p = b3.reshape(L, Cr, 1).astype(jnp.float32)
    w1_p = jnp.transpose(w1, (0, 2, 1)).astype(jnp.float32)        # (L, C, Cr)
    b1_p = b1.reshape(L, C, 1).astype(jnp.float32)

    cmax = max(cin_list)

    # ---- boundary masks (hoisted out of the kernel); row masks keep batched
    #      lanes from bleeding across elements.
    oy = jnp.arange(HW, dtype=jnp.int32) // Wo
    ox = jnp.arange(HW, dtype=jnp.int32) % Wo
    rows = []
    for dy in (-1, 0, 1):
        for dx in (-1, 0, 1):
            ok = (oy + dy >= 0) & (oy + dy < Ho) & (ox + dx >= 0) & (ox + dx < Wo)
            rows.append(ok)
    mask = jnp.tile(jnp.stack(rows).astype(jnp.float32), (1, NB))   # (9, NL)

    pad_lo = ((Wo + 1 + 127) // 128) * 128        # lane-aligned interior start
    pad_cols = pad_lo + NL + Wo + 1

    # ---- pallas_call plumbing
    inputs = [x_flat, mask]
    in_specs = [pl.BlockSpec((F * F * cin0, NL), lambda n: (0, n)),
                pl.BlockSpec((9, NL), lambda n: (0, 0))]
    for w_eq, b_eq in ds_packed:
        inputs += [w_eq, b_eq]
        in_specs += [pl.BlockSpec(w_eq.shape, lambda n: (0, 0)),
                     pl.BlockSpec(b_eq.shape, lambda n: (0, 0))]
    inputs += [wpre_p, bpre_p, w3_p, b3_p, w1_p, b1_p]
    in_specs += [pl.BlockSpec(wpre_p.shape, lambda n: (0, 0)),
                 pl.BlockSpec(bpre_p.shape, lambda n: (0, 0)),
                 pl.BlockSpec(w3_p.shape, lambda n: (0, 0, 0)),
                 pl.BlockSpec(b3_p.shape, lambda n: (0, 0, 0)),
                 pl.BlockSpec(w1_p.shape, lambda n: (0, 0, 0)),
                 pl.BlockSpec(b1_p.shape, lambda n: (0, 0, 0))]

    # Advisory cost estimate so XLA schedules the call sensibly.
    mac = sum(wq.shape[0] * wq.shape[1] for wq, _ in ds_packed)
    mac += wpre_p.shape[0] * wpre_p.shape[1] + L * (Cr * 9 * C + C * Cr)
    bytes_in = sum(int(a.size) * a.dtype.itemsize for a in inputs)
    bytes_out = C * N * HW * 4
    cost = pl.CostEstimate(flops=2 * mac * N * HW, transcendentals=0,
                           bytes_accessed=bytes_in + bytes_out)

    # VMEM budget: double-buffered in/out blocks + weights + scratch.  Only
    # raise the scoped limit if the default (32 MiB) would not fit.
    weight_bytes = bytes_in - int(x_flat.size) * 4
    vmem_est = (2 * (F * F * cin0 + C) * NL * 4 + cmax * pad_cols * 4
                + 9 * cmax * NL * 4 + 2 * weight_bytes)
    cp_kwargs = dict(dimension_semantics=("parallel",))
    if vmem_est > 30 * 1024 * 1024:
        cp_kwargs["vmem_limit_bytes"] = min(int(vmem_est * 5 // 4),
                                            100 * 1024 * 1024)

    kernel = functools.partial(
        _encoder_kernel, num_ds=nd, num_res=L, width=Wo, cmax=cmax,
        pad_lo=pad_lo, use_vpu_1x1=(Cr < 16))

    out = pl.pallas_call(
        kernel,
        out_shape=jax.ShapeDtypeStruct((C, N * HW), jnp.float32),
        grid_spec=pltpu.PrefetchScalarGridSpec(
            num_scalar_prefetch=0,
            grid=(num_steps,),
            in_specs=in_specs,
            out_specs=pl.BlockSpec((C, NL), lambda n: (0, n)),
            scratch_shapes=[pltpu.VMEM((cmax, pad_cols), jnp.float32),
                            pltpu.VMEM((9 * cmax, NL), jnp.float32)]),
        compiler_params=pltpu.CompilerParams(**cp_kwargs),
        cost_estimate=cost,
    )(*inputs)

    return jnp.transpose(out.reshape(C, N, Ho, Wo), (1, 0, 2, 3))


# ---------------------------------------------------------------------------
# Plain-JAX reference (lax.conv) matching the PyTorch forward
# ---------------------------------------------------------------------------
def residual_encoder_v2_reference(x, ds_ws, ds_bs, wpre, bpre, w3, b3, w1, b1):
    dn = ("NCHW", "HWIO", "NCHW")
    h = x.astype(jnp.float32)
    for w, b in zip(ds_ws, ds_bs):
        h = lax.conv_general_dilated(h, w, (2, 2), [(1, 1), (1, 1)],
                                     dimension_numbers=dn,
                                     precision=lax.Precision.HIGHEST)
        h = jax.nn.relu(h + b[None, :, None, None])
    h = jnp.transpose(h, (0, 2, 3, 1))                       # NHWC
    dn2 = ("NHWC", "HWIO", "NHWC")
    conv = functools.partial(lax.conv_general_dilated,
                             dimension_numbers=dn2,
                             precision=lax.Precision.HIGHEST)
    h = conv(h, wpre, (1, 1), "SAME") + bpre
    for l in range(w3.shape[0]):
        a = jax.nn.relu(h)
        y = conv(a, w3[l], (1, 1), "SAME") + b3[l]
        y = jax.nn.relu(y)
        y = conv(y, w1[l][None, None, :, :], (1, 1), "SAME") + b1[l]
        h = h + y
    return jnp.transpose(jax.nn.relu(h), (0, 3, 1, 2))       # back to NCHW


if __name__ == "__main__":
    # ResidualEncoderV2(input_shape=(3, 64, 64), num_hiddens=8,
    #                   num_downsampling_layers=2, num_residual_layers=2,
    #                   num_residual_hiddens=4); N=4 exercises both the
    #   lane-batched (NB=2) path and the 2-step "parallel" grid.
    N, Cin, Hin, Win = 4, 3, 64, 64
    num_hiddens, num_ds, L, Cr = 8, 2, 2, 4

    key = jax.random.PRNGKey(0)
    keys = jax.random.split(key, 12)

    x = jax.random.normal(keys[0], (N, Cin, Hin, Win), dtype=jnp.float32)

    # Downsampling conv weights (HWIO) + biases.
    ds_ws, ds_bs = [], []
    c_in = Cin
    for i in range(num_ds):
        c_out = num_hiddens // 2 if i == 0 else num_hiddens
        ds_ws.append(0.1 * jax.random.normal(keys[1 + 2 * i], (4, 4, c_in, c_out),
                                             dtype=jnp.float32))
        ds_bs.append(0.1 * jax.random.normal(keys[2 + 2 * i], (c_out,),
                                             dtype=jnp.float32))
        c_in = c_out

    # Encoder's final 3x3 conv (HWIO).
    wpre = 0.1 * jax.random.normal(keys[5], (3, 3, num_hiddens, num_hiddens),
                                   dtype=jnp.float32)
    bpre = 0.1 * jax.random.normal(keys[6], (num_hiddens,), dtype=jnp.float32)

    # Residual stack weights: 3x3 convs in HWIO per layer, 1x1 as (in, out).
    w3 = 0.1 * jax.random.normal(keys[7], (L, 3, 3, num_hiddens, Cr),
                                 dtype=jnp.float32)
    b3 = 0.1 * jax.random.normal(keys[8], (L, Cr), dtype=jnp.float32)
    w1 = 0.1 * jax.random.normal(keys[9], (L, Cr, num_hiddens), dtype=jnp.float32)
    b1 = 0.1 * jax.random.normal(keys[10], (L, num_hiddens), dtype=jnp.float32)

    out = residual_encoder_v2_pallas(x, ds_ws, ds_bs, wpre, bpre, w3, b3, w1, b1)
    out = jax.block_until_ready(out)

    ref = residual_encoder_v2_reference(x, ds_ws, ds_bs, wpre, bpre, w3, b3, w1, b1)

    assert out.shape == (N, num_hiddens, Hin // 4, Win // 4)
    max_err = float(jnp.max(jnp.abs(out - ref)))
    # bf16 matmul operands (f32 accumulation) vs. the f32 HIGHEST reference.
    assert jnp.allclose(out, ref, atol=2e-2, rtol=2e-2), max_err

    print("KERNEL_OK")
</pallas_src>

<mosaic_0001>
module attributes {stable_mosaic.version = 11 : i64} {
  func.func @_encoder_kernel(%arg0: i32, %arg1: memref<48x512xf32, #tpu.memory_space<vmem>>, %arg2: memref<9x512xf32, #tpu.memory_space<vmem>>, %arg3: memref<16x432xbf16, #tpu.memory_space<vmem>>, %arg4: memref<16x1xf32, #tpu.memory_space<vmem>>, %arg5: memref<8x144xbf16, #tpu.memory_space<vmem>>, %arg6: memref<8x1xf32, #tpu.memory_space<vmem>>, %arg7: memref<8x72xbf16, #tpu.memory_space<vmem>>, %arg8: memref<8x1xf32, #tpu.memory_space<vmem>>, %arg9: memref<2x4x72xbf16, #tpu.memory_space<vmem>>, %arg10: memref<2x4x1xf32, #tpu.memory_space<vmem>>, %arg11: memref<2x8x4xf32, #tpu.memory_space<vmem>>, %arg12: memref<2x8x1xf32, #tpu.memory_space<vmem>>, %arg13: memref<8x512xf32, #tpu.memory_space<vmem>>, %arg14: memref<48x657xf32, #tpu.memory_space<vmem>>, %arg15: memref<432x512xf32, #tpu.memory_space<vmem>>) attributes {dimension_semantics = [#tpu.dimension_semantics<parallel>], iteration_bounds = array<i64: 2>, scalar_prefetch = 0 : i64, scratch_operands = 2 : i64, tpu.core_type = #tpu.core_type<tc>, window_params = [{transform_indices = @transform_0, window_bounds = array<i64: 48, 512>}, {pipeline_mode = #tpu.pipeline_mode<synchronous>, transform_indices = @transform_1, window_bounds = array<i64: 9, 512>}, {pipeline_mode = #tpu.pipeline_mode<synchronous>, transform_indices = @transform_2, window_bounds = array<i64: 16, 432>}, {pipeline_mode = #tpu.pipeline_mode<synchronous>, transform_indices = @transform_3, window_bounds = array<i64: 16, 1>}, {pipeline_mode = #tpu.pipeline_mode<synchronous>, transform_indices = @transform_4, window_bounds = array<i64: 8, 144>}, {pipeline_mode = #tpu.pipeline_mode<synchronous>, transform_indices = @transform_5, window_bounds = array<i64: 8, 1>}, {pipeline_mode = #tpu.pipeline_mode<synchronous>, transform_indices = @transform_6, window_bounds = array<i64: 8, 72>}, {pipeline_mode = #tpu.pipeline_mode<synchronous>, transform_indices = @transform_7, window_bounds = array<i64: 8, 1>}, {pipeline_mode = #tpu.pipeline_mode<synchronous>, transform_indices = @transform_8, window_bounds = array<i64: 2, 4, 72>}, {pipeline_mode = #tpu.pipeline_mode<synchronous>, transform_indices = @transform_9, window_bounds = array<i64: 2, 4, 1>}, {pipeline_mode = #tpu.pipeline_mode<synchronous>, transform_indices = @transform_10, window_bounds = array<i64: 2, 8, 4>}, {pipeline_mode = #tpu.pipeline_mode<synchronous>, transform_indices = @transform_11, window_bounds = array<i64: 2, 8, 1>}, {transform_indices = @transform_12, window_bounds = array<i64: 8, 512>}]} {
    %cst = arith.constant 0.000000e+00 : f32
    %0 = vector.broadcast %cst : f32 to vector<48x17xf32>
    %c0 = arith.constant 0 : index
    %c111 = arith.constant 111 : index
    %1 = vector.load %arg14[%c0, %c111] : memref<48x657xf32, #tpu.memory_space<vmem>>, vector<48x17xf32>
    tpu.vector_store %arg14[%c0, %c111], %0 {strides = array<i32>} : memref<48x657xf32, #tpu.memory_space<vmem>>, vector<48x17xf32>,
    %c0_0 = arith.constant 0 : index
    %c640 = arith.constant 640 : index
    %2 = vector.load %arg14[%c0_0, %c640] : memref<48x657xf32, #tpu.memory_space<vmem>>, vector<48x17xf32>
    tpu.vector_store %arg14[%c0_0, %c640], %0 {strides = array<i32>} : memref<48x657xf32, #tpu.memory_space<vmem>>, vector<48x17xf32>,
    %c0_1 = arith.constant 0 : index
    %c0_2 = arith.constant 0 : index
    %3 = vector.load %arg1[%c0_1, %c0_2] : memref<48x512xf32, #tpu.memory_space<vmem>>, vector<48x512xf32>
    %c0_3 = arith.constant 0 : index
    %c0_4 = arith.constant 0 : index
    %4 = vector.load %arg3[%c0_3, %c0_4] : memref<16x432xbf16, #tpu.memory_space<vmem>>, vector<16x432xbf16>
    %c0_5 = arith.constant 0 : index
    %c0_6 = arith.constant 0 : index
    %5 = vector.load %arg4[%c0_5, %c0_6] : memref<16x1xf32, #tpu.memory_space<vmem>>, vector<16x1xf32>
    %c0_7 = arith.constant 0 : index
    %c128 = arith.constant 128 : index
    %6 = vector.load %arg14[%c0_7, %c128] : memref<48x657xf32, #tpu.memory_space<vmem>>, vector<48x512xf32>
    tpu.vector_store %arg14[%c0_7, %c128], %3 {strides = array<i32>} : memref<48x657xf32, #tpu.memory_space<vmem>>, vector<48x512xf32>,
    %c0_8 = arith.constant 0 : index
    %c111_9 = arith.constant 111 : index
    %7 = vector.load %arg14[%c0_8, %c111_9] : memref<48x657xf32, #tpu.memory_space<vmem>>, vector<48x512xf32>
    %c0_10 = arith.constant 0 : index
    %c0_11 = arith.constant 0 : index
    %8 = vector.load %arg2[%c0_10, %c0_11] : memref<9x512xf32, #tpu.memory_space<vmem>>, vector<1x512xf32>
    %9 = vector.broadcast %8 : vector<1x512xf32> to vector<48x512xf32>
    %10 = arith.mulf %7, %9 : vector<48x512xf32>
    %c0_12 = arith.constant 0 : index
    %c0_13 = arith.constant 0 : index
    %11 = vector.load %arg15[%c0_12, %c0_13] : memref<432x512xf32, #tpu.memory_space<vmem>>, vector<48x512xf32>
    tpu.vector_store %arg15[%c0_12, %c0_13], %10 {strides = array<i32>} : memref<432x512xf32, #tpu.memory_space<vmem>>, vector<48x512xf32>,
    %c0_14 = arith.constant 0 : index
    %c112 = arith.constant 112 : index
    %12 = vector.load %arg14[%c0_14, %c112] : memref<48x657xf32, #tpu.memory_space<vmem>>, vector<48x512xf32>
    %c1 = arith.constant 1 : index
    %c0_15 = arith.constant 0 : index
    %13 = vector.load %arg2[%c1, %c0_15] : memref<9x512xf32, #tpu.memory_space<vmem>>, vector<1x512xf32>
    %14 = vector.broadcast %13 : vector<1x512xf32> to vector<48x512xf32>
    %15 = arith.mulf %12, %14 : vector<48x512xf32>
    %c48 = arith.constant 48 : index
    %c0_16 = arith.constant 0 : index
    %16 = vector.load %arg15[%c48, %c0_16] : memref<432x512xf32, #tpu.memory_space<vmem>>, vector<48x512xf32>
    tpu.vector_store %arg15[%c48, %c0_16], %15 {strides = array<i32>} : memref<432x512xf32, #tpu.memory_space<vmem>>, vector<48x512xf32>,
    %c0_17 = arith.constant 0 : index
    %c113 = arith.constant 113 : index
    %17 = vector.load %arg14[%c0_17, %c113] : memref<48x657xf32, #tpu.memory_space<vmem>>, vector<48x512xf32>
    %c2 = arith.constant 2 : index
    %c0_18 = arith.constant 0 : index
    %18 = vector.load %arg2[%c2, %c0_18] : memref<9x512xf32, #tpu.memory_space<vmem>>, vector<1x512xf32>
    %19 = vector.broadcast %18 : vector<1x512xf32> to vector<48x512xf32>
    %20 = arith.mulf %17, %19 : vector<48x512xf32>
    %c96 = arith.constant 96 : index
    %c0_19 = arith.constant 0 : index
    %21 = vector.load %arg15[%c96, %c0_19] : memref<432x512xf32, #tpu.memory_space<vmem>>, vector<48x512xf32>
    tpu.vector_store %arg15[%c96, %c0_19], %20 {strides = array<i32>} : memref<432x512xf32, #tpu.memory_space<vmem>>, vector<48x512xf32>,
    %c0_20 = arith.constant 0 : index
    %c127 = arith.constant 127 : index
    %22 = vector.load %arg14[%c0_20, %c127] : memref<48x657xf32, #tpu.memory_space<vmem>>, vector<48x512xf32>
    %c3 = arith.constant 3 : index
    %c0_21 = arith.constant 0 : index
    %23 = vector.load %arg2[%c3, %c0_21] : memref<9x512xf32, #tpu.memory_space<vmem>>, vector<1x512xf32>
    %24 = vector.broadcast %23 : vector<1x512xf32> to vector<48x512xf32>
    %25 = arith.mulf %22, %24 : vector<48x512xf32>
    %c144 = arith.constant 144 : index
    %c0_22 = arith.constant 0 : index
    %26 = vector.load %arg15[%c144, %c0_22] : memref<432x512xf32, #tpu.memory_space<vmem>>, vector<48x512xf32>
    tpu.vector_store %arg15[%c144, %c0_22], %25 {strides = array<i32>} : memref<432x512xf32, #tpu.memory_space<vmem>>, vector<48x512xf32>,
    %c0_23 = arith.constant 0 : index
    %c128_24 = arith.constant 128 : index
    %27 = vector.load %arg14[%c0_23, %c128_24] : memref<48x657xf32, #tpu.memory_space<vmem>>, vector<48x512xf32>
    %c192 = arith.constant 192 : index
    %c0_25 = arith.constant 0 : index
    %28 = vector.load %arg15[%c192, %c0_25] : memref<432x512xf32, #tpu.memory_space<vmem>>, vector<48x512xf32>
    tpu.vector_store %arg15[%c192, %c0_25], %27 {strides = array<i32>} : memref<432x512xf32, #tpu.memory_space<vmem>>, vector<48x512xf32>,
    %c0_26 = arith.constant 0 : index
    %c129 = arith.constant 129 : index
    %29 = vector.load %arg14[%c0_26, %c129] : memref<48x657xf32, #tpu.memory_space<vmem>>, vector<48x512xf32>
    %c5 = arith.constant 5 : index
    %c0_27 = arith.constant 0 : index
    %30 = vector.load %arg2[%c5, %c0_27] : memref<9x512xf32, #tpu.memory_space<vmem>>, vector<1x512xf32>
    %31 = vector.broadcast %30 : vector<1x512xf32> to vector<48x512xf32>
    %32 = arith.mulf %29, %31 : vector<48x512xf32>
    %c240 = arith.constant 240 : index
    %c0_28 = arith.constant 0 : index
    %33 = vector.load %arg15[%c240, %c0_28] : memref<432x512xf32, #tpu.memory_space<vmem>>, vector<48x512xf32>
    tpu.vector_store %arg15[%c240, %c0_28], %32 {strides = array<i32>} : memref<432x512xf32, #tpu.memory_space<vmem>>, vector<48x512xf32>,
    %c0_29 = arith.constant 0 : index
    %c143 = arith.constant 143 : index
    %34 = vector.load %arg14[%c0_29, %c143] : memref<48x657xf32, #tpu.memory_space<vmem>>, vector<48x512xf32>
    %c6 = arith.constant 6 : index
    %c0_30 = arith.constant 0 : index
    %35 = vector.load %arg2[%c6, %c0_30] : memref<9x512xf32, #tpu.memory_space<vmem>>, vector<1x512xf32>
    %36 = vector.broadcast %35 : vector<1x512xf32> to vector<48x512xf32>
    %37 = arith.mulf %34, %36 : vector<48x512xf32>
    %c288 = arith.constant 288 : index
    %c0_31 = arith.constant 0 : index
    %38 = vector.load %arg15[%c288, %c0_31] : memref<432x512xf32, #tpu.memory_space<vmem>>, vector<48x512xf32>
    tpu.vector_store %arg15[%c288, %c0_31], %37 {strides = array<i32>} : memref<432x512xf32, #tpu.memory_space<vmem>>, vector<48x512xf32>,
    %c0_32 = arith.constant 0 : index
    %c144_33 = arith.constant 144 : index
    %39 = vector.load %arg14[%c0_32, %c144_33] : memref<48x657xf32, #tpu.memory_space<vmem>>, vector<48x512xf32>
    %c7 = arith.constant 7 : index
    %c0_34 = arith.constant 0 : index
    %40 = vector.load %arg2[%c7, %c0_34] : memref<9x512xf32, #tpu.memory_space<vmem>>, vector<1x512xf32>
    %41 = vector.broadcast %40 : vector<1x512xf32> to vector<48x512xf32>
    %42 = arith.mulf %39, %41 : vector<48x512xf32>
    %c336 = arith.constant 336 : index
    %c0_35 = arith.constant 0 : index
    %43 = vector.load %arg15[%c336, %c0_35] : memref<432x512xf32, #tpu.memory_space<vmem>>, vector<48x512xf32>
    tpu.vector_store %arg15[%c336, %c0_35], %42 {strides = array<i32>} : memref<432x512xf32, #tpu.memory_space<vmem>>, vector<48x512xf32>,
    %c0_36 = arith.constant 0 : index
    %c145 = arith.constant 145 : index
    %44 = vector.load %arg14[%c0_36, %c145] : memref<48x657xf32, #tpu.memory_space<vmem>>, vector<48x512xf32>
    %c8 = arith.constant 8 : index
    %c0_37 = arith.constant 0 : index
    %45 = vector.load %arg2[%c8, %c0_37] : memref<9x512xf32, #tpu.memory_space<vmem>>, vector<1x512xf32>
    %46 = vector.broadcast %45 : vector<1x512xf32> to vector<48x512xf32>
    %47 = arith.mulf %44, %46 : vector<48x512xf32>
    %c384 = arith.constant 384 : index
    %c0_38 = arith.constant 0 : index
    %48 = vector.load %arg15[%c384, %c0_38] : memref<432x512xf32, #tpu.memory_space<vmem>>, vector<48x512xf32>
    tpu.vector_store %arg15[%c384, %c0_38], %47 {strides = array<i32>} : memref<432x512xf32, #tpu.memory_space<vmem>>, vector<48x512xf32>,
    %c0_39 = arith.constant 0 : index
    %c0_40 = arith.constant 0 : index
    %49 = vector.load %arg15[%c0_39, %c0_40] : memref<432x512xf32, #tpu.memory_space<vmem>>, vector<432x512xf32>
    %50 = arith.truncf %49 : vector<432x512xf32> to vector<432x512xbf16>
    %cst_41 = arith.constant dense<0.000000e+00> : vector<16x512xf32>
    %51 = tpu.matmul %4, %50, %cst_41 {dimension_numbers = #tpu.dot_dimension_numbers<[1], [0], [0], [1], [0, 0, 1, 1], [], []>} : vector<16x432xbf16>, vector<432x512xbf16>, vector<16x512xf32> -> vector<16x512xf32>
    %52 = vector.broadcast %5 : vector<16x1xf32> to vector<16x512xf32>
    %53 = arith.addf %51, %52 : vector<16x512xf32>
    %cst_42 = arith.constant 0.000000e+00 : f32
    %54 = vector.broadcast %cst_42 : f32 to vector<16x512xf32>
    %55 = arith.maximumf %53, %54 : vector<16x512xf32>
    %c0_43 = arith.constant 0 : index
    %c0_44 = arith.constant 0 : index
    %56 = vector.load %arg5[%c0_43, %c0_44] : memref<8x144xbf16, #tpu.memory_space<vmem>>, vector<8x144xbf16>
    %c0_45 = arith.constant 0 : index
    %c0_46 = arith.constant 0 : index
    %57 = vector.load %arg6[%c0_45, %c0_46] : memref<8x1xf32, #tpu.memory_space<vmem>>, vector<8x1xf32>
    %c0_47 = arith.constant 0 : index
    %c128_48 = arith.constant 128 : index
    %58 = vector.load %arg14[%c0_47, %c128_48] : memref<48x657xf32, #tpu.memory_space<vmem>>, vector<16x512xf32>
    tpu.vector_store %arg14[%c0_47, %c128_48], %55 {strides = array<i32>} : memref<48x657xf32, #tpu.memory_space<vmem>>, vector<16x512xf32>,
    %c0_49 = arith.constant 0 : index
    %c111_50 = arith.constant 111 : index
    %59 = vector.load %arg14[%c0_49, %c111_50] : memref<48x657xf32, #tpu.memory_space<vmem>>, vector<16x512xf32>
    %c0_51 = arith.constant 0 : index
    %c0_52 = arith.constant 0 : index
    %60 = vector.load %arg2[%c0_51, %c0_52] : memref<9x512xf32, #tpu.memory_space<vmem>>, vector<1x512xf32>
    %61 = vector.broadcast %60 : vector<1x512xf32> to vector<16x512xf32>
    %62 = arith.mulf %59, %61 : vector<16x512xf32>
    %c0_53 = arith.constant 0 : index
    %c0_54 = arith.constant 0 : index
    %63 = vector.load %arg15[%c0_53, %c0_54] : memref<432x512xf32, #tpu.memory_space<vmem>>, vector<16x512xf32>
    tpu.vector_store %arg15[%c0_53, %c0_54], %62 {strides = array<i32>} : memref<432x512xf32, #tpu.memory_space<vmem>>, vector<16x512xf32>,
    %c0_55 = arith.constant 0 : index
    %c112_56 = arith.constant 112 : index
    %64 = vector.load %arg14[%c0_55, %c112_56] : memref<48x657xf32, #tpu.memory_space<vmem>>, vector<16x512xf32>
    %c1_57 = arith.constant 1 : index
    %c0_58 = arith.constant 0 : index
    %65 = vector.load %arg2[%c1_57, %c0_58] : memref<9x512xf32, #tpu.memory_space<vmem>>, vector<1x512xf32>
    %66 = vector.broadcast %65 : vector<1x512xf32> to vector<16x512xf32>
    %67 = arith.mulf %64, %66 : vector<16x512xf32>
    %c16 = arith.constant 16 : index
    %c0_59 = arith.constant 0 : index
    %68 = vector.load %arg15[%c16, %c0_59] : memref<432x512xf32, #tpu.memory_space<vmem>>, vector<16x512xf32>
    tpu.vector_store %arg15[%c16, %c0_59], %67 {strides = array<i32>} : memref<432x512xf32, #tpu.memory_space<vmem>>, vector<16x512xf32>,
    %c0_60 = arith.constant 0 : index
    %c113_61 = arith.constant 113 : index
    %69 = vector.load %arg14[%c0_60, %c113_61] : memref<48x657xf32, #tpu.memory_space<vmem>>, vector<16x512xf32>
    %c2_62 = arith.constant 2 : index
    %c0_63 = arith.constant 0 : index
    %70 = vector.load %arg2[%c2_62, %c0_63] : memref<9x512xf32, #tpu.memory_space<vmem>>, vector<1x512xf32>
    %71 = vector.broadcast %70 : vector<1x512xf32> to vector<16x512xf32>
    %72 = arith.mulf %69, %71 : vector<16x512xf32>
    %c32 = arith.constant 32 : index
    %c0_64 = arith.constant 0 : index
    %73 = vector.load %arg15[%c32, %c0_64] : memref<432x512xf32, #tpu.memory_space<vmem>>, vector<16x512xf32>
    tpu.vector_store %arg15[%c32, %c0_64], %72 {strides = array<i32>} : memref<432x512xf32, #tpu.memory_space<vmem>>, vector<16x512xf32>,
    %c0_65 = arith.constant 0 : index
    %c127_66 = arith.constant 127 : index
    %74 = vector.load %arg14[%c0_65, %c127_66] : memref<48x657xf32, #tpu.memory_space<vmem>>, vector<16x512xf32>
    %c3_67 = arith.constant 3 : index
    %c0_68 = arith.constant 0 : index
    %75 = vector.load %arg2[%c3_67, %c0_68] : memref<9x512xf32, #tpu.memory_space<vmem>>, vector<1x512xf32>
    %76 = vector.broadcast %75 : vector<1x512xf32> to vector<16x512xf32>
    %77 = arith.mulf %74, %76 : vector<16x512xf32>
    %c48_69 = arith.constant 48 : index
    %c0_70 = arith.constant 0 : index
    %78 = vector.load %arg15[%c48_69, %c0_70] : memref<432x512xf32, #tpu.memory_space<vmem>>, vector<16x512xf32>
    tpu.vector_store %arg15[%c48_69, %c0_70], %77 {strides = array<i32>} : memref<432x512xf32, #tpu.memory_space<vmem>>, vector<16x512xf32>,
    %c0_71 = arith.constant 0 : index
    %c128_72 = arith.constant 128 : index
    %79 = vector.load %arg14[%c0_71, %c128_72] : memref<48x657xf32, #tpu.memory_space<vmem>>, vector<16x512xf32>
    %c64 = arith.constant 64 : index
    %c0_73 = arith.constant 0 : index
    %80 = vector.load %arg15[%c64, %c0_73] : memref<432x512xf32, #tpu.memory_space<vmem>>, vector<16x512xf32>
    tpu.vector_store %arg15[%c64, %c0_73], %79 {strides = array<i32>} : memref<432x512xf32, #tpu.memory_space<vmem>>, vector<16x512xf32>,
    %c0_74 = arith.constant 0 : index
    %c129_75 = arith.constant 129 : index
    %81 = vector.load %arg14[%c0_74, %c129_75] : memref<48x657xf32, #tpu.memory_space<vmem>>, vector<16x512xf32>
    %c5_76 = arith.constant 5 : index
    %c0_77 = arith.constant 0 : index
    %82 = vector.load %arg2[%c5_76, %c0_77] : memref<9x512xf32, #tpu.memory_space<vmem>>, vector<1x512xf32>
    %83 = vector.broadcast %82 : vector<1x512xf32> to vector<16x512xf32>
    %84 = arith.mulf %81, %83 : vector<16x512xf32>
    %c80 = arith.constant 80 : index
    %c0_78 = arith.constant 0 : index
    %85 = vector.load %arg15[%c80, %c0_78] : memref<432x512xf32, #tpu.memory_space<vmem>>, vector<16x512xf32>
    tpu.vector_store %arg15[%c80, %c0_78], %84 {strides = array<i32>} : memref<432x512xf32, #tpu.memory_space<vmem>>, vector<16x512xf32>,
    %c0_79 = arith.constant 0 : index
    %c143_80 = arith.constant 143 : index
    %86 = vector.load %arg14[%c0_79, %c143_80] : memref<48x657xf32, #tpu.memory_space<vmem>>, vector<16x512xf32>
    %c6_81 = arith.constant 6 : index
    %c0_82 = arith.constant 0 : index
    %87 = vector.load %arg2[%c6_81, %c0_82] : memref<9x512xf32, #tpu.memory_space<vmem>>, vector<1x512xf32>
    %88 = vector.broadcast %87 : vector<1x512xf32> to vector<16x512xf32>
    %89 = arith.mulf %86, %88 : vector<16x512xf32>
    %c96_83 = arith.constant 96 : index
    %c0_84 = arith.constant 0 : index
    %90 = vector.load %arg15[%c96_83, %c0_84] : memref<432x512xf32, #tpu.memory_space<vmem>>, vector<16x512xf32>
    tpu.vector_store %arg15[%c96_83, %c0_84], %89 {strides = array<i32>} : memref<432x512xf32, #tpu.memory_space<vmem>>, vector<16x512xf32>,
    %c0_85 = arith.constant 0 : index
    %c144_86 = arith.constant 144 : index
    %91 = vector.load %arg14[%c0_85, %c144_86] : memref<48x657xf32, #tpu.memory_space<vmem>>, vector<16x512xf32>
    %c7_87 = arith.constant 7 : index
    %c0_88 = arith.constant 0 : index
    %92 = vector.load %arg2[%c7_87, %c0_88] : memref<9x512xf32, #tpu.memory_space<vmem>>, vector<1x512xf32>
    %93 = vector.broadcast %92 : vector<1x512xf32> to vector<16x512xf32>
    %94 = arith.mulf %91, %93 : vector<16x512xf32>
    %c112_89 = arith.constant 112 : index
    %c0_90 = arith.constant 0 : index
    %95 = vector.load %arg15[%c112_89, %c0_90] : memref<432x512xf32, #tpu.memory_space<vmem>>, vector<16x512xf32>
    tpu.vector_store %arg15[%c112_89, %c0_90], %94 {strides = array<i32>} : memref<432x512xf32, #tpu.memory_space<vmem>>, vector<16x512xf32>,
    %c0_91 = arith.constant 0 : index
    %c145_92 = arith.constant 145 : index
    %96 = vector.load %arg14[%c0_91, %c145_92] : memref<48x657xf32, #tpu.memory_space<vmem>>, vector<16x512xf32>
    %c8_93 = arith.constant 8 : index
    %c0_94 = arith.constant 0 : index
    %97 = vector.load %arg2[%c8_93, %c0_94] : memref<9x512xf32, #tpu.memory_space<vmem>>, vector<1x512xf32>
    %98 = vector.broadcast %97 : vector<1x512xf32> to vector<16x512xf32>
    %99 = arith.mulf %96, %98 : vector<16x512xf32>
    %c128_95 = arith.constant 128 : index
    %c0_96 = arith.constant 0 : index
    %100 = vector.load %arg15[%c128_95, %c0_96] : memref<432x512xf32, #tpu.memory_space<vmem>>, vector<16x512xf32>
    tpu.vector_store %arg15[%c128_95, %c0_96], %99 {strides = array<i32>} : memref<432x512xf32, #tpu.memory_space<vmem>>, vector<16x512xf32>,
    %c0_97 = arith.constant 0 : index
    %c0_98 = arith.constant 0 : index
    %101 = vector.load %arg15[%c0_97, %c0_98] : memref<432x512xf32, #tpu.memory_space<vmem>>, vector<144x512xf32>
    %102 = arith.truncf %101 : vector<144x512xf32> to vector<144x512xbf16>
    %cst_99 = arith.constant dense<0.000000e+00> : vector<8x512xf32>
    %103 = tpu.matmul %56, %102, %cst_99 {dimension_numbers = #tpu.dot_dimension_numbers<[1], [0], [0], [1], [0, 0, 1, 1], [], []>} : vector<8x144xbf16>, vector<144x512xbf16>, vector<8x512xf32> -> vector<8x512xf32>
    %104 = vector.broadcast %57 : vector<8x1xf32> to vector<8x512xf32>
    %105 = arith.addf %103, %104 : vector<8x512xf32>
    %cst_100 = arith.constant 0.000000e+00 : f32
    %106 = vector.broadcast %cst_100 : f32 to vector<8x512xf32>
    %107 = arith.maximumf %105, %106 : vector<8x512xf32>
    %c0_101 = arith.constant 0 : index
    %c0_102 = arith.constant 0 : index
    %108 = vector.load %arg7[%c0_101, %c0_102] : memref<8x72xbf16, #tpu.memory_space<vmem>>, vector<8x72xbf16>
    %c0_103 = arith.constant 0 : index
    %c0_104 = arith.constant 0 : index
    %109 = vector.load %arg8[%c0_103, %c0_104] : memref<8x1xf32, #tpu.memory_space<vmem>>, vector<8x1xf32>
    %c0_105 = arith.constant 0 : index
    %c128_106 = arith.constant 128 : index
    %110 = vector.load %arg14[%c0_105, %c128_106] : memref<48x657xf32, #tpu.memory_space<vmem>>, vector<8x512xf32>
    tpu.vector_store %arg14[%c0_105, %c128_106], %107 {strides = array<i32>} : memref<48x657xf32, #tpu.memory_space<vmem>>, vector<8x512xf32>,
    %c0_107 = arith.constant 0 : index
    %c111_108 = arith.constant 111 : index
    %111 = vector.load %arg14[%c0_107, %c111_108] : memref<48x657xf32, #tpu.memory_space<vmem>>, vector<8x512xf32>
    %c0_109 = arith.constant 0 : index
    %c0_110 = arith.constant 0 : index
    %112 = vector.load %arg2[%c0_109, %c0_110] : memref<9x512xf32, #tpu.memory_space<vmem>>, vector<1x512xf32>
    %113 = vector.broadcast %112 : vector<1x512xf32> to vector<8x512xf32>
    %114 = arith.mulf %111, %113 : vector<8x512xf32>
    %c0_111 = arith.constant 0 : index
    %c0_112 = arith.constant 0 : index
    %115 = vector.load %arg15[%c0_111, %c0_112] : memref<432x512xf32, #tpu.memory_space<vmem>>, vector<8x512xf32>
    tpu.vector_store %arg15[%c0_111, %c0_112], %114 {strides = array<i32>} : memref<432x512xf32, #tpu.memory_space<vmem>>, vector<8x512xf32>,
    %c0_113 = arith.constant 0 : index
    %c112_114 = arith.constant 112 : index
    %116 = vector.load %arg14[%c0_113, %c112_114] : memref<48x657xf32, #tpu.memory_space<vmem>>, vector<8x512xf32>
    %c1_115 = arith.constant 1 : index
    %c0_116 = arith.constant 0 : index
    %117 = vector.load %arg2[%c1_115, %c0_116] : memref<9x512xf32, #tpu.memory_space<vmem>>, vector<1x512xf32>
    %118 = vector.broadcast %117 : vector<1x512xf32> to vector<8x512xf32>
    %119 = arith.mulf %116, %118 : vector<8x512xf32>
    %c8_117 = arith.constant 8 : index
    %c0_118 = arith.constant 0 : index
    %120 = vector.load %arg15[%c8_117, %c0_118] : memref<432x512xf32, #tpu.memory_space<vmem>>, vector<8x512xf32>
    tpu.vector_store %arg15[%c8_117, %c0_118], %119 {strides = array<i32>} : memref<432x512xf32, #tpu.memory_space<vmem>>, vector<8x512xf32>,
    %c0_119 = arith.constant 0 : index
    %c113_120 = arith.constant 113 : index
    %121 = vector.load %arg14[%c0_119, %c113_120] : memref<48x657xf32, #tpu.memory_space<vmem>>, vector<8x512xf32>
    %c2_121 = arith.constant 2 : index
    %c0_122 = arith.constant 0 : index
    %122 = vector.load %arg2[%c2_121, %c0_122] : memref<9x512xf32, #tpu.memory_space<vmem>>, vector<1x512xf32>
    %123 = vector.broadcast %122 : vector<1x512xf32> to vector<8x512xf32>
    %124 = arith.mulf %121, %123 : vector<8x512xf32>
    %c16_123 = arith.constant 16 : index
    %c0_124 = arith.constant 0 : index
    %125 = vector.load %arg15[%c16_123, %c0_124] : memref<432x512xf32, #tpu.memory_space<vmem>>, vector<8x512xf32>
    tpu.vector_store %arg15[%c16_123, %c0_124], %124 {strides = array<i32>} : memref<432x512xf32, #tpu.memory_space<vmem>>, vector<8x512xf32>,
    %c0_125 = arith.constant 0 : index
    %c127_126 = arith.constant 127 : index
    %126 = vector.load %arg14[%c0_125, %c127_126] : memref<48x657xf32, #tpu.memory_space<vmem>>, vector<8x512xf32>
    %c3_127 = arith.constant 3 : index
    %c0_128 = arith.constant 0 : index
    %127 = vector.load %arg2[%c3_127, %c0_128] : memref<9x512xf32, #tpu.memory_space<vmem>>, vector<1x512xf32>
    %128 = vector.broadcast %127 : vector<1x512xf32> to vector<8x512xf32>
    %129 = arith.mulf %126, %128 : vector<8x512xf32>
    %c24 = arith.constant 24 : index
    %c0_129 = arith.constant 0 : index
    %130 = vector.load %arg15[%c24, %c0_129] : memref<432x512xf32, #tpu.memory_space<vmem>>, vector<8x512xf32>
    tpu.vector_store %arg15[%c24, %c0_129], %129 {strides = array<i32>} : memref<432x512xf32, #tpu.memory_space<vmem>>, vector<8x512xf32>,
    %c0_130 = arith.constant 0 : index
    %c128_131 = arith.constant 128 : index
    %131 = vector.load %arg14[%c0_130, %c128_131] : memref<48x657xf32, #tpu.memory_space<vmem>>, vector<8x512xf32>
    %c32_132 = arith.constant 32 : index
    %c0_133 = arith.constant 0 : index
    %132 = vector.load %arg15[%c32_132, %c0_133] : memref<432x512xf32, #tpu.memory_space<vmem>>, vector<8x512xf32>
    tpu.vector_store %arg15[%c32_132, %c0_133], %131 {strides = array<i32>} : memref<432x512xf32, #tpu.memory_space<vmem>>, vector<8x512xf32>,
    %c0_134 = arith.constant 0 : index
    %c129_135 = arith.constant 129 : index
    %133 = vector.load %arg14[%c0_134, %c129_135] : memref<48x657xf32, #tpu.memory_space<vmem>>, vector<8x512xf32>
    %c5_136 = arith.constant 5 : index
    %c0_137 = arith.constant 0 : index
    %134 = vector.load %arg2[%c5_136, %c0_137] : memref<9x512xf32, #tpu.memory_space<vmem>>, vector<1x512xf32>
    %135 = vector.broadcast %134 : vector<1x512xf32> to vector<8x512xf32>
    %136 = arith.mulf %133, %135 : vector<8x512xf32>
    %c40 = arith.constant 40 : index
    %c0_138 = arith.constant 0 : index
    %137 = vector.load %arg15[%c40, %c0_138] : memref<432x512xf32, #tpu.memory_space<vmem>>, vector<8x512xf32>
    tpu.vector_store %arg15[%c40, %c0_138], %136 {strides = array<i32>} : memref<432x512xf32, #tpu.memory_space<vmem>>, vector<8x512xf32>,
    %c0_139 = arith.constant 0 : index
    %c143_140 = arith.constant 143 : index
    %138 = vector.load %arg14[%c0_139, %c143_140] : memref<48x657xf32, #tpu.memory_space<vmem>>, vector<8x512xf32>
    %c6_141 = arith.constant 6 : index
    %c0_142 = arith.constant 0 : index
    %139 = vector.load %arg2[%c6_141, %c0_142] : memref<9x512xf32, #tpu.memory_space<vmem>>, vector<1x512xf32>
    %140 = vector.broadcast %139 : vector<1x512xf32> to vector<8x512xf32>
    %141 = arith.mulf %138, %140 : vector<8x512xf32>
    %c48_143 = arith.constant 48 : index
    %c0_144 = arith.constant 0 : index
    %142 = vector.load %arg15[%c48_143, %c0_144] : memref<432x512xf32, #tpu.memory_space<vmem>>, vector<8x512xf32>
    tpu.vector_store %arg15[%c48_143, %c0_144], %141 {strides = array<i32>} : memref<432x512xf32, #tpu.memory_space<vmem>>, vector<8x512xf32>,
    %c0_145 = arith.constant 0 : index
    %c144_146 = arith.constant 144 : index
    %143 = vector.load %arg14[%c0_145, %c144_146] : memref<48x657xf32, #tpu.memory_space<vmem>>, vector<8x512xf32>
    %c7_147 = arith.constant 7 : index
    %c0_148 = arith.constant 0 : index
    %144 = vector.load %arg2[%c7_147, %c0_148] : memref<9x512xf32, #tpu.memory_space<vmem>>, vector<1x512xf32>
    %145 = vector.broadcast %144 : vector<1x512xf32> to vector<8x512xf32>
    %146 = arith.mulf %143, %145 : vector<8x512xf32>
    %c56 = arith.constant 56 : index
    %c0_149 = arith.constant 0 : index
    %147 = vector.load %arg15[%c56, %c0_149] : memref<432x512xf32, #tpu.memory_space<vmem>>, vector<8x512xf32>
    tpu.vector_store %arg15[%c56, %c0_149], %146 {strides = array<i32>} : memref<432x512xf32, #tpu.memory_space<vmem>>, vector<8x512xf32>,
    %c0_150 = arith.constant 0 : index
    %c145_151 = arith.constant 145 : index
    %148 = vector.load %arg14[%c0_150, %c145_151] : memref<48x657xf32, #tpu.memory_space<vmem>>, vector<8x512xf32>
    %c8_152 = arith.constant 8 : index
    %c0_153 = arith.constant 0 : index
    %149 = vector.load %arg2[%c8_152, %c0_153] : memref<9x512xf32, #tpu.memory_space<vmem>>, vector<1x512xf32>
    %150 = vector.broadcast %149 : vector<1x512xf32> to vector<8x512xf32>
    %151 = arith.mulf %148, %150 : vector<8x512xf32>
    %c64_154 = arith.constant 64 : index
    %c0_155 = arith.constant 0 : index
    %152 = vector.load %arg15[%c64_154, %c0_155] : memref<432x512xf32, #tpu.memory_space<vmem>>, vector<8x512xf32>
    tpu.vector_store %arg15[%c64_154, %c0_155], %151 {strides = array<i32>} : memref<432x512xf32, #tpu.memory_space<vmem>>, vector<8x512xf32>,
    %c0_156 = arith.constant 0 : index
    %c0_157 = arith.constant 0 : index
    %153 = vector.load %arg15[%c0_156, %c0_157] : memref<432x512xf32, #tpu.memory_space<vmem>>, vector<72x512xf32>
    %154 = arith.truncf %153 : vector<72x512xf32> to vector<72x512xbf16>
    %cst_158 = arith.constant dense<0.000000e+00> : vector<8x512xf32>
    %155 = tpu.matmul %108, %154, %cst_158 {dimension_numbers = #tpu.dot_dimension_numbers<[1], [0], [0], [1], [0, 0, 1, 1], [], []>} : vector<8x72xbf16>, vector<72x512xbf16>, vector<8x512xf32> -> vector<8x512xf32>
    %156 = vector.broadcast %109 : vector<8x1xf32> to vector<8x512xf32>
    %157 = arith.addf %155, %156 : vector<8x512xf32>
    %cst_159 = arith.constant 0.000000e+00 : f32
    %158 = vector.broadcast %cst_159 : f32 to vector<8x512xf32>
    %159 = arith.maximumf %157, %158 : vector<8x512xf32>
    %c0_160 = arith.constant 0 : index
    %c0_161 = arith.constant 0 : index
    %c0_162 = arith.constant 0 : index
    %160 = vector.load %arg9[%c0_160, %c0_161, %c0_162] : memref<2x4x72xbf16, #tpu.memory_space<vmem>>, vector<1x4x72xbf16>
    %161 = vector.shape_cast %160 : vector<1x4x72xbf16> to vector<4x72xbf16>
    %c0_163 = arith.constant 0 : index
    %c0_164 = arith.constant 0 : index
    %c0_165 = arith.constant 0 : index
    %162 = vector.load %arg10[%c0_163, %c0_164, %c0_165] : memref<2x4x1xf32, #tpu.memory_space<vmem>>, vector<1x4x1xf32>
    %163 = vector.shape_cast %162 : vector<1x4x1xf32> to vector<4x1xf32>
    %c0_166 = arith.constant 0 : index
    %c128_167 = arith.constant 128 : index
    %164 = vector.load %arg14[%c0_166, %c128_167] : memref<48x657xf32, #tpu.memory_space<vmem>>, vector<8x512xf32>
    tpu.vector_store %arg14[%c0_166, %c128_167], %159 {strides = array<i32>} : memref<48x657xf32, #tpu.memory_space<vmem>>, vector<8x512xf32>,
    %c0_168 = arith.constant 0 : index
    %c111_169 = arith.constant 111 : index
    %165 = vector.load %arg14[%c0_168, %c111_169] : memref<48x657xf32, #tpu.memory_space<vmem>>, vector<8x512xf32>
    %c0_170 = arith.constant 0 : index
    %c0_171 = arith.constant 0 : index
    %166 = vector.load %arg2[%c0_170, %c0_171] : memref<9x512xf32, #tpu.memory_space<vmem>>, vector<1x512xf32>
    %167 = vector.broadcast %166 : vector<1x512xf32> to vector<8x512xf32>
    %168 = arith.mulf %165, %167 : vector<8x512xf32>
    %c0_172 = arith.constant 0 : index
    %c0_173 = arith.constant 0 : index
    %169 = vector.load %arg15[%c0_172, %c0_173] : memref<432x512xf32, #tpu.memory_space<vmem>>, vector<8x512xf32>
    tpu.vector_store %arg15[%c0_172, %c0_173], %168 {strides = array<i32>} : memref<432x512xf32, #tpu.memory_space<vmem>>, vector<8x512xf32>,
    %c0_174 = arith.constant 0 : index
    %c112_175 = arith.constant 112 : index
    %170 = vector.load %arg14[%c0_174, %c112_175] : memref<48x657xf32, #tpu.memory_space<vmem>>, vector<8x512xf32>
    %c1_176 = arith.constant 1 : index
    %c0_177 = arith.constant 0 : index
    %171 = vector.load %arg2[%c1_176, %c0_177] : memref<9x512xf32, #tpu.memory_space<vmem>>, vector<1x512xf32>
    %172 = vector.broadcast %171 : vector<1x512xf32> to vector<8x512xf32>
    %173 = arith.mulf %170, %172 : vector<8x512xf32>
    %c8_178 = arith.constant 8 : index
    %c0_179 = arith.constant 0 : index
    %174 = vector.load %arg15[%c8_178, %c0_179] : memref<432x512xf32, #tpu.memory_space<vmem>>, vector<8x512xf32>
    tpu.vector_store %arg15[%c8_178, %c0_179], %173 {strides = array<i32>} : memref<432x512xf32, #tpu.memory_space<vmem>>, vector<8x512xf32>,
    %c0_180 = arith.constant 0 : index
    %c113_181 = arith.constant 113 : index
    %175 = vector.load %arg14[%c0_180, %c113_181] : memref<48x657xf32, #tpu.memory_space<vmem>>, vector<8x512xf32>
    %c2_182 = arith.constant 2 : index
    %c0_183 = arith.constant 0 : index
    %176 = vector.load %arg2[%c2_182, %c0_183] : memref<9x512xf32, #tpu.memory_space<vmem>>, vector<1x512xf32>
    %177 = vector.broadcast %176 : vector<1x512xf32> to vector<8x512xf32>
    %178 = arith.mulf %175, %177 : vector<8x512xf32>
    %c16_184 = arith.constant 16 : index
    %c0_185 = arith.constant 0 : index
    %179 = vector.load %arg15[%c16_184, %c0_185] : memref<432x512xf32, #tpu.memory_space<vmem>>, vector<8x512xf32>
    tpu.vector_store %arg15[%c16_184, %c0_185], %178 {strides = array<i32>} : memref<432x512xf32, #tpu.memory_space<vmem>>, vector<8x512xf32>,
    %c0_186 = arith.constant 0 : index
    %c127_187 = arith.constant 127 : index
    %180 = vector.load %arg14[%c0_186, %c127_187] : memref<48x657xf32, #tpu.memory_space<vmem>>, vector<8x512xf32>
    %c3_188 = arith.constant 3 : index
    %c0_189 = arith.constant 0 : index
    %181 = vector.load %arg2[%c3_188, %c0_189] : memref<9x512xf32, #tpu.memory_space<vmem>>, vector<1x512xf32>
    %182 = vector.broadcast %181 : vector<1x512xf32> to vector<8x512xf32>
    %183 = arith.mulf %180, %182 : vector<8x512xf32>
    %c24_190 = arith.constant 24 : index
    %c0_191 = arith.constant 0 : index
    %184 = vector.load %arg15[%c24_190, %c0_191] : memref<432x512xf32, #tpu.memory_space<vmem>>, vector<8x512xf32>
    tpu.vector_store %arg15[%c24_190, %c0_191], %183 {strides = array<i32>} : memref<432x512xf32, #tpu.memory_space<vmem>>, vector<8x512xf32>,
    %c0_192 = arith.constant 0 : index
    %c128_193 = arith.constant 128 : index
    %185 = vector.load %arg14[%c0_192, %c128_193] : memref<48x657xf32, #tpu.memory_space<vmem>>, vector<8x512xf32>
    %c32_194 = arith.constant 32 : index
    %c0_195 = arith.constant 0 : index
    %186 = vector.load %arg15[%c32_194, %c0_195] : memref<432x512xf32, #tpu.memory_space<vmem>>, vector<8x512xf32>
    tpu.vector_store %arg15[%c32_194, %c0_195], %185 {strides = array<i32>} : memref<432x512xf32, #tpu.memory_space<vmem>>, vector<8x512xf32>,
    %c0_196 = arith.constant 0 : index
    %c129_197 = arith.constant 129 : index
    %187 = vector.load %arg14[%c0_196, %c129_197] : memref<48x657xf32, #tpu.memory_space<vmem>>, vector<8x512xf32>
    %c5_198 = arith.constant 5 : index
    %c0_199 = arith.constant 0 : index
    %188 = vector.load %arg2[%c5_198, %c0_199] : memref<9x512xf32, #tpu.memory_space<vmem>>, vector<1x512xf32>
    %189 = vector.broadcast %188 : vector<1x512xf32> to vector<8x512xf32>
    %190 = arith.mulf %187, %189 : vector<8x512xf32>
    %c40_200 = arith.constant 40 : index
    %c0_201 = arith.constant 0 : index
    %191 = vector.load %arg15[%c40_200, %c0_201] : memref<432x512xf32, #tpu.memory_space<vmem>>, vector<8x512xf32>
    tpu.vector_store %arg15[%c40_200, %c0_201], %190 {strides = array<i32>} : memref<432x512xf32, #tpu.memory_space<vmem>>, vector<8x512xf32>,
    %c0_202 = arith.constant 0 : index
    %c143_203 = arith.constant 143 : index
    %192 = vector.load %arg14[%c0_202, %c143_203] : memref<48x657xf32, #tpu.memory_space<vmem>>, vector<8x512xf32>
    %c6_204 = arith.constant 6 : index
    %c0_205 = arith.constant 0 : index
    %193 = vector.load %arg2[%c6_204, %c0_205] : memref<9x512xf32, #tpu.memory_space<vmem>>, vector<1x512xf32>
    %194 = vector.broadcast %193 : vector<1x512xf32> to vector<8x512xf32>
    %195 = arith.mulf %192, %194 : vector<8x512xf32>
    %c48_206 = arith.constant 48 : index
    %c0_207 = arith.constant 0 : index
    %196 = vector.load %arg15[%c48_206, %c0_207] : memref<432x512xf32, #tpu.memory_space<vmem>>, vector<8x512xf32>
    tpu.vector_store %arg15[%c48_206, %c0_207], %195 {strides = array<i32>} : memref<432x512xf32, #tpu.memory_space<vmem>>, vector<8x512xf32>,
    %c0_208 = arith.constant 0 : index
    %c144_209 = arith.constant 144 : index
    %197 = vector.load %arg14[%c0_208, %c144_209] : memref<48x657xf32, #tpu.memory_space<vmem>>, vector<8x512xf32>
    %c7_210 = arith.constant 7 : index
    %c0_211 = arith.constant 0 : index
    %198 = vector.load %arg2[%c7_210, %c0_211] : memref<9x512xf32, #tpu.memory_space<vmem>>, vector<1x512xf32>
    %199 = vector.broadcast %198 : vector<1x512xf32> to vector<8x512xf32>
    %200 = arith.mulf %197, %199 : vector<8x512xf32>
    %c56_212 = arith.constant 56 : index
    %c0_213 = arith.constant 0 : index
    %201 = vector.load %arg15[%c56_212, %c0_213] : memref<432x512xf32, #tpu.memory_space<vmem>>, vector<8x512xf32>
    tpu.vector_store %arg15[%c56_212, %c0_213], %200 {strides = array<i32>} : memref<432x512xf32, #tpu.memory_space<vmem>>, vector<8x512xf32>,
    %c0_214 = arith.constant 0 : index
    %c145_215 = arith.constant 145 : index
    %202 = vector.load %arg14[%c0_214, %c145_215] : memref<48x657xf32, #tpu.memory_space<vmem>>, vector<8x512xf32>
    %c8_216 = arith.constant 8 : index
    %c0_217 = arith.constant 0 : index
    %203 = vector.load %arg2[%c8_216, %c0_217] : memref<9x512xf32, #tpu.memory_space<vmem>>, vector<1x512xf32>
    %204 = vector.broadcast %203 : vector<1x512xf32> to vector<8x512xf32>
    %205 = arith.mulf %202, %204 : vector<8x512xf32>
    %c64_218 = arith.constant 64 : index
    %c0_219 = arith.constant 0 : index
    %206 = vector.load %arg15[%c64_218, %c0_219] : memref<432x512xf32, #tpu.memory_space<vmem>>, vector<8x512xf32>
    tpu.vector_store %arg15[%c64_218, %c0_219], %205 {strides = array<i32>} : memref<432x512xf32, #tpu.memory_space<vmem>>, vector<8x512xf32>,
    %c0_220 = arith.constant 0 : index
    %c0_221 = arith.constant 0 : index
    %207 = vector.load %arg15[%c0_220, %c0_221] : memref<432x512xf32, #tpu.memory_space<vmem>>, vector<72x512xf32>
    %208 = arith.truncf %207 : vector<72x512xf32> to vector<72x512xbf16>
    %cst_222 = arith.constant dense<0.000000e+00> : vector<4x512xf32>
    %209 = tpu.matmul %161, %208, %cst_222 {dimension_numbers = #tpu.dot_dimension_numbers<[1], [0], [0], [1], [0, 0, 1, 1], [], []>} : vector<4x72xbf16>, vector<72x512xbf16>, vector<4x512xf32> -> vector<4x512xf32>
    %210 = vector.broadcast %163 : vector<4x1xf32> to vector<4x512xf32>
    %211 = arith.addf %209, %210 : vector<4x512xf32>
    %cst_223 = arith.constant 0.000000e+00 : f32
    %212 = vector.broadcast %cst_223 : f32 to vector<4x512xf32>
    %213 = arith.maximumf %211, %212 : vector<4x512xf32>
    %c0_224 = arith.constant 0 : index
    %c0_225 = arith.constant 0 : index
    %c0_226 = arith.constant 0 : index
    %214 = vector.load %arg11[%c0_224, %c0_225, %c0_226] : memref<2x8x4xf32, #tpu.memory_space<vmem>>, vector<1x8x4xf32>
    %215 = vector.shape_cast %214 : vector<1x8x4xf32> to vector<8x4xf32>
    %c0_227 = arith.constant 0 : index
    %c0_228 = arith.constant 0 : index
    %c0_229 = arith.constant 0 : index
    %216 = vector.load %arg12[%c0_227, %c0_228, %c0_229] : memref<2x8x1xf32, #tpu.memory_space<vmem>>, vector<1x8x1xf32>
    %217 = vector.shape_cast %216 : vector<1x8x1xf32> to vector<8x1xf32>
    %218 = vector.extract_strided_slice %215 {offsets = [0, 0], sizes = [8, 1], strides = [1, 1]} : vector<8x4xf32> to vector<8x1xf32>
    %219 = vector.extract_strided_slice %213 {offsets = [0, 0], sizes = [1, 512], strides = [1, 1]} : vector<4x512xf32> to vector<1x512xf32>
    %220 = vector.broadcast %218 : vector<8x1xf32> to vector<8x512xf32>
    %221 = vector.broadcast %219 : vector<1x512xf32> to vector<8x512xf32>
    %222 = arith.mulf %220, %221 : vector<8x512xf32>
    %223 = vector.broadcast %217 : vector<8x1xf32> to vector<8x512xf32>
    %224 = arith.addf %223, %222 : vector<8x512xf32>
    %225 = vector.extract_strided_slice %215 {offsets = [0, 1], sizes = [8, 1], strides = [1, 1]} : vector<8x4xf32> to vector<8x1xf32>
    %226 = vector.extract_strided_slice %213 {offsets = [1, 0], sizes = [1, 512], strides = [1, 1]} : vector<4x512xf32> to vector<1x512xf32>
    %227 = vector.broadcast %225 : vector<8x1xf32> to vector<8x512xf32>
    %228 = vector.broadcast %226 : vector<1x512xf32> to vector<8x512xf32>
    %229 = arith.mulf %227, %228 : vector<8x512xf32>
    %230 = arith.addf %224, %229 : vector<8x512xf32>
    %231 = vector.extract_strided_slice %215 {offsets = [0, 2], sizes = [8, 1], strides = [1, 1]} : vector<8x4xf32> to vector<8x1xf32>
    %232 = vector.extract_strided_slice %213 {offsets = [2, 0], sizes = [1, 512], strides = [1, 1]} : vector<4x512xf32> to vector<1x512xf32>
    %233 = vector.broadcast %231 : vector<8x1xf32> to vector<8x512xf32>
    %234 = vector.broadcast %232 : vector<1x512xf32> to vector<8x512xf32>
    %235 = arith.mulf %233, %234 : vector<8x512xf32>
    %236 = arith.addf %230, %235 : vector<8x512xf32>
    %237 = vector.extract_strided_slice %215 {offsets = [0, 3], sizes = [8, 1], strides = [1, 1]} : vector<8x4xf32> to vector<8x1xf32>
    %238 = vector.extract_strided_slice %213 {offsets = [3, 0], sizes = [1, 512], strides = [1, 1]} : vector<4x512xf32> to vector<1x512xf32>
    %239 = vector.broadcast %237 : vector<8x1xf32> to vector<8x512xf32>
    %240 = vector.broadcast %238 : vector<1x512xf32> to vector<8x512xf32>
    %241 = arith.mulf %239, %240 : vector<8x512xf32>
    %242 = arith.addf %236, %241 : vector<8x512xf32>
    %243 = arith.addf %157, %242 : vector<8x512xf32>
    %cst_230 = arith.constant 0.000000e+00 : f32
    %244 = vector.broadcast %cst_230 : f32 to vector<8x512xf32>
    %245 = arith.maximumf %243, %244 : vector<8x512xf32>
    %c1_231 = arith.constant 1 : index
    %c0_232 = arith.constant 0 : index
    %c0_233 = arith.constant 0 : index
    %246 = vector.load %arg9[%c1_231, %c0_232, %c0_233] : memref<2x4x72xbf16, #tpu.memory_space<vmem>>, vector<1x4x72xbf16>
    %247 = vector.shape_cast %246 : vector<1x4x72xbf16> to vector<4x72xbf16>
    %c1_234 = arith.constant 1 : index
    %c0_235 = arith.constant 0 : index
    %c0_236 = arith.constant 0 : index
    %248 = vector.load %arg10[%c1_234, %c0_235, %c0_236] : memref<2x4x1xf32, #tpu.memory_space<vmem>>, vector<1x4x1xf32>
    %249 = vector.shape_cast %248 : vector<1x4x1xf32> to vector<4x1xf32>
    %c0_237 = arith.constant 0 : index
    %c128_238 = arith.constant 128 : index
    %250 = vector.load %arg14[%c0_237, %c128_238] : memref<48x657xf32, #tpu.memory_space<vmem>>, vector<8x512xf32>
    tpu.vector_store %arg14[%c0_237, %c128_238], %245 {strides = array<i32>} : memref<48x657xf32, #tpu.memory_space<vmem>>, vector<8x512xf32>,
    %c0_239 = arith.constant 0 : index
    %c111_240 = arith.constant 111 : index
    %251 = vector.load %arg14[%c0_239, %c111_240] : memref<48x657xf32, #tpu.memory_space<vmem>>, vector<8x512xf32>
    %c0_241 = arith.constant 0 : index
    %c0_242 = arith.constant 0 : index
    %252 = vector.load %arg2[%c0_241, %c0_242] : memref<9x512xf32, #tpu.memory_space<vmem>>, vector<1x512xf32>
    %253 = vector.broadcast %252 : vector<1x512xf32> to vector<8x512xf32>
    %254 = arith.mulf %251, %253 : vector<8x512xf32>
    %c0_243 = arith.constant 0 : index
    %c0_244 = arith.constant 0 : index
    %255 = vector.load %arg15[%c0_243, %c0_244] : memref<432x512xf32, #tpu.memory_space<vmem>>, vector<8x512xf32>
    tpu.vector_store %arg15[%c0_243, %c0_244], %254 {strides = array<i32>} : memref<432x512xf32, #tpu.memory_space<vmem>>, vector<8x512xf32>,
    %c0_245 = arith.constant 0 : index
    %c112_246 = arith.constant 112 : index
    %256 = vector.load %arg14[%c0_245, %c112_246] : memref<48x657xf32, #tpu.memory_space<vmem>>, vector<8x512xf32>
    %c1_247 = arith.constant 1 : index
    %c0_248 = arith.constant 0 : index
    %257 = vector.load %arg2[%c1_247, %c0_248] : memref<9x512xf32, #tpu.memory_space<vmem>>, vector<1x512xf32>
    %258 = vector.broadcast %257 : vector<1x512xf32> to vector<8x512xf32>
    %259 = arith.mulf %256, %258 : vector<8x512xf32>
    %c8_249 = arith.constant 8 : index
    %c0_250 = arith.constant 0 : index
    %260 = vector.load %arg15[%c8_249, %c0_250] : memref<432x512xf32, #tpu.memory_space<vmem>>, vector<8x512xf32>
    tpu.vector_store %arg15[%c8_249, %c0_250], %259 {strides = array<i32>} : memref<432x512xf32, #tpu.memory_space<vmem>>, vector<8x512xf32>,
    %c0_251 = arith.constant 0 : index
    %c113_252 = arith.constant 113 : index
    %261 = vector.load %arg14[%c0_251, %c113_252] : memref<48x657xf32, #tpu.memory_space<vmem>>, vector<8x512xf32>
    %c2_253 = arith.constant 2 : index
    %c0_254 = arith.constant 0 : index
    %262 = vector.load %arg2[%c2_253, %c0_254] : memref<9x512xf32, #tpu.memory_space<vmem>>, vector<1x512xf32>
    %263 = vector.broadcast %262 : vector<1x512xf32> to vector<8x512xf32>
    %264 = arith.mulf %261, %263 : vector<8x512xf32>
    %c16_255 = arith.constant 16 : index
    %c0_256 = arith.constant 0 : index
    %265 = vector.load %arg15[%c16_255, %c0_256] : memref<432x512xf32, #tpu.memory_space<vmem>>, vector<8x512xf32>
    tpu.vector_store %arg15[%c16_255, %c0_256], %264 {strides = array<i32>} : memref<432x512xf32, #tpu.memory_space<vmem>>, vector<8x512xf32>,
    %c0_257 = arith.constant 0 : index
    %c127_258 = arith.constant 127 : index
    %266 = vector.load %arg14[%c0_257, %c127_258] : memref<48x657xf32, #tpu.memory_space<vmem>>, vector<8x512xf32>
    %c3_259 = arith.constant 3 : index
    %c0_260 = arith.constant 0 : index
    %267 = vector.load %arg2[%c3_259, %c0_260] : memref<9x512xf32, #tpu.memory_space<vmem>>, vector<1x512xf32>
    %268 = vector.broadcast %267 : vector<1x512xf32> to vector<8x512xf32>
    %269 = arith.mulf %266, %268 : vector<8x512xf32>
    %c24_261 = arith.constant 24 : index
    %c0_262 = arith.constant 0 : index
    %270 = vector.load %arg15[%c24_261, %c0_262] : memref<432x512xf32, #tpu.memory_space<vmem>>, vector<8x512xf32>
    tpu.vector_store %arg15[%c24_261, %c0_262], %269 {strides = array<i32>} : memref<432x512xf32, #tpu.memory_space<vmem>>, vector<8x512xf32>,
    %c0_263 = arith.constant 0 : index
    %c128_264 = arith.constant 128 : index
    %271 = vector.load %arg14[%c0_263, %c128_264] : memref<48x657xf32, #tpu.memory_space<vmem>>, vector<8x512xf32>
    %c32_265 = arith.constant 32 : index
    %c0_266 = arith.constant 0 : index
    %272 = vector.load %arg15[%c32_265, %c0_266] : memref<432x512xf32, #tpu.memory_space<vmem>>, vector<8x512xf32>
    tpu.vector_store %arg15[%c32_265, %c0_266], %271 {strides = array<i32>} : memref<432x512xf32, #tpu.memory_space<vmem>>, vector<8x512xf32>,
    %c0_267 = arith.constant 0 : index
    %c129_268 = arith.constant 129 : index
    %273 = vector.load %arg14[%c0_267, %c129_268] : memref<48x657xf32, #tpu.memory_space<vmem>>, vector<8x512xf32>
    %c5_269 = arith.constant 5 : index
    %c0_270 = arith.constant 0 : index
    %274 = vector.load %arg2[%c5_269, %c0_270] : memref<9x512xf32, #tpu.memory_space<vmem>>, vector<1x512xf32>
    %275 = vector.broadcast %274 : vector<1x512xf32> to vector<8x512xf32>
    %276 = arith.mulf %273, %275 : vector<8x512xf32>
    %c40_271 = arith.constant 40 : index
    %c0_272 = arith.constant 0 : index
    %277 = vector.load %arg15[%c40_271, %c0_272] : memref<432x512xf32, #tpu.memory_space<vmem>>, vector<8x512xf32>
    tpu.vector_store %arg15[%c40_271, %c0_272], %276 {strides = array<i32>} : memref<432x512xf32, #tpu.memory_space<vmem>>, vector<8x512xf32>,
    %c0_273 = arith.constant 0 : index
    %c143_274 = arith.constant 143 : index
    %278 = vector.load %arg14[%c0_273, %c143_274] : memref<48x657xf32, #tpu.memory_space<vmem>>, vector<8x512xf32>
    %c6_275 = arith.constant 6 : index
    %c0_276 = arith.constant 0 : index
    %279 = vector.load %arg2[%c6_275, %c0_276] : memref<9x512xf32, #tpu.memory_space<vmem>>, vector<1x512xf32>
    %280 = vector.broadcast %279 : vector<1x512xf32> to vector<8x512xf32>
    %281 = arith.mulf %278, %280 : vector<8x512xf32>
    %c48_277 = arith.constant 48 : index
    %c0_278 = arith.constant 0 : index
    %282 = vector.load %arg15[%c48_277, %c0_278] : memref<432x512xf32, #tpu.memory_space<vmem>>, vector<8x512xf32>
    tpu.vector_store %arg15[%c48_277, %c0_278], %281 {strides = array<i32>} : memref<432x512xf32, #tpu.memory_space<vmem>>, vector<8x512xf32>,
    %c0_279 = arith.constant 0 : index
    %c144_280 = arith.constant 144 : index
    %283 = vector.load %arg14[%c0_279, %c144_280] : memref<48x657xf32, #tpu.memory_space<vmem>>, vector<8x512xf32>
    %c7_281 = arith.constant 7 : index
    %c0_282 = arith.constant 0 : index
    %284 = vector.load %arg2[%c7_281, %c0_282] : memref<9x512xf32, #tpu.memory_space<vmem>>, vector<1x512xf32>
    %285 = vector.broadcast %284 : vector<1x512xf32> to vector<8x512xf32>
    %286 = arith.mulf %283, %285 : vector<8x512xf32>
    %c56_283 = arith.constant 56 : index
    %c0_284 = arith.constant 0 : index
    %287 = vector.load %arg15[%c56_283, %c0_284] : memref<432x512xf32, #tpu.memory_space<vmem>>, vector<8x512xf32>
    tpu.vector_store %arg15[%c56_283, %c0_284], %286 {strides = array<i32>} : memref<432x512xf32, #tpu.memory_space<vmem>>, vector<8x512xf32>,
    %c0_285 = arith.constant 0 : index
    %c145_286 = arith.constant 145 : index
    %288 = vector.load %arg14[%c0_285, %c145_286] : memref<48x657xf32, #tpu.memory_space<vmem>>, vector<8x512xf32>
    %c8_287 = arith.constant 8 : index
    %c0_288 = arith.constant 0 : index
    %289 = vector.load %arg2[%c8_287, %c0_288] : memref<9x512xf32, #tpu.memory_space<vmem>>, vector<1x512xf32>
    %290 = vector.broadcast %289 : vector<1x512xf32> to vector<8x512xf32>
    %291 = arith.mulf %288, %290 : vector<8x512xf32>
    %c64_289 = arith.constant 64 : index
    %c0_290 = arith.constant 0 : index
    %292 = vector.load %arg15[%c64_289, %c0_290] : memref<432x512xf32, #tpu.memory_space<vmem>>, vector<8x512xf32>
    tpu.vector_store %arg15[%c64_289, %c0_290], %291 {strides = array<i32>} : memref<432x512xf32, #tpu.memory_space<vmem>>, vector<8x512xf32>,
    %c0_291 = arith.constant 0 : index
    %c0_292 = arith.constant 0 : index
    %293 = vector.load %arg15[%c0_291, %c0_292] : memref<432x512xf32, #tpu.memory_space<vmem>>, vector<72x512xf32>
    %294 = arith.truncf %293 : vector<72x512xf32> to vector<72x512xbf16>
    %cst_293 = arith.constant dense<0.000000e+00> : vector<4x512xf32>
    %295 = tpu.matmul %247, %294, %cst_293 {dimension_numbers = #tpu.dot_dimension_numbers<[1], [0], [0], [1], [0, 0, 1, 1], [], []>} : vector<4x72xbf16>, vector<72x512xbf16>, vector<4x512xf32> -> vector<4x512xf32>
    %296 = vector.broadcast %249 : vector<4x1xf32> to vector<4x512xf32>
    %297 = arith.addf %295, %296 : vector<4x512xf32>
    %cst_294 = arith.constant 0.000000e+00 : f32
    %298 = vector.broadcast %cst_294 : f32 to vector<4x512xf32>
    %299 = arith.maximumf %297, %298 : vector<4x512xf32>
    %c1_295 = arith.constant 1 : index
    %c0_296 = arith.constant 0 : index
    %c0_297 = arith.constant 0 : index
    %300 = vector.load %arg11[%c1_295, %c0_296, %c0_297] : memref<2x8x4xf32, #tpu.memory_space<vmem>>, vector<1x8x4xf32>
    %301 = vector.shape_cast %300 : vector<1x8x4xf32> to vector<8x4xf32>
    %c1_298 = arith.constant 1 : index
    %c0_299 = arith.constant 0 : index
    %c0_300 = arith.constant 0 : index
    %302 = vector.load %arg12[%c1_298, %c0_299, %c0_300] : memref<2x8x1xf32, #tpu.memory_space<vmem>>, vector<1x8x1xf32>
    %303 = vector.shape_cast %302 : vector<1x8x1xf32> to vector<8x1xf32>
    %304 = vector.extract_strided_slice %301 {offsets = [0, 0], sizes = [8, 1], strides = [1, 1]} : vector<8x4xf32> to vector<8x1xf32>
    %305 = vector.extract_strided_slice %299 {offsets = [0, 0], sizes = [1, 512], strides = [1, 1]} : vector<4x512xf32> to vector<1x512xf32>
    %306 = vector.broadcast %304 : vector<8x1xf32> to vector<8x512xf32>
    %307 = vector.broadcast %305 : vector<1x512xf32> to vector<8x512xf32>
    %308 = arith.mulf %306, %307 : vector<8x512xf32>
    %309 = vector.broadcast %303 : vector<8x1xf32> to vector<8x512xf32>
    %310 = arith.addf %309, %308 : vector<8x512xf32>
    %311 = vector.extract_strided_slice %301 {offsets = [0, 1], sizes = [8, 1], strides = [1, 1]} : vector<8x4xf32> to vector<8x1xf32>
    %312 = vector.extract_strided_slice %299 {offsets = [1, 0], sizes = [1, 512], strides = [1, 1]} : vector<4x512xf32> to vector<1x512xf32>
    %313 = vector.broadcast %311 : vector<8x1xf32> to vector<8x512xf32>
    %314 = vector.broadcast %312 : vector<1x512xf32> to vector<8x512xf32>
    %315 = arith.mulf %313, %314 : vector<8x512xf32>
    %316 = arith.addf %310, %315 : vector<8x512xf32>
    %317 = vector.extract_strided_slice %301 {offsets = [0, 2], sizes = [8, 1], strides = [1, 1]} : vector<8x4xf32> to vector<8x1xf32>
    %318 = vector.extract_strided_slice %299 {offsets = [2, 0], sizes = [1, 512], strides = [1, 1]} : vector<4x512xf32> to vector<1x512xf32>
    %319 = vector.broadcast %317 : vector<8x1xf32> to vector<8x512xf32>
    %320 = vector.broadcast %318 : vector<1x512xf32> to vector<8x512xf32>
    %321 = arith.mulf %319, %320 : vector<8x512xf32>
    %322 = arith.addf %316, %321 : vector<8x512xf32>
    %323 = vector.extract_strided_slice %301 {offsets = [0, 3], sizes = [8, 1], strides = [1, 1]} : vector<8x4xf32> to vector<8x1xf32>
    %324 = vector.extract_strided_slice %299 {offsets = [3, 0], sizes = [1, 512], strides = [1, 1]} : vector<4x512xf32> to vector<1x512xf32>
    %325 = vector.broadcast %323 : vector<8x1xf32> to vector<8x512xf32>
    %326 = vector.broadcast %324 : vector<1x512xf32> to vector<8x512xf32>
    %327 = arith.mulf %325, %326 : vector<8x512xf32>
    %328 = arith.addf %322, %327 : vector<8x512xf32>
    %329 = arith.addf %243, %328 : vector<8x512xf32>
    %cst_301 = arith.constant 0.000000e+00 : f32
    %330 = vector.broadcast %cst_301 : f32 to vector<8x512xf32>
    %331 = arith.maximumf %329, %330 : vector<8x512xf32>
    %c0_302 = arith.constant 0 : index
    %c0_303 = arith.constant 0 : index
    %332 = vector.load %arg13[%c0_302, %c0_303] : memref<8x512xf32, #tpu.memory_space<vmem>>, vector<8x512xf32>
    tpu.vector_store %arg13[%c0_302, %c0_303], %331 {strides = array<i32>} : memref<8x512xf32, #tpu.memory_space<vmem>>, vector<8x512xf32>,
    return
  }
  func.func @transform_0(%arg0: i32) -> (i32, i32) {
    %c0_i32 = arith.constant 0 : i32
    %c0_i32_0 = arith.constant 0 : i32
    return %c0_i32, %arg0 : i32, i32
  }
  func.func @transform_1(%arg0: i32) -> (i32, i32) {
    %c0_i32 = arith.constant 0 : i32
    %c0_i32_0 = arith.constant 0 : i32
    %c0_i32_1 = arith.constant 0 : i32
    return %c0_i32, %c0_i32_0 : i32, i32
  }
  func.func @transform_2(%arg0: i32) -> (i32, i32) {
    %c0_i32 = arith.constant 0 : i32
    %c0_i32_0 = arith.constant 0 : i32
    %c0_i32_1 = arith.constant 0 : i32
    return %c0_i32, %c0_i32_0 : i32, i32
  }
  func.func @transform_3(%arg0: i32) -> (i32, i32) {
    %c0_i32 = arith.constant 0 : i32
    %c0_i32_0 = arith.constant 0 : i32
    %c0_i32_1 = arith.constant 0 : i32
    return %c0_i32, %c0_i32_0 : i32, i32
  }
  func.func @transform_4(%arg0: i32) -> (i32, i32) {
    %c0_i32 = arith.constant 0 : i32
    %c0_i32_0 = arith.constant 0 : i32
    %c0_i32_1 = arith.constant 0 : i32
    return %c0_i32, %c0_i32_0 : i32, i32
  }
  func.func @transform_5(%arg0: i32) -> (i32, i32) {
    %c0_i32 = arith.constant 0 : i32
    %c0_i32_0 = arith.constant 0 : i32
    %c0_i32_1 = arith.constant 0 : i32
    return %c0_i32, %c0_i32_0 : i32, i32
  }
  func.func @transform_6(%arg0: i32) -> (i32, i32) {
    %c0_i32 = arith.constant 0 : i32
    %c0_i32_0 = arith.constant 0 : i32
    %c0_i32_1 = arith.constant 0 : i32
    return %c0_i32, %c0_i32_0 : i32, i32
  }
  func.func @transform_7(%arg0: i32) -> (i32, i32) {
    %c0_i32 = arith.constant 0 : i32
    %c0_i32_0 = arith.constant 0 : i32
    %c0_i32_1 = arith.constant 0 : i32
    return %c0_i32, %c0_i32_0 : i32, i32
  }
  func.func @transform_8(%arg0: i32) -> (i32, i32, i32) {
    %c0_i32 = arith.constant 0 : i32
    %c0_i32_0 = arith.constant 0 : i32
    %c0_i32_1 = arith.constant 0 : i32
    %c0_i32_2 = arith.constant 0 : i32
    return %c0_i32, %c0_i32_0, %c0_i32_1 : i32, i32, i32
  }
  func.func @transform_9(%arg0: i32) -> (i32, i32, i32) {
    %c0_i32 = arith.constant 0 : i32
    %c0_i32_0 = arith.constant 0 : i32
    %c0_i32_1 = arith.constant 0 : i32
    %c0_i32_2 = arith.constant 0 : i32
    return %c0_i32, %c0_i32_0, %c0_i32_1 : i32, i32, i32
  }
  func.func @transform_10(%arg0: i32) -> (i32, i32, i32) {
    %c0_i32 = arith.constant 0 : i32
    %c0_i32_0 = arith.constant 0 : i32
    %c0_i32_1 = arith.constant 0 : i32
    %c0_i32_2 = arith.constant 0 : i32
    return %c0_i32, %c0_i32_0, %c0_i32_1 : i32, i32, i32
  }
  func.func @transform_11(%arg0: i32) -> (i32, i32, i32) {
    %c0_i32 = arith.constant 0 : i32
    %c0_i32_0 = arith.constant 0 : i32
    %c0_i32_1 = arith.constant 0 : i32
    %c0_i32_2 = arith.constant 0 : i32
    return %c0_i32, %c0_i32_0, %c0_i32_1 : i32, i32, i32
  }
  func.func @transform_12(%arg0: i32) -> (i32, i32) {
    %c0_i32 = arith.constant 0 : i32
    %c0_i32_0 = arith.constant 0 : i32
    return %c0_i32, %arg0 : i32, i32
  }
}

</mosaic_0001>

<bundles_post_ra>
// kernel: tile.14
= control target key start
LH: loop header
LB: loop body
LE: loop exit
PB: predicated region body
PF: predicated region fallthrough
CT: control target
= control target key end

     0   :  { %s22_s0 = inlined_call_operand.vmem [shape: f32[4], index: 0, kind: input, shape index: {}]   ;;  %s23_s1 = inlined_call_operand.vmem [shape: f32[4,4], index: 1, kind: output, shape index: {}]  }
   0x1   :  { %v4_v0 = vld [vmem:[%s22_s0] ss:$0 sm:$0xff] }
   0x2   :  { %5 = vst [vmem:[%s23_s1] sm:$0xf] %v4_v0 }

// kernel: tile.0
= control target key start
LH: loop header
LB: loop body
LE: loop exit
PB: predicated region body
PF: predicated region fallthrough
CT: control target
= control target key end

     0   :  { %s34_s8 = smov 125   ;;  %s35_s9 = smov 126   ;;  %vm7_vm0 = vcmask 7168   ;;  %s61_s0 = inlined_call_operand.vmem [shape: f32[4,4], index: 0, kind: input, shape index: {}]   ;;  %s62_s1 = inlined_call_operand.vmem [shape: f32[16,1], index: 1, kind: output, shape index: {}]  }
   0x1   :  { %v4_v0 = vld [vmem:[%s61_s0] sm:$0xf]  ;;  %s33_s0 = smov 127  }
   0x2   :  { %5 = vst [vmem:[#allocation0] sm:$0xf] %v4_v0 }
   0x9   :  { %v9_v1 = vld [vmem:[#allocation0] sm:$0xf]  }
   0xa   :  { %v21_v2 = vld [vmem:[#allocation0] sm:$0xf]   ;;  %10 = vrot.lane.b32.xlu0 %v9_v1, %s33_s0 }
   0xb   :  { %22 = vrot.lane.b32.xlu1 %v21_v2, %s34_s8  ;;  %v15_v3 = vld [vmem:[#allocation0] sm:$0xf]  }
   0xc   :  { %v6_v4 = vld [vmem:[#allocation0] sm:$0xf]  }
   0xd   :  { %8 = vst.msk [vmem:[%s62_s1] ss:$4 sm:$0xf] %vm7_vm0, %v6_v4  }
  0x12   :  { %16 = vrot.lane.b32.xlu0 %v15_v3, %s35_s9 }
  0x7c   :  { %v11_v5 = vpop.permute.xlu0 %10  }
  0x7d   :  { %v23_v6 = vpop.permute.xlu1 %22   ;;  %27 = vst.msk [vmem:[%s62_s1 + $0x1] ss:$4 sm:$0xf] %vm7_vm0, %v11_v5  }
  0x7e   :  { %29 = vst.msk [vmem:[%s62_s1 + $0x3] ss:$4 sm:$0xf] %vm7_vm0, %v23_v6  }
  0x84   :  { %v17_v7 = vpop.permute.xlu0 %16  }
  0x85   :  { %28 = vst.msk [vmem:[%s62_s1 + $0x2] ss:$4 sm:$0xf] %vm7_vm0, %v17_v7  }

// kernel: residual_encoder_v2_pallas.1
= control target key start
LH: loop header
LB: loop body
LE: loop exit
PB: predicated region body
PF: predicated region fallthrough
CT: control target
= control target key end

     0   :  { %s7549_s21 = smov 0   ;;  %s7551_s22 = smov 0   ;;  %s11728_s0 = inlined_call_operand.vmem [shape: f32[48,1024], index: 0, kind: input, shape index: {}]   ;;  %s11729_s1 = inlined_call_operand.vmem [shape: f32[9,512], index: 1, kind: input, shape index: {}]   ;;  %s11730_s2 = inlined_call_operand.vmem [shape: bf16[16,432], index: 2, kind: input, shape index: {}]   ;;  %s11731_s3 = inlined_call_operand.vmem [shape: f32[16,1], index: 3, kind: input, shape index: {}]   ;;  %s11732_s4 = inlined_call_operand.vmem [shape: bf16[8,144], index: 4, kind: input, shape index: {}]   ;;  %s11733_s5 = inlined_call_operand.vmem [shape: f32[8,1], index: 5, kind: input, shape index: {}]   ;;  %s11734_s6 = inlined_call_operand.vmem [shape: bf16[8,72], index: 6, kind: input, shape index: {}]   ;;  %s11735_s7 = inlined_call_operand.vmem [shape: f32[8,1], index: 7, kind: input, shape index: {}]   ;;  %s11736_s8 = inlined_call_operand.vmem [shape: bf16[2,4,72], index: 8, kind: input, shape index: {}]   ;;  %s11737_s9 = inlined_call_operand.vmem [shape: f32[2,4,1], index: 9, kind: input, shape index: {}]   ;;  %s11738_s10 = inlined_call_operand.vmem [shape: f32[2,8,4], index: 10, kind: input, shape index: {}]   ;;  %s11739_s11 = inlined_call_operand.vmem [shape: f32[2,8,1], index: 11, kind: input, shape index: {}]   ;;  %s11740_s12 = inlined_call_operand.vmem [shape: f32[8,1024], index: 12, kind: output, shape index: {}]  }
   0x1   :  { %s7553_s23 = smov 0  }
   0x2 LB: > { %s7566_s25 = sadd.s32 1, %s7469_s23   ;;  %s29_s27 = sadd.s32 1, %s7465_s22  ;;  %s7469_s23 = sphi %s7553_s23, %s12254_s23   ;;  %s7465_s22 = sphi %s7551_s22, %s12253_s22   ;;  %s7461_s21 = sphi %s7549_s21, %s12252_s21  }
   0x3   : > { %s26_s26 = ssub.s32 %s7469_s23, %s7566_s25  ;;  %p36_p1 = scmp.ne.s32.totalorder %s7465_s22, %s7461_s21 }
   0x4   : > { %p27_p0 = scmp.eq.s32.totalorder %s26_s26, 0  ;;  %p37_p2 = scmp.eq.s32.totalorder %s7469_s23, 0 }
   0x5   : > { %p6267_p4 = scmp.ge.s32.totalorder %s7469_s23, 2 }
   0x6   : > { %s7575_s28 = scalar_select %p27_p0, %s7465_s22, %s29_s27  }
   0x7   : > { %p38_p3 = por %p37_p2, %p36_p1  ;;  %352 = sbr.rel (%p6267_p4) target bundleno = 40 (0x28), region = 60 }
   0xc   : > { %355 = sbr.rel (!%p38_p3) target bundleno = 40 (0x28), region = 64  ;;  %s357_s29 = sand.u32 (%p38_p3), 1, %s7465_s22  }
   0xd   : > { %s6350_s30 = sshll.u32 (%p38_p3), %s7469_s23, 5  ;;  %s6355_s13 = smul.u32 (%p38_p3), 192, %s357_s29 }
   0xe   : > { %s7583_s16 = scalar_lea.vmem (%p38_p3), %s11728_s0, %s6350_s30 }
   0xf   : > { %v375_v0 = vld [vmem:[%s7583_s16] sm:$0xff] (%p38_p3)  ;;  %v377_v1 = vld [vmem:[%s7583_s16 + $0x8] sm:$0xff] (%p38_p3)  ;;  %v379_v2 = vld [vmem:[%s7583_s16 + $0x10] sm:$0xff] (%p38_p3)  ;;  %s7588_s17 = scalar_lea.vmem (%p38_p3), [#allocation4], %s6355_s13 }
  0x10   : > { %376 = vst [vmem:[%s7588_s17] sm:$0xff] (%p38_p3), %v375_v0  ;;  %v381_v3 = vld [vmem:[%s7583_s16 + $0x18] sm:$0xff] (%p38_p3)  ;;  %v383_v4 = vld [vmem:[%s7583_s16 + $0x40] sm:$0xff] (%p38_p3)  ;;  %v385_v5 = vld [vmem:[%s7583_s16 + $0x48] sm:$0xff] (%p38_p3) }
  0x11   : > { %378 = vst [vmem:[%s7588_s17 + $0x8] sm:$0xff] %v377_v1  ;;  %v387_v6 = vld [vmem:[%s7583_s16 + $0x50] sm:$0xff]  ;;  %v389_v7 = vld [vmem:[%s7583_s16 + $0x58] sm:$0xff]  ;;  %v391_v8 = vld [vmem:[%s7583_s16 + $0x80] sm:$0xff] }
  0x12   : > { %380 = vst [vmem:[%s7588_s17 + $0x10] sm:$0xff] %v379_v2  ;;  %v393_v9 = vld [vmem:[%s7583_s16 + $0x88] sm:$0xff]  ;;  %v395_v10 = vld [vmem:[%s7583_s16 + $0x90] sm:$0xff]  ;;  %v397_v11 = vld [vmem:[%s7583_s16 + $0x98] sm:$0xff] }
  0x13   : > { %382 = vst [vmem:[%s7588_s17 + $0x18] sm:$0xff] %v381_v3  ;;  %v399_v12 = vld [vmem:[%s7583_s16 + $0xc0] sm:$0xff]  ;;  %v401_v13 = vld [vmem:[%s7583_s16 + $0xc8] sm:$0xff]  ;;  %v403_v14 = vld [vmem:[%s7583_s16 + $0xd0] sm:$0xff] }
  0x14   : > { %384 = vst [vmem:[%s7588_s17 + $0x20] sm:$0xff] %v383_v4  ;;  %v405_v15 = vld [vmem:[%s7583_s16 + $0xd8] sm:$0xff]  ;;  %v407_v16 = vld [vmem:[%s7583_s16 + $0x100] sm:$0xff]  ;;  %v409_v17 = vld [vmem:[%s7583_s16 + $0x108] sm:$0xff] }
  0x15   : > { %386 = vst [vmem:[%s7588_s17 + $0x28] sm:$0xff] %v385_v5  ;;  %v411_v18 = vld [vmem:[%s7583_s16 + $0x110] sm:$0xff]  ;;  %v413_v19 = vld [vmem:[%s7583_s16 + $0x118] sm:$0xff]  ;;  %v415_v20 = vld [vmem:[%s7583_s16 + $0x140] sm:$0xff] }
  0x16   : > { %388 = vst [vmem:[%s7588_s17 + $0x30] sm:$0xff] %v387_v6  ;;  %v417_v21 = vld [vmem:[%s7583_s16 + $0x148] sm:$0xff]  ;;  %v419_v22 = vld [vmem:[%s7583_s16 + $0x150] sm:$0xff]  ;;  %v421_v23 = vld [vmem:[%s7583_s16 + $0x158] sm:$0xff] }
  0x17   : > { %390 = vst [vmem:[%s7588_s17 + $0x38] sm:$0xff] %v389_v7 }
  0x18   : > { %392 = vst [vmem:[%s7588_s17 + $0x40] sm:$0xff] %v391_v8 }
  0x19   : > { %394 = vst [vmem:[%s7588_s17 + $0x48] sm:$0xff] %v393_v9 }
  0x1a   : > { %396 = vst [vmem:[%s7588_s17 + $0x50] sm:$0xff] %v395_v10 }
  0x1b   : > { %398 = vst [vmem:[%s7588_s17 + $0x58] sm:$0xff] %v397_v11 }
  0x1c   : > { %400 = vst [vmem:[%s7588_s17 + $0x60] sm:$0xff] %v399_v12 }
  0x1d   : > { %402 = vst [vmem:[%s7588_s17 + $0x68] sm:$0xff] %v401_v13 }
  0x1e   : > { %404 = vst [vmem:[%s7588_s17 + $0x70] sm:$0xff] %v403_v14 }
  0x1f   : > { %406 = vst [vmem:[%s7588_s17 + $0x78] sm:$0xff] %v405_v15 }
  0x20   : > { %408 = vst [vmem:[%s7588_s17 + $0x80] sm:$0xff] %v407_v16 }
  0x21   : > { %410 = vst [vmem:[%s7588_s17 + $0x88] sm:$0xff] %v409_v17 }
  0x22   : > { %412 = vst [vmem:[%s7588_s17 + $0x90] sm:$0xff] %v411_v18 }
  0x23   : > { %414 = vst [vmem:[%s7588_s17 + $0x98] sm:$0xff] %v413_v19 }
  0x24   : > { %416 = vst [vmem:[%s7588_s17 + $0xa0] sm:$0xff] %v415_v20 }
  0x25   : > { %418 = vst [vmem:[%s7588_s17 + $0xa8] sm:$0xff] %v417_v21 }
  0x26   : > { %420 = vst [vmem:[%s7588_s17 + $0xb0] sm:$0xff] %v419_v22 }
  0x27   : > { %422 = vst [vmem:[%s7588_s17 + $0xb8] sm:$0xff] %v421_v23 }
  0x28 PF: > { %p6270_p5 = scmp.ge.s32.totalorder %s7469_s23, 1  ;;  %p427_p6 = scmp.lt.s32.totalorder %s7469_s23, 3 }
  0x2a   : > { %p428_p7 = pnand %p6270_p5, %p427_p6 }
  0x2c   : > { %431 = sbr.rel (%p428_p7) target bundleno = 3232 (0xca0), region = 87 }
  0x31   : > { %v581_v24 = vld [vmem:[%s11729_s1] ss:$8 sm:$0xf]  ;;  %v6273_v27 = vld [vmem:[%s11729_s1 + $0x1] ss:$8 sm:$0xf] }
  0x32   : > { %v585_v25 = vperm.slane %v581_v24, 2  ;;  %v583_v26 = vperm.slane %v581_v24, 0  ;;  %s7471_s27 = smov 111   ;;  %v830_v28 = vperm.slane %v6273_v27, 1  ;;  %s7472_s29 = smov 112   ;;  %v586_v30 = vperm.slane %v581_v24, 3 }
  0x33   : > { %v6274_v29 = vld [vmem:[%s11729_s1 + $0x2] ss:$8 sm:$0xf]  ;;  %v584_v31 = vperm.slane %v581_v24, 1  ;;  %s7473_s14 = smov 113   ;;  %v829_v33 = vperm.slane %v6273_v27, 0 }
  0x34   : > { %591 = vrot.lane.b32.xlu1 %v585_v25, %s7471_s27  ;;  %587 = vrot.lane.b32.xlu0 %v583_v26, %s7471_s27  ;;  %v1076_v32 = vperm.slane %v6274_v29, 0  ;;  %v831_v34 = vperm.slane %v6273_v27, 2  ;;  %v1079_v35 = vperm.slane %v6274_v29, 3  ;;  %v832_v36 = vperm.slane %v6273_v27, 3  ;;  %s434_s15 = sand.u32 1, %s7461_s21   ;;  %s7475_s21 = smov 17  }
  0x35   : > { %835 = vrot.lane.b32.xlu2 %v830_v28, %s7472_s29  ;;  %v1077_v37 = vperm.slane %v6274_v29, 1  ;;  %v1078_v38 = vperm.slane %v6274_v29, 2  ;;  %vm483_vm0 = vcmask 1048440   ;;  %s6356_s16 = smul.u32 192, %s434_s15  ;;  %v7474_v39 = vmov 0.0   ;;  %s7476_s18 = smov 16  }
  0x36   : > { %489 = vst.msk [vmem:[#allocation2 + $0xf0] sm:$0xff] %vm483_vm0, %v7474_v39  ;;  %vm595_vm1 = vcmask 908288   ;;  %s7477_s19 = smov 15   ;;  %vm841_vm2 = vcmask 916480   ;;  %vm1088_vm3 = vcmask 924672   ;;  %vm490_vm4 = vcmask 138240  }
  0x37   : > { %484 = vst.msk [vmem:[#allocation2] sm:$0xff] %vm483_vm0, %v7474_v39  ;;  %s7665_s17 = scalar_lea.vmem [#allocation4], %s6356_s16  ;;  %s11916_s30 = smov 127   ;;  %vm970_vm5 = vcmask 130048   ;;  %vm1217_vm6 = vcmask 121856   ;;  %vm1335_vm7 = vcmask 1039360  }
  0x38   : > { %485 = vst.msk [vmem:[#allocation2 + $0x30] sm:$0xff] %vm483_vm0, %v7474_v39  ;;  %v7668_v40 = vld [vmem:[%s7665_s17 + $0x98] sm:$0xff]  ;;  %v7680_v43 = vld [vmem:[%s7665_s17 + $0x20] sm:$0xff]  ;;  %v7683_v44 = vld [vmem:[%s7665_s17 + $0x28] sm:$0xff]  ;;  %s11914_s13 = smov 1   ;;  %vm1464_vm8 = vcmask 7168  }
  0x39   : > { %486 = vst.msk [vmem:[#allocation2 + $0x60] sm:$0xff] %vm483_vm0, %v7474_v39  ;;  %v7672_v41 = vld [vmem:[%s7665_s17 + $0x58] sm:$0xff]  ;;  %v7688_v45 = vld [vmem:[%s7665_s17 + $0x48] sm:$0xff]  ;;  %v7691_v46 = vld [vmem:[%s7665_s17 + $0x50] sm:$0xff]  ;;  %vm2918_vm9 = vcmask 392192   ;;  %s12237_s24 = smov 127  }
  0x3a   : > { %487 = vst.msk [vmem:[#allocation2 + $0x90] sm:$0xff] %vm483_vm0, %v7474_v39  ;;  %v7676_v42 = vld [vmem:[%s7665_s17 + $0x18] sm:$0xff]  ;;  %v7696_v47 = vld [vmem:[%s7665_s17 + $0x60] sm:$0xff]  ;;  %v7699_v48 = vld [vmem:[%s7665_s17 + $0x68] sm:$0xff]  ;;  %vm4729_vm10 = vcmask 1043456   ;;  %vm4725_vm11 = vcmask 588800  }
  0x3b   : > { %488 = vst.msk [vmem:[#allocation2 + $0xc0] sm:$0xff] %vm483_vm0, %v7474_v39  ;;  %v7703_v49 = vld [vmem:[%s7665_s17 + $0x40] sm:$0xff]  ;;  %v7708_v50 = vld [vmem:[%s7665_s17 + $0x70] sm:$0xff]  ;;  %v7716_v52 = vld [vmem:[%s7665_s17 + $0x78] sm:$0xff]  ;;  %s12251_s16 = sadd.s32 4294967295, %s7469_s23  }
  0x3c   : > { %593 = vrot.lane.b32.xlu1 %v586_v30, %s7471_s27  ;;  %589 = vrot.lane.b32.xlu0 %v584_v31, %s7471_s27  ;;  %546 = vst [vmem:[#allocation2 + $0xe0] sm:$0xff] %v7668_v40  ;;  %v7711_v51 = vld [vmem:[%s7665_s17] sm:$0xff]  ;;  %v7720_v53 = vld [vmem:[%s7665_s17 + $0x88] sm:$0xff] }
  0x3d   : > { %1080 = vrot.lane.b32.xlu2 %v1076_v32, %s7473_s14  ;;  %538 = vst [vmem:[#allocation2 + $0x80] sm:$0xff] %v7672_v41  ;;  %v7723_v54 = vld [vmem:[%s7665_s17 + $0x90] sm:$0xff]  ;;  %v7728_v55 = vld [vmem:[%s7665_s17 + $0x8] sm:$0xff]  ;;  %v7739_v58 = vld [vmem:[%s7665_s17 + $0xb8] sm:$0xff] }
  0x3e   : > { %530 = vst [vmem:[#allocation2 + $0x20] sm:$0xff] %v7676_v42  ;;  %v7731_v56 = vld [vmem:[%s7665_s17 + $0x10] sm:$0xff]  ;;  %v7747_v60 = vld [vmem:[%s7665_s17 + $0x38] sm:$0xff]  ;;  %v7752_v61 = vld [vmem:[%s7665_s17 + $0x80] sm:$0xff] }
  0x3f   : > { %531 = vst [vmem:[#allocation2 + $0x38] sm:$0xff] %v7680_v43  ;;  %v7736_v57 = vld [vmem:[%s7665_s17 + $0xb0] sm:$0xff]  ;;  %v7756_v62 = vld [vmem:[%s7665_s17 + $0xa0] sm:$0xff]  ;;  %v7759_v63 = vld [vmem:[%s7665_s17 + $0xa8] sm:$0xff] }
  0x40   : > { %532 = vst [vmem:[#allocation2 + $0x40] sm:$0xff] %v7683_v44  ;;  %v7744_v59 = vld [vmem:[%s7665_s17 + $0x30] sm:$0xff] }
  0x41   : > { %536 = vst [vmem:[#allocation2 + $0x70] sm:$0xff] %v7688_v45  ;;  %v7763_v1 = vld [vmem:[#allocation2 + $0xf0] sm:$0xff] }
  0x42   : > { %537 = vst [vmem:[#allocation2 + $0x78] sm:$0xff] %v7691_v46  ;;  %v566_v2 = vld [vmem:[#allocation2 + $0x90] sm:$0xff] }
  0x43   : > { %539 = vst [vmem:[#allocation2 + $0x98] sm:$0xff] %v7696_v47  ;;  %v556_v3 = vld [vmem:[#allocation2 + $0x30] sm:$0xff] }
  0x44   : > { %833 = vrot.lane.b32.xlu1 %v829_v33, %s7472_s29  ;;  %837 = vrot.lane.b32.xlu0 %v831_v34, %s7472_s29  ;;  %540 = vst [vmem:[#allocation2 + $0xa0] sm:$0xff] %v7699_v48  ;;  %v7814_v34 = vld [vmem:[#allocation2 + $0x60] sm:$0xff] }
  0x45   : > { %1086 = vrot.lane.b32.xlu2 %v1079_v35, %s7473_s14  ;;  %535 = vst [vmem:[#allocation2 + $0x68] sm:$0xff] %v7703_v49 }
  0x46   : > { %541 = vst [vmem:[#allocation2 + $0xa8] sm:$0xff] %v7708_v50 }
  0x47   : > { %527 = vst [vmem:[#allocation2 + $0x8] sm:$0xff] %v7711_v51 }
  0x48   : > { %542 = vst [vmem:[#allocation2 + $0xb0] sm:$0xff] %v7716_v52 }
  0x49   : > { %544 = vst [vmem:[#allocation2 + $0xd0] sm:$0xff] %v7720_v53 }
  0x4a   : > { %545 = vst [vmem:[#allocation2 + $0xd8] sm:$0xff] %v7723_v54 }
  0x4b   : > { %528 = vst [vmem:[#allocation2 + $0x10] sm:$0xff] %v7728_v55 }
  0x4c   : > { %839 = vrot.lane.b32.xlu1 %v832_v36, %s7472_s29  ;;  %1082 = vrot.lane.b32.xlu0 %v1077_v37, %s7473_s14  ;;  %529 = vst [vmem:[#allocation2 + $0x18] sm:$0xff] %v7731_v56 }
  0x4d   : > { %549 = vst [vmem:[#allocation2 + $0x108] sm:$0xff] %v7736_v57 }
  0x4e   : > { %550 = vst [vmem:[#allocation2 + $0x110] sm:$0xff] %v7739_v58 }
  0x4f   : > { %533 = vst [vmem:[#allocation2 + $0x48] sm:$0xff] %v7744_v59 }
  0x50   : > { %534 = vst [vmem:[#allocation2 + $0x50] sm:$0xff] %v7747_v60 }
  0x51   : > { %543 = vst [vmem:[#allocation2 + $0xc8] sm:$0xff] %v7752_v61 }
  0x52   : > { %547 = vst [vmem:[#allocation2 + $0xf8] sm:$0xff] %v7756_v62 }
  0x53   : > { %548 = vst [vmem:[#allocation2 + $0x100] sm:$0xff] %v7759_v63 }
  0x54   : > { %1084 = vrot.lane.b32.xlu1 %v1078_v38, %s7473_s14  ;;  %491 = vst.msk [vmem:[#allocation2 + $0x28] sm:$0xff] %vm490_vm4, %v7474_v39 }
  0x55   : > { %492 = vst.msk [vmem:[#allocation2 + $0x58] sm:$0xff] %vm490_vm4, %v7474_v39 }
  0x56   : > { %493 = vst.msk [vmem:[#allocation2 + $0x88] sm:$0xff] %vm490_vm4, %v7474_v39 }
  0x57   : > { %494 = vst.msk [vmem:[#allocation2 + $0xb8] sm:$0xff] %vm490_vm4, %v7474_v39 }
  0x58   : > { %495 = vst.msk [vmem:[#allocation2 + $0xe8] sm:$0xff] %vm490_vm4, %v7474_v39 }
  0x59   : > { %496 = vst.msk [vmem:[#allocation2 + $0x118] sm:$0xff] %vm490_vm4, %v7474_v39 }
  0x8f   : > { %v7767_v5 = vpop.permute.xlu2 %835 }
  0x97   : > { %v7786_v17 = vpop.permute.xlu2 %1080 }
  0x98   : > { %v1102_v33 = vmul.f32 %v7786_v17, %v556_v3 }
  0x9f   : > { %v7800_v26 = vpop.permute.xlu2 %1086 }
  0xa0   : > { %v1101_v32 = vmul.f32 %v7800_v26, %v7676_v42 }
  0xa6   : > { %v592_v0 = vpop.permute.xlu1 %591  ;;  %v7765_v4 = vpop.permute.xlu0 %587 }
  0xa7   : > { %v629_v6 = vmul.f32 %v7765_v4, %v7763_v1  ;;  %v619_v7 = vmul.f32 %v7765_v4, %v566_v2  ;;  %v609_v9 = vmul.f32 %v7765_v4, %v556_v3  ;;  %v614_v37 = vmul.f32 %v7765_v4, %v7814_v34 }
  0xae   : > { %v7772_v8 = vpop.permute.xlu1 %593  ;;  %v590_v21 = vpop.permute.xlu0 %589 }
  0xaf   : > { %v628_v10 = vmul.f32 %v7772_v8, %v7668_v40  ;;  %v618_v11 = vmul.f32 %v7772_v8, %v7672_v41  ;;  %v608_v12 = vmul.f32 %v7772_v8, %v7676_v42  ;;  %v7804_v30 = vsel %vm595_vm1, %v7765_v4, %v590_v21 }
  0xb0   : > { %v7807_v31 = vsel %vm595_vm1, %v590_v21, %v592_v0  ;;  %v610_v35 = vmul.f32 %v7804_v30, %v7680_v43  ;;  %v615_v38 = vmul.f32 %v7804_v30, %v7703_v49 }
  0xb1   : > { %v6404_v13 = vpack.i.bf16 %v629_v6, %v628_v10  ;;  %v6399_v14 = vpack.i.bf16 %v619_v7, %v618_v11  ;;  %v6394_v15 = vpack.i.bf16 %v609_v9, %v608_v12  ;;  %v611_v36 = vmul.f32 %v7807_v31, %v7683_v44  ;;  %v7836_v12 = vld [vmem:[#allocation2] sm:$0xff] }
  0xb2   : > { %v6424_v6 = vpack.i.bf16 %v1102_v33, %v1101_v32  ;;  %v6449_v10 = vpack.i.bf16 %v615_v38, %v614_v37  ;;  %v598_v11 = vsel %vm595_vm1, %v592_v0, %v7772_v8  ;;  %v605_v0 = vmul.f32 %v7804_v30, %v7711_v51 }
  0xb3   : > { %6405 = vrot.lane.b32.xlu1 %v6404_v13, %s7475_s21  ;;  %6400 = vrot.lane.b32.xlu2 %v6399_v14, %s7475_s21  ;;  %v6439_v9 = vpack.i.bf16 %v611_v36, %v610_v35  ;;  %v604_v13 = vmul.f32 %v7765_v4, %v7836_v12  ;;  %v620_v14 = vmul.f32 %v7804_v30, %v7696_v47 }
  0xb4   : > { %6395 = vrot.lane.b32.xlu0 %v6394_v15, %s7475_s21  ;;  %v621_v15 = vmul.f32 %v7807_v31, %v7699_v48 }
  0xb6   : > { %v7784_v16 = vpop.permute.xlu1 %833 }
  0xb7   : > { %v875_v19 = vmul.f32 %v7784_v16, %v7763_v1  ;;  %v855_v20 = vmul.f32 %v7784_v16, %v556_v3  ;;  %v865_v25 = vmul.f32 %v7784_v16, %v566_v2  ;;  %v7830_v3 = vmul.f32 %v7786_v17, %v566_v2 }
  0xb8   : > { %v617_v2 = vmul.f32 %v598_v11, %v7691_v46  ;;  %v7877_v36 = vsel %vm841_vm2, %v7784_v16, %v7767_v5  ;;  %v860_v37 = vmul.f32 %v7784_v16, %v7814_v34 }
  0xb9   : > { %v861_v38 = vmul.f32 %v7877_v36, %v7703_v49 }
  0xbe   : > { %v7788_v18 = vpop.permute.xlu1 %839 }
  0xbf   : > { %v874_v22 = vmul.f32 %v7788_v18, %v7668_v40  ;;  %v854_v23 = vmul.f32 %v7788_v18, %v7676_v42  ;;  %v864_v24 = vmul.f32 %v7788_v18, %v7672_v41  ;;  %v7827_v42 = vmul.f32 %v7800_v26, %v7672_v41 }
  0xc0   : > { %v616_v41 = vmul.f32 %v7807_v31, %v7688_v45 }
  0xc1   : > { %v6419_v27 = vpack.i.bf16 %v875_v19, %v874_v22  ;;  %v6409_v28 = vpack.i.bf16 %v855_v20, %v854_v23  ;;  %v6414_v29 = vpack.i.bf16 %v865_v25, %v864_v24  ;;  %v6579_v7 = vpack.i.bf16 %v7830_v3, %v7827_v42 }
  0xc2   : > { %v7854_v19 = vmul.f32 %v7800_v26, %v7668_v40  ;;  %v7858_v20 = vmul.f32 %v7786_v17, %v7763_v1  ;;  %v6454_v21 = vpack.i.bf16 %v617_v2, %v616_v41  ;;  %v6429_v22 = vpack.i.bf16 %v605_v0, %v604_v13  ;;  %v838_v2 = vpop.permute.xlu0 %837 }
  0xc3   : > { %6420 = vrot.lane.b32.xlu2 %v6419_v27, %s7476_s18  ;;  %6410 = vrot.lane.b32.xlu1 %v6409_v28, %s7476_s18  ;;  %v6459_v24 = vpack.i.bf16 %v621_v15, %v620_v14  ;;  %v622_v25 = vmul.f32 %v598_v11, %v7708_v50  ;;  %v623_v40 = vmul.f32 %v7772_v8, %v7716_v52 }
  0xc4   : > { %6415 = vrot.lane.b32.xlu0 %v6414_v29, %s7476_s18  ;;  %v6604_v23 = vpack.i.bf16 %v7858_v20, %v7854_v19  ;;  %v606_v1 = vmul.f32 %v7807_v31, %v7728_v55  ;;  %v607_v27 = vmul.f32 %v598_v11, %v7731_v56  ;;  %v626_v28 = vmul.f32 %v7807_v31, %v7720_v53 }
  0xc5   : > { %v627_v29 = vmul.f32 %v598_v11, %v7723_v54  ;;  %v6464_v32 = vpack.i.bf16 %v623_v40, %v622_v25  ;;  %v633_v41 = vmul.f32 %v7772_v8, %v7739_v58  ;;  %v6509_v13 = vpack.i.bf16 %v861_v38, %v860_v37 }
  0xc6   : > { %v6434_v33 = vpack.i.bf16 %v607_v27, %v606_v1  ;;  %v7894_v14 = vsel %vm841_vm2, %v7767_v5, %v838_v2  ;;  %v859_v37 = vmul.f32 %v7788_v18, %v7747_v60 }
  0xc7   : > { %v6474_v35 = vpack.i.bf16 %v627_v29, %v626_v28  ;;  %v867_v5 = vmul.f32 %v7894_v14, %v7699_v48  ;;  %v852_v25 = vmul.f32 %v7894_v14, %v7728_v55 }
  0xcb   : > { %6425 = vrot.lane.b32.xlu2 %v6424_v6, %s7477_s19  ;;  %6440 = vrot.lane.b32.xlu1 %v6439_v9, %s7475_s21  ;;  %v612_v6 = vmul.f32 %v598_v11, %v7744_v59  ;;  %v613_v9 = vmul.f32 %v7772_v8, %v7747_v60  ;;  %v866_v8 = vmul.f32 %v7877_v36, %v7696_v47 }
  0xcc   : > { %6450 = vrot.lane.b32.xlu0 %v6449_v10, %s7475_s21  ;;  %v632_v10 = vmul.f32 %v598_v11, %v7736_v57  ;;  %v7902_v11 = vsel %vm841_vm2, %v838_v2, %v7788_v18 }
  0xcd   : > { %v6444_v0 = vpack.i.bf16 %v613_v9, %v612_v6  ;;  %v853_v40 = vmul.f32 %v7902_v11, %v7731_v56  ;;  %v6519_v1 = vpack.i.bf16 %v867_v5, %v866_v8  ;;  %v873_v29 = vmul.f32 %v7902_v11, %v7723_v54 }
  0xce   : > { %v6484_v15 = vpack.i.bf16 %v633_v41, %v632_v10  ;;  %v850_v10 = vmul.f32 %v7784_v16, %v7836_v12  ;;  %v851_v41 = vmul.f32 %v7877_v36, %v7711_v51 }
  0xcf   : > { %v6494_v28 = vpack.i.bf16 %v853_v40, %v852_v25 }
  0xd0   : > { %v6489_v5 = vpack.i.bf16 %v851_v41, %v850_v10 }
  0xd3   : > { %6455 = vrot.lane.b32.xlu1 %v6454_v21, %s7475_s21  ;;  %6430 = vrot.lane.b32.xlu2 %v6429_v22, %s7475_s21  ;;  %v7896_v21 = vld [vmem:[#allocation2 + $0xc0] sm:$0xff] }
  0xd4   : > { %6460 = vrot.lane.b32.xlu0 %v6459_v24, %s7475_s21  ;;  %v624_v22 = vmul.f32 %v7765_v4, %v7896_v21  ;;  %v625_v24 = vmul.f32 %v7804_v30, %v7752_v61  ;;  %v872_v4 = vmul.f32 %v7894_v14, %v7720_v53  ;;  %v870_v2 = vmul.f32 %v7784_v16, %v7896_v21 }
  0xd6   : > { %v6469_v27 = vpack.i.bf16 %v625_v24, %v624_v22  ;;  %v6534_v38 = vpack.i.bf16 %v873_v29, %v872_v4  ;;  %v877_v4 = vmul.f32 %v7894_v14, %v7759_v63 }
  0xdb   : > { %6465 = vrot.lane.b32.xlu1 %v6464_v32, %s7475_s21  ;;  %6435 = vrot.lane.b32.xlu2 %v6434_v33, %s7475_s21  ;;  %v630_v32 = vmul.f32 %v7804_v30, %v7756_v62  ;;  %v631_v33 = vmul.f32 %v7807_v31, %v7759_v63  ;;  %v878_v30 = vmul.f32 %v7902_v11, %v7736_v57 }
  0xdc   : > { %6475 = vrot.lane.b32.xlu0 %v6474_v35, %s7475_s21  ;;  %v858_v35 = vmul.f32 %v7902_v11, %v7744_v59  ;;  %v879_v31 = vmul.f32 %v7788_v18, %v7739_v58 }
  0xdd   : > { %v6479_v6 = vpack.i.bf16 %v631_v33, %v630_v32 }
  0xde   : > { %v6504_v9 = vpack.i.bf16 %v859_v37, %v858_v35  ;;  %v6544_v8 = vpack.i.bf16 %v879_v31, %v878_v30 }
  0xe3   : > { %6510 = vrot.lane.b32.xlu1 %v6509_v13, %s7476_s18  ;;  %6445 = vrot.lane.b32.xlu2 %v6444_v0, %s7475_s21  ;;  %v871_v13 = vmul.f32 %v7877_v36, %v7752_v61  ;;  %v1083_v0 = vpop.permute.xlu0 %1082 }
  0xe4   : > { %6485 = vrot.lane.b32.xlu0 %v6484_v15, %s7475_s21  ;;  %v1085_v15 = vpop.permute.xlu1 %1084  ;;  %v1089_v35 = vsel %vm1088_vm3, %v7786_v17, %v1083_v0 }
  0xe5   : > { %v7949_v22 = vsel %vm1088_vm3, %v1085_v15, %v7800_v26  ;;  %v6529_v24 = vpack.i.bf16 %v871_v13, %v870_v2  ;;  %v7954_v25 = vsel %vm1088_vm3, %v1083_v0, %v1085_v15  ;;  %v1098_v30 = vmul.f32 %v1089_v35, %v7711_v51 }
  0xe6   : > { %v1099_v16 = vmul.f32 %v7954_v25, %v7728_v55  ;;  %v1100_v40 = vmul.f32 %v7949_v22, %v7731_v56  ;;  %v1105_v37 = vmul.f32 %v7949_v22, %v7744_v59  ;;  %v869_v2 = vmul.f32 %v7788_v18, %v7716_v52 }
  0xe7   : > { %v1103_v13 = vmul.f32 %v1089_v35, %v7680_v43  ;;  %v1104_v0 = vmul.f32 %v7954_v25, %v7683_v44  ;;  %v1117_v18 = vmul.f32 %v7786_v17, %v7896_v21  ;;  %v1109_v42 = vmul.f32 %v7954_v25, %v7688_v45 }
  0xe8   : > { %v6554_v29 = vpack.i.bf16 %v1100_v40, %v1099_v16  ;;  %v1108_v16 = vmul.f32 %v1089_v35, %v7703_v49  ;;  %v1110_v3 = vmul.f32 %v7949_v22, %v7691_v46 }
  0xeb   : > { %6520 = vrot.lane.b32.xlu1 %v6519_v1, %s7476_s18  ;;  %6470 = vrot.lane.b32.xlu2 %v6469_v27, %s7475_s21  ;;  %v856_v1 = vmul.f32 %v7877_v36, %v7680_v43  ;;  %v857_v27 = vmul.f32 %v7894_v14, %v7683_v44 }
  0xec   : > { %6495 = vrot.lane.b32.xlu0 %v6494_v28, %s7476_s18  ;;  %v876_v28 = vmul.f32 %v7877_v36, %v7756_v62  ;;  %v1106_v36 = vmul.f32 %v7800_v26, %v7747_v60 }
  0xed   : > { %v6499_v32 = vpack.i.bf16 %v857_v27, %v856_v1  ;;  %v6574_v1 = vpack.i.bf16 %v1110_v3, %v1109_v42  ;;  %v1123_v27 = vmul.f32 %v1089_v35, %v7756_v62 }
  0xee   : > { %v6539_v33 = vpack.i.bf16 %v877_v4, %v876_v28  ;;  %v6564_v31 = vpack.i.bf16 %v1106_v36, %v1105_v37  ;;  %v1124_v28 = vmul.f32 %v7954_v25, %v7759_v63  ;;  %v1113_v4 = vmul.f32 %v1089_v35, %v7696_v47 }
  0xf3   : > { %6535 = vrot.lane.b32.xlu1 %v6534_v38, %s7476_s18  ;;  %6480 = vrot.lane.b32.xlu2 %v6479_v6, %s7475_s21  ;;  %v862_v38 = vmul.f32 %v7894_v14, %v7688_v45  ;;  %v863_v6 = vmul.f32 %v7902_v11, %v7691_v46  ;;  %v868_v14 = vmul.f32 %v7902_v11, %v7708_v50 }
  0xf4   : > { %6505 = vrot.lane.b32.xlu0 %v6504_v9, %s7476_s18  ;;  %v1097_v9 = vmul.f32 %v7786_v17, %v7836_v12 }
  0xf5   : > { %v6514_v10 = vpack.i.bf16 %v863_v6, %v862_v38  ;;  %v6524_v15 = vpack.i.bf16 %v869_v2, %v868_v14  ;;  %v6275_v38 = vld [vmem:[%s11729_s1 + $0x3] ss:$8 sm:$0xf]  ;;  %v1126_v14 = vmul.f32 %v7800_v26, %v7739_v58 }
  0xf6   : > { %v6549_v41 = vpack.i.bf16 %v1098_v30, %v1097_v9  ;;  %v1119_v9 = vmul.f32 %v7954_v25, %v7720_v53  ;;  %v1120_v30 = vmul.f32 %v7949_v22, %v7723_v54  ;;  %v1324_v39 = vperm.slane %v6275_v38, 1 }
  0xfb   : > { %6545 = vrot.lane.b32.xlu1 %v6544_v8, %s7476_s18  ;;  %6490 = vrot.lane.b32.xlu2 %v6489_v5, %s7476_s18  ;;  %v6559_v8 = vpack.i.bf16 %v1104_v0, %v1103_v13  ;;  %v1118_v5 = vmul.f32 %v1089_v35, %v7752_v61  ;;  %v6609_v35 = vpack.i.bf16 %v1124_v28, %v1123_v27  ;;  %v1323_v13 = vperm.slane %v6275_v38, 0 }
  0xfc   : > { %6530 = vrot.lane.b32.xlu0 %v6529_v24, %s7476_s18  ;;  %v1107_v24 = vmul.f32 %v7786_v17, %v7814_v34 }
  0xfe   : > { %v6569_v40 = vpack.i.bf16 %v1108_v16, %v1107_v24 }
 0x103   : > { %6555 = vrot.lane.b32.xlu1 %v6554_v29, %s7477_s19  ;;  %6500 = vrot.lane.b32.xlu2 %v6499_v32, %s7476_s18  ;;  %v1114_v29 = vmul.f32 %v7954_v25, %v7699_v48  ;;  %v1115_v32 = vmul.f32 %v7949_v22, %v7708_v50  ;;  %v1125_v25 = vmul.f32 %v7949_v22, %v7736_v57 }
 0x104   : > { %6540 = vrot.lane.b32.xlu0 %v6539_v33, %s7476_s18  ;;  %v1116_v33 = vmul.f32 %v7800_v26, %v7716_v52 }
 0x105   : > { %v6584_v37 = vpack.i.bf16 %v1114_v29, %v1113_v4  ;;  %v6614_v0 = vpack.i.bf16 %v1126_v14, %v1125_v25 }
 0x106   : > { %v6589_v36 = vpack.i.bf16 %v1116_v33, %v1115_v32 }
 0x10b   : > { %6565 = vrot.lane.b32.xlu1 %v6564_v31, %s7477_s19  ;;  %6515 = vrot.lane.b32.xlu2 %v6514_v10, %s7476_s18  ;;  %v6599_v31 = vpack.i.bf16 %v1120_v30, %v1119_v9 }
 0x10c   : > { %6550 = vrot.lane.b32.xlu0 %v6549_v41, %s7477_s19 }
 0x10d   : > { %v8001_v11 = vpop.permute.xlu2 %6400 }
 0x10e   : > { %11931 = vst [vmem:[#allocation5_spill] sm:$0xff] %v8001_v11 }
 0x113   : > { %6580 = vrot.lane.b32.xlu1 %v6579_v7, %s7477_s19  ;;  %6525 = vrot.lane.b32.xlu2 %v6524_v15, %s7476_s18  ;;  %v6594_v7 = vpack.i.bf16 %v1118_v5, %v1117_v18  ;;  %v1325_v15 = vperm.slane %v6275_v38, 2 }
 0x114   : > { %6560 = vrot.lane.b32.xlu0 %v6559_v8, %s7477_s19  ;;  %v1326_v8 = vperm.slane %v6275_v38, 3 }
 0x11b   : > { %6595 = vrot.lane.b32.xlu1 %v6594_v7, %s7477_s19  ;;  %6570 = vrot.lane.b32.xlu2 %v6569_v40, %s7477_s19 }
 0x11c   : > { %6575 = vrot.lane.b32.xlu0 %v6574_v1, %s7477_s19 }
 0x11d   : > { %v8018_v17 = vpop.permute.xlu2 %6420 }
 0x11e   : > { %11932 = vst [vmem:[#allocation6_spill] sm:$0xff] %v8018_v17 }
 0x123   : > { %6610 = vrot.lane.b32.xlu1 %v6609_v35, %s7477_s19  ;;  %6585 = vrot.lane.b32.xlu2 %v6584_v37, %s7477_s19 }
 0x124   : > { %6590 = vrot.lane.b32.xlu0 %v6589_v36, %s7477_s19 }
 0x125   : > { %v8046_v6 = vpop.permute.xlu2 %6425  ;;  %v8058_v10 = vpop.permute.xlu1 %6405 }
 0x126   : > { %11933 = vst [vmem:[#allocation7_spill] sm:$0xff] %v8046_v6  ;;  %v8066_v2 = vpop.permute.xlu0 %6395 }
 0x127   : > { %11934 = vst [vmem:[#allocation8_spill] sm:$0xff] %v8058_v10 }
 0x128   : > { %11935 = vst [vmem:[#allocation9_spill] sm:$0xff] %v8066_v2 }
 0x12b   : > { %6600 = vrot.lane.b32.xlu2 %v6599_v31, %s7477_s19  ;;  %1329 = vrot.lane.b32.xlu1 %v1324_v39, %s11916_s30 }
 0x12c   : > { %6605 = vrot.lane.b32.xlu0 %v6604_v23, %s7477_s19 }
 0x12d   : > { %v8060_v41 = vpop.permute.xlu2 %6430 }
 0x12e   : > { %v11747_v5 = vunpack.i.h.bf16 %v8060_v41 }
 0x133   : > { %6615 = vrot.lane.b32.xlu2 %v6614_v0, %s7477_s19 }
 0x134   : > { %1327 = vrot.lane.b32.xlu0 %v1323_v13, %s11916_s30 }
 0x135   : > { %v8070_v19 = vpop.permute.xlu1 %6410  ;;  %v8072_v20 = vpop.permute.xlu2 %6435 }
 0x136   : > { %11936 = vst [vmem:[#allocation10_spill] sm:$0xff] %v8070_v19  ;;  %v8074_v23 = vpop.permute.xlu0 %6415  ;;  %v11741_v26 = vunpack.i.l.bf16 %v8072_v20 }
 0x137   : > { %11937 = vst [vmem:[#allocation11_spill] sm:$0xff] %v8072_v20 }
 0x138   : > { %11938 = vst [vmem:[#allocation12_spill] sm:$0xff] %v8074_v23  ;;  %v8093_v3 = vsel %vm490_vm4, %v11747_v5, %v11741_v26 }
 0x139   : > { %11941 = vst [vmem:[#allocation15_spill] sm:$0xff] %v8093_v3 }
 0x13b   : > { %1331 = vrot.lane.b32.xlu2 %v1325_v15, %s11916_s30 }
 0x13c   : > { %1333 = vrot.lane.b32.xlu0 %v1326_v8, %s11916_s30 }
 0x13d   : > { %v8079_v22 = vpop.permute.xlu1 %6440  ;;  %v8081_v18 = vpop.permute.xlu2 %6445 }
 0x13e   : > { %11939 = vst [vmem:[#allocation13_spill] sm:$0xff] %v8079_v22  ;;  %v11742_v24 = vunpack.i.h.bf16 %v8079_v22  ;;  %v11748_v16 = vunpack.i.l.bf16 %v8079_v22  ;;  %v8086_v42 = vpop.permute.xlu0 %6450 }
 0x13f   : > { %11940 = vst [vmem:[#allocation14_spill] sm:$0xff] %v8081_v18  ;;  %v11749_v28 = vunpack.i.h.bf16 %v8086_v42 }
 0x140   : > { %v8100_v7 = vsel %vm490_vm4, %v11748_v16, %v11742_v24 }
 0x141   : > { %11942 = vst [vmem:[#allocation16_spill] sm:$0xff] %v8100_v7 }
 0x145   : > { %v8104_v1 = vpop.permute.xlu1 %6455  ;;  %v8106_v27 = vpop.permute.xlu2 %6470 }
 0x146   : > { %11943 = vst [vmem:[#allocation17_spill] sm:$0xff] %v8104_v1  ;;  %v11743_v4 = vunpack.i.l.bf16 %v8104_v1  ;;  %v8110_v29 = vpop.permute.xlu0 %6460  ;;  %v11751_v25 = vunpack.i.h.bf16 %v8106_v27 }
 0x147   : > { %11944 = vst [vmem:[#allocation18_spill] sm:$0xff] %v8110_v29  ;;  %v11744_v32 = vunpack.i.h.bf16 %v8110_v29  ;;  %v11750_v33 = vunpack.i.l.bf16 %v8110_v29 }
 0x148   : > { %v8119_v35 = vsel %vm490_vm4, %v11749_v28, %v11743_v4 }
 0x149   : > { %11945 = vst [vmem:[#allocation19_spill] sm:$0xff] %v8119_v35  ;;  %v8126_v37 = vsel %vm490_vm4, %v11750_v33, %v11744_v32 }
 0x14a   : > { %11946 = vst [vmem:[#allocation20_spill] sm:$0xff] %v8126_v37 }
 0x14d   : > { %v8130_v38 = vpop.permute.xlu1 %6465  ;;  %v8132_v9 = vpop.permute.xlu2 %6480 }
 0x14e   : > { %11947 = vst [vmem:[#allocation21_spill] sm:$0xff] %v8130_v38  ;;  %v8134_v30 = vpop.permute.xlu0 %6475  ;;  %v11745_v39 = vunpack.i.h.bf16 %v8132_v9  ;;  %v11752_v31 = vunpack.i.l.bf16 %v8132_v9 }
 0x14f   : > { %11948 = vst [vmem:[#allocation22_spill] sm:$0xff] %v8132_v9  ;;  %v11746_v14 = vunpack.i.l.bf16 %v8134_v30 }
 0x150   : > { %11949 = vst [vmem:[#allocation23_spill] sm:$0xff] %v8134_v30  ;;  %v8145_v13 = vsel %vm490_vm4, %v11752_v31, %v11745_v39 }
 0x151   : > { %11950 = vst [vmem:[#allocation24_spill] sm:$0xff] %v8145_v13  ;;  %v8152_v0 = vsel %vm490_vm4, %v11751_v25, %v11746_v14 }
 0x152   : > { %11951 = vst [vmem:[#allocation25_spill] sm:$0xff] %v8152_v0 }
 0x155   : > { %v8156_v8 = vpop.permute.xlu1 %6510  ;;  %v8158_v26 = vpop.permute.xlu2 %6490 }
 0x156   : > { %v8160_v24 = vpop.permute.xlu0 %6485  ;;  %v11759_v36 = vunpack.i.h.bf16 %v8158_v26 }
 0x157   : > { %11952 = vst [vmem:[#allocation26_spill] sm:$0xff] %v8160_v24 }
 0x15d   : > { %v8162_v4 = vpop.permute.xlu1 %6520  ;;  %v8164_v32 = vpop.permute.xlu2 %6500 }
 0x15e   : > { %11953 = vst [vmem:[#allocation27_spill] sm:$0xff] %v8162_v4  ;;  %v8166_v39 = vpop.permute.xlu0 %6495  ;;  %v11755_v40 = vunpack.i.h.bf16 %v8164_v32  ;;  %v11756_v14 = vunpack.i.l.bf16 %v8164_v32  ;;  %v11773_v33 = vunpack.i.h.bf16 %v8162_v4  ;;  %v11774_v25 = vunpack.i.l.bf16 %v8162_v4 }
 0x15f   : > { %11954 = vst [vmem:[#allocation28_spill] sm:$0xff] %v8164_v32  ;;  %v11758_v15 = vunpack.i.l.bf16 %v8166_v39 }
 0x160   : > { %11955 = vst [vmem:[#allocation29_spill] sm:$0xff] %v8166_v39  ;;  %v8177_v5 = vsel %vm970_vm5, %v11756_v14, %v11755_v40  ;;  %v11769_v40 = vunpack.i.h.bf16 %v8156_v8  ;;  %v8210_v28 = vsel %vm970_vm5, %v11774_v25, %v11773_v33 }
 0x161   : > { %11956 = vst [vmem:[#allocation30_spill] sm:$0xff] %v8177_v5  ;;  %v8184_v16 = vsel %vm970_vm5, %v11759_v36, %v11758_v15 }
 0x162   : > { %11957 = vst [vmem:[#allocation31_spill] sm:$0xff] %v8184_v16  ;;  %v6428_v16 = vunpack.i.h.bf16 %v8046_v6 }
 0x163   : > { %11962 = vst [vmem:[#allocation36_spill] sm:$0xff] %v8210_v28 }
 0x165   : > { %v8190_v31 = vpop.permute.xlu1 %6535  ;;  %v8192_v20 = vpop.permute.xlu2 %6515 }
 0x166   : > { %11958 = vst [vmem:[#allocation32_spill] sm:$0xff] %v8190_v31  ;;  %v8195_v14 = vpop.permute.xlu0 %6505  ;;  %v11768_v18 = vunpack.i.l.bf16 %v8192_v20 }
 0x167   : > { %11959 = vst [vmem:[#allocation33_spill] sm:$0xff] %v8192_v20 }
 0x168   : > { %11960 = vst [vmem:[#allocation34_spill] sm:$0xff] %v8195_v14  ;;  %v8203_v15 = vsel %vm970_vm5, %v11769_v40, %v11768_v18  ;;  %v11784_v14 = vunpack.i.l.bf16 %v8190_v31 }
 0x169   : > { %11961 = vst [vmem:[#allocation35_spill] sm:$0xff] %v8203_v15 }
 0x16d   : > { %v8214_v1 = vpop.permute.xlu1 %6545  ;;  %v8216_v38 = vpop.permute.xlu2 %6525 }
 0x16e   : > { %11963 = vst [vmem:[#allocation37_spill] sm:$0xff] %v8214_v1  ;;  %v6531_v30 = vpop.permute.xlu0 %6530 }
 0x16f   : > { %11964 = vst [vmem:[#allocation38_spill] sm:$0xff] %v8216_v38  ;;  %v6533_v24 = vunpack.i.h.bf16 %v6531_v30 }
 0x171   : > { %v8228_v36 = vsel %vm970_vm5, %v6533_v24, %v11784_v14 }
 0x172   : > { %11967 = vst [vmem:[#allocation41_spill] sm:$0xff] %v8228_v36 }
 0x175   : > { %v8218_v39 = vpop.permute.xlu1 %6555  ;;  %v6571_v18 = vpop.permute.xlu2 %6570 }
 0x176   : > { %11965 = vst [vmem:[#allocation39_spill] sm:$0xff] %v8218_v39  ;;  %v8220_v40 = vpop.permute.xlu0 %6540  ;;  %v6573_v35 = vunpack.i.h.bf16 %v6571_v18  ;;  %v6572_v37 = vunpack.i.l.bf16 %v6571_v18  ;;  %v11797_v13 = vunpack.i.l.bf16 %v8218_v39 }
 0x177   : > { %11966 = vst [vmem:[#allocation40_spill] sm:$0xff] %v8220_v40  ;;  %v11786_v20 = vunpack.i.h.bf16 %v8220_v40  ;;  %v6542_v33 = vunpack.i.l.bf16 %v8220_v40 }
 0x178   : > { %v1226_v18 = vsel %vm1217_vm6, %v6572_v37, %v6573_v35  ;;  %v6532_v37 = vunpack.i.l.bf16 %v6531_v30 }
 0x179   : > { %v8233_v25 = vsel %vm970_vm5, %v6542_v33, %v11786_v20 }
 0x17a   : > { %11968 = vst [vmem:[#allocation42_spill] sm:$0xff] %v8233_v25  ;;  %v987_v30 = vsel %vm970_vm5, %v6532_v37, %v6533_v24  ;;  %v6413_v24 = vunpack.i.h.bf16 %v8070_v19 }
 0x17d   : > { %v8237_v1 = vpop.permute.xlu1 %6565  ;;  %v8239_v7 = vpop.permute.xlu2 %6585 }
 0x17e   : > { %11969 = vst [vmem:[#allocation43_spill] sm:$0xff] %v8237_v1  ;;  %v6551_v3 = vpop.permute.xlu0 %6550  ;;  %v6587_v14 = vunpack.i.l.bf16 %v8239_v7 }
 0x17f   : > { %11970 = vst [vmem:[#allocation44_spill] sm:$0xff] %v8239_v7  ;;  %v6553_v0 = vunpack.i.h.bf16 %v6551_v3  ;;  %v6552_v5 = vunpack.i.l.bf16 %v6551_v3 }
 0x185   : > { %v8241_v31 = vpop.permute.xlu1 %6580  ;;  %v8253_v28 = vpop.permute.xlu2 %6600 }
 0x186   : > { %11971 = vst [vmem:[#allocation45_spill] sm:$0xff] %v8241_v31  ;;  %v6583_v40 = vunpack.i.h.bf16 %v8241_v31  ;;  %v8245_v20 = vpop.permute.xlu0 %6560  ;;  %v8258_v31 = vsel %vm1217_vm6, %v6553_v0, %v11797_v13  ;;  %v11804_v37 = vunpack.i.l.bf16 %v8253_v28 }
 0x187   : > { %11972 = vst [vmem:[#allocation46_spill] sm:$0xff] %v8245_v20  ;;  %v11801_v38 = vunpack.i.h.bf16 %v8245_v20  ;;  %v6562_v1 = vunpack.i.l.bf16 %v8245_v20 }
 0x188   : > { %v1230_v15 = vsel %vm1217_vm6, %v6583_v40, %v6587_v14  ;;  %11973 = vst [vmem:[#allocation47_spill] sm:$0xff] %v8253_v28  ;;  %v6423_v40 = vunpack.i.h.bf16 %v8018_v17 }
 0x189   : > { %v2809_v36 = vpack.c.bf16 %v1230_v15, %v1226_v18  ;;  %11974 = vst [vmem:[#allocation48_spill] sm:$0xff] %v8258_v31  ;;  %v8263_v25 = vsel %vm1217_vm6, %v6562_v1, %v11801_v38  ;;  %v1222_v6 = vsel %vm1217_vm6, %v6428_v16, %v6562_v1  ;;  %v1218_v15 = vsel %vm1217_vm6, %v6552_v5, %v6553_v0 }
 0x18a   : > { %11975 = vst [vmem:[#allocation49_spill] sm:$0xff] %v8263_v25  ;;  %v11803_v18 = vunpack.i.h.bf16 %v8239_v7  ;;  %v2805_v39 = vpack.c.bf16 %v1222_v6, %v1218_v15  ;;  %v991_v38 = vsel %vm970_vm5, %v6423_v40, %v6542_v33  ;;  %v6418_v1 = vunpack.i.h.bf16 %v8074_v23  ;;  %v8645_v7 = vld [vmem:[#allocation2 + $0x110] sm:$0xff] }
 0x18b   : > { %2922 = vmatpush.bf16.msra.mxu0 %v2809_v36  ;;  %v6512_v36 = vunpack.i.l.bf16 %v8156_v8  ;;  %v2801_v3 = vpack.c.bf16 %v991_v38, %v987_v30  ;;  %v11979_v33 = vunpack.i.l.bf16 %v8162_v4  ;;  %v6408_v40 = vunpack.i.h.bf16 %v8058_v10  ;;  %v8593_v4 = vld [vmem:[#allocation2 + $0xa8] sm:$0xff] }
 0x18c   : > { %v8288_v6 = vsel %vm1217_vm6, %v6587_v14, %v11803_v18  ;;  %v11981_v14 = vunpack.i.h.bf16 %v8156_v8  ;;  %v6472_v8 = vunpack.i.l.bf16 %v8106_v27 }
 0x18d   : > { %v8271_v13 = vpop.permute.xlu1 %6595  ;;  %11978 = vst [vmem:[#allocation52_spill] sm:$0xff] %v8288_v6  ;;  %v8296_v38 = vpop.permute.xlu2 %6615 }
 0x18e   : > { %v8273_v20 = vpop.permute.xlu0 %6575  ;;  %11980 = vst [vmem:[#allocation53_spill] sm:$0xff] %v8296_v38  ;;  %v979_v15 = vsel %vm970_vm5, %v6512_v36, %v11981_v14  ;;  %v11984_v36 = vunpack.i.h.bf16 %v8158_v26 }
 0x18f   : > { %11976 = vst [vmem:[#allocation50_spill] sm:$0xff] %v8273_v20  ;;  %v11802_v16 = vunpack.i.l.bf16 %v8273_v20  ;;  %2923 = vmatpush.bf16.msra.mxu0 %v2805_v39  ;;  %v983_v39 = vsel %vm970_vm5, %v6418_v1, %v11979_v33  ;;  %v11807_v33 = vunpack.i.l.bf16 %v8296_v38  ;;  %v8577_v38 = vld [vmem:[#allocation2 + $0x78] sm:$0xff]  ;;  %v8650_v20 = vld [vmem:[#allocation2 + $0x108] sm:$0xff] }
 0x190   : > { %v2797_v1 = vpack.c.bf16 %v983_v39, %v979_v15  ;;  %v11985_v39 = vunpack.i.h.bf16 %v8253_v28  ;;  %12015 = vst [vmem:[#allocation78_spill] sm:$0xff] %v8650_v20 }
 0x191   : > { %v8283_v5 = vsel %vm1217_vm6, %v6573_v35, %v11802_v16  ;;  %v6492_v35 = vunpack.i.l.bf16 %v8158_v26  ;;  %v6398_v26 = vunpack.i.h.bf16 %v8066_v2 }
 0x192   : > { %11977 = vst [vmem:[#allocation51_spill] sm:$0xff] %v8283_v5  ;;  %v8323_v15 = vsel %vm1217_vm6, %v11804_v37, %v11985_v39  ;;  %v6452_v39 = vunpack.i.l.bf16 %v8086_v42  ;;  %v11989_v37 = vunpack.i.h.bf16 %v8106_v27  ;;  %v11993_v27 = vunpack.i.l.bf16 %v8079_v22 }
 0x193   : > { %2924 = vmatpush.bf16.msra.mxu0 %v2801_v3  ;;  %v11983_v3 = vunpack.i.l.bf16 %v8164_v32  ;;  %v971_v14 = vsel %vm970_vm5, %v6492_v35, %v11984_v36  ;;  %11986 = vst [vmem:[#allocation55_spill] sm:$0xff] %v8323_v15  ;;  %v11988_v35 = vunpack.i.l.bf16 %v8132_v9  ;;  %v6403_v36 = vunpack.i.h.bf16 %v8001_v11  ;;  %v8570_v9 = vld [vmem:[#allocation2 + $0x70] sm:$0xff]  ;;  %v8575_v32 = vld [vmem:[#allocation2 + $0x58] sm:$0xff]  ;;  %v8596_v15 = vld [vmem:[#allocation2 + $0x88] sm:$0xff] }
 0x194   : > { %v740_v10 = vsel %vm490_vm4, %v6472_v8, %v11989_v37  ;;  %v11994_v8 = vunpack.i.h.bf16 %v8060_v41 }
 0x195   : > { %v8304_v30 = vpop.permute.xlu1 %6610  ;;  %v975_v0 = vsel %vm970_vm5, %v6413_v24, %v11983_v3  ;;  %v744_v3 = vsel %vm490_vm4, %v6408_v40, %v11988_v35  ;;  %v6432_v40 = vunpack.i.l.bf16 %v8060_v41  ;;  %v8368_v41 = vld [vmem:[#allocation2 + $0x20] sm:$0xff] }
 0x196   : > { %v11808_v16 = vunpack.i.h.bf16 %v8304_v30  ;;  %v8308_v18 = vpop.permute.xlu0 %6590  ;;  %v2789_v19 = vpack.c.bf16 %v744_v3, %v740_v10  ;;  %v728_v10 = vsel %vm490_vm4, %v6398_v26, %v11993_v27 }
 0x197   : > { %11982 = vst [vmem:[#allocation54_spill] sm:$0xff] %v8308_v18  ;;  %2925 = vmatpush.bf16.msra.mxu0 %v2797_v1  ;;  %v2793_v1 = vpack.c.bf16 %v975_v0, %v971_v14  ;;  %v11991_v0 = vunpack.i.l.bf16 %v8110_v29  ;;  %v8568_v29 = vld [vmem:[#allocation2 + $0x68] sm:$0xff] }
 0x198   : > { %v8330_v24 = vsel %vm1217_vm6, %v11808_v16, %v11807_v33 }
 0x199   : > { %11987 = vst [vmem:[#allocation56_spill] sm:$0xff] %v8330_v24  ;;  %v736_v14 = vsel %vm490_vm4, %v6403_v36, %v11991_v0  ;;  %v8598_v24 = vld [vmem:[#allocation2 + $0xb0] sm:$0xff] }
 0x19b   : > { %2926 = vmatpush.bf16.msra.mxu0 %v2793_v1  ;;  %v11992_v1 = vunpack.i.h.bf16 %v8086_v42 }
 0x19d   : > { %v732_v35 = vsel %vm490_vm4, %v6452_v39, %v11992_v1  ;;  %v1330_v37 = vpop.permute.xlu1 %1329  ;;  %v1332_v39 = vpop.permute.xlu2 %1331 }
 0x19e   : > { %v8342_v33 = vpop.permute.xlu0 %6605  ;;  %v2785_v16 = vpack.c.bf16 %v736_v14, %v732_v35 }
 0x19f   : > { %11990 = vst [vmem:[#allocation57_spill] sm:$0xff] %v8342_v33  ;;  %2927 = vmatpush.bf16.msra.mxu0 %v2789_v19  ;;  %v724_v19 = vsel %vm490_vm4, %v6432_v40, %v11994_v8  ;;  %v1295_v40 = vld [vmem:[#allocation2 + $0x30] sm:$0xff] }
 0x1a0   : > { %v2781_v3 = vpack.c.bf16 %v728_v10, %v724_v19 }
 0x1a3   : > { %2928 = vmatpush.bf16.msra.mxu0 %v2785_v16  ;;  %v8365_v16 = vsel %vm1335_vm7, %v1330_v37, %v1332_v39 }
 0x1a6   : > { %v1328_v36 = vpop.permute.xlu0 %1327 }
 0x1a7   : > { %2929 = vmatpush.bf16.msra.mxu0 %v2781_v3  ;;  %v8359_v0 = vsel %vm1335_vm7, %v1328_v36, %v1330_v37  ;;  %v1344_v42 = vmul.f32 %v1328_v36, %v7836_v12  ;;  %v1351_v12 = vmul.f32 %v8365_v16, %v7683_v44  ;;  %v1346_v37 = vmul.f32 %v8365_v16, %v7728_v55 }
 0x1a8   : > { %v1345_v14 = vmul.f32 %v8359_v0, %v7711_v51  ;;  %v1350_v35 = vmul.f32 %v8359_v0, %v7680_v43  ;;  %v1349_v51 = vmul.f32 %v1328_v36, %v1295_v40  ;;  %v1354_v43 = vmul.f32 %v1328_v36, %v7814_v34 }
 0x1a9   : > { %v1355_v44 = vmul.f32 %v8359_v0, %v7703_v49  ;;  %v1361_v49 = vmul.f32 %v8365_v16, %v7699_v48  ;;  %v1315_v48 = vld [vmem:[#allocation2 + $0xf0] sm:$0xff] }
 0x1aa   : > { %v6619_v26 = vpack.i.bf16 %v1345_v14, %v1344_v42  ;;  %v6634_v3 = vpack.i.bf16 %v1351_v12, %v1350_v35  ;;  %v1356_v14 = vmul.f32 %v8365_v16, %v7688_v45  ;;  %v8391_v12 = vld [vmem:[#allocation2 + $0x80] sm:$0xff] }
 0x1ac   : > { %6620 = vrot.lane.b32.xlu1 %v6619_v26, %s11914_s13  ;;  %v6644_v26 = vpack.i.bf16 %v1355_v44, %v1354_v43  ;;  %v1369_v43 = vmul.f32 %v1328_v36, %v1315_v48 }
 0x1ae   : > { %v1334_v1 = vpop.permute.xlu0 %1333 }
 0x1af   : > { %v1348_v27 = vmul.f32 %v1334_v1, %v8368_v41  ;;  %v1338_v10 = vsel %vm1335_vm7, %v1332_v39, %v1334_v1  ;;  %v1358_v34 = vmul.f32 %v1334_v1, %v8391_v12 }
 0x1b0   : > { %v1347_v8 = vmul.f32 %v1338_v10, %v7731_v56  ;;  %v1357_v39 = vmul.f32 %v1338_v10, %v7691_v46  ;;  %v1352_v55 = vmul.f32 %v1338_v10, %v7744_v59  ;;  %v1353_v56 = vmul.f32 %v1334_v1, %v7747_v60  ;;  %v1305_v59 = vld [vmem:[#allocation2 + $0x90] sm:$0xff] }
 0x1b1   : > { %v6629_v19 = vpack.i.bf16 %v1349_v51, %v1348_v27  ;;  %v1360_v46 = vmul.f32 %v8359_v0, %v7696_v47  ;;  %v1362_v45 = vmul.f32 %v1338_v10, %v7708_v50  ;;  %v1363_v60 = vmul.f32 %v1334_v1, %v7716_v52 }
 0x1b2   : > { %v6624_v42 = vpack.i.bf16 %v1347_v8, %v1346_v37  ;;  %v6649_v40 = vpack.i.bf16 %v1357_v39, %v1356_v14  ;;  %v6639_v35 = vpack.i.bf16 %v1353_v56, %v1352_v55  ;;  %v1359_v27 = vmul.f32 %v1328_v36, %v1305_v59 }
 0x1b3   : > { %6630 = vrot.lane.b32.xlu0 %v6629_v19, %s11914_s13  ;;  %v6659_v51 = vpack.i.bf16 %v1361_v49, %v1360_v46  ;;  %v6664_v37 = vpack.i.bf16 %v1363_v60, %v1362_v45  ;;  %v8403_v19 = vld [vmem:[#allocation2 + $0xe0] sm:$0xff]  ;;  %v1367_v47 = vmul.f32 %v1338_v10, %v7723_v54  ;;  %v1364_v52 = vmul.f32 %v1328_v36, %v7896_v21 }
 0x1b4   : > { %6635 = vrot.lane.b32.xlu1 %v6634_v3, %s11914_s13  ;;  %6625 = vrot.lane.b32.xlu2 %v6624_v42, %s11914_s13  ;;  %v6654_v8 = vpack.i.bf16 %v1359_v27, %v1358_v34  ;;  %v1368_v50 = vmul.f32 %v1334_v1, %v8403_v19  ;;  %v1365_v3 = vmul.f32 %v8359_v0, %v7752_v61  ;;  %v6276_v61 = vld [vmem:[%s11729_s1 + $0x5] ss:$8 sm:$0xf] }
 0x1b5   : > { %v1366_v42 = vmul.f32 %v8365_v16, %v7720_v53  ;;  %v1372_v54 = vmul.f32 %v1338_v10, %v7736_v57  ;;  %v1373_v21 = vmul.f32 %v1334_v1, %v7739_v58  ;;  %v1370_v53 = vmul.f32 %v8359_v0, %v7756_v62 }
 0x1b6   : > { %v6679_v39 = vpack.i.bf16 %v1369_v43, %v1368_v50  ;;  %v6669_v55 = vpack.i.bf16 %v1365_v3, %v1364_v52  ;;  %v1371_v36 = vmul.f32 %v8365_v16, %v7759_v63  ;;  %v1618_v56 = vperm.slane %v6276_v61, 0 }
 0x1b7   : > { %v6674_v44 = vpack.i.bf16 %v1367_v47, %v1366_v42  ;;  %v6689_v14 = vpack.i.bf16 %v1373_v21, %v1372_v54  ;;  %v1620_v57 = vperm.slane %v6276_v61, 2  ;;  %v1621_v58 = vperm.slane %v6276_v61, 3 }
 0x1b8   : > { %v1619_v1 = vperm.slane %v6276_v61, 1  ;;  %v8500_v61 = vld [vmem:[#allocation2 + $0x8] sm:$0xff] }
 0x1bb   : > { %6645 = vrot.lane.b32.xlu0 %v6644_v26, %s11914_s13  ;;  %v6684_v26 = vpack.i.bf16 %v1371_v36, %v1370_v53  ;;  %v8504_v36 = vld [vmem:[#allocation2 + $0x10] sm:$0xff] }
 0x1bc   : > { %6650 = vrot.lane.b32.xlu1 %v6649_v40, %s11914_s13  ;;  %6640 = vrot.lane.b32.xlu2 %v6639_v35, %s11914_s13 }
 0x1c3   : > { %6660 = vrot.lane.b32.xlu0 %v6659_v51, %s11914_s13 }
 0x1c4   : > { %6665 = vrot.lane.b32.xlu1 %v6664_v37, %s11914_s13  ;;  %6655 = vrot.lane.b32.xlu2 %v6654_v8, %s11914_s13 }
 0x1cb   : > { %6675 = vrot.lane.b32.xlu0 %v6674_v44, %s11914_s13  ;;  %v8534_v44 = vld [vmem:[#allocation2 + $0x38] sm:$0xff] }
 0x1cc   : > { %6680 = vrot.lane.b32.xlu1 %v6679_v39, %s11914_s13  ;;  %6670 = vrot.lane.b32.xlu2 %v6669_v55, %s11914_s13  ;;  %12010 = vst [vmem:[#allocation73_spill] sm:$0xff] %v8534_v44 }
 0x1d3   : > { %6690 = vrot.lane.b32.xlu0 %v6689_v14, %s11914_s13 }
 0x1d4   : > { %1622 = vrot.lane.b32.xlu1 %v1618_v56, %s11914_s13  ;;  %6685 = vrot.lane.b32.xlu2 %v6684_v26, %s11914_s13 }
 0x1db   : > { %1626 = vrot.lane.b32.xlu0 %v1620_v57, %s11914_s13 }
 0x1dc   : > { %1628 = vrot.lane.b32.xlu1 %v1621_v58, %s11914_s13  ;;  %1624 = vrot.lane.b32.xlu2 %v1619_v1, %s11914_s13  ;;  %s12238_s13 = smov 1  }
 0x20e   : > { %v8432_v62 = vpop.permute.xlu2 %6625 }
 0x20f   : > { %11995 = vst [vmem:[#allocation58_spill] sm:$0xff] %v8432_v62  ;;  %v11810_v16 = vunpack.i.h.bf16 %v8432_v62  ;;  %v11813_v10 = vunpack.i.l.bf16 %v8432_v62 }
 0x211   : > { %v8453_v45 = vsel %vm1464_vm8, %v11813_v10, %v11810_v16  ;;  %v8536_v10 = vld [vmem:[#allocation2 + $0x40] sm:$0xff] }
 0x212   : > { %11999 = vst [vmem:[#allocation62_spill] sm:$0xff] %v8453_v45  ;;  %v8604_v45 = vld [vmem:[#allocation2 + $0xa0] sm:$0xff] }
 0x216   : > { %v8434_v63 = vpop.permute.xlu2 %6640 }
 0x217   : > { %11996 = vst [vmem:[#allocation59_spill] sm:$0xff] %v8434_v63  ;;  %v11809_v46 = vunpack.i.l.bf16 %v8434_v63  ;;  %v8600_v63 = vld [vmem:[#allocation2 + $0xb8] sm:$0xff] }
 0x21e   : > { %v8436_v0 = vpop.permute.xlu1 %6620  ;;  %v8446_v59 = vpop.permute.xlu2 %6655 }
 0x21f   : > { %11998 = vst [vmem:[#allocation61_spill] sm:$0xff] %v8446_v59 }
 0x225   : > { %v8440_v40 = vpop.permute.xlu0 %6630 }
 0x226   : > { %11997 = vst [vmem:[#allocation60_spill] sm:$0xff] %v8440_v40  ;;  %v8442_v35 = vpop.permute.xlu1 %6635  ;;  %v8468_v37 = vpop.permute.xlu2 %6670 }
 0x227   : > { %v11815_v49 = vunpack.i.h.bf16 %v8442_v35 }
 0x229   : > { %v8460_v60 = vsel %vm1464_vm8, %v11815_v49, %v11809_v46  ;;  %v8545_v49 = vld [vmem:[#allocation2 + $0x48] sm:$0xff] }
 0x22a   : > { %12000 = vst [vmem:[#allocation63_spill] sm:$0xff] %v8460_v60 }
 0x22d   : > { %v8464_v27 = vpop.permute.xlu0 %6645 }
 0x22e   : > { %v8466_v51 = vpop.permute.xlu1 %6650  ;;  %v8494_v39 = vpop.permute.xlu2 %6685 }
 0x22f   : > { %12001 = vst [vmem:[#allocation64_spill] sm:$0xff] %v8466_v51  ;;  %v11811_v8 = vunpack.i.h.bf16 %v8466_v51  ;;  %v11816_v47 = vunpack.i.l.bf16 %v8466_v51  ;;  %v11819_v46 = vunpack.i.h.bf16 %v8494_v39 }
 0x231   : > { %v8483_v42 = vsel %vm1464_vm8, %v11816_v47, %v11811_v8 }
 0x232   : > { %12003 = vst [vmem:[#allocation66_spill] sm:$0xff] %v8483_v42  ;;  %v8620_v42 = vld [vmem:[#allocation2 + $0xd8] sm:$0xff] }
 0x235   : > { %v8472_v48 = vpop.permute.xlu0 %6660 }
 0x236   : > { %v11817_v50 = vunpack.i.h.bf16 %v8472_v48  ;;  %v8475_v52 = vpop.permute.xlu1 %6665  ;;  %v1625_v21 = vpop.permute.xlu2 %1624 }
 0x237   : > { %12002 = vst [vmem:[#allocation65_spill] sm:$0xff] %v8475_v52  ;;  %v11812_v3 = vunpack.i.l.bf16 %v8475_v52  ;;  %v8625_v52 = vld [vmem:[#allocation2 + $0xd0] sm:$0xff] }
 0x239   : > { %v8490_v43 = vsel %vm1464_vm8, %v11817_v50, %v11812_v3 }
 0x23a   : > { %12004 = vst [vmem:[#allocation67_spill] sm:$0xff] %v8490_v43  ;;  %v8623_v43 = vld [vmem:[#allocation2 + $0xc8] sm:$0xff] }
 0x23b   : > { %12012 = vst [vmem:[#allocation75_spill] sm:$0xff] %v8623_v43 }
 0x23d   : > { %v8496_v55 = vpop.permute.xlu0 %6675 }
 0x23e   : > { %12005 = vst [vmem:[#allocation68_spill] sm:$0xff] %v8496_v55  ;;  %v8498_v54 = vpop.permute.xlu1 %6680  ;;  %v11814_v56 = vunpack.i.h.bf16 %v8496_v55  ;;  %v11820_v14 = vunpack.i.l.bf16 %v8496_v55 }
 0x23f   : > { %12006 = vst [vmem:[#allocation69_spill] sm:$0xff] %v8498_v54 }
 0x240   : > { %v8525_v34 = vsel %vm1464_vm8, %v11820_v14, %v11814_v56  ;;  %v8543_v56 = vld [vmem:[#allocation2 + $0x18] sm:$0xff] }
 0x241   : > { %12008 = vst [vmem:[#allocation71_spill] sm:$0xff] %v8525_v34  ;;  %v8627_v34 = vld [vmem:[#allocation2 + $0xe8] sm:$0xff] }
 0x242   : > { %12013 = vst [vmem:[#allocation76_spill] sm:$0xff] %v8627_v34 }
 0x245   : > { %v8502_v53 = vpop.permute.xlu0 %6690 }
 0x246   : > { %12007 = vst [vmem:[#allocation70_spill] sm:$0xff] %v8502_v53  ;;  %v11818_v26 = vunpack.i.l.bf16 %v8502_v53  ;;  %v8509_v57 = vpop.permute.xlu1 %1622  ;;  %v8647_v53 = vld [vmem:[#allocation2 + $0x118] sm:$0xff] }
 0x247   : > { %v8513_v58 = vsel %vm1464_vm8, %v8509_v57, %v1625_v21  ;;  %v1638_v1 = vmul.f32 %v8509_v57, %v8500_v61 }
 0x248   : > { %v1639_v16 = vmul.f32 %v8513_v58, %v8504_v36  ;;  %v8532_v3 = vsel %vm1464_vm8, %v11819_v46, %v11818_v26  ;;  %v1643_v46 = vmul.f32 %v8509_v57, %v8534_v44 }
 0x249   : > { %12009 = vst [vmem:[#allocation72_spill] sm:$0xff] %v8532_v3 }
 0x24a   : > { %v6694_v8 = vpack.i.bf16 %v1639_v16, %v1638_v1  ;;  %v8541_v1 = vld [vmem:[#allocation2 + $0x28] sm:$0xff]  ;;  %v1644_v16 = vmul.f32 %v8513_v58, %v8536_v10 }
 0x24b   : > { %12011 = vst [vmem:[#allocation74_spill] sm:$0xff] %v8541_v1 }
 0x24c   : > { %6695 = vrot.lane.b32.xlu2 %v6694_v8, %s11916_s30 }
 0x24d   : > { %v1627_v47 = vpop.permute.xlu0 %1626 }
 0x24e   : > { %v8548_v50 = vsel %vm1464_vm8, %v1625_v21, %v1627_v47  ;;  %v8550_v26 = vpop.permute.xlu1 %1628 }
 0x24f   : > { %v1642_v8 = vmul.f32 %v8550_v26, %v8541_v1  ;;  %v8560_v14 = vsel %vm1464_vm8, %v1627_v47, %v8550_v26  ;;  %v1640_v2 = vmul.f32 %v8548_v50, %v8543_v56  ;;  %v1645_v21 = vmul.f32 %v8548_v50, %v8545_v49  ;;  %v8573_v47 = vld [vmem:[#allocation2 + $0x50] sm:$0xff] }
 0x250   : > { %v1641_v11 = vmul.f32 %v8560_v14, %v8368_v41  ;;  %v1660_v3 = vmul.f32 %v8548_v50, %v8620_v42  ;;  %v1666_v18 = vmul.f32 %v8560_v14, %v8645_v7 }
 0x251   : > { %v6704_v23 = vpack.i.bf16 %v1643_v46, %v1642_v8  ;;  %v6709_v17 = vpack.i.bf16 %v1645_v21, %v1644_v16  ;;  %v1648_v46 = vmul.f32 %v8509_v57, %v8568_v29  ;;  %v1650_v16 = vmul.f32 %v8548_v50, %v8577_v38 }
 0x252   : > { %v6699_v22 = vpack.i.bf16 %v1641_v11, %v1640_v2  ;;  %v1649_v11 = vmul.f32 %v8513_v58, %v8570_v9  ;;  %v1646_v2 = vmul.f32 %v8560_v14, %v8573_v47 }
 0x253   : > { %6705 = vrot.lane.b32.xlu1 %v6704_v23, %s11916_s30  ;;  %v1647_v23 = vmul.f32 %v8550_v26, %v8575_v32 }
 0x254   : > { %6700 = vrot.lane.b32.xlu0 %v6699_v22, %s11916_s30  ;;  %6710 = vrot.lane.b32.xlu2 %v6709_v17, %s11916_s30  ;;  %v1651_v22 = vmul.f32 %v8560_v14, %v8391_v12  ;;  %v6719_v8 = vpack.i.bf16 %v1649_v11, %v1648_v46  ;;  %v1655_v46 = vmul.f32 %v8548_v50, %v8593_v4  ;;  %v8608_v11 = vld [vmem:[#allocation2 + $0x98] sm:$0xff] }
 0x255   : > { %v6714_v17 = vpack.i.bf16 %v1647_v23, %v1646_v2  ;;  %v1652_v2 = vmul.f32 %v8550_v26, %v8596_v15  ;;  %v1656_v23 = vmul.f32 %v8560_v14, %v8598_v24 }
 0x256   : > { %v6724_v21 = vpack.i.bf16 %v1651_v22, %v1650_v16  ;;  %v1657_v16 = vmul.f32 %v8550_v26, %v8600_v63  ;;  %v1654_v22 = vmul.f32 %v8513_v58, %v8604_v45 }
 0x258   : > { %v6739_v60 = vpack.i.bf16 %v1657_v16, %v1656_v23  ;;  %v1658_v23 = vmul.f32 %v8509_v57, %v8623_v43  ;;  %v1659_v16 = vmul.f32 %v8513_v58, %v8625_v52 }
 0x25b   : > { %6720 = vrot.lane.b32.xlu1 %v6719_v8, %s11916_s30  ;;  %v1653_v8 = vmul.f32 %v8509_v57, %v8608_v11 }
 0x25c   : > { %6715 = vrot.lane.b32.xlu0 %v6714_v17, %s11916_s30  ;;  %6725 = vrot.lane.b32.xlu2 %v6724_v21, %s11916_s30  ;;  %v6734_v17 = vpack.i.bf16 %v1655_v46, %v1654_v22  ;;  %v1661_v46 = vmul.f32 %v8560_v14, %v8403_v19  ;;  %v1662_v22 = vmul.f32 %v8550_v26, %v8627_v34 }
 0x25d   : > { %v6729_v21 = vpack.i.bf16 %v1653_v8, %v1652_v2  ;;  %v8635_v2 = vld [vmem:[#allocation2 + $0xf8] sm:$0xff] }
 0x25e   : > { %12014 = vst [vmem:[#allocation77_spill] sm:$0xff] %v8635_v2  ;;  %v6749_v8 = vpack.i.bf16 %v1661_v46, %v1660_v3  ;;  %v1667_v3 = vmul.f32 %v8550_v26, %v8647_v53  ;;  %v1665_v46 = vmul.f32 %v8548_v50, %v8650_v20 }
 0x263   : > { %6735 = vrot.lane.b32.xlu1 %v6734_v17, %s11916_s30  ;;  %v6744_v17 = vpack.i.bf16 %v1659_v16, %v1658_v23  ;;  %v6277_v23 = vld [vmem:[%s11729_s1 + $0x6] ss:$8 sm:$0xf] }
 0x264   : > { %6730 = vrot.lane.b32.xlu0 %v6729_v21, %s11916_s30  ;;  %6740 = vrot.lane.b32.xlu2 %v6739_v60, %s11916_s30  ;;  %v1663_v60 = vmul.f32 %v8509_v57, %v8635_v2  ;;  %v8658_v57 = vld [vmem:[#allocation2 + $0x100] sm:$0xff]  ;;  %v1865_v14 = vperm.slane %v6277_v23, 2  ;;  %v1864_v26 = vperm.slane %v6277_v23, 1 }
 0x265   : > { %12016 = vst [vmem:[#allocation79_spill] sm:$0xff] %v8658_v57  ;;  %v1664_v16 = vmul.f32 %v8513_v58, %v8658_v57  ;;  %v2838_v6 = vpack.c.bf16 %v8658_v57, %v8625_v52 }
 0x266   : > { %v6754_v21 = vpack.i.bf16 %v1663_v60, %v1662_v22  ;;  %v1863_v22 = vperm.slane %v6277_v23, 0  ;;  %v6764_v60 = vpack.i.bf16 %v1667_v3, %v1666_v18 }
 0x26b   : > { %6750 = vrot.lane.b32.xlu1 %v6749_v8, %s11916_s30  ;;  %v6759_v8 = vpack.i.bf16 %v1665_v46, %v1664_v16 }
 0x26c   : > { %6745 = vrot.lane.b32.xlu0 %v6744_v17, %s11916_s30  ;;  %6755 = vrot.lane.b32.xlu2 %v6754_v21, %s11916_s30  ;;  %v1866_v17 = vperm.slane %v6277_v23, 3 }
 0x273   : > { %6765 = vrot.lane.b32.xlu1 %v6764_v60, %s11916_s30 }
 0x274   : > { %6760 = vrot.lane.b32.xlu0 %v6759_v8, %s11916_s30  ;;  %1867 = vrot.lane.b32.xlu2 %v1863_v22, %s7477_s19  ;;  %s6271_s30 = sshll.u32 %s12251_s16, 2 }
 0x275   : > { %p477_p8 = scmp.lt.s32.totalorder %s6271_s30, 7 }
 0x277   : > { %s12256_s30 = smov (!%p477_p8, %s6271_s30), 7 }
 0x278   : > { %s6272_s23 = sshll.u32 %s12256_s30, 3 }
 0x279   : > { %s11697_s26 = scalar_lea.vmem %s11740_s12, %s6272_s23 }
 0x27b   : > { %1871 = vrot.lane.b32.xlu1 %v1865_v14, %s7477_s19 }
 0x27c   : > { %1869 = vrot.lane.b32.xlu0 %v1864_v26, %s7477_s19  ;;  %1873 = vrot.lane.b32.xlu2 %v1866_v17, %s7477_s19 }
 0x2a6   : > { %v6696_v50 = vpop.permute.xlu2 %6695 }
 0x2a7   : > { %v6698_v3 = vunpack.i.h.bf16 %v6696_v50  ;;  %v6697_v46 = vunpack.i.l.bf16 %v6696_v50 }
 0x2a9   : > { %v1758_v17 = vsel %vm1335_vm7, %v6697_v46, %v6698_v3 }
 0x2ae   : > { %v6711_v58 = vpop.permute.xlu2 %6710 }
 0x2af   : > { %v6713_v16 = vunpack.i.h.bf16 %v6711_v58  ;;  %v6712_v60 = vunpack.i.l.bf16 %v6711_v58 }
 0x2b1   : > { %v1763_v50 = vsel %vm1335_vm7, %v6712_v60, %v6713_v16 }
 0x2b6   : > { %v8673_v21 = vpop.permute.xlu2 %6725 }
 0x2be   : > { %v8675_v18 = vpop.permute.xlu2 %6740 }
 0x2c5   : > { %v8677_v22 = vpop.permute.xlu1 %6705 }
 0x2c6   : > { %12017 = vst [vmem:[#allocation80_spill] sm:$0xff] %v8677_v22  ;;  %v6708_v23 = vunpack.i.h.bf16 %v8677_v22  ;;  %v8680_v8 = vpop.permute.xlu0 %6700  ;;  %v8682_v14 = vpop.permute.xlu2 %6755  ;;  %v2837_v22 = vpack.c.bf16 %v8635_v2, %v8623_v43  ;;  %v6633_v2 = vunpack.i.h.bf16 %v8440_v40 }
 0x2c7   : > { %12018 = vst [vmem:[#allocation81_spill] sm:$0xff] %v8680_v8  ;;  %v6702_v26 = vunpack.i.l.bf16 %v8680_v8  ;;  %v11861_v46 = vunpack.i.h.bf16 %v8680_v8  ;;  %v12025_v8 = vunpack.i.l.bf16 %v8496_v55  ;;  %v6647_v55 = vunpack.i.l.bf16 %v8464_v27 }
 0x2c8   : > { %v1762_v31 = vsel %vm1335_vm7, %v6708_v23, %v6712_v60  ;;  %v6683_v23 = vunpack.i.h.bf16 %v8498_v54 }
 0x2c9   : > { %v2841_v25 = vpack.c.bf16 %v1762_v31, %v1758_v17  ;;  %v1759_v5 = vsel %vm1335_vm7, %v6698_v3, %v6702_v26  ;;  %v8714_v17 = vsel %vm1335_vm7, %v6702_v26, %v11861_v46 }
 0x2ca   : > { %v2842_v58 = vpack.c.bf16 %v1763_v50, %v1759_v5  ;;  %v2834_v5 = vpack.c.bf16 %v8604_v45, %v8570_v9  ;;  %12022 = vst [vmem:[#allocation85_spill] sm:$0xff] %v8714_v17  ;;  %v6673_v50 = vunpack.i.h.bf16 %v8468_v37 }
 0x2cb   : > { %2936 = vmatpush.bf16.msra.mxu1 %v2841_v25  ;;  %v2833_v25 = vpack.c.bf16 %v8608_v11, %v8568_v29 }
 0x2cc   : > { %2992 = vmatpush.bf16.msrb.mxu0 %v2842_v58  ;;  %v6672_v58 = vunpack.i.l.bf16 %v8468_v37  ;;  %v1482_v37 = vsel %vm1464_vm8, %v6673_v50, %v12025_v8 }
 0x2cd   : > { %v8693_v20 = vpop.permute.xlu1 %6720 }
 0x2ce   : > { %12019 = vst [vmem:[#allocation82_spill] sm:$0xff] %v8693_v20  ;;  %v8696_v34 = vpop.permute.xlu0 %6715  ;;  %v8698_v31 = vpop.permute.xlu2 %1867  ;;  %v6658_v20 = vunpack.i.h.bf16 %v8446_v59  ;;  %v1481_v8 = vsel %vm1464_vm8, %v6672_v58, %v6673_v50 }
 0x2cf   : > { %12020 = vst [vmem:[#allocation83_spill] sm:$0xff] %v8696_v34  ;;  %v11859_v3 = vunpack.i.l.bf16 %v8696_v34  ;;  %2937 = vmatpush.bf16.msra.mxu1 %v2837_v22  ;;  %v2829_v22 = vpack.c.bf16 %v8534_v44, %v8500_v61  ;;  %v1888_v26 = vmul.f32 %v8698_v31, %v8534_v44  ;;  %v11880_v44 = vunpack.i.h.bf16 %v8673_v21 }
 0x2d0   : > { %2993 = vmatpush.bf16.msrb.mxu0 %v2838_v6 }
 0x2d1   : > { %v8708_v60 = vsel %vm1335_vm7, %v6713_v16, %v11859_v3  ;;  %v6687_v16 = vunpack.i.l.bf16 %v8494_v39  ;;  %v2830_v3 = vpack.c.bf16 %v8536_v10, %v8504_v36 }
 0x2d2   : > { %12021 = vst [vmem:[#allocation84_spill] sm:$0xff] %v8708_v60  ;;  %v12026_v60 = vunpack.i.h.bf16 %v8494_v39 }
 0x2d3   : > { %2938 = vmatpush.bf16.msra.mxu1 %v2833_v25  ;;  %v6662_v25 = vunpack.i.l.bf16 %v8472_v48  ;;  %v1485_v6 = vsel %vm1464_vm8, %v6683_v23, %v6687_v16  ;;  %v6648_v23 = vunpack.i.h.bf16 %v8464_v27  ;;  %v12027_v27 = vunpack.i.h.bf16 %v8472_v48 }
 0x2d4   : > { %2994 = vmatpush.bf16.msrb.mxu0 %v2834_v5  ;;  %v6743_v5 = vunpack.i.h.bf16 %v8675_v18  ;;  %v2825_v57 = vpack.c.bf16 %v1485_v6, %v1481_v8 }
 0x2d5   : > { %v8725_v54 = vpop.permute.xlu1 %6735  ;;  %v1477_v43 = vsel %vm1464_vm8, %v6658_v20, %v6662_v25  ;;  %v6622_v20 = vunpack.i.l.bf16 %v8436_v0  ;;  %v1473_v48 = vsel %vm1464_vm8, %v6647_v55, %v6648_v23  ;;  %v12032_v55 = vunpack.i.h.bf16 %v8442_v35 }
 0x2d6   : > { %12023 = vst [vmem:[#allocation86_spill] sm:$0xff] %v8725_v54  ;;  %v8730_v46 = vpop.permute.xlu0 %6730  ;;  %v8736_v17 = vpop.permute.xlu2 %1873  ;;  %v2821_v50 = vpack.c.bf16 %v1477_v43, %v1473_v48  ;;  %v6598_v43 = vunpack.i.h.bf16 %v8271_v13 }
 0x2d7   : > { %12024 = vst [vmem:[#allocation87_spill] sm:$0xff] %v8730_v46  ;;  %v6732_v34 = vunpack.i.l.bf16 %v8730_v46  ;;  %2939 = vmatpush.bf16.msra.mxu1 %v2829_v22  ;;  %v1887_v54 = vmul.f32 %v8736_v17, %v8541_v1  ;;  %v1486_v46 = vsel %vm1464_vm8, %v6687_v16, %v12026_v60  ;;  %v6637_v1 = vunpack.i.l.bf16 %v8442_v35 }
 0x2d8   : > { %2995 = vmatpush.bf16.msrb.mxu0 %v2830_v3  ;;  %v2826_v59 = vpack.c.bf16 %v1486_v46, %v1482_v37  ;;  %v1478_v3 = vsel %vm1464_vm8, %v6662_v25, %v12027_v27  ;;  %v6623_v46 = vunpack.i.h.bf16 %v8436_v0  ;;  %v6608_v16 = vunpack.i.h.bf16 %v8342_v33 }
 0x2d9   : > { %v6779_v22 = vpack.i.bf16 %v1888_v26, %v1887_v54  ;;  %v8761_v39 = vsel %vm1335_vm7, %v11880_v44, %v6732_v34  ;;  %v12029_v54 = vunpack.i.l.bf16 %v8675_v18  ;;  %v12031_v34 = vunpack.i.l.bf16 %v8466_v51 }
 0x2da   : > { %12028 = vst [vmem:[#allocation88_spill] sm:$0xff] %v8761_v39  ;;  %v1469_v0 = vsel %vm1464_vm8, %v6633_v2, %v6637_v1  ;;  %v1470_v37 = vsel %vm1464_vm8, %v6637_v1, %v12032_v55  ;;  %v12034_v35 = vunpack.i.h.bf16 %v8304_v30 }
 0x2db   : > { %2940 = vmatpush.bf16.msra.mxu1 %v2825_v57  ;;  %6780 = vrot.lane.b32.xlu2 %v6779_v22, %s7473_s14  ;;  %v8766_v60 = vsel %vm1335_vm7, %v12029_v54, %v6743_v5  ;;  %v1474_v58 = vsel %vm1464_vm8, %v6648_v23, %v12031_v34  ;;  %v6597_v5 = vunpack.i.l.bf16 %v8271_v13  ;;  %v1465_v23 = vsel %vm1464_vm8, %v6622_v20, %v6623_v46 }
 0x2dc   : > { %12030 = vst [vmem:[#allocation89_spill] sm:$0xff] %v8766_v60  ;;  %2996 = vmatpush.bf16.msrb.mxu0 %v2826_v59  ;;  %v2822_v25 = vpack.c.bf16 %v1478_v3, %v1474_v58  ;;  %v6612_v59 = vunpack.i.l.bf16 %v8304_v30  ;;  %v2817_v8 = vpack.c.bf16 %v1469_v0, %v1465_v23  ;;  %v12033_v22 = vunpack.i.l.bf16 %v8432_v62 }
 0x2dd   : > { %v8773_v6 = vpop.permute.xlu1 %6750  ;;  %v1234_v13 = vsel %vm1217_vm6, %v6597_v5, %v6598_v43  ;;  %v6757_v34 = vunpack.i.l.bf16 %v8682_v14 }
 0x2de   : > { %v8779_v26 = vpop.permute.xlu0 %6745  ;;  %v1466_v27 = vsel %vm1464_vm8, %v6623_v46, %v12033_v22  ;;  %v1238_v3 = vsel %vm1217_vm6, %v6608_v16, %v6612_v59  ;;  %v1239_v1 = vsel %vm1217_vm6, %v6612_v59, %v12034_v35  ;;  %v11881_v54 = vunpack.i.h.bf16 %v8773_v6 }
 0x2df   : > { %2941 = vmatpush.bf16.msra.mxu1 %v2821_v50  ;;  %v2818_v2 = vpack.c.bf16 %v1470_v37, %v1466_v27  ;;  %v2813_v20 = vpack.c.bf16 %v1238_v3, %v1234_v13  ;;  %v12035_v50 = vunpack.i.l.bf16 %v8253_v28  ;;  %v1883_v22 = vmul.f32 %v8698_v31, %v8500_v61 }
 0x2e0   : > { %2997 = vmatpush.bf16.msrb.mxu0 %v2822_v25  ;;  %v8811_v0 = vsel %vm1335_vm7, %v11881_v54, %v6757_v34  ;;  %v1893_v3 = vmul.f32 %v8698_v31, %v8568_v29 }
 0x2e1   : > { %v1235_v46 = vsel %vm1217_vm6, %v6598_v43, %v12035_v50  ;;  %12036 = vst [vmem:[#allocation90_spill] sm:$0xff] %v8811_v0 }
 0x2e2   : > { %v2814_v25 = vpack.c.bf16 %v1239_v1, %v1235_v46 }
 0x2e3   : > { %2942 = vmatpush.bf16.msra.mxu1 %v2817_v8 }
 0x2e4   : > { %2998 = vmatpush.bf16.msrb.mxu0 %v2818_v2 }
 0x2e5   : > { %v8798_v48 = vpop.permute.xlu1 %6765 }
 0x2e6   : > { %v6768_v58 = vunpack.i.h.bf16 %v8798_v48  ;;  %v11882_v30 = vunpack.i.l.bf16 %v8798_v48  ;;  %v8806_v16 = vpop.permute.xlu0 %6760 }
 0x2e7   : > { %2943 = vmatpush.bf16.msra.mxu1 %v2813_v20 }
 0x2e8   : > { %2999 = vmatpush.bf16.msrb.mxu0 %v2814_v25  ;;  %v8816_v59 = vsel %vm1335_vm7, %v11882_v30, %v6768_v58 }
 0x2e9   : > { %12037 = vst [vmem:[#allocation91_spill] sm:$0xff] %v8816_v59 }
 0x2ed   : > { %v1872_v37 = vpop.permute.xlu1 %1871 }
 0x2ee   : > { %v1877_v43 = vsel %vm1217_vm6, %v1872_v37, %v8736_v17  ;;  %v1870_v5 = vpop.permute.xlu0 %1869 }
 0x2ef   : > { %v1875_v23 = vsel %vm1217_vm6, %v8698_v31, %v1870_v5  ;;  %v1876_v8 = vsel %vm1217_vm6, %v1870_v5, %v1872_v37  ;;  %v1886_v27 = vmul.f32 %v1877_v43, %v8368_v41  ;;  %v1891_v25 = vmul.f32 %v1877_v43, %v8573_v47 }
 0x2f0   : > { %v1884_v2 = vmul.f32 %v1875_v23, %v8504_v36  ;;  %v1894_v35 = vmul.f32 %v1875_v23, %v8570_v9  ;;  %v1885_v1 = vmul.f32 %v1876_v8, %v8543_v56  ;;  %v1889_v41 = vmul.f32 %v1875_v23, %v8536_v10 }
 0x2f1   : > { %v1890_v46 = vmul.f32 %v1876_v8, %v8545_v49  ;;  %v1899_v34 = vmul.f32 %v1875_v23, %v8604_v45  ;;  %v1900_v58 = vmul.f32 %v1876_v8, %v8593_v4  ;;  %v1892_v37 = vmul.f32 %v8736_v17, %v8575_v32 }
 0x2f2   : > { %v6769_v13 = vpack.i.bf16 %v1884_v2, %v1883_v22  ;;  %v6794_v20 = vpack.i.bf16 %v1894_v35, %v1893_v3  ;;  %v6774_v50 = vpack.i.bf16 %v1886_v27, %v1885_v1  ;;  %v1905_v2 = vmul.f32 %v1876_v8, %v8620_v42 }
 0x2f3   : > { %v6784_v5 = vpack.i.bf16 %v1890_v46, %v1889_v41  ;;  %v6809_v22 = vpack.i.bf16 %v1900_v58, %v1899_v34  ;;  %v6789_v27 = vpack.i.bf16 %v1892_v37, %v1891_v25  ;;  %v1906_v3 = vmul.f32 %v1877_v43, %v8403_v19 }
 0x2f4   : > { %6770 = vrot.lane.b32.xlu0 %v6769_v13, %s7473_s14  ;;  %6795 = vrot.lane.b32.xlu2 %v6794_v20, %s7473_s14  ;;  %v1895_v35 = vmul.f32 %v1876_v8, %v8577_v38  ;;  %v1896_v1 = vmul.f32 %v1877_v43, %v8391_v12  ;;  %v1897_v13 = vmul.f32 %v8736_v17, %v8596_v15 }
 0x2f5   : > { %6775 = vrot.lane.b32.xlu1 %v6774_v50, %s7473_s14  ;;  %v1898_v20 = vmul.f32 %v8698_v31, %v8608_v11  ;;  %v6824_v50 = vpack.i.bf16 %v1906_v3, %v1905_v2  ;;  %v1911_v19 = vmul.f32 %v1877_v43, %v8645_v7  ;;  %v1912_v34 = vmul.f32 %v8736_v17, %v8647_v53 }
 0x2f6   : > { %v6799_v41 = vpack.i.bf16 %v1896_v1, %v1895_v35  ;;  %v1901_v58 = vmul.f32 %v1877_v43, %v8598_v24  ;;  %v1902_v25 = vmul.f32 %v8736_v17, %v8600_v63  ;;  %v1904_v37 = vmul.f32 %v1875_v23, %v8625_v52  ;;  %v12039_v35 = vld [vmem:[#allocation76_spill] sm:$0xff]  ;;  %v12040_v1 = vld [vmem:[#allocation77_spill] sm:$0xff] }
 0x2f7   : > { %v6804_v46 = vpack.i.bf16 %v1898_v20, %v1897_v13  ;;  %v1907_v43 = vmul.f32 %v8736_v17, %v12039_v35  ;;  %v1908_v13 = vmul.f32 %v8698_v31, %v12040_v1  ;;  %v12041_v20 = vld [vmem:[#allocation79_spill] sm:$0xff] }
 0x2f8   : > { %v6814_v2 = vpack.i.bf16 %v1902_v25, %v1901_v58 }
 0x2f9   : > { %v6829_v58 = vpack.i.bf16 %v1908_v13, %v1907_v43 }
 0x2fc   : > { %6785 = vrot.lane.b32.xlu0 %v6784_v5, %s7473_s14  ;;  %6810 = vrot.lane.b32.xlu2 %v6809_v22, %s7473_s14  ;;  %v12038_v5 = vld [vmem:[#allocation75_spill] sm:$0xff] }
 0x2fd   : > { %6790 = vrot.lane.b32.xlu1 %v6789_v27, %s7473_s14  ;;  %v1903_v22 = vmul.f32 %v8698_v31, %v12038_v5  ;;  %v6839_v27 = vpack.i.bf16 %v1912_v34, %v1911_v19  ;;  %v6278_v19 = vld [vmem:[%s11729_s1 + $0x7] ss:$8 sm:$0xf] }
 0x2fe   : > { %v2110_v34 = vperm.slane %v6278_v19, 2  ;;  %v2108_v17 = vperm.slane %v6278_v19, 0  ;;  %v2111_v31 = vperm.slane %v6278_v19, 3 }
 0x2ff   : > { %v6819_v3 = vpack.i.bf16 %v1904_v37, %v1903_v22  ;;  %v2109_v37 = vperm.slane %v6278_v19, 1 }
 0x304   : > { %6825 = vrot.lane.b32.xlu2 %v6824_v50, %s7473_s14  ;;  %6800 = vrot.lane.b32.xlu0 %v6799_v41, %s7473_s14  ;;  %v1909_v50 = vmul.f32 %v1875_v23, %v12041_v20  ;;  %v12042_v41 = vld [vmem:[#allocation78_spill] sm:$0xff] }
 0x305   : > { %6805 = vrot.lane.b32.xlu1 %v6804_v46, %s7473_s14  ;;  %v1910_v46 = vmul.f32 %v1876_v8, %v12042_v41 }
 0x307   : > { %v6834_v25 = vpack.i.bf16 %v1910_v46, %v1909_v50 }
 0x30c   : > { %6840 = vrot.lane.b32.xlu2 %v6839_v27, %s7473_s14  ;;  %6815 = vrot.lane.b32.xlu0 %v6814_v2, %s7473_s14 }
 0x30d   : > { %6820 = vrot.lane.b32.xlu1 %v6819_v3, %s7473_s14 }
 0x314   : > { %6830 = vrot.lane.b32.xlu0 %v6829_v58, %s7473_s14  ;;  %2116 = vrot.lane.b32.xlu2 %v2110_v34, %s7476_s18 }
 0x315   : > { %6835 = vrot.lane.b32.xlu1 %v6834_v25, %s7473_s14 }
 0x31c   : > { %2112 = vrot.lane.b32.xlu0 %v2108_v17, %s7476_s18 }
 0x31d   : > { %2114 = vrot.lane.b32.xlu1 %v2109_v37, %s7476_s18 }
 0x324   : > { %2118 = vrot.lane.b32.xlu0 %v2111_v31, %s7476_s18 }
 0x335   : > { %v8884_v23 = vpop.permute.xlu2 %6780 }
 0x336   : > { %v6782_v50 = vunpack.i.l.bf16 %v8884_v23 }
 0x34e   : > { %v8886_v8 = vpop.permute.xlu2 %6795 }
 0x356   : > { %v8892_v2 = vpop.permute.xlu2 %6810 }
 0x35e   : > { %v8918_v31 = vpop.permute.xlu2 %6825 }
 0x35f   : > { %v11898_v59 = vunpack.i.h.bf16 %v8918_v31 }
 0x366   : > { %v8888_v22 = vpop.permute.xlu0 %6770 }
 0x367   : > { %v8890_v27 = vpop.permute.xlu1 %6775 }
 0x368   : > { %v11883_v3 = vunpack.i.h.bf16 %v8890_v27 }
 0x36a   : > { %v8905_v34 = vsel %vm1088_vm3, %v11883_v3, %v6782_v50  ;;  %v8938_v3 = vpop.permute.xlu2 %6840 }
 0x36b   : > { %12043 = vst [vmem:[#allocation75_spill] sm:$0xff] %v8905_v34  ;;  %v6843_v39 = vunpack.i.h.bf16 %v8938_v3  ;;  %v11899_v60 = vunpack.i.l.bf16 %v8938_v3 }
 0x36e   : > { %v8895_v43 = vpop.permute.xlu0 %6785 }
 0x36f   : > { %v8897_v13 = vpop.permute.xlu1 %6790 }
 0x370   : > { %v6793_v46 = vunpack.i.h.bf16 %v8897_v13  ;;  %v11884_v19 = vunpack.i.l.bf16 %v8897_v13 }
 0x372   : > { %v8910_v58 = vsel %vm1088_vm3, %v11884_v19, %v6793_v46  ;;  %v8958_v19 = vsel %vm1088_vm3, %v11899_v60, %v6843_v39  ;;  %v2117_v28 = vpop.permute.xlu2 %2116  ;;  %v12049_v60 = vld [vmem:[#allocation73_spill] sm:$0xff] }
 0x373   : > { %12044 = vst [vmem:[#allocation76_spill] sm:$0xff] %v8910_v58 }
 0x374   : > { %12048 = vst [vmem:[#allocation92_spill] sm:$0xff] %v8958_v19 }
 0x376   : > { %v8914_v17 = vpop.permute.xlu0 %6800 }
 0x377   : > { %v8916_v37 = vpop.permute.xlu1 %6805  ;;  %v11889_v57 = vunpack.i.h.bf16 %v8914_v17 }
 0x378   : > { %v6807_v55 = vunpack.i.l.bf16 %v8916_v37 }
 0x37a   : > { %v8931_v25 = vsel %vm1088_vm3, %v11889_v57, %v6807_v55 }
 0x37b   : > { %12045 = vst [vmem:[#allocation77_spill] sm:$0xff] %v8931_v25 }
 0x37e   : > { %v8922_v50 = vpop.permute.xlu0 %6815 }
 0x37f   : > { %v6818_v44 = vunpack.i.h.bf16 %v8922_v50  ;;  %v11890_v46 = vunpack.i.l.bf16 %v8922_v50  ;;  %v8926_v54 = vpop.permute.xlu1 %6820 }
 0x381   : > { %v8936_v30 = vsel %vm1088_vm3, %v11890_v46, %v6818_v44  ;;  %v12050_v46 = vld [vmem:[#allocation74_spill] sm:$0xff] }
 0x382   : > { %12046 = vst [vmem:[#allocation79_spill] sm:$0xff] %v8936_v30 }
 0x386   : > { %v8944_v0 = vpop.permute.xlu0 %6830 }
 0x387   : > { %v6832_v55 = vunpack.i.l.bf16 %v8944_v0  ;;  %v8948_v57 = vpop.permute.xlu1 %6835 }
 0x389   : > { %v8953_v44 = vsel %vm1088_vm3, %v11898_v59, %v6832_v55  ;;  %v8967_v59 = vld [vmem:[#allocation2 + $0x20] sm:$0xff] }
 0x38a   : > { %12047 = vst [vmem:[#allocation78_spill] sm:$0xff] %v8953_v44 }
 0x38e   : > { %v2113_v34 = vpop.permute.xlu0 %2112 }
 0x38f   : > { %v2115_v58 = vpop.permute.xlu1 %2114  ;;  %v2128_v25 = vmul.f32 %v2113_v34, %v8500_v61  ;;  %v2133_v51 = vmul.f32 %v2113_v34, %v12049_v60  ;;  %v2138_v60 = vmul.f32 %v2113_v34, %v8568_v29 }
 0x390   : > { %v2120_v30 = vsel %vm970_vm5, %v2113_v34, %v2115_v58  ;;  %v2121_v55 = vsel %vm970_vm5, %v2115_v58, %v2117_v28 }
 0x391   : > { %v2129_v62 = vmul.f32 %v2120_v30, %v8504_v36  ;;  %v2134_v61 = vmul.f32 %v2120_v30, %v8536_v10  ;;  %v2135_v40 = vmul.f32 %v2121_v55, %v8545_v49  ;;  %v2130_v36 = vmul.f32 %v2121_v55, %v8543_v56 }
 0x392   : > { %v2144_v29 = vmul.f32 %v2120_v30, %v8604_v45 }
 0x393   : > { %v6844_v33 = vpack.i.bf16 %v2129_v62, %v2128_v25 }
 0x395   : > { %6845 = vrot.lane.b32.xlu1 %v6844_v33, %s7472_s29  ;;  %v6859_v33 = vpack.i.bf16 %v2135_v40, %v2134_v61 }
 0x396   : > { %v2119_v39 = vpop.permute.xlu0 %2118 }
 0x397   : > { %v2132_v44 = vmul.f32 %v2119_v39, %v12050_v46  ;;  %v2122_v19 = vsel %vm970_vm5, %v2117_v28, %v2119_v39  ;;  %v2139_v28 = vmul.f32 %v2120_v30, %v8570_v9  ;;  %v2137_v49 = vmul.f32 %v2119_v39, %v8575_v32 }
 0x398   : > { %v2131_v62 = vmul.f32 %v2122_v19, %v8967_v59  ;;  %v2136_v10 = vmul.f32 %v2122_v19, %v8573_v47  ;;  %v2141_v56 = vmul.f32 %v2122_v19, %v8391_v12  ;;  %v2145_v9 = vmul.f32 %v2121_v55, %v8593_v4 }
 0x399   : > { %v6854_v58 = vpack.i.bf16 %v2133_v51, %v2132_v44  ;;  %v6869_v46 = vpack.i.bf16 %v2139_v28, %v2138_v60  ;;  %v2140_v51 = vmul.f32 %v2121_v55, %v8577_v38  ;;  %v2142_v47 = vmul.f32 %v2119_v39, %v8596_v15 }
 0x39a   : > { %v6849_v25 = vpack.i.bf16 %v2131_v62, %v2130_v36  ;;  %v6864_v44 = vpack.i.bf16 %v2137_v49, %v2136_v10  ;;  %v2146_v32 = vmul.f32 %v2122_v19, %v8598_v24  ;;  %v2147_v12 = vmul.f32 %v2119_v39, %v8600_v63  ;;  %v8994_v62 = vld [vmem:[#allocation2 + $0xe0] sm:$0xff] }
 0x39b   : > { %6855 = vrot.lane.b32.xlu0 %v6854_v58, %s7472_s29  ;;  %v6874_v40 = vpack.i.bf16 %v2141_v56, %v2140_v51  ;;  %v2143_v38 = vmul.f32 %v2113_v34, %v8608_v11  ;;  %v6884_v61 = vpack.i.bf16 %v2145_v9, %v2144_v29  ;;  %v2151_v4 = vmul.f32 %v2122_v19, %v8994_v62  ;;  %v6282_v9 = vld [vmem:[%s11730_s2] sm:$0xf] }
 0x39c   : > { %6850 = vrot.lane.b32.xlu2 %v6849_v25, %s7472_s29  ;;  %v6889_v58 = vpack.i.bf16 %v2147_v12, %v2146_v32  ;;  %v2148_v15 = vmul.f32 %v2113_v34, %v12038_v5  ;;  %v2149_v24 = vmul.f32 %v2120_v30, %v8625_v52  ;;  %v2150_v63 = vmul.f32 %v2121_v55, %v8620_v42 }
 0x39d   : > { %6860 = vrot.lane.b32.xlu1 %v6859_v33, %s7472_s29  ;;  %v6879_v36 = vpack.i.bf16 %v2143_v38, %v2142_v47  ;;  %v2152_v45 = vmul.f32 %v2119_v39, %v12039_v35  ;;  %v2153_v25 = vmul.f32 %v2113_v34, %v12040_v1  ;;  %v2156_v28 = vmul.f32 %v2122_v19, %v8645_v7  ;;  %v6279_v35 = vld [vmem:[%s11729_s1 + $0x20] ss:$8 sm:$0xf] }
 0x39e   : > { %v6899_v11 = vpack.i.bf16 %v2151_v4, %v2150_v63  ;;  %v6894_v33 = vpack.i.bf16 %v2149_v24, %v2148_v15  ;;  %v2157_v5 = vmul.f32 %v2119_v39, %v8647_v53  ;;  %v2154_v52 = vmul.f32 %v2120_v30, %v12041_v20  ;;  %v6353_v47 = vld [vmem:[%s11730_s2 + $0xc] sm:$0xf0] }
 0x39f   : > { %v6904_v60 = vpack.i.bf16 %v2153_v25, %v2152_v45  ;;  %v2155_v42 = vmul.f32 %v2121_v55, %v12042_v41  ;;  %v2353_v34 = vperm.slane %v6279_v35, 0  ;;  %v2355_v7 = vperm.slane %v6279_v35, 2 }
 0x3a0   : > { %v6914_v1 = vpack.i.bf16 %v2157_v5, %v2156_v28  ;;  %v2354_v19 = vperm.slane %v6279_v35, 1  ;;  %v2356_v53 = vperm.slane %v6279_v35, 3  ;;  %v9055_v12 = vor.u32 %v6353_v47, %v6282_v9  ;;  %v12054_v5 = vld [vmem:[#allocation86_spill] sm:$0xff] }
 0x3a1   : > { %v6909_v10 = vpack.i.bf16 %v2155_v42, %v2154_v52  ;;  %v11904_v15 = vunpack.i.h.bf16 %v8892_v2  ;;  %v11905_v63 = vunpack.i.l.bf16 %v8892_v2 }
 0x3a2   : > { %2930 = vmatmul.bf16.vlgmr.msra.gmra.mxu0 %v9055_v12 }
 0x3a3   : > { %6870 = vrot.lane.b32.xlu0 %v6869_v46, %s7472_s29 }
 0x3a4   : > { %6865 = vrot.lane.b32.xlu2 %v6864_v44, %s7472_s29 }
 0x3a5   : > { %6875 = vrot.lane.b32.xlu1 %v6874_v40, %s7472_s29 }
 0x3ab   : > { %6885 = vrot.lane.b32.xlu0 %v6884_v61, %s7472_s29 }
 0x3ac   : > { %6880 = vrot.lane.b32.xlu2 %v6879_v36, %s7472_s29 }
 0x3ad   : > { %6890 = vrot.lane.b32.xlu1 %v6889_v58, %s7472_s29 }
 0x3b3   : > { %6900 = vrot.lane.b32.xlu0 %v6899_v11, %s7472_s29 }
 0x3b4   : > { %6895 = vrot.lane.b32.xlu2 %v6894_v33, %s7472_s29 }
 0x3b5   : > { %6905 = vrot.lane.b32.xlu1 %v6904_v60, %s7472_s29  ;;  %v12053_v60 = vld [vmem:[#allocation82_spill] sm:$0xff] }
 0x3bb   : > { %6915 = vrot.lane.b32.xlu0 %v6914_v1, %s7472_s29 }
 0x3bc   : > { %6910 = vrot.lane.b32.xlu2 %v6909_v10, %s7472_s29 }
 0x3bd   : > { %2357 = vrot.lane.b32.xlu1 %v2353_v34, %s7475_s21 }
 0x3c3   : > { %2361 = vrot.lane.b32.xlu0 %v2355_v7, %s7475_s21 }
 0x3c4   : > { %2359 = vrot.lane.b32.xlu2 %v2354_v19, %s7475_s21 }
 0x3c5   : > { %2363 = vrot.lane.b32.xlu1 %v2356_v53, %s7475_s21 }
 0x3f6   : > { %v9021_v30 = vpop.permute.xlu2 %6850 }
 0x3f7   : > { %v11906_v46 = vunpack.i.h.bf16 %v9021_v30 }
 0x3fe   : > { %v9023_v20 = vpop.permute.xlu2 %6865 }
 0x3ff   : > { %v6868_v55 = vunpack.i.h.bf16 %v9023_v20  ;;  %v11907_v39 = vunpack.i.l.bf16 %v9023_v20 }
 0x401   : > { %v9045_v29 = vsel %vm841_vm2, %v11907_v39, %v6868_v55  ;;  %v6833_v39 = vunpack.i.h.bf16 %v8944_v0 }
 0x402   : > { %12052 = vst [vmem:[#allocation74_spill] sm:$0xff] %v9045_v29 }
 0x406   : > { %v9029_v49 = vpop.permute.xlu2 %6880 }
 0x407   : > { %v9025_v41 = vpop.permute.xlu1 %6845  ;;  %v6882_v45 = vunpack.i.l.bf16 %v9029_v49 }
 0x408   : > { %v6848_v1 = vunpack.i.h.bf16 %v9025_v41 }
 0x40d   : > { %v9031_v56 = vpop.permute.xlu0 %6855 }
 0x40e   : > { %v6857_v51 = vunpack.i.l.bf16 %v9031_v56  ;;  %v6896_v61 = vpop.permute.xlu2 %6895 }
 0x40f   : > { %v9035_v44 = vpop.permute.xlu1 %6860  ;;  %v6898_v55 = vunpack.i.h.bf16 %v6896_v61  ;;  %v6897_v33 = vunpack.i.l.bf16 %v6896_v61 }
 0x410   : > { %v9040_v40 = vsel %vm841_vm2, %v11906_v46, %v6857_v51 }
 0x411   : > { %12051 = vst [vmem:[#allocation73_spill] sm:$0xff] %v9040_v40  ;;  %v6858_v40 = vunpack.i.h.bf16 %v9031_v56 }
 0x415   : > { %v9058_v38 = vpop.permute.xlu0 %6870 }
 0x416   : > { %v9075_v42 = vpop.permute.xlu2 %6910  ;;  %v6873_v32 = vunpack.i.h.bf16 %v9058_v38 }
 0x417   : > { %v9060_v36 = vpop.permute.xlu1 %6875  ;;  %v6913_v9 = vunpack.i.h.bf16 %v9075_v42  ;;  %v6912_v47 = vunpack.i.l.bf16 %v9075_v42 }
 0x418   : > { %v11908_v4 = vunpack.i.h.bf16 %v9060_v36  ;;  %v6877_v28 = vunpack.i.l.bf16 %v9060_v36 }
 0x419   : > { %v2269_v46 = vsel %vm841_vm2, %v6912_v47, %v6913_v9 }
 0x41a   : > { %v9082_v34 = vsel %vm841_vm2, %v11908_v4, %v6882_v45  ;;  %v9102_v45 = vsel %vm1088_vm3, %v11905_v63, %v11904_v15  ;;  %v6862_v4 = vunpack.i.l.bf16 %v9035_v44  ;;  %v6872_v15 = vunpack.i.l.bf16 %v9058_v38 }
 0x41b   : > { %12055 = vst [vmem:[#allocation82_spill] sm:$0xff] %v9082_v34  ;;  %v2257_v38 = vsel %vm841_vm2, %v6873_v32, %v6877_v28 }
 0x41c   : > { %v2256_v0 = vsel %vm841_vm2, %v6872_v15, %v6873_v32 }
 0x41d   : > { %v9062_v58 = vpop.permute.xlu0 %6885 }
 0x41e   : > { %v6888_v35 = vunpack.i.h.bf16 %v9062_v58  ;;  %v6887_v42 = vunpack.i.l.bf16 %v9062_v58  ;;  %v6883_v58 = vunpack.i.h.bf16 %v9029_v49 }
 0x41f   : > { %v9066_v24 = vpop.permute.xlu1 %6890 }
 0x420   : > { %v6893_v11 = vunpack.i.h.bf16 %v9066_v24  ;;  %v11909_v25 = vunpack.i.l.bf16 %v9066_v24  ;;  %v2261_v19 = vsel %vm841_vm2, %v6887_v42, %v6888_v35 }
 0x422   : > { %v9087_v10 = vsel %vm841_vm2, %v11909_v25, %v6893_v11  ;;  %v2264_v11 = vsel %vm841_vm2, %v6897_v33, %v6898_v55  ;;  %v2260_v33 = vsel %vm841_vm2, %v6883_v58, %v6887_v42  ;;  %v2321_v42 = vld [vmem:[#allocation2 + $0x10] sm:$0xff] }
 0x423   : > { %12056 = vst [vmem:[#allocation86_spill] sm:$0xff] %v9087_v10 }
 0x425   : > { %v9107_v52 = vpop.permute.xlu0 %6900 }
 0x426   : > { %v6902_v7 = vunpack.i.l.bf16 %v9107_v52  ;;  %v6903_v29 = vunpack.i.h.bf16 %v9107_v52  ;;  %v2870_v52 = vpack.c.bf16 %v2261_v19, %v2257_v38 }
 0x427   : > { %v6906_v53 = vpop.permute.xlu1 %6905 }
 0x428   : > { %v6908_v63 = vunpack.i.h.bf16 %v6906_v53  ;;  %v2265_v61 = vsel %vm841_vm2, %v6898_v55, %v6902_v7  ;;  %v6852_v55 = vunpack.i.l.bf16 %v9021_v30  ;;  %v2266_v58 = vsel %vm841_vm2, %v6902_v7, %v6903_v29 }
 0x429   : > { %v2874_v51 = vpack.c.bf16 %v2269_v46, %v2265_v61  ;;  %v2360_v61 = vpop.permute.xlu2 %2359  ;;  %v12057_v46 = vunpack.i.h.bf16 %v9035_v44  ;;  %v6907_v38 = vunpack.i.l.bf16 %v6906_v53 }
 0x42a   : > { %v2268_v25 = vsel %vm841_vm2, %v6908_v63, %v6912_v47  ;;  %v6837_v63 = vunpack.i.l.bf16 %v8948_v57  ;;  %v6847_v47 = vunpack.i.l.bf16 %v9025_v41  ;;  %v2869_v41 = vpack.c.bf16 %v2260_v33, %v2256_v0 }
 0x42b   : > { %3006 = vmatpush.bf16.msrb.mxu1 %v2874_v51  ;;  %v2873_v49 = vpack.c.bf16 %v2268_v25, %v2264_v11  ;;  %v2320_v51 = vld [vmem:[#allocation2 + $0x8] sm:$0xff]  ;;  %v2253_v34 = vsel %vm841_vm2, %v6862_v4, %v12057_v46  ;;  %v2249_v19 = vsel %vm841_vm2, %v6848_v1, %v6852_v55  ;;  %v12059_v0 = vunpack.i.h.bf16 %v8886_v8 }
 0x42c   : > { %v2866_v7 = vpack.c.bf16 %v2253_v34, %v2249_v19  ;;  %v2248_v53 = vsel %vm841_vm2, %v6847_v47, %v6848_v1  ;;  %v12061_v34 = vunpack.i.l.bf16 %v9066_v24  ;;  %v12062_v1 = vunpack.i.l.bf16 %v8918_v31 }
 0x42d   : > { %2950 = vmatpush.bf16.msra.mxu2 %v2873_v49  ;;  %v6916_v56 = vpop.permute.xlu0 %6915  ;;  %v2252_v49 = vsel %vm841_vm2, %v6858_v40, %v6862_v4  ;;  %v12063_v47 = vunpack.i.h.bf16 %v8926_v54  ;;  %v12064_v24 = vunpack.i.h.bf16 %v9060_v36 }
 0x42e   : > { %v6918_v25 = vunpack.i.h.bf16 %v6916_v56  ;;  %v6917_v11 = vunpack.i.l.bf16 %v6916_v56  ;;  %v2865_v19 = vpack.c.bf16 %v2252_v49, %v2248_v53 }
 0x42f   : > { %v9141_v10 = vpop.permute.xlu1 %2357  ;;  %3007 = vmatpush.bf16.msrb.mxu1 %v2870_v52  ;;  %v12058_v52 = vunpack.i.l.bf16 %v8914_v17 }
 0x430   : > { %v2270_v32 = vsel %vm841_vm2, %v6913_v9, %v6917_v11  ;;  %v9150_v15 = vsel %vm490_vm4, %v9141_v10, %v2360_v61  ;;  %v2373_v46 = vmul.f32 %v9141_v10, %v2320_v51  ;;  %v9160_v4 = vsel %vm841_vm2, %v6917_v11, %v6918_v25 }
 0x431   : > { %2951 = vmatpush.bf16.msra.mxu2 %v2869_v41  ;;  %v2875_v56 = vpack.c.bf16 %v2270_v32, %v2266_v58  ;;  %v2374_v33 = vmul.f32 %v9150_v15, %v2321_v42  ;;  %v2012_v40 = vsel %vm1088_vm3, %v12059_v0, %v12058_v52  ;;  %v12060_v9 = vunpack.i.h.bf16 %v8948_v57  ;;  %v2325_v52 = vld [vmem:[#allocation2 + $0x38] sm:$0xff] }
 0x432   : > { %v2262_v58 = vsel %vm841_vm2, %v6888_v35, %v12061_v34  ;;  %v6787_v42 = vunpack.i.l.bf16 %v8895_v43  ;;  %v2023_v32 = vsel %vm1088_vm3, %v6833_v39, %v6837_v63  ;;  %v9172_v25 = vsel %vm841_vm2, %v6903_v29, %v6907_v38  ;;  %v2326_v39 = vld [vmem:[#allocation2 + $0x40] sm:$0xff]  ;;  %v9189_v29 = vld [vmem:[#allocation2 + $0x18] sm:$0xff] }
 0x433   : > { %v2024_v51 = vsel %vm1088_vm3, %v6837_v63, %v12060_v9  ;;  %3008 = vmatpush.bf16.msrb.mxu1 %v2866_v7  ;;  %3062 = vmatpush.bf16.msra.mxu0 %v2875_v56  ;;  %v6919_v41 = vpack.i.bf16 %v2374_v33, %v2373_v46  ;;  %v2020_v11 = vsel %vm1088_vm3, %v12063_v47, %v12062_v1  ;;  %v12066_v46 = vunpack.i.l.bf16 %v8926_v54  ;;  %v9187_v63 = vld [vmem:[#allocation2 + $0x48] sm:$0xff] }
 0x434   : > { %v2258_v35 = vsel %vm841_vm2, %v6877_v28, %v12064_v24  ;;  %v12065_v7 = vmov %v12063_v47  ;;  %v6808_v38 = vunpack.i.h.bf16 %v8916_v37  ;;  %v2862_v36 = vpack.c.bf16 %v2024_v51, %v2020_v11  ;;  %v2324_v28 = vld [vmem:[#allocation2 + $0x28] sm:$0xff] }
 0x435   : > { %v2019_v49 = vsel %vm1088_vm3, %v12066_v46, %v12065_v7  ;;  %6920 = vrot.lane.b32.xlu2 %v6919_v41, %s7471_s27  ;;  %2952 = vmatpush.bf16.msra.mxu2 %v2865_v19  ;;  %v2362_v56 = vpop.permute.xlu0 %2361  ;;  %v2871_v33 = vpack.c.bf16 %v2262_v58, %v2258_v35  ;;  %v2876_v54 = vpack.c.bf16 %v9160_v4, %v9172_v25  ;;  %v12067_v34 = vunpack.i.l.bf16 %v9023_v20  ;;  %v12189_v4 = vld [vmem:[#allocation26_spill] sm:$0xff] }
 0x436   : > { %v9196_v0 = vsel %vm490_vm4, %v2360_v61, %v2362_v56  ;;  %v2861_v53 = vpack.c.bf16 %v2023_v32, %v2019_v49  ;;  %v2858_v9 = vpack.c.bf16 %v9102_v45, %v2012_v40  ;;  %v12068_v37 = vunpack.i.h.bf16 %v9035_v44 }
 0x437   : > { %v6777_v51 = vunpack.i.l.bf16 %v8890_v27  ;;  %v9205_v58 = vpop.permute.xlu1 %2363  ;;  %3009 = vmatpush.bf16.msrb.mxu1 %v2862_v36  ;;  %3063 = vmatpush.bf16.msra.mxu0 %v2871_v33  ;;  %v2379_v19 = vmul.f32 %v9150_v15, %v2326_v39  ;;  %v2380_v61 = vmul.f32 %v9196_v0, %v9187_v63  ;;  %v2375_v45 = vmul.f32 %v9196_v0, %v9189_v29 }
 0x438   : > { %v2254_v41 = vsel %vm841_vm2, %v12068_v37, %v12067_v34  ;;  %v2377_v20 = vmul.f32 %v9205_v58, %v2324_v28  ;;  %v2378_v44 = vmul.f32 %v9141_v10, %v2325_v52  ;;  %v12069_v40 = vunpack.i.h.bf16 %v9021_v30  ;;  %v2330_v34 = vld [vmem:[#allocation2 + $0x68] sm:$0xff]  ;;  %v2331_v37 = vld [vmem:[#allocation2 + $0x70] sm:$0xff] }
 0x439   : > { %v9221_v1 = vsel %vm490_vm4, %v2362_v56, %v9205_v58  ;;  %2953 = vmatpush.bf16.msra.mxu2 %v2861_v53  ;;  %v6934_v11 = vpack.i.bf16 %v2380_v61, %v2379_v19  ;;  %v12070_v35 = vunpack.i.l.bf16 %v8892_v2  ;;  %v6748_v46 = vunpack.i.h.bf16 %v8779_v26  ;;  %v9250_v19 = vld [vmem:[#allocation2 + $0x78] sm:$0xff] }
 0x43a   : > { %v2250_v32 = vsel %vm841_vm2, %v6852_v55, %v12069_v40  ;;  %v2376_v24 = vmul.f32 %v9221_v1, %v8967_v59  ;;  %v6929_v49 = vpack.i.bf16 %v2378_v44, %v2377_v20  ;;  %v12071_v30 = vunpack.i.h.bf16 %v8895_v43 }
 0x43b   : > { %v2867_v47 = vpack.c.bf16 %v2254_v41, %v2250_v32  ;;  %v2015_v7 = vsel %vm1088_vm3, %v6808_v38, %v12070_v35  ;;  %v12072_v39 = vunpack.i.l.bf16 %v8938_v3  ;;  %v12073_v56 = vunpack.i.h.bf16 %v8948_v57  ;;  %3010 = vmatpush.bf16.msrb.mxu1 %v2858_v9  ;;  %v2329_v35 = vld [vmem:[#allocation2 + $0x58] sm:$0xff] }
 0x43c   : > { %v2008_v55 = vsel %vm1088_vm3, %v6787_v42, %v12071_v30  ;;  %v6783_v33 = vunpack.i.h.bf16 %v8884_v23  ;;  %v6924_v38 = vpack.i.bf16 %v2376_v24, %v2375_v45  ;;  %v12074_v28 = vunpack.i.h.bf16 %v8886_v8  ;;  %6930 = vrot.lane.b32.xlu1 %v6929_v49, %s7471_s27  ;;  %v9270_v24 = vld [vmem:[#allocation2 + $0x50] sm:$0xff] }
 0x43d   : > { %v2025_v36 = vsel %vm1088_vm3, %v12073_v56, %v12072_v39  ;;  %3064 = vmatpush.bf16.msra.mxu0 %v2867_v47  ;;  %v12075_v52 = vunpack.i.l.bf16 %v8886_v8  ;;  %v12076_v41 = vunpack.i.h.bf16 %v8806_v16  ;;  %v12077_v3 = vunpack.i.l.bf16 %v8806_v16  ;;  %v9268_v47 = vld [vmem:[#allocation2 + $0x80] sm:$0xff]  ;;  %6935 = vrot.lane.b32.xlu2 %v6934_v11, %s7471_s27 }
 0x43e   : > { %v12078_v9 = vunpack.i.h.bf16 %v8888_v22  ;;  %v12079_v61 = vunpack.i.h.bf16 %v8918_v31  ;;  %v12080_v45 = vunpack.i.l.bf16 %v8918_v31  ;;  %v12082_v40 = vunpack.i.l.bf16 %v8888_v22  ;;  %6925 = vrot.lane.b32.xlu0 %v6924_v38, %s7471_s27 }
 0x43f   : > { %v2011_v53 = vsel %vm1088_vm3, %v12075_v52, %v12074_v28  ;;  %v1779_v57 = vsel %vm1335_vm7, %v12077_v3, %v12076_v41  ;;  %v2007_v30 = vsel %vm1088_vm3, %v6783_v33, %v6787_v42  ;;  %v2383_v22 = vmul.f32 %v9141_v10, %v2330_v34  ;;  %v12088_v41 = vld [vmem:[#allocation87_spill] sm:$0xff] }
 0x440   : > { %v2857_v23 = vpack.c.bf16 %v2015_v7, %v2011_v53  ;;  %v2004_v8 = vsel %vm1088_vm3, %v12078_v9, %v6777_v51  ;;  %v2021_v20 = vsel %vm1088_vm3, %v12080_v45, %v12079_v61  ;;  %v12081_v44 = vmov %v12078_v9 }
 0x441   : > { %v2003_v32 = vsel %vm1088_vm3, %v12082_v40, %v12081_v44  ;;  %v6737_v7 = vunpack.i.l.bf16 %v12054_v5  ;;  %v2854_v31 = vpack.c.bf16 %v2008_v55, %v2004_v8  ;;  %v2863_v49 = vpack.c.bf16 %v2025_v36, %v2021_v20 }
 0x442   : > { %2954 = vmatpush.bf16.msra.mxu2 %v2857_v23  ;;  %v2384_v39 = vmul.f32 %v9150_v15, %v2331_v37  ;;  %v12083_v56 = vunpack.i.l.bf16 %v8922_v50  ;;  %v12084_v28 = vunpack.i.h.bf16 %v8892_v2  ;;  %v2385_v11 = vmul.f32 %v9196_v0, %v9250_v19 }
 0x443   : > { %v6747_v55 = vunpack.i.l.bf16 %v8779_v26  ;;  %3011 = vmatpush.bf16.msrb.mxu1 %v2854_v31  ;;  %3065 = vmatpush.bf16.msra.mxu0 %v2863_v49  ;;  %v2386_v42 = vmul.f32 %v9221_v1, %v9268_v47  ;;  %v2381_v36 = vmul.f32 %v9221_v1, %v9270_v24  ;;  %v2382_v33 = vmul.f32 %v9205_v58, %v2329_v35 }
 0x444   : > { %v2017_v52 = vsel %vm1088_vm3, %v12084_v28, %v12083_v56  ;;  %v6722_v50 = vunpack.i.l.bf16 %v12053_v60  ;;  %v2853_v2 = vpack.c.bf16 %v2007_v30, %v2003_v32  ;;  %v12085_v38 = vunpack.i.l.bf16 %v8773_v6  ;;  %v2345_v30 = vld [vmem:[#allocation2 + $0xf8] sm:$0xff]  ;;  %v2346_v56 = vld [vmem:[#allocation2 + $0x100] sm:$0xff] }
 0x445   : > { %v12086_v34 = vunpack.i.h.bf16 %v8914_v17  ;;  %v12087_v26 = vunpack.i.l.bf16 %v8914_v17  ;;  %v6733_v3 = vunpack.i.h.bf16 %v12088_v41  ;;  %v12089_v8 = vunpack.i.l.bf16 %v8806_v16  ;;  %v2335_v28 = vld [vmem:[#allocation2 + $0x98] sm:$0xff] }
 0x446   : > { %v1775_v53 = vsel %vm1335_vm7, %v6748_v46, %v12085_v38  ;;  %v12090_v61 = vunpack.i.h.bf16 %v8682_v14  ;;  %v6727_v20 = vunpack.i.l.bf16 %v8673_v21  ;;  %2955 = vmatpush.bf16.msra.mxu2 %v2853_v2  ;;  %v6944_v44 = vpack.i.bf16 %v2384_v39, %v2383_v22 }
 0x447   : > { %v2013_v37 = vsel %vm1088_vm3, %v12087_v26, %v12086_v34  ;;  %v2850_v23 = vpack.c.bf16 %v1779_v57, %v1775_v53  ;;  %v12091_v40 = vunpack.i.h.bf16 %v12054_v5  ;;  %v12092_v32 = vunpack.i.l.bf16 %v8897_v13  ;;  %v9364_v5 = vld [vmem:[#allocation2 + $0xd8] sm:$0xff] }
 0x448   : > { %v2859_v9 = vpack.c.bf16 %v2017_v52, %v2013_v37  ;;  %v1778_v45 = vsel %vm1335_vm7, %v12090_v61, %v12089_v8  ;;  %v12093_v35 = vunpack.i.h.bf16 %v8895_v43  ;;  %v6949_v31 = vpack.i.bf16 %v2386_v42, %v2385_v11  ;;  %6945 = vrot.lane.b32.xlu1 %v6944_v44, %s7471_s27  ;;  %v2340_v42 = vld [vmem:[#allocation2 + $0xc8] sm:$0xff] }
 0x449   : > { %v1771_v17 = vsel %vm1335_vm7, %v6737_v7, %v12091_v40  ;;  %3012 = vmatpush.bf16.msrb.mxu1 %v2850_v23  ;;  %v6939_v14 = vpack.i.bf16 %v2382_v33, %v2381_v36  ;;  %v1774_v49 = vsel %vm1335_vm7, %v6747_v55, %v6748_v46  ;;  %v12094_v39 = vunpack.i.h.bf16 %v12053_v60  ;;  %v2336_v55 = vld [vmem:[#allocation2 + $0xa0] sm:$0xff]  ;;  %v2341_v36 = vld [vmem:[#allocation2 + $0xd0] sm:$0xff] }
 0x44a   : > { %v2009_v57 = vsel %vm1088_vm3, %v12093_v35, %v12092_v32  ;;  %3066 = vmatpush.bf16.msra.mxu0 %v2859_v9  ;;  %v2849_v22 = vpack.c.bf16 %v1778_v45, %v1774_v49  ;;  %v12095_v43 = vunpack.i.h.bf16 %v8890_v27  ;;  %6950 = vrot.lane.b32.xlu2 %v6949_v31, %s7471_s27  ;;  %v1770_v38 = vsel %vm1335_vm7, %v6733_v3, %v6737_v7  ;;  %v9362_v35 = vld [vmem:[#allocation2 + $0xb0] sm:$0xff] }
 0x44b   : > { %v1767_v13 = vsel %vm1335_vm7, %v12094_v39, %v6727_v20  ;;  %v12096_v11 = vmov %v12094_v39  ;;  %6940 = vrot.lane.b32.xlu0 %v6939_v14, %s7471_s27  ;;  %v2398_v27 = vmul.f32 %v9141_v10, %v2345_v30  ;;  %v12097_v60 = vunpack.i.l.bf16 %v8798_v48  ;;  %v9378_v39 = vld [vmem:[#allocation2 + $0x110] sm:$0xff] }
 0x44c   : > { %v2005_v52 = vsel %vm1088_vm3, %v6777_v51, %v12095_v43  ;;  %v1766_v46 = vsel %vm1335_vm7, %v6722_v50, %v12096_v11  ;;  %v2846_v33 = vpack.c.bf16 %v1771_v17, %v1767_v13  ;;  %2956 = vmatpush.bf16.msra.mxu2 %v2849_v22  ;;  %v2399_v51 = vmul.f32 %v9150_v15, %v2346_v56  ;;  %v2339_v17 = vld [vmem:[#allocation2 + $0xb8] sm:$0xff]  ;;  %v2344_v43 = vld [vmem:[#allocation2 + $0xe8] sm:$0xff] }
 0x44d   : > { %v2855_v2 = vpack.c.bf16 %v2009_v57, %v2005_v52  ;;  %v12098_v50 = vunpack.i.h.bf16 %v8806_v16  ;;  %v2388_v34 = vmul.f32 %v9141_v10, %v2335_v28  ;;  %v2389_v26 = vmul.f32 %v9150_v15, %v2336_v55  ;;  %v2349_v13 = vld [vmem:[#allocation2 + $0x118] sm:$0xff] }
 0x44e   : > { %3013 = vmatpush.bf16.msrb.mxu1 %v2846_v33  ;;  %v2393_v37 = vmul.f32 %v9141_v10, %v2340_v42  ;;  %v2394_v7 = vmul.f32 %v9150_v15, %v2341_v36  ;;  %v2845_v41 = vpack.c.bf16 %v1770_v38, %v1766_v46  ;;  %v12099_v3 = vunpack.i.h.bf16 %v8773_v6  ;;  %v9354_v15 = vld [vmem:[#allocation2 + $0xa8] sm:$0xff] }
 0x44f   : > { %v1780_v53 = vsel %vm1335_vm7, %v12098_v50, %v12097_v60  ;;  %3067 = vmatpush.bf16.msra.mxu0 %v2855_v2  ;;  %v12100_v23 = vunpack.i.l.bf16 %v8773_v6  ;;  %v6959_v9 = vpack.i.bf16 %v2399_v51, %v2398_v27  ;;  %v12101_v8 = vunpack.i.l.bf16 %v8675_v18  ;;  %v2334_v18 = vld [vmem:[#allocation2 + $0x88] sm:$0xff]  ;;  %v6354_v2 = vld [vmem:[%s11730_s2 + $0x14] sm:$0xf0] }
 0x450   : > { %2957 = vmatpush.bf16.msra.mxu2 %v2845_v41  ;;  %v12102_v61 = vmov %v12091_v40  ;;  %v6964_v10 = vpack.i.bf16 %v2389_v26, %v2388_v34  ;;  %v6954_v44 = vpack.i.bf16 %v2394_v7, %v2393_v37  ;;  %v9356_v40 = vld [vmem:[#allocation2 + $0x108] sm:$0xff]  ;;  %v12103_v6 = vunpack.i.h.bf16 %v8673_v21 }
 0x451   : > { %v1776_v48 = vsel %vm1335_vm7, %v12100_v23, %v12099_v3  ;;  %v1772_v45 = vsel %vm1335_vm7, %v12102_v61, %v12101_v8  ;;  %6960 = vrot.lane.b32.xlu1 %v6959_v9, %s7471_s27  ;;  %v2390_v31 = vmul.f32 %v9196_v0, %v9354_v15  ;;  %v2400_v14 = vmul.f32 %v9196_v0, %v9356_v40  ;;  %v6290_v33 = vld [vmem:[%s11730_s2 + $0x8] sm:$0xf] }
 0x452   : > { %v2851_v16 = vpack.c.bf16 %v1780_v53, %v1776_v48  ;;  %v1768_v32 = vsel %vm1335_vm7, %v6727_v20, %v12103_v6  ;;  %6965 = vrot.lane.b32.xlu2 %v6964_v10, %s7471_s27  ;;  %v2391_v21 = vmul.f32 %v9221_v1, %v9362_v35  ;;  %v2392_v20 = vmul.f32 %v9205_v58, %v2339_v17  ;;  %v526_v7 = vld [vmem:[%s11731_s3 + $0x8] sm:$0xff] }
 0x453   : > { %6955 = vrot.lane.b32.xlu0 %v6954_v44, %s7471_s27  ;;  %v2847_v57 = vpack.c.bf16 %v1772_v45, %v1768_v32  ;;  %v2387_v49 = vmul.f32 %v9205_v58, %v2334_v18  ;;  %v2395_v30 = vmul.f32 %v9196_v0, %v9364_v5  ;;  %v6974_v56 = vpack.i.bf16 %v2390_v31, %v2400_v14  ;;  %v9435_v18 = vld [vmem:[%s11729_s1] ss:$8 sm:$0xf] }
 0x454   : > { %3068 = vmatpush.bf16.msra.mxu0 %v2851_v16  ;;  %v6979_v28 = vpack.i.bf16 %v2392_v20, %v2391_v21  ;;  %v2401_v52 = vmul.f32 %v9221_v1, %v9378_v39  ;;  %v2402_v11 = vmul.f32 %v9205_v58, %v2349_v13  ;;  %v2396_v0 = vmul.f32 %v9221_v1, %v8994_v62  ;;  %v6284_v1 = vld [vmem:[%s11730_s2 + $0x10] sm:$0xf0] }
 0x455   : > { %v6969_v22 = vpack.i.bf16 %v2395_v30, %v2387_v49  ;;  %v2397_v46 = vmul.f32 %v9205_v58, %v2344_v43  ;;  %v9399_v38 = vor.u32 %v6354_v2, %v6290_v33  ;;  %v6351_v58 = vld [vmem:[%s11730_s2 + $0x4] sm:$0xf]  ;;  %v11918_v37 = vmov 0  }
 0x456   : > { %v6989_v55 = vpack.i.bf16 %v2402_v11, %v2401_v52  ;;  %v9408_v27 = vor.u32 %v6351_v58, %v6284_v1  ;;  %6995 = vset.pattern.permute.xlu0 %v11918_v37  ;;  %6994 = vset.pattern.permute.xlu2 %v11918_v37  ;;  %v3176_v14 = vperm.slane %v9435_v18, 0  ;;  %v6487_v25 = vunpack.i.l.bf16 %v12189_v4 }
 0x457   : > { %v6984_v42 = vpack.i.bf16 %v2397_v46, %v2396_v0  ;;  %2958 = vmatmul.bf16.vlgmr.msra.gmra.mxu2 %v9399_v38  ;;  %7356 = vset.pattern.permute.xlu1 %v11918_v37  ;;  %v6352_v46 = vld [vmem:[%s11730_s2 + $0xc] sm:$0xf] }
 0x458   : > { %3069 = vmatpush.bf16.msra.mxu0 %v2847_v57  ;;  %2944 = vmatmul.bf16.vlgmr.msra.gmra.mxu1 %v9408_v27 }
 0x459   : > { %6975 = vrot.lane.b32.xlu1 %v6974_v56, %s7471_s27  ;;  %3000 = vmatmul.bf16.vlgmr.msrb.gmra.mxu0 %v9408_v27 }
 0x45a   : > { %6980 = vrot.lane.b32.xlu2 %v6979_v28, %s7471_s27 }
 0x45b   : > { %6970 = vrot.lane.b32.xlu0 %v6969_v22, %s7471_s27 }
 0x461   : > { %6990 = vrot.lane.b32.xlu1 %v6989_v55, %s7471_s27  ;;  %v6292_v55 = vld [vmem:[%s11730_s2 + $0x18] sm:$0xf0] }
 0x463   : > { %6985 = vrot.lane.b32.xlu0 %v6984_v42, %s7471_s27 }
 0x468   : > { %3014 = vmatmul.bf16.vlgmr.msrb.gmra.mxu1 %v9399_v38 }
 0x469   : > { %3070 = vmatmul.bf16.vlgmr.msra.gmra.mxu0 %v9399_v38  ;;  %3180 = vrot.lane.b32.xlu1 %v3176_v14, %s7471_s27 }
 0x46b   : > { %2896 = vperm.xlu0 %6995, %v526_v7  }
 0x48f   : > { %v9391_v36 = vpop.permute.xlu2 %6920 }
 0x490   : > { %v6923_v21 = vunpack.i.h.bf16 %v9391_v36  ;;  %v6922_v20 = vunpack.i.l.bf16 %v9391_v36 }
 0x492   : > { %v2493_v42 = vsel %vm595_vm1, %v6922_v20, %v6923_v21 }
 0x497   : > { %v9410_v51 = vpop.permute.xlu2 %6935 }
 0x498   : > { %v6937_v49 = vunpack.i.l.bf16 %v9410_v51 }
 0x4a4   : > { %v9418_v53 = vpop.permute.xlu2 %6950 }
 0x4a5   : > { %v6952_v33 = vunpack.i.l.bf16 %v9418_v53 }
 0x4ac   : > { %v6966_v3 = vpop.permute.xlu2 %6965 }
 0x4ad   : > { %v6968_v44 = vunpack.i.h.bf16 %v6966_v3  ;;  %v6967_v17 = vunpack.i.l.bf16 %v6966_v3  ;;  %v6938_v3 = vunpack.i.h.bf16 %v9410_v51 }
 0x4ae   : > { %v9414_v60 = vpop.permute.xlu1 %6930 }
 0x4af   : > { %v6933_v57 = vunpack.i.h.bf16 %v9414_v60  ;;  %v2505_v56 = vsel %vm595_vm1, %v6967_v17, %v6968_v44  ;;  %v2498_v20 = vsel %vm595_vm1, %v6937_v49, %v6938_v3 }
 0x4b0   : > { %v9416_v50 = vpop.permute.xlu0 %6925 }
 0x4b1   : > { %v2497_v11 = vsel %vm595_vm1, %v6933_v57, %v6937_v49  ;;  %v6927_v1 = vunpack.i.l.bf16 %v9416_v50 }
 0x4b2   : > { %v2877_v2 = vpack.c.bf16 %v2497_v11, %v2493_v42 }
 0x4b3   : > { %v2494_v51 = vsel %vm595_vm1, %v6923_v21, %v6927_v1 }
 0x4ba   : > { %v6946_v34 = vpop.permute.xlu1 %6945 }
 0x4bb   : > { %v6948_v9 = vunpack.i.h.bf16 %v6946_v34  ;;  %v6947_v8 = vunpack.i.l.bf16 %v6946_v34  ;;  %v9457_v34 = vor.u32 %v6352_v46, %v6292_v55  ;;  %v12108_v46 = vld [vmem:[#allocation48_spill] sm:$0xff] }
 0x4bd   : > { %v9420_v26 = vpop.permute.xlu0 %6940  ;;  %v2501_v31 = vsel %vm595_vm1, %v6947_v8, %v6948_v9 }
 0x4be   : > { %v2881_v13 = vpack.c.bf16 %v2505_v56, %v2501_v31  ;;  %v6942_v49 = vunpack.i.l.bf16 %v9420_v26 }
 0x4c3   : > { %v6961_v41 = vpop.permute.xlu1 %6960 }
 0x4c4   : > { %v6963_v23 = vunpack.i.h.bf16 %v6961_v41  ;;  %v6962_v48 = vunpack.i.l.bf16 %v6961_v41  ;;  %v3178_v41 = vperm.slane %v9435_v18, 2 }
 0x4c5   : > { %v6956_v16 = vpop.permute.xlu0 %6955 }
 0x4c6   : > { %v6958_v61 = vunpack.i.h.bf16 %v6956_v16  ;;  %v6957_v45 = vunpack.i.l.bf16 %v6956_v16  ;;  %v2513_v10 = vsel %vm595_vm1, %v6962_v48, %v6963_v23  ;;  %v12104_v48 = vld [vmem:[#allocation52_spill] sm:$0xff]  ;;  %v12105_v16 = vld [vmem:[#allocation51_spill] sm:$0xff]  ;;  %3184 = vrot.lane.b32.xlu1 %v3178_v41, %s7471_s27  ;;  %v6928_v41 = vunpack.i.h.bf16 %v9416_v50 }
 0x4c7   : > { %v12106_v8 = vpack.c.bf16 %v12104_v48, %v12105_v16  ;;  %v12112_v48 = vld [vmem:[#allocation41_spill] sm:$0xff] }
 0x4c8   : > { %v2509_v6 = vsel %vm595_vm1, %v6957_v45, %v6958_v61  ;;  %v6981_v45 = vpop.permute.xlu2 %6980 }
 0x4c9   : > { %v2885_v32 = vpack.c.bf16 %v2513_v10, %v2509_v6  ;;  %v6982_v56 = vunpack.i.l.bf16 %v6981_v45  ;;  %v6983_v21 = vunpack.i.h.bf16 %v6981_v45  ;;  %v12115_v45 = vld [vmem:[#allocation85_spill] sm:$0xff] }
 0x4cb   : > { %2969 = vmatpush.bf16.msra.mxu3 %v2885_v32  ;;  %v6976_v30 = vpop.permute.xlu1 %6975 }
 0x4cc   : > { %v6977_v28 = vunpack.i.l.bf16 %v6976_v30  ;;  %v6978_v43 = vunpack.i.h.bf16 %v6976_v30  ;;  %v6953_v30 = vunpack.i.h.bf16 %v9418_v53 }
 0x4cd   : > { %v6971_v22 = vpop.permute.xlu0 %6970 }
 0x4ce   : > { %v6973_v52 = vunpack.i.h.bf16 %v6971_v22  ;;  %v2514_v0 = vsel %vm595_vm1, %v6963_v23, %v6977_v28  ;;  %v2506_v7 = vsel %vm595_vm1, %v6968_v44, %v6978_v43  ;;  %v6972_v31 = vunpack.i.l.bf16 %v6971_v22 }
 0x4cf   : > { %2970 = vmatpush.bf16.msra.mxu3 %v2881_v13  ;;  %v2878_v22 = vpack.c.bf16 %v2498_v20, %v2494_v51  ;;  %v2507_v53 = vsel %vm595_vm1, %v6978_v43, %v6982_v56  ;;  %v6932_v43 = vunpack.i.l.bf16 %v9414_v60  ;;  %v2499_v51 = vsel %vm595_vm1, %v6938_v3, %v6942_v49 }
 0x4d0   : > { %v2510_v36 = vsel %vm595_vm1, %v6958_v61, %v6973_v52  ;;  %v2502_v61 = vsel %vm595_vm1, %v6948_v9, %v6952_v33 }
 0x4d1   : > { %v2886_v58 = vpack.c.bf16 %v2514_v0, %v2510_v36  ;;  %v2882_v6 = vpack.c.bf16 %v2506_v7, %v2502_v61  ;;  %v12107_v0 = vld [vmem:[#allocation49_spill] sm:$0xff]  ;;  %v12114_v61 = vld [vmem:[#allocation84_spill] sm:$0xff]  ;;  %v2496_v3 = vsel %vm595_vm1, %v6928_v41, %v6932_v43  ;;  %v12142_v43 = vld [vmem:[#allocation39_spill] sm:$0xff] }
 0x4d2   : > { %v12109_v55 = vpack.c.bf16 %v12107_v0, %v12108_v46  ;;  %v525_v36 = vld [vmem:[%s11731_s3] sm:$0xff] }
 0x4d3   : > { %2971 = vmatpush.bf16.msra.mxu3 %v2877_v2  ;;  %3025 = vmatpush.bf16.msrb.mxu2 %v2886_v58  ;;  %v6991_v23 = vpop.permute.xlu1 %6990  ;;  %v2504_v2 = vsel %vm595_vm1, %v6953_v30, %v6972_v31  ;;  %v12110_v58 = vld [vmem:[#allocation83_spill] sm:$0xff] }
 0x4d4   : > { %v6993_v10 = vunpack.i.h.bf16 %v6991_v23  ;;  %v6992_v17 = vunpack.i.l.bf16 %v6991_v23  ;;  %2891 = vperm.xlu2 %6994, %v525_v36   ;;  %v6718_v7 = vunpack.i.h.bf16 %v12110_v58  ;;  %v12111_v23 = vld [vmem:[#allocation42_spill] sm:$0xff] }
 0x4d5   : > { %v6986_v44 = vpop.permute.xlu0 %6985  ;;  %v12113_v16 = vpack.c.bf16 %v12111_v23, %v12112_v48  ;;  %v12138_v23 = vld [vmem:[#allocation72_spill] sm:$0xff]  ;;  %v2832_v48 = vpack.c.bf16 %v9270_v24, %v8967_v59 }
 0x4d6   : > { %v6988_v32 = vunpack.i.h.bf16 %v6986_v44  ;;  %v6987_v57 = vunpack.i.l.bf16 %v6986_v44  ;;  %6296 = vmatmul.msk.bf16.vlgmr.msra.gmra.mxu3 %vm2918_vm9, %v9457_v34  ;;  %v2515_v14 = vsel %vm595_vm1, %v6977_v28, %v6992_v17  ;;  %v2516_v9 = vsel %vm595_vm1, %v6992_v17, %v6993_v10 }
 0x4d7   : > { %2978 = vmatpush.bf16.msrb.mxu3 %v12106_v8  ;;  %3026 = vmatpush.bf16.msrb.mxu2 %v2882_v6  ;;  %v2503_v8 = vsel %vm595_vm1, %v6952_v33, %v6953_v30  ;;  %v2508_v17 = vsel %vm595_vm1, %v6982_v56, %v6983_v21  ;;  %v2839_v44 = vpack.c.bf16 %v9356_v40, %v9364_v5  ;;  %v12117_v6 = vld [vmem:[#allocation80_spill] sm:$0xff]  ;;  %v12118_v33 = vunpack.i.l.bf16 %v12110_v58  ;;  %v12122_v56 = vld [vmem:[#allocation81_spill] sm:$0xff]  ;;  %v12125_v21 = vld [vmem:[#allocation31_spill] sm:$0xff] }
 0x4d8   : > { %v2511_v13 = vsel %vm595_vm1, %v6973_v52, %v6987_v57  ;;  %v2512_v11 = vsel %vm595_vm1, %v6987_v57, %v6988_v32  ;;  %v6943_v52 = vunpack.i.h.bf16 %v9420_v26  ;;  %v12116_v26 = vpack.c.bf16 %v12114_v61, %v12115_v45  ;;  %v12136_v58 = vld [vmem:[#allocation44_spill] sm:$0xff]  ;;  %v12143_v45 = vld [vmem:[#allocation43_spill] sm:$0xff] }
 0x4d9   : > { %v2887_v42 = vpack.c.bf16 %v2515_v14, %v2511_v13  ;;  %v2888_v28 = vpack.c.bf16 %v2516_v9, %v2512_v11  ;;  %v2883_v10 = vpack.c.bf16 %v2507_v53, %v2503_v8  ;;  %v6707_v32 = vunpack.i.l.bf16 %v12117_v6  ;;  %v12119_v14 = vld [vmem:[#allocation36_spill] sm:$0xff]  ;;  %v12120_v9 = vld [vmem:[#allocation35_spill] sm:$0xff] }
 0x4da   : > { %v2884_v57 = vpack.c.bf16 %v2508_v17, %v2504_v2  ;;  %v2500_v60 = vsel %vm595_vm1, %v6942_v49, %v6943_v52  ;;  %v1765_v31 = vsel %vm1335_vm7, %v12118_v33, %v6718_v7  ;;  %v12121_v20 = vpack.c.bf16 %v12119_v14, %v12120_v9  ;;  %v12132_v49 = vld [vmem:[#allocation70_spill] sm:$0xff]  ;;  %v12133_v52 = vld [vmem:[#allocation20_spill] sm:$0xff]  ;;  %v12134_v2 = vld [vmem:[#allocation19_spill] sm:$0xff] }
 0x4db   : > { %2979 = vmatpush.bf16.msrb.mxu3 %v12109_v55  ;;  %3027 = vmatpush.bf16.msrb.mxu2 %v2878_v22  ;;  %v2495_v40 = vsel %vm595_vm1, %v6927_v1, %v6928_v41  ;;  %v2835_v30 = vpack.c.bf16 %v9354_v15, %v9250_v19  ;;  %v12123_v13 = vunpack.i.h.bf16 %v12122_v56  ;;  %v2880_v0 = vpack.c.bf16 %v2500_v60, %v2496_v3  ;;  %v12124_v55 = vld [vmem:[#allocation30_spill] sm:$0xff]  ;;  %v12127_v15 = vld [vmem:[#allocation24_spill] sm:$0xff]  ;;  %v12128_v22 = vld [vmem:[#allocation25_spill] sm:$0xff] }
 0x4dc   : > { %3081 = vmatpush.bf16.msra.mxu1 %v2887_v42  ;;  %3137 = vmatpush.bf16.msrb.mxu0 %v2888_v28  ;;  %v2879_v5 = vpack.c.bf16 %v2499_v51, %v2495_v40  ;;  %v12126_v50 = vpack.c.bf16 %v12124_v55, %v12125_v21  ;;  %v2831_v1 = vpack.c.bf16 %v9187_v63, %v9189_v29  ;;  %v12130_v28 = vld [vmem:[#allocation54_spill] sm:$0xff]  ;;  %v3177_v29 = vperm.slane %v9435_v18, 1  ;;  %v12150_v33 = vld [vmem:[#allocation67_spill] sm:$0xff]  ;;  %v12157_v56 = vld [vmem:[#allocation32_spill] sm:$0xff] }
 0x4dd   : > { %v1761_v11 = vsel %vm1335_vm7, %v12123_v13, %v6707_v32  ;;  %v2840_v19 = vpack.c.bf16 %v9378_v39, %v8994_v62  ;;  %v12129_v42 = vpack.c.bf16 %v12127_v15, %v12128_v22  ;;  %v6592_v36 = vunpack.i.l.bf16 %v12130_v28  ;;  %v12131_v62 = vld [vmem:[#allocation50_spill] sm:$0xff]  ;;  %v12146_v32 = vld [vmem:[#allocation16_spill] sm:$0xff] }
 0x4de   : > { %6297 = vmatmul.msk.bf16.vlgmr.msrb.gmra.mxu2 %vm2918_vm9, %v9457_v34  ;;  %v2844_v46 = vpack.c.bf16 %v1765_v31, %v1761_v11  ;;  %v2836_v63 = vpack.c.bf16 %v9362_v35, %v9268_v47  ;;  %v6578_v39 = vunpack.i.h.bf16 %v12131_v62  ;;  %v6693_v53 = vunpack.i.h.bf16 %v12132_v49  ;;  %3182 = vrot.lane.b32.xlu2 %v3177_v29, %s7471_s27  ;;  %v12139_v47 = vld [vmem:[#allocation71_spill] sm:$0xff]  ;;  %v12151_v31 = vld [vmem:[#allocation66_spill] sm:$0xff]  ;;  %v12158_v11 = vld [vmem:[#allocation37_spill] sm:$0xff] }
 0x4df   : > { %2980 = vmatpush.bf16.msrb.mxu3 %v12113_v16  ;;  %3048 = vmatpush.bf16.msra.mxu2 %v12116_v26  ;;  %v12137_v7 = vunpack.i.h.bf16 %v12136_v58  ;;  %v12140_v35 = vpack.c.bf16 %v12138_v23, %v12139_v47  ;;  %v12141_v16 = vld [vmem:[#allocation69_spill] sm:$0xff]  ;;  %v6558_v61 = vunpack.i.h.bf16 %v12142_v43  ;;  %v6567_v26 = vunpack.i.l.bf16 %v12143_v45  ;;  %v12153_v9 = vld [vmem:[#allocation46_spill] sm:$0xff]  ;;  %v12170_v47 = vld [vmem:[#allocation64_spill] sm:$0xff] }
 0x4e0   : > { %3082 = vmatpush.bf16.msra.mxu1 %v2883_v10  ;;  %3138 = vmatpush.bf16.msrb.mxu0 %v2884_v57  ;;  %v6682_v8 = vunpack.i.l.bf16 %v12141_v16  ;;  %v12144_v10 = vunpack.i.l.bf16 %v12131_v62  ;;  %v12147_v57 = vld [vmem:[#allocation15_spill] sm:$0xff]  ;;  %v12149_v59 = vunpack.i.l.bf16 %v12132_v49  ;;  %v12152_v14 = vpack.c.bf16 %v12150_v33, %v12151_v31  ;;  %v12163_v29 = vld [vmem:[#allocation38_spill] sm:$0xff]  ;;  %v12172_v16 = vld [vmem:[#allocation33_spill] sm:$0xff] }
 0x4e1   : > { %v1232_v41 = vsel %vm1217_vm6, %v12137_v7, %v6592_v36  ;;  %v12148_v51 = vpack.c.bf16 %v12146_v32, %v12147_v57  ;;  %v6538_v13 = vunpack.i.h.bf16 %v12157_v56  ;;  %v12159_v55 = vunpack.i.l.bf16 %v12142_v43  ;;  %v12178_v31 = vld [vmem:[#allocation56_spill] sm:$0xff] }
 0x4e2   : > { %v1228_v17 = vsel %vm1217_vm6, %v12144_v10, %v6578_v39  ;;  %v1488_v24 = vsel %vm1464_vm8, %v12149_v59, %v6693_v53  ;;  %v6527_v49 = vunpack.i.l.bf16 %v12163_v29  ;;  %v12164_v53 = vld [vmem:[#allocation63_spill] sm:$0xff] }
 0x4e3   : > { %2981 = vmatpush.bf16.msrb.mxu3 %v12121_v20  ;;  %3049 = vmatpush.bf16.msra.mxu2 %v2839_v44  ;;  %v12145_v44 = vld [vmem:[#allocation65_spill] sm:$0xff]  ;;  %v2811_v60 = vpack.c.bf16 %v1232_v41, %v1228_v17  ;;  %v12154_v20 = vunpack.i.h.bf16 %v12153_v9  ;;  %v1220_v21 = vsel %vm1217_vm6, %v12159_v55, %v6558_v61  ;;  %v12169_v41 = vld [vmem:[#allocation59_spill] sm:$0xff]  ;;  %v12173_v17 = vunpack.i.l.bf16 %v12157_v56 }
 0x4e4   : > { %3083 = vmatpush.bf16.msra.mxu1 %v2879_v5  ;;  %3139 = vmatpush.bf16.msrb.mxu0 %v2880_v0  ;;  %v6668_v6 = vunpack.i.h.bf16 %v12145_v44  ;;  %v12155_v5 = vld [vmem:[#allocation68_spill] sm:$0xff]  ;;  %v6547_v0 = vunpack.i.l.bf16 %v12158_v11  ;;  %v6643_v23 = vunpack.i.h.bf16 %v12169_v41 }
 0x4e5   : > { %v1224_v40 = vsel %vm1217_vm6, %v12154_v20, %v6567_v26  ;;  %v12156_v3 = vunpack.i.h.bf16 %v12155_v5  ;;  %v12181_v20 = vld [vmem:[#allocation27_spill] sm:$0xff] }
 0x4e6   : > { %v2807_v22 = vpack.c.bf16 %v1224_v40, %v1220_v21  ;;  %v12182_v40 = vunpack.i.h.bf16 %v12181_v20  ;;  %v12185_v21 = vld [vmem:[#allocation29_spill] sm:$0xff] }
 0x4e7   : > { %2982 = vmatpush.bf16.msrb.mxu3 %v12126_v50  ;;  %3050 = vmatpush.bf16.msra.mxu2 %v2835_v30  ;;  %v1484_v30 = vsel %vm1464_vm8, %v12156_v3, %v6682_v8  ;;  %v12160_v50 = vld [vmem:[#allocation61_spill] sm:$0xff]  ;;  %v6518_v8 = vunpack.i.h.bf16 %v12172_v16 }
 0x4e8   : > { %3104 = vmatpush.bf16.msrb.mxu1 %v2844_v46  ;;  %6299 = vmatmul.msk.bf16.vlgmr.msrb.gmra.mxu0 %vm2918_vm9, %v9457_v34  ;;  %v2828_v46 = vpack.c.bf16 %v1488_v24, %v1484_v30  ;;  %v12177_v24 = vld [vmem:[#allocation34_spill] sm:$0xff]  ;;  %v985_v5 = vsel %vm970_vm5, %v12182_v40, %v6527_v49  ;;  %v12183_v3 = vld [vmem:[#allocation53_spill] sm:$0xff] }
 0x4e9   : > { %6298 = vmatmul.msk.bf16.vlgmr.msra.gmra.mxu1 %vm2918_vm9, %v9457_v34  ;;  %v12135_v34 = vpack.c.bf16 %v12133_v52, %v12134_v2  ;;  %v12165_v52 = vld [vmem:[#allocation62_spill] sm:$0xff]  ;;  %v6507_v33 = vunpack.i.l.bf16 %v12177_v24  ;;  %v6618_v30 = vunpack.i.h.bf16 %v12183_v3 }
 0x4ea   : > { %v12166_v2 = vpack.c.bf16 %v12164_v53, %v12165_v52  ;;  %v9734_v62 = vld [vmem:[%s11729_s1 + $0x2] ss:$8 sm:$0xf] }
 0x4eb   : > { %2983 = vmatpush.bf16.msrb.mxu3 %v12129_v42  ;;  %3051 = vmatpush.bf16.msra.mxu2 %v2831_v1  ;;  %v6657_v1 = vunpack.i.l.bf16 %v12160_v50  ;;  %v12162_v42 = vunpack.i.l.bf16 %v12145_v44  ;;  %v989_v44 = vsel %vm970_vm5, %v12173_v17, %v6538_v13  ;;  %v6498_v50 = vunpack.i.h.bf16 %v12185_v21 }
 0x4ec   : > { %3105 = vmatpush.bf16.msrb.mxu1 %v2840_v19  ;;  %v12161_v19 = vld [vmem:[#allocation60_spill] sm:$0xff] }
 0x4ed   : > { %v6632_v15 = vunpack.i.l.bf16 %v12161_v19  ;;  %v12186_v19 = vunpack.i.l.bf16 %v12172_v16 }
 0x4ef   : > { %2984 = vmatpush.bf16.msrb.mxu3 %v12135_v34  ;;  %3052 = vmatpush.bf16.msra.mxu2 %v12140_v35  ;;  %v12167_v34 = vld [vmem:[#allocation40_spill] sm:$0xff]  ;;  %v12171_v35 = vunpack.i.h.bf16 %v12170_v47  ;;  %v12196_v47 = vld [vmem:[#allocation23_spill] sm:$0xff] }
 0x4f0   : > { %3106 = vmatpush.bf16.msrb.mxu1 %v2836_v63  ;;  %v1480_v63 = vsel %vm1464_vm8, %v12162_v42, %v6668_v6  ;;  %v12168_v58 = vunpack.i.h.bf16 %v12167_v34  ;;  %v12174_v6 = vld [vmem:[#allocation57_spill] sm:$0xff]  ;;  %v12187_v42 = vld [vmem:[#allocation47_spill] sm:$0xff]  ;;  %v12192_v34 = vld [vmem:[#allocation86_spill] sm:$0xff]  ;;  %v12205_v40 = vunpack.i.l.bf16 %v12196_v47 }
 0x4f1   : > { %v6607_v32 = vunpack.i.l.bf16 %v12174_v6  ;;  %v12198_v6 = vld [vmem:[#allocation21_spill] sm:$0xff] }
 0x4f2   : > { %v993_v7 = vsel %vm970_vm5, %v12168_v58, %v6547_v0  ;;  %v12193_v58 = vld [vmem:[#allocation82_spill] sm:$0xff] }
 0x4f3   : > { %2985 = vmatpush.bf16.msrb.mxu3 %v12148_v51  ;;  %3053 = vmatpush.bf16.msra.mxu2 %v12152_v14  ;;  %v2803_v57 = vpack.c.bf16 %v993_v7, %v989_v44  ;;  %v12175_v51 = vld [vmem:[#allocation58_spill] sm:$0xff]  ;;  %v12179_v14 = vld [vmem:[#allocation55_spill] sm:$0xff]  ;;  %v12194_v7 = vpack.c.bf16 %v12192_v34, %v12193_v58  ;;  %v3179_v34 = vperm.slane %v9435_v18, 3 }
 0x4f4   : > { %3107 = vmatpush.bf16.msrb.mxu1 %v2832_v48  ;;  %v1476_v48 = vsel %vm1464_vm8, %v12171_v35, %v6657_v1  ;;  %v12180_v9 = vpack.c.bf16 %v12178_v31, %v12179_v14  ;;  %v6478_v35 = vunpack.i.h.bf16 %v12196_v47  ;;  %v12202_v31 = vld [vmem:[#allocation73_spill] sm:$0xff]  ;;  %v12217_v18 = vld [vmem:[#allocation79_spill] sm:$0xff]  ;;  %v3371_v47 = vperm.slane %v9734_v62, 3 }
 0x4f5   : > { %v2824_v10 = vpack.c.bf16 %v1480_v63, %v1476_v48  ;;  %v12188_v63 = vunpack.i.h.bf16 %v12187_v42  ;;  %v12210_v42 = vld [vmem:[#allocation78_spill] sm:$0xff]  ;;  %3186 = vrot.lane.b32.xlu2 %v3179_v34, %s7471_s27 }
 0x4f6   : > { %2986 = vmatmul.bf16.vlgmr.msrb.gmra.mxu3 %v9055_v12  ;;  %v12227_v34 = vld [vmem:[#allocation90_spill] sm:$0xff] }
 0x4f7   : > { %3034 = vmatpush.bf16.msra.mxu3 %v2811_v60  ;;  %3054 = vmatpush.bf16.msra.mxu2 %v12166_v2  ;;  %v12176_v60 = vunpack.i.h.bf16 %v12175_v51  ;;  %v1237_v53 = vsel %vm1217_vm6, %v12188_v63, %v6607_v32  ;;  %v6467_v32 = vunpack.i.l.bf16 %v12198_v6 }
 0x4f8   : > { %3108 = vmatpush.bf16.msrb.mxu1 %v2828_v46  ;;  %v12184_v46 = vunpack.i.l.bf16 %v12169_v41  ;;  %v12195_v41 = vunpack.i.l.bf16 %v12183_v3 }
 0x4f9   : > { %v1468_v59 = vsel %vm1464_vm8, %v12176_v60, %v6632_v15  ;;  %v981_v15 = vsel %vm970_vm5, %v12186_v19, %v6518_v8 }
 0x4fa   : > { %v1472_v55 = vsel %vm1464_vm8, %v12184_v46, %v6643_v23  ;;  %v1241_v23 = vsel %vm1217_vm6, %v12195_v41, %v6618_v30  ;;  %v12206_v30 = vld [vmem:[#allocation14_spill] sm:$0xff]  ;;  %v12214_v41 = vld [vmem:[#allocation13_spill] sm:$0xff] }
 0x4fb   : > { %3035 = vmatpush.bf16.msra.mxu3 %v2807_v22  ;;  %3055 = vmatpush.bf16.msra.mxu2 %v12180_v9  ;;  %v2820_v1 = vpack.c.bf16 %v1472_v55, %v1468_v59  ;;  %v2799_v22 = vpack.c.bf16 %v985_v5, %v981_v15  ;;  %v2816_v48 = vpack.c.bf16 %v1241_v23, %v1237_v53  ;;  %v12201_v59 = vld [vmem:[#allocation74_spill] sm:$0xff]  ;;  %v12204_v9 = vld [vmem:[#allocation17_spill] sm:$0xff]  ;;  %v6447_v46 = vunpack.i.l.bf16 %v12206_v30  ;;  %v12212_v53 = vld [vmem:[#allocation11_spill] sm:$0xff] }
 0x4fc   : > { %3109 = vmatpush.bf16.msrb.mxu1 %v2824_v10  ;;  %v12197_v10 = vunpack.i.l.bf16 %v12185_v21  ;;  %v12203_v14 = vpack.c.bf16 %v12201_v59, %v12202_v31  ;;  %v6458_v20 = vunpack.i.h.bf16 %v12204_v9  ;;  %v742_v5 = vsel %vm490_vm4, %v12205_v40, %v6478_v35  ;;  %v12207_v55 = vld [vmem:[#allocation18_spill] sm:$0xff]  ;;  %v12235_v21 = vld [vmem:[#allocation5_spill] sm:$0xff] }
 0x4fd   : > { %v6593_v15 = vunpack.i.h.bf16 %v12130_v28  ;;  %v12215_v23 = vunpack.i.h.bf16 %v12214_v41  ;;  %v12220_v59 = vunpack.i.l.bf16 %v12212_v53 }
 0x4fe   : > { %3056 = vmatmul.bf16.vlgmr.msra.gmra.mxu2 %v9408_v27  ;;  %v973_v17 = vsel %vm970_vm5, %v12197_v10, %v6498_v50  ;;  %v6568_v10 = vunpack.i.h.bf16 %v12143_v45  ;;  %v12225_v45 = vld [vmem:[#allocation6_spill] sm:$0xff] }
 0x4ff   : > { %3036 = vmatpush.bf16.msra.mxu3 %v2803_v57  ;;  %3118 = vmatpush.bf16.msrb.mxu2 %v2876_v54  ;;  %v12190_v54 = vld [vmem:[#allocation28_spill] sm:$0xff]  ;;  %v12199_v57 = vld [vmem:[#allocation22_spill] sm:$0xff] }
 0x500   : > { %3110 = vmatpush.bf16.msrb.mxu1 %v2820_v1  ;;  %v12191_v52 = vunpack.i.h.bf16 %v12190_v54  ;;  %v12200_v51 = vunpack.i.h.bf16 %v12199_v57  ;;  %v12208_v1 = vunpack.i.h.bf16 %v12207_v55  ;;  %v6438_v54 = vunpack.i.h.bf16 %v12212_v53  ;;  %v12222_v55 = vld [vmem:[#allocation76_spill] sm:$0xff] }
 0x501   : > { %v1233_v57 = vsel %vm1217_vm6, %v6592_v36, %v6593_v15  ;;  %v12221_v36 = vld [vmem:[#allocation7_spill] sm:$0xff]  ;;  %v1225_v15 = vsel %vm1217_vm6, %v6567_v26, %v6568_v10  ;;  %v6422_v26 = vunpack.i.l.bf16 %v12225_v45  ;;  %v6508_v10 = vunpack.i.h.bf16 %v12177_v24 }
 0x502   : > { %v977_v2 = vsel %vm970_vm5, %v12191_v52, %v6507_v33  ;;  %v746_v60 = vsel %vm490_vm4, %v12200_v51, %v6487_v25  ;;  %v738_v19 = vsel %vm490_vm4, %v12208_v1, %v6467_v32  ;;  %v12218_v51 = vld [vmem:[#allocation77_spill] sm:$0xff]  ;;  %v726_v31 = vsel %vm490_vm4, %v12220_v59, %v6438_v54  ;;  %v12223_v1 = vld [vmem:[#allocation75_spill] sm:$0xff] }
 0x503   : > { %3037 = vmatpush.bf16.msra.mxu3 %v2799_v22  ;;  %3119 = vmatpush.bf16.msrb.mxu2 %v12194_v7  ;;  %v2795_v44 = vpack.c.bf16 %v977_v2, %v973_v17  ;;  %v2791_v3 = vpack.c.bf16 %v746_v60, %v742_v5  ;;  %v12209_v22 = vld [vmem:[#allocation92_spill] sm:$0xff]  ;;  %v12216_v17 = vld [vmem:[#allocation45_spill] sm:$0xff]  ;;  %v12219_v60 = vpack.c.bf16 %v12217_v18, %v12218_v51  ;;  %v6427_v5 = vunpack.i.l.bf16 %v12221_v36 }
 0x504   : > { %3111 = vmatpush.bf16.msrb.mxu1 %v2816_v48  ;;  %v12211_v63 = vpack.c.bf16 %v12209_v22, %v12210_v42  ;;  %v9696_v2 = vld [vmem:[%s11729_s1 + $0x1] ss:$8 sm:$0xf]  ;;  %v730_v48 = vsel %vm490_vm4, %v12215_v23, %v6447_v46  ;;  %v3370_v22 = vperm.slane %v9734_v62, 2  ;;  %v990_v43 = vsel %vm970_vm5, %v6538_v13, %v6422_v26 }
 0x505   : > { %v3274_v7 = vperm.slane %v9696_v2, 2  ;;  %v2783_v28 = vpack.c.bf16 %v730_v48, %v726_v31  ;;  %v1221_v42 = vsel %vm1217_vm6, %v6558_v61, %v6427_v5  ;;  %v3275_v41 = vperm.slane %v9696_v2, 3  ;;  %v12229_v23 = vld [vmem:[#allocation12_spill] sm:$0xff] }
 0x506   : > { %v6417_v48 = vunpack.i.l.bf16 %v12229_v23  ;;  %v6488_v51 = vunpack.i.h.bf16 %v12189_v4  ;;  %v6468_v59 = vunpack.i.h.bf16 %v12198_v6  ;;  %v3273_v23 = vperm.slane %v9696_v2, 1 }
 0x507   : > { %3038 = vmatpush.bf16.msra.mxu3 %v2795_v44  ;;  %3120 = vmatpush.bf16.msrb.mxu2 %v12203_v14  ;;  %v6582_v44 = vunpack.i.l.bf16 %v12216_v17  ;;  %v12230_v17 = vld [vmem:[#allocation89_spill] sm:$0xff] }
 0x508   : > { %3112 = vmatmul.bf16.vlgmr.msrb.gmra.mxu1 %v9408_v27  ;;  %v12213_v27 = vunpack.i.l.bf16 %v12204_v9  ;;  %3280 = vrot.lane.b32.xlu1 %v3274_v7, %s7472_s29  ;;  %v982_v56 = vsel %vm970_vm5, %v6518_v8, %v6417_v48  ;;  %v3368_v8 = vperm.slane %v9734_v62, 0  ;;  %v747_v31 = vsel %vm490_vm4, %v6487_v25, %v6488_v51  ;;  %v2931_v9 = vpop.f32.mrf.mxu0 }
 0x509   : > { %v1229_v14 = vsel %vm1217_vm6, %v6578_v39, %v6582_v44  ;;  %v3272_v39 = vperm.slane %v9696_v2, 0  ;;  %v12231_v44 = vld [vmem:[#allocation88_spill] sm:$0xff] }
 0x50a   : > { %v734_v52 = vsel %vm490_vm4, %v12213_v27, %v6458_v20  ;;  %v2812_v40 = vpack.c.bf16 %v1233_v57, %v1229_v14  ;;  %v6528_v27 = vunpack.i.h.bf16 %v12163_v29  ;;  %v12232_v57 = vpack.c.bf16 %v12230_v17, %v12231_v44 }
 0x50b   : > { %3039 = vmatpush.bf16.msra.mxu3 %v2791_v3  ;;  %3121 = vmatpush.bf16.msrb.mxu2 %v12211_v63  ;;  %v2787_v58 = vpack.c.bf16 %v738_v19, %v734_v52  ;;  %v6548_v3 = vunpack.i.h.bf16 %v12158_v11  ;;  %v12224_v19 = vpack.c.bf16 %v12222_v55, %v12223_v1  ;;  %v2808_v63 = vpack.c.bf16 %v1225_v15, %v1221_v42  ;;  %v12226_v52 = vld [vmem:[#allocation91_spill] sm:$0xff]  ;;  %v2959_v55 = vpop.f32.mrf.mxu2  ;;  %v9813_v42 = vpop.permute.xlu1 %3180 }
 0x50c   : > { %3276 = vrot.lane.b32.xlu2 %v3272_v39, %s7472_s29  ;;  %v986_v11 = vsel %vm970_vm5, %v6527_v49, %v6528_v27  ;;  %v978_v29 = vsel %vm970_vm5, %v6507_v33, %v6508_v10  ;;  %v6448_v14 = vunpack.i.h.bf16 %v12206_v30 }
 0x50d   : > { %v994_v7 = vsel %vm970_vm5, %v6547_v0, %v6548_v3  ;;  %v2800_v13 = vpack.c.bf16 %v986_v11, %v982_v56  ;;  %v12233_v0 = vld [vmem:[#allocation10_spill] sm:$0xff]  ;;  %v2945_v3 = vpop.f32.mrf.mxu1 }
 0x50e   : > { %v2804_v61 = vpack.c.bf16 %v994_v7, %v990_v43  ;;  %v6412_v18 = vunpack.i.l.bf16 %v12233_v0  ;;  %v731_v36 = vsel %vm490_vm4, %v6447_v46, %v6448_v14  ;;  %v9808_v46 = vpop.permute.xlu0 %2896 }
 0x50f   : > { %3040 = vmatpush.bf16.msra.mxu3 %v2787_v58  ;;  %3122 = vmatpush.bf16.msrb.mxu2 %v12219_v60  ;;  %v12228_v58 = vpack.c.bf16 %v12226_v52, %v12227_v34  ;;  %v12234_v60 = vld [vmem:[#allocation8_spill] sm:$0xff] }
 0x510   : > { %3376 = vrot.lane.b32.xlu1 %v3370_v22, %s7473_s14  ;;  %v974_v49 = vsel %vm970_vm5, %v6498_v50, %v6412_v18  ;;  %v6402_v50 = vunpack.i.l.bf16 %v12235_v21  ;;  %v2933_v1 = vpop.f32.mrf.mxu0  ;;  %v9811_v22 = vld [vmem:[#allocation2] sm:$0xff] }
 0x511   : > { %v2796_v16 = vpack.c.bf16 %v978_v29, %v974_v49  ;;  %v3196_v27 = vmul.f32 %v9813_v42, %v9811_v22 }
 0x512   : > { %v735_v4 = vsel %vm490_vm4, %v6458_v20, %v6402_v50 }
 0x513   : > { %3041 = vmatpush.bf16.msra.mxu3 %v2783_v28  ;;  %3123 = vmatpush.bf16.msrb.mxu2 %v12224_v19  ;;  %v739_v28 = vsel %vm490_vm4, %v6467_v32, %v6468_v59  ;;  %v2961_v52 = vpop.f32.mrf.mxu2 }
 0x514   : > { %3282 = vrot.lane.b32.xlu2 %v3275_v41, %s7472_s29  ;;  %v2788_v25 = vpack.c.bf16 %v739_v28, %v735_v4 }
 0x515   : > { %v2947_v15 = vpop.f32.mrf.mxu1 }
 0x516   : > { %3042 = vmatmul.bf16.vlgmr.msra.gmra.mxu3 %v9055_v12 }
 0x517   : > { %3090 = vmatpush.bf16.msrb.mxu3 %v2812_v40  ;;  %3124 = vmatpush.bf16.msrb.mxu2 %v12228_v58 }
 0x518   : > { %v3001_v48 = vpop.f32.mrf.mxu0 }
 0x51b   : > { %3091 = vmatpush.bf16.msrb.mxu3 %v2808_v63  ;;  %3125 = vmatpush.bf16.msrb.mxu2 %v12232_v57 }
 0x51c   : > { %3372 = vrot.lane.b32.xlu2 %v3368_v8, %s7473_s14 }
 0x51d   : > { %v3015_v17 = vpop.f32.mrf.mxu1 }
 0x51e   : > { %3126 = vmatmul.bf16.vlgmr.msrb.gmra.mxu2 %v9399_v38  ;;  %v6407_v38 = vunpack.i.l.bf16 %v12234_v60 }
 0x51f   : > { %3092 = vmatpush.bf16.msrb.mxu3 %v2804_v61 }
 0x520   : > { %v743_v24 = vsel %vm490_vm4, %v6478_v35, %v6407_v38  ;;  %v12236_v35 = vld [vmem:[#allocation9_spill] sm:$0xff]  ;;  %v3003_v18 = vpop.f32.mrf.mxu0 }
 0x521   : > { %v2792_v33 = vpack.c.bf16 %v747_v31, %v743_v24  ;;  %v6397_v40 = vunpack.i.l.bf16 %v12236_v35 }
 0x523   : > { %3093 = vmatpush.bf16.msrb.mxu3 %v2800_v13  ;;  %v727_v6 = vsel %vm490_vm4, %v6438_v54, %v6397_v40  ;;  %v2934_v54 = vadd.f32 %v2933_v1, %v9808_v46 }
 0x524   : > { %v2784_v32 = vpack.c.bf16 %v731_v36, %v727_v6  ;;  %3378 = vrot.lane.b32.xlu2 %v3371_v47, %s7473_s14 }
 0x525   : > { %v2948_v45 = vadd.f32 %v2947_v15, %v2934_v54  ;;  %v3017_v49 = vpop.f32.mrf.mxu1 }
 0x527   : > { %3094 = vmatpush.bf16.msrb.mxu3 %v2796_v16  ;;  %v2962_v58 = vadd.f32 %v2961_v52, %v2948_v45 }
 0x528   : > { %v3071_v28 = vpop.f32.mrf.mxu0 }
 0x52b   : > { %3095 = vmatpush.bf16.msrb.mxu3 %v2792_v33 }
 0x52e   : > { %v9805_v20 = vpop.permute.xlu2 %2891 }
 0x52f   : > { %3096 = vmatpush.bf16.msrb.mxu3 %v2788_v25  ;;  %v2932_v5 = vadd.f32 %v2931_v9, %v9805_v20 }
 0x531   : > { %v2946_v30 = vadd.f32 %v2945_v3, %v2932_v5 }
 0x533   : > { %3097 = vmatpush.bf16.msrb.mxu3 %v2784_v32  ;;  %v2960_v53 = vadd.f32 %v2959_v55, %v2946_v30  ;;  %v3073_v30 = vpop.f32.mrf.mxu0 }
 0x536   : > { %3098 = vmatmul.bf16.vlgmr.msrb.gmra.mxu3 %v9055_v12 }
 0x538   : > { %v3183_v19 = vpop.permute.xlu2 %3182  ;;  %v3185_v60 = vpop.permute.xlu1 %3184 }
 0x539   : > { %v3188_v63 = vsel %vm595_vm1, %v9813_v42, %v3183_v19  ;;  %v3189_v31 = vsel %vm595_vm1, %v3183_v19, %v3185_v60 }
 0x54f   : > { %v9842_v40 = vpop.permute.xlu2 %3186 }
 0x550   : > { %v9846_v6 = vsel %vm595_vm1, %v3185_v60, %v9842_v40 }
 0x559   : > { %v2973_v39 = vpop.f32.mrf.mxu3 }
 0x55a   : > { %v2974_v12 = vadd.f32 %v2973_v39, %v2960_v53 }
 0x55c   : > { %v9817_v26 = vmax.f32 %v2974_v12, 0.0 }
 0x55e   : > { %3156 = vst [vmem:[#allocation2 + $0x8] sm:$0xff] %v9817_v26  ;;  %v3197_v34 = vmul.f32 %v3188_v63, %v9817_v26 }
 0x560   : > { %v6996_v7 = vpack.i.bf16 %v3197_v34, %v3196_v27 }
 0x561   : > { %v2975_v43 = vpop.f32.mrf.mxu3  ;;  %v3029_v57 = vpop.f32.mrf.mxu2 }
 0x562   : > { %v2976_v61 = vadd.f32 %v2975_v43, %v2962_v58  ;;  %6997 = vrot.lane.b32.xlu0 %v6996_v7, %s7475_s21 }
 0x564   : > { %v9824_v41 = vmax.f32 %v2976_v61, 0.0 }
 0x565   : > { %v3141_v58 = vpop.f32.mrf.mxu0 }
 0x566   : > { %3160 = vst [vmem:[#allocation2 + $0x38] sm:$0xff] %v9824_v41  ;;  %v3202_v24 = vmul.f32 %v3188_v63, %v9824_v41  ;;  %v3085_v25 = vpop.f32.mrf.mxu1  ;;  %v3277_v63 = vpop.permute.xlu2 %3276 }
 0x569   : > { %v3031_v16 = vpop.f32.mrf.mxu2 }
 0x56a   : > { %3278 = vrot.lane.b32.xlu0 %v3273_v23, %s7472_s29 }
 0x56e   : > { %v3087_v54 = vpop.f32.mrf.mxu1  ;;  %v9860_v43 = vpop.permute.xlu2 %3282 }
 0x579   : > { %v2987_v10 = vpop.f32.mrf.mxu3 }
 0x57a   : > { %v2988_v44 = vadd.f32 %v2987_v10, %v9805_v20 }
 0x57c   : > { %v3002_v11 = vadd.f32 %v3001_v48, %v2988_v44  ;;  %v9862_v48 = vld [vmem:[#allocation2 + $0x30] sm:$0xff] }
 0x57e   : > { %v3016_v56 = vadd.f32 %v3015_v17, %v3002_v11 }
 0x580   : > { %v3030_v13 = vadd.f32 %v3029_v57, %v3016_v56  ;;  %v3201_v56 = vmul.f32 %v9813_v42, %v9862_v48 }
 0x581   : > { %v2989_v0 = vpop.f32.mrf.mxu3  ;;  %v3057_v50 = vpop.f32.mrf.mxu2 }
 0x582   : > { %v9830_v51 = vmax.f32 %v3030_v13, 0.0  ;;  %v2990_v29 = vadd.f32 %v2989_v0, %v9808_v46  ;;  %v3143_v0 = vpop.f32.mrf.mxu0 }
 0x584   : > { %3157 = vst [vmem:[#allocation2 + $0x10] sm:$0xff] %v9830_v51  ;;  %v3004_v2 = vadd.f32 %v3003_v18, %v2990_v29  ;;  %v3198_v1 = vmul.f32 %v3189_v31, %v9830_v51 }
 0x585   : > { %v3113_v45 = vpop.f32.mrf.mxu1 }
 0x586   : > { %v3018_v8 = vadd.f32 %v3017_v49, %v3004_v2  ;;  %v3373_v49 = vpop.permute.xlu2 %3372 }
 0x588   : > { %v3032_v38 = vadd.f32 %v3031_v16, %v3018_v8  ;;  %v3297_v16 = vmul.f32 %v3277_v63, %v9862_v48 }
 0x589   : > { %v3059_v9 = vpop.f32.mrf.mxu2 }
 0x58a   : > { %v9834_v59 = vmax.f32 %v3032_v38, 0.0  ;;  %v3393_v38 = vmul.f32 %v3373_v49, %v9862_v48 }
 0x58c   : > { %3161 = vst [vmem:[#allocation2 + $0x40] sm:$0xff] %v9834_v59  ;;  %v3203_v33 = vmul.f32 %v3189_v31, %v9834_v59 }
 0x58d   : > { %v3115_v17 = vpop.f32.mrf.mxu1 }
 0x58e   : > { %v7001_v21 = vpack.i.bf16 %v3203_v33, %v3202_v24  ;;  %v9880_v60 = vpop.permute.xlu2 %3378  ;;  %v9889_v33 = vld [vmem:[%s11729_s1 + $0x3] ss:$8 sm:$0xf] }
 0x590   : > { %7002 = vrot.lane.b32.xlu0 %v7001_v21, %s7475_s21 }
 0x599   : > { %v3043_v14 = vpop.f32.mrf.mxu3 }
 0x59a   : > { %v3044_v4 = vadd.f32 %v3043_v14, %v9805_v20  ;;  %v3281_v14 = vpop.permute.xlu1 %3280 }
 0x59c   : > { %v3058_v47 = vadd.f32 %v3057_v50, %v3044_v4  ;;  %v3464_v50 = vperm.slane %v9889_v33, 0  ;;  %v3292_v4 = vmul.f32 %v3277_v63, %v9811_v22 }
 0x59e   : > { %v3072_v35 = vadd.f32 %v3071_v28, %v3058_v47  ;;  %v3286_v28 = vsel %vm841_vm2, %v3281_v14, %v9860_v43  ;;  %v3467_v47 = vperm.slane %v9889_v33, 3 }
 0x5a0   : > { %v3086_v36 = vadd.f32 %v3085_v25, %v3072_v35 }
 0x5a1   : > { %v3045_v32 = vpop.f32.mrf.mxu3  ;;  %v3127_v52 = vpop.f32.mrf.mxu2 }
 0x5a2   : > { %v9848_v5 = vmax.f32 %v3086_v36, 0.0  ;;  %v3046_v3 = vadd.f32 %v3045_v32, %v9808_v46 }
 0x5a4   : > { %3158 = vst [vmem:[#allocation2 + $0x18] sm:$0xff] %v9848_v5  ;;  %v3060_v55 = vadd.f32 %v3059_v9, %v3046_v3  ;;  %v3199_v53 = vmul.f32 %v9846_v6, %v9848_v5  ;;  %v3295_v32 = vmul.f32 %v3286_v28, %v9848_v5 }
 0x5a6   : > { %v3074_v19 = vadd.f32 %v3073_v30, %v3060_v55  ;;  %v7021_v15 = vpack.i.bf16 %v3199_v53, %v3198_v1  ;;  %v9908_v1 = vld [vmem:[%s11729_s1 + $0x7] ss:$8 sm:$0xf] }
 0x5a8   : > { %v3088_v39 = vadd.f32 %v3087_v54, %v3074_v19  ;;  %7022 = vrot.lane.b32.xlu1 %v7021_v15, %s7475_s21  ;;  %v3769_v19 = vperm.slane %v9908_v1, 1 }
 0x5a9   : > { %v3129_v11 = vpop.f32.mrf.mxu2 }
 0x5aa   : > { %v9856_v12 = vmax.f32 %v3088_v39, 0.0  ;;  %v3770_v39 = vperm.slane %v9908_v1, 2 }
 0x5ac   : > { %3162 = vst [vmem:[#allocation2 + $0x48] sm:$0xff] %v9856_v12 }
 0x5b9   : > { %v3099_v27 = vpop.f32.mrf.mxu3 }
 0x5ba   : > { %v3100_v34 = vadd.f32 %v3099_v27, %v9805_v20 }
 0x5bc   : > { %v3114_v7 = vadd.f32 %v3113_v45, %v3100_v34  ;;  %v9923_v45 = vld [vmem:[%s11729_s1 + $0x6] ss:$8 sm:$0xf] }
 0x5bd   : > { %v3674_v27 = vperm.slane %v9923_v45, 2 }
 0x5be   : > { %v3128_v61 = vadd.f32 %v3127_v52, %v3114_v7  ;;  %v3675_v52 = vperm.slane %v9923_v45, 3  ;;  %v3377_v7 = vpop.permute.xlu1 %3376 }
 0x5c0   : > { %v3142_v23 = vadd.f32 %v3141_v58, %v3128_v61  ;;  %v3382_v61 = vsel %vm1088_vm3, %v3377_v7, %v9880_v60 }
 0x5c1   : > { %v3101_v10 = vpop.f32.mrf.mxu3 }
 0x5c2   : > { %v9864_v44 = vmax.f32 %v3142_v23, 0.0  ;;  %v3102_v57 = vadd.f32 %v3101_v10, %v9808_v46  ;;  %v3388_v23 = vmul.f32 %v3373_v49, %v9811_v22 }
 0x5c4   : > { %3159 = vst [vmem:[#allocation2 + $0x20] sm:$0xff] %v9864_v44  ;;  %v3116_v20 = vadd.f32 %v3115_v17, %v3102_v57  ;;  %v3200_v13 = vmul.f32 %v9842_v40, %v9864_v44  ;;  %v3296_v42 = vmul.f32 %v9860_v43, %v9864_v44  ;;  %v3392_v31 = vmul.f32 %v9880_v60, %v9864_v44 }
 0x5c6   : > { %v3130_v18 = vadd.f32 %v3129_v11, %v3116_v20  ;;  %v7036_v29 = vpack.i.bf16 %v3201_v56, %v3200_v13  ;;  %v7041_v8 = vpack.i.bf16 %v3297_v16, %v3296_v42  ;;  %v7046_v24 = vpack.i.bf16 %v3393_v38, %v3392_v31 }
 0x5c7   : > { %v3391_v11 = vmul.f32 %v3382_v61, %v9848_v5  ;;  %v3465_v31 = vperm.slane %v9889_v33, 1 }
 0x5c8   : > { %v3144_v2 = vadd.f32 %v3143_v0, %v3130_v18  ;;  %7037 = vrot.lane.b32.xlu2 %v7036_v29, %s7475_s21 }
 0x5ca   : > { %v9874_v46 = vmax.f32 %v3144_v2, 0.0  ;;  %v3204_v2 = vmul.f32 %v9846_v6, %v9856_v12 }
 0x5cc   : > { %3163 = vst [vmem:[#allocation2 + $0x50] sm:$0xff] %v9874_v46  ;;  %v3301_v38 = vmul.f32 %v9860_v43, %v9874_v46  ;;  %v3397_v6 = vmul.f32 %v9880_v60, %v9874_v46  ;;  %v3768_v43 = vperm.slane %v9908_v1, 0  ;;  %v3673_v60 = vperm.slane %v9923_v45, 1 }
 0x5d0   : > { %7042 = vrot.lane.b32.xlu2 %v7041_v8, %s7476_s18  ;;  %v3300_v8 = vmul.f32 %v3286_v28, %v9856_v12  ;;  %v9970_v28 = vld [vmem:[%s11729_s1 + $0x20] ss:$8 sm:$0xf] }
 0x5d4   : > { %v9891_v21 = vpop.permute.xlu0 %6997 }
 0x5d8   : > { %7047 = vrot.lane.b32.xlu2 %v7046_v24, %s7477_s19  ;;  %v7061_v24 = vpack.i.bf16 %v3301_v38, %v3300_v8 }
 0x5dc   : > { %v3279_v25 = vpop.permute.xlu0 %3278 }
 0x5dd   : > { %v3285_v35 = vsel %vm841_vm2, %v3279_v25, %v3281_v14  ;;  %v3284_v36 = vsel %vm841_vm2, %v3277_v63, %v3279_v25  ;;  %v3369_v63 = vperm.slane %v9734_v62, 1  ;;  %v3466_v14 = vperm.slane %v9889_v33, 2  ;;  %v6303_v33 = vld [vmem:[%s11729_s1 + $0x5] ss:$8 sm:$0xf] }
 0x5de   : > { %v3294_v9 = vmul.f32 %v3285_v35, %v9830_v51  ;;  %v3293_v3 = vmul.f32 %v3284_v36, %v9817_v26  ;;  %v3299_v53 = vmul.f32 %v3285_v35, %v9834_v59  ;;  %v3298_v54 = vmul.f32 %v3284_v36, %v9824_v41 }
 0x5df   : > { %v3577_v25 = vperm.slane %v6303_v33, 1  ;;  %v3864_v35 = vperm.slane %v9970_v28, 0  ;;  %v3579_v38 = vperm.slane %v6303_v33, 3 }
 0x5e0   : > { %3468 = vrot.lane.b32.xlu2 %v3464_v50, %s12237_s24  ;;  %v7026_v30 = vpack.i.bf16 %v3295_v32, %v3294_v9  ;;  %v7006_v55 = vpack.i.bf16 %v3293_v3, %v3292_v4  ;;  %v7011_v15 = vpack.i.bf16 %v3299_v53, %v3298_v54  ;;  %v3865_v4 = vperm.slane %v9970_v28, 1 }
 0x5e2   : > { %7027 = vrot.lane.b32.xlu1 %v7026_v30, %s7476_s18  ;;  %7007 = vrot.lane.b32.xlu0 %v7006_v55, %s7476_s18 }
 0x5e8   : > { %3474 = vrot.lane.b32.xlu2 %v3467_v47, %s12237_s24  ;;  %v3771_v47 = vperm.slane %v9908_v1, 3 }
 0x5ea   : > { %7012 = vrot.lane.b32.xlu0 %v7011_v15, %s7476_s18 }
 0x5f0   : > { %3774 = vrot.lane.b32.xlu2 %v3769_v19, %s7476_s18 }
 0x5f2   : > { %3374 = vrot.lane.b32.xlu0 %v3369_v63, %s7473_s14 }
 0x5f8   : > { %3776 = vrot.lane.b32.xlu2 %v3770_v39, %s7476_s18 }
 0x600   : > { %3680 = vrot.lane.b32.xlu2 %v3674_v27, %s7477_s19 }
 0x602   : > { %v9930_v34 = vpop.permute.xlu0 %7002 }
 0x608   : > { %3682 = vrot.lane.b32.xlu2 %v3675_v52, %s7477_s19 }
 0x610   : > { %3870 = vrot.lane.b32.xlu2 %v3865_v4, %s7475_s21 }
 0x61a   : > { %v9987_v32 = vpop.permute.xlu1 %7022 }
 0x622   : > { %v9985_v36 = vpop.permute.xlu2 %7037 }
 0x62a   : > { %v9989_v9 = vpop.permute.xlu2 %7042 }
 0x632   : > { %v9997_v53 = vpop.permute.xlu2 %7047 }
 0x63a   : > { %v10003_v19 = vpop.permute.xlu2 %3468 }
 0x63b   : > { %v3484_v15 = vmul.f32 %v10003_v19, %v9811_v22  ;;  %v3672_v22 = vperm.slane %v9923_v45, 0 }
 0x654   : > { %v9932_v62 = vpop.permute.xlu0 %7007  ;;  %v9991_v3 = vpop.permute.xlu1 %7027 }
 0x65c   : > { %v9934_v58 = vpop.permute.xlu0 %7012 }
 0x664   : > { %v3375_v10 = vpop.permute.xlu0 %3374 }
 0x665   : > { %v3381_v17 = vsel %vm1088_vm3, %v3375_v10, %v3377_v7  ;;  %v3380_v57 = vsel %vm1088_vm3, %v3373_v49, %v3375_v10  ;;  %v3205_v49 = vmul.f32 %v9842_v40, %v9874_v46  ;;  %v3396_v40 = vmul.f32 %v3382_v61, %v9856_v12  ;;  %v10018_v61 = vpop.permute.xlu2 %3474 }
 0x666   : > { %v3390_v56 = vmul.f32 %v3381_v17, %v9830_v51  ;;  %v3389_v20 = vmul.f32 %v3380_v57, %v9817_v26  ;;  %v3395_v18 = vmul.f32 %v3381_v17, %v9834_v59  ;;  %v3394_v29 = vmul.f32 %v3380_v57, %v9824_v41 }
 0x667   : > { %v7056_v42 = vpack.i.bf16 %v3205_v49, %v3204_v2  ;;  %v7066_v50 = vpack.i.bf16 %v3397_v6, %v3396_v40  ;;  %v3576_v57 = vperm.slane %v6303_v33, 0 }
 0x668   : > { %v7031_v13 = vpack.i.bf16 %v3391_v11, %v3390_v56  ;;  %v7016_v0 = vpack.i.bf16 %v3389_v20, %v3388_v23  ;;  %v7051_v16 = vpack.i.bf16 %v3395_v18, %v3394_v29  ;;  %v3578_v29 = vperm.slane %v6303_v33, 2 }
 0x66a   : > { %7032 = vrot.lane.b32.xlu1 %v7031_v13, %s7477_s19  ;;  %7017 = vrot.lane.b32.xlu0 %v7016_v0, %s7477_s19 }
 0x66d   : > { %v3775_v10 = vpop.permute.xlu2 %3774 }
 0x672   : > { %7057 = vrot.lane.b32.xlu1 %v7056_v42, %s7475_s21  ;;  %7052 = vrot.lane.b32.xlu0 %v7051_v16, %s7477_s19 }
 0x675   : > { %v10031_v0 = vpop.permute.xlu2 %3776 }
 0x676   : > { %v3781_v16 = vsel %vm970_vm5, %v3775_v10, %v10031_v0 }
 0x677   : > { %v3790_v42 = vmul.f32 %v3781_v16, %v9848_v5  ;;  %v3795_v8 = vmul.f32 %v3781_v16, %v9856_v12 }
 0x67a   : > { %7062 = vrot.lane.b32.xlu1 %v7061_v24, %s7476_s18  ;;  %3470 = vrot.lane.b32.xlu0 %v3465_v31, %s12237_s24  ;;  %v7096_v31 = vpack.i.bf16 %v3795_v8, %v3790_v42  ;;  %v3866_v24 = vperm.slane %v9970_v28, 2 }
 0x67d   : > { %v3681_v40 = vpop.permute.xlu2 %3680 }
 0x682   : > { %7067 = vrot.lane.b32.xlu1 %v7066_v50, %s7477_s19 }
 0x685   : > { %v10046_v50 = vpop.permute.xlu2 %3682 }
 0x68a   : > { %3472 = vrot.lane.b32.xlu1 %v3466_v14, %s12237_s24 }
 0x68d   : > { %v10050_v4 = vpop.permute.xlu2 %3870 }
 0x692   : > { %3772 = vrot.lane.b32.xlu1 %v3768_v43, %s7476_s18 }
 0x69a   : > { %3678 = vrot.lane.b32.xlu1 %v3673_v60, %s7477_s19 }
 0x6a2   : > { %3582 = vrot.lane.b32.xlu1 %v3577_v25, %s12238_s13 }
 0x6aa   : > { %3778 = vrot.lane.b32.xlu1 %v3771_v47, %s7476_s18 }
 0x6b2   : > { %3868 = vrot.lane.b32.xlu1 %v3864_v35, %s7475_s21 }
 0x6dc   : > { %v9993_v30 = vpop.permute.xlu1 %7032  ;;  %v9995_v55 = vpop.permute.xlu0 %7017 }
 0x6e4   : > { %v9999_v1 = vpop.permute.xlu1 %7057  ;;  %v10001_v54 = vpop.permute.xlu0 %7052 }
 0x6ec   : > { %v10007_v39 = vpop.permute.xlu1 %7062  ;;  %v10009_v63 = vpop.permute.xlu0 %3470 }
 0x6ed   : > { %v10014_v27 = vsel %vm1335_vm7, %v10003_v19, %v10009_v63 }
 0x6ee   : > { %v3485_v52 = vmul.f32 %v10014_v27, %v9817_v26 }
 0x6f0   : > { %v7071_v7 = vpack.i.bf16 %v3485_v52, %v3484_v15 }
 0x6f2   : > { %7072 = vrot.lane.b32.xlu0 %v7071_v7, %s12238_s13 }
 0x6f4   : > { %v10021_v23 = vpop.permute.xlu1 %7067 }
 0x6fa   : > { %3676 = vrot.lane.b32.xlu0 %v3672_v22, %s7477_s19 }
 0x6fc   : > { %v10025_v17 = vpop.permute.xlu1 %3472 }
 0x702   : > { %3580 = vrot.lane.b32.xlu0 %v3576_v57, %s12238_s13 }
 0x704   : > { %v3773_v11 = vpop.permute.xlu1 %3772 }
 0x705   : > { %v3780_v56 = vsel %vm970_vm5, %v3773_v11, %v3775_v10  ;;  %v3788_v20 = vmul.f32 %v3773_v11, %v9817_v26  ;;  %v3793_v13 = vmul.f32 %v3773_v11, %v9824_v41 }
 0x706   : > { %v3789_v18 = vmul.f32 %v3780_v56, %v9830_v51  ;;  %v3794_v45 = vmul.f32 %v3780_v56, %v9834_v59 }
 0x708   : > { %v7081_v2 = vpack.i.bf16 %v3794_v45, %v3793_v13  ;;  %v7076_v49 = vpack.i.bf16 %v3789_v18, %v3788_v20 }
 0x70a   : > { %7082 = vrot.lane.b32.xlu2 %v7081_v2, %s7472_s29  ;;  %7077 = vrot.lane.b32.xlu1 %v7076_v49, %s7472_s29 }
 0x70b   : > { %3584 = vrot.lane.b32.xlu0 %v3578_v29, %s12238_s13  ;;  %v3867_v29 = vperm.slane %v9970_v28, 3  ;;  %v3490_v28 = vmul.f32 %v10014_v27, %v9824_v41 }
 0x70c   : > { %v3679_v6 = vpop.permute.xlu1 %3678 }
 0x70d   : > { %v3685_v42 = vsel %vm1217_vm6, %v3679_v6, %v3681_v40 }
 0x712   : > { %7097 = vrot.lane.b32.xlu2 %v7096_v31, %s7472_s29 }
 0x713   : > { %3586 = vrot.lane.b32.xlu0 %v3579_v38, %s12238_s13 }
 0x714   : > { %v3583_v14 = vpop.permute.xlu1 %3582 }
 0x71b   : > { %3872 = vrot.lane.b32.xlu0 %v3866_v24, %s7475_s21  ;;  %v3489_v24 = vmul.f32 %v10003_v19, %v9862_v48 }
 0x71c   : > { %v10052_v60 = vpop.permute.xlu1 %3778 }
 0x724   : > { %v10061_v57 = vpop.permute.xlu1 %3868 }
 0x764   : > { %v10048_v43 = vpop.permute.xlu0 %7072  ;;  %v7083_v25 = vpop.permute.xlu2 %7082 }
 0x765   : > { %v7085_v8 = vunpack.i.h.bf16 %v7083_v25  ;;  %v7084_v38 = vunpack.i.l.bf16 %v7083_v25 }
 0x76c   : > { %v3677_v33 = vpop.permute.xlu0 %3676  ;;  %v10069_v2 = vpop.permute.xlu2 %7097 }
 0x76d   : > { %v3684_v47 = vsel %vm1217_vm6, %v3677_v33, %v3679_v6  ;;  %v3692_v35 = vmul.f32 %v3677_v33, %v9817_v26  ;;  %v3697_v52 = vmul.f32 %v3677_v33, %v9824_v41  ;;  %v7100_v31 = vunpack.i.h.bf16 %v10069_v2 }
 0x76e   : > { %v3693_v15 = vmul.f32 %v3684_v47, %v9830_v51  ;;  %v3698_v7 = vmul.f32 %v3684_v47, %v9834_v59  ;;  %v3694_v33 = vmul.f32 %v3685_v42, %v9848_v5  ;;  %v3699_v6 = vmul.f32 %v3685_v42, %v9856_v12 }
 0x76f   : > { %v7099_v25 = vunpack.i.l.bf16 %v10069_v2 }
 0x770   : > { %v7091_v22 = vpack.i.bf16 %v3698_v7, %v3697_v52  ;;  %v7086_v10 = vpack.i.bf16 %v3693_v15, %v3692_v35  ;;  %v3832_v7 = vsel %vm841_vm2, %v7084_v38, %v7085_v8 }
 0x772   : > { %7092 = vrot.lane.b32.xlu1 %v7091_v22, %s7473_s14  ;;  %7087 = vrot.lane.b32.xlu0 %v7086_v10, %s7473_s14  ;;  %v3833_v22 = vsel %vm841_vm2, %v7085_v8, %v7100_v31 }
 0x774   : > { %v3581_v11 = vpop.permute.xlu0 %3580 }
 0x775   : > { %v3588_v56 = vsel %vm1464_vm8, %v3581_v11, %v3583_v14  ;;  %v3596_v20 = vmul.f32 %v3581_v11, %v9817_v26  ;;  %v3601_v13 = vmul.f32 %v3581_v11, %v9824_v41 }
 0x776   : > { %v3597_v18 = vmul.f32 %v3588_v56, %v9830_v51  ;;  %v3602_v45 = vmul.f32 %v3588_v56, %v9834_v59 }
 0x778   : > { %v7106_v49 = vpack.i.bf16 %v3602_v45, %v3601_v13  ;;  %v7101_v16 = vpack.i.bf16 %v3597_v18, %v3596_v20  ;;  %v7121_v13 = vpack.i.bf16 %v3490_v28, %v3489_v24  ;;  %v7111_v18 = vpack.i.bf16 %v3699_v6, %v3694_v33 }
 0x77a   : > { %3874 = vrot.lane.b32.xlu0 %v3867_v29, %s7475_s21  ;;  %7107 = vrot.lane.b32.xlu2 %v7106_v49, %s12237_s24  ;;  %v10094_v29 = vld [vmem:[#allocation2 + $0x28] sm:$0xff]  ;;  %v3782_v49 = vsel %vm970_vm5, %v10031_v0, %v10052_v60 }
 0x77b   : > { %7102 = vrot.lane.b32.xlu1 %v7101_v16, %s12237_s24  ;;  %v10104_v16 = vld [vmem:[#allocation2 + $0x58] sm:$0xff]  ;;  %v3696_v8 = vmul.f32 %v10046_v50, %v10094_v29  ;;  %v3792_v0 = vmul.f32 %v10052_v60, %v10094_v29  ;;  %v3796_v24 = vmul.f32 %v3782_v49, %v9874_v46 }
 0x77c   : > { %v7078_v47 = vpop.permute.xlu1 %7077  ;;  %v3797_v28 = vmul.f32 %v10052_v60, %v10104_v16  ;;  %v3701_v60 = vmul.f32 %v10046_v50, %v10104_v16 }
 0x77d   : > { %v7080_v35 = vunpack.i.h.bf16 %v7078_v47  ;;  %v7079_v15 = vunpack.i.l.bf16 %v7078_v47  ;;  %v3585_v52 = vpop.permute.xlu0 %3584 }
 0x77e   : > { %v3589_v48 = vsel %vm1464_vm8, %v3583_v14, %v3585_v52  ;;  %v3686_v14 = vsel %vm1217_vm6, %v3681_v40, %v10046_v50  ;;  %v3791_v40 = vmul.f32 %v3782_v49, %v9864_v44  ;;  %v3876_v50 = vsel %vm490_vm4, %v10061_v57, %v10050_v4 }
 0x77f   : > { %v3829_v19 = vsel %vm841_vm2, %v7080_v35, %v7099_v25  ;;  %v3828_v27 = vsel %vm841_vm2, %v7079_v15, %v7080_v35  ;;  %v3598_v10 = vmul.f32 %v3589_v48, %v9848_v5  ;;  %v3603_v11 = vmul.f32 %v3589_v48, %v9856_v12 }
 0x780   : > { %v4048_v56 = vpack.c.bf16 %v3832_v7, %v3828_v27  ;;  %v4049_v20 = vpack.c.bf16 %v3833_v22, %v3829_v19  ;;  %v3695_v42 = vmul.f32 %v3686_v14, %v9864_v44  ;;  %v7126_v33 = vpack.i.bf16 %v3792_v0, %v3791_v40 }
 0x781   : > { %v7116_v45 = vpack.i.bf16 %v3603_v11, %v3598_v10  ;;  %v7131_v35 = vpack.i.bf16 %v3797_v28, %v3796_v24  ;;  %v3477_v15 = vsel %vm1335_vm7, %v10009_v63, %v10025_v17  ;;  %v3700_v7 = vmul.f32 %v3686_v14, %v9874_v46 }
 0x782   : > { %4070 = vmatpush.bf16.msra.mxu3 %v4048_v56  ;;  %4096 = vmatpush.bf16.msra.mxu1 %v4049_v20  ;;  %v7136_v47 = vpack.i.bf16 %v3696_v8, %v3695_v42  ;;  %v3486_v48 = vmul.f32 %v3477_v15, %v9830_v51  ;;  %v3491_v19 = vmul.f32 %v3477_v15, %v9834_v59 }
 0x783   : > { %7112 = vrot.lane.b32.xlu0 %v7111_v18, %s7473_s14  ;;  %7122 = vrot.lane.b32.xlu2 %v7121_v13, %s12238_s13  ;;  %v7141_v27 = vpack.i.bf16 %v3701_v60, %v3700_v7  ;;  %v3890_v14 = vmul.f32 %v3876_v50, %v9834_v59  ;;  %v3885_v49 = vmul.f32 %v3876_v50, %v9830_v51 }
 0x784   : > { %7117 = vrot.lane.b32.xlu1 %v7116_v45, %s12237_s24  ;;  %v7146_v11 = vpack.i.bf16 %v3491_v19, %v3486_v48  ;;  %v3884_v59 = vmul.f32 %v10061_v57, %v9817_v26  ;;  %v3889_v51 = vmul.f32 %v10061_v57, %v9824_v41  ;;  %v3493_v24 = vmul.f32 %v10018_v61, %v9874_v46  ;;  %v3155_v26 = vld [vmem:[%s11733_s5] sm:$0xff] }
 0x785   : > { %v3587_v38 = vpop.permute.xlu0 %3586 }
 0x786   : > { %v3590_v6 = vsel %vm1464_vm8, %v3585_v52, %v3587_v38  ;;  %v3600_v52 = vmul.f32 %v10094_v29, %v3587_v38  ;;  %v3605_v13 = vmul.f32 %v10104_v16, %v3587_v38 }
 0x787   : > { %v3599_v22 = vmul.f32 %v3590_v6, %v9864_v44  ;;  %v3604_v20 = vmul.f32 %v3590_v6, %v9874_v46 }
 0x789   : > { %v7151_v10 = vpack.i.bf16 %v3600_v52, %v3599_v22  ;;  %v7156_v8 = vpack.i.bf16 %v3605_v13, %v3604_v20 }
 0x78b   : > { %7127 = vrot.lane.b32.xlu0 %v7126_v33, %s7472_s29  ;;  %7137 = vrot.lane.b32.xlu2 %v7136_v47, %s7473_s14  ;;  %v7181_v33 = vpack.i.bf16 %v3889_v51, %v3884_v59 }
 0x78c   : > { %7132 = vrot.lane.b32.xlu1 %v7131_v35, %s7472_s29 }
 0x78d   : > { %v3873_v63 = vpop.permute.xlu0 %3872 }
 0x78e   : > { %v3877_v56 = vsel %vm490_vm4, %v10050_v4, %v3873_v63  ;;  %v3478_v4 = vsel %vm1335_vm7, %v10025_v17, %v10018_v61  ;;  %v3488_v17 = vmul.f32 %v10018_v61, %v9864_v44 }
 0x78f   : > { %v3891_v18 = vmul.f32 %v3877_v56, %v9856_v12  ;;  %v3886_v45 = vmul.f32 %v3877_v56, %v9848_v5  ;;  %v3487_v0 = vmul.f32 %v3478_v4, %v9848_v5  ;;  %v3492_v38 = vmul.f32 %v3478_v4, %v9856_v12  ;;  %v10170_v12 = vld [vmem:[%s11729_s1] ss:$8 sm:$0xf] }
 0x790   : > { %v4193_v61 = vperm.slane %v10170_v12, 2 }
 0x791   : > { %v7166_v42 = vpack.i.bf16 %v3891_v18, %v3890_v14  ;;  %v7161_v40 = vpack.i.bf16 %v3886_v45, %v3885_v49  ;;  %v7171_v28 = vpack.i.bf16 %v3488_v17, %v3487_v0  ;;  %v7176_v47 = vpack.i.bf16 %v3493_v24, %v3492_v38  ;;  %v3548_v38 = vld [vmem:[#allocation2 + $0x8] sm:$0xff] }
 0x792   : > { %v7075_v17 = vunpack.i.h.bf16 %v10048_v43  ;;  %v7074_v24 = vunpack.i.l.bf16 %v10048_v43 }
 0x793   : > { %7142 = vrot.lane.b32.xlu0 %v7141_v27, %s7473_s14  ;;  %7152 = vrot.lane.b32.xlu2 %v7151_v10, %s12237_s24  ;;  %v10181_v27 = vld [vmem:[%s11729_s1 + $0x6] ss:$8 sm:$0xf] }
 0x794   : > { %7147 = vrot.lane.b32.xlu1 %v7146_v11, %s12238_s13  ;;  %v4494_v10 = vperm.slane %v10181_v27, 0 }
 0x79b   : > { %7157 = vrot.lane.b32.xlu0 %v7156_v8, %s12237_s24  ;;  %7167 = vrot.lane.b32.xlu2 %v7166_v42, %s7471_s27 }
 0x79c   : > { %7162 = vrot.lane.b32.xlu1 %v7161_v40, %s7471_s27 }
 0x7a3   : > { %7172 = vrot.lane.b32.xlu0 %v7171_v28, %s12238_s13  ;;  %7182 = vrot.lane.b32.xlu2 %v7181_v33, %s7471_s27  ;;  %v7050_v28 = vunpack.i.h.bf16 %v9997_v53 }
 0x7a4   : > { %7177 = vrot.lane.b32.xlu1 %v7176_v47, %s12238_s13  ;;  %v4036_v47 = vpack.c.bf16 %v9824_v41, %v3548_v38  ;;  %v7020_v41 = vunpack.i.h.bf16 %v9995_v55 }
 0x7ab   : > { %4058 = vperm.xlu2 %6994, %v3155_v26   ;;  %v4192_v26 = vperm.slane %v10170_v12, 1 }
 0x7b3   : > { %4199 = vrot.lane.b32.xlu2 %v4193_v61, %s7471_s27 }
 0x7bb   : > { %4498 = vrot.lane.b32.xlu2 %v4494_v10, %s7477_s19  ;;  %v7019_v10 = vunpack.i.l.bf16 %v9995_v55 }
 0x7d4   : > { %v10165_v5 = vpop.permute.xlu2 %7107 }
 0x7d5   : > { %v7110_v11 = vunpack.i.h.bf16 %v10165_v5  ;;  %v7109_v56 = vunpack.i.l.bf16 %v10165_v5  ;;  %v7054_v5 = vunpack.i.l.bf16 %v10001_v54 }
 0x7d7   : > { %v3640_v59 = vsel %vm1335_vm7, %v7109_v56, %v7110_v11  ;;  %v3524_v56 = vsel %vm1464_vm8, %v7074_v24, %v7075_v17 }
 0x7dd   : > { %v10173_v57 = vpop.permute.xlu2 %7122 }
 0x7e4   : > { %v7093_v6 = vpop.permute.xlu1 %7092  ;;  %v7088_v35 = vpop.permute.xlu0 %7087 }
 0x7e5   : > { %v7095_v15 = vunpack.i.h.bf16 %v7093_v6  ;;  %v7094_v7 = vunpack.i.l.bf16 %v7093_v6  ;;  %v7090_v60 = vunpack.i.h.bf16 %v7088_v35  ;;  %v7089_v22 = vunpack.i.l.bf16 %v7088_v35  ;;  %v10186_v50 = vpop.permute.xlu2 %7137 }
 0x7e7   : > { %v3732_v52 = vsel %vm1088_vm3, %v7089_v22, %v7090_v60  ;;  %v3736_v48 = vsel %vm1088_vm3, %v7094_v7, %v7095_v15 }
 0x7e8   : > { %v4044_v19 = vpack.c.bf16 %v3736_v48, %v3732_v52 }
 0x7ea   : > { %4071 = vmatpush.bf16.msra.mxu3 %v4044_v19  ;;  %v4191_v19 = vperm.slane %v10170_v12, 0 }
 0x7ec   : > { %v3875_v20 = vpop.permute.xlu0 %3874 }
 0x7ed   : > { %v7103_v13 = vpop.permute.xlu1 %7102  ;;  %v3878_v18 = vsel %vm490_vm4, %v3873_v63, %v3875_v20  ;;  %v3888_v45 = vmul.f32 %v3875_v20, %v10094_v29  ;;  %v3893_v14 = vmul.f32 %v3875_v20, %v10104_v16  ;;  %v10199_v63 = vld [vmem:[%s11729_s1 + $0x7] ss:$8 sm:$0xf]  ;;  %v10215_v61 = vpop.permute.xlu2 %7152 }
 0x7ee   : > { %v7105_v49 = vunpack.i.h.bf16 %v7103_v13  ;;  %v7104_v42 = vunpack.i.l.bf16 %v7103_v13  ;;  %v3887_v8 = vmul.f32 %v3878_v18, %v9864_v44  ;;  %v3892_v4 = vmul.f32 %v3878_v18, %v9874_v46 }
 0x7ef   : > { %v7191_v40 = vpack.i.bf16 %v3893_v14, %v3888_v45  ;;  %v4554_v51 = vperm.slane %v10199_v63, 1  ;;  %v7125_v44 = vunpack.i.h.bf16 %v10173_v57  ;;  %v7124_v46 = vunpack.i.l.bf16 %v10173_v57  ;;  %v10362_v57 = vld [vmem:[%s11729_s1 + $0x5] ss:$8 sm:$0xf] }
 0x7f0   : > { %v3636_v0 = vsel %vm1335_vm7, %v7104_v42, %v7105_v49  ;;  %v7186_v29 = vpack.i.bf16 %v3892_v4, %v3887_v8  ;;  %v7014_v14 = vunpack.i.l.bf16 %v9934_v58  ;;  %v3432_v42 = vsel %vm1217_vm6, %v7050_v28, %v7054_v5  ;;  %v10246_v8 = vld [vmem:[%s11729_s1 + $0x20] ss:$8 sm:$0xf] }
 0x7f1   : > { %7192 = vrot.lane.b32.xlu1 %v7191_v40, %s7471_s27  ;;  %v4040_v16 = vpack.c.bf16 %v3640_v59, %v3636_v0  ;;  %4559 = vrot.lane.b32.xlu2 %v4554_v51, %s7476_s18  ;;  %v3528_v22 = vsel %vm1464_vm8, %v7124_v46, %v7125_v44  ;;  %v7045_v4 = vunpack.i.h.bf16 %v9989_v9  ;;  %v7010_v40 = vunpack.i.h.bf16 %v9932_v62 }
 0x7f2   : > { %7187 = vrot.lane.b32.xlu0 %v7186_v29, %s7471_s27  ;;  %v4032_v18 = vpack.c.bf16 %v3528_v22, %v3524_v56  ;;  %v7009_v0 = vunpack.i.l.bf16 %v9932_v62  ;;  %v3428_v59 = vsel %vm1217_vm6, %v7019_v10, %v7020_v41  ;;  %v10264_v29 = vld [vmem:[%s11729_s1 + $0x2] ss:$8 sm:$0xf]  ;;  %v7040_v46 = vunpack.i.h.bf16 %v9985_v36 }
 0x7f3   : > { %4072 = vmatpush.bf16.msra.mxu3 %v4040_v16  ;;  %v4028_v16 = vpack.c.bf16 %v3432_v42, %v3428_v59  ;;  %v4309_v51 = vperm.slane %v10264_v29, 0  ;;  %v4194_v28 = vperm.slane %v10170_v12, 3  ;;  %v3553_v56 = vld [vmem:[#allocation2 + $0x40] sm:$0xff]  ;;  %v7000_v12 = vunpack.i.h.bf16 %v9891_v21 }
 0x7f4   : > { %v3332_v42 = vsel %vm970_vm5, %v7009_v0, %v7010_v40  ;;  %v12239_v62 = vunpack.i.l.bf16 %v9930_v34 }
 0x7f5   : > { %v10209_v33 = vpop.permute.xlu0 %7112 }
 0x7f6   : > { %v10217_v6 = vpop.permute.xlu1 %7117  ;;  %v11927_v35 = vunpack.i.h.bf16 %v10209_v33  ;;  %v11922_v7 = vunpack.i.l.bf16 %v10209_v33 }
 0x7f7   : > { %v11921_v52 = vunpack.i.h.bf16 %v10217_v6  ;;  %v11920_v48 = vunpack.i.l.bf16 %v10217_v6  ;;  %4073 = vmatpush.bf16.msra.mxu3 %v4036_v47  ;;  %v3336_v47 = vsel %vm970_vm5, %v7045_v4, %v7014_v14 }
 0x7f8   : > { %v3733_v20 = vsel %vm1088_vm3, %v7090_v60, %v11922_v7  ;;  %v3737_v13 = vsel %vm1088_vm3, %v7095_v15, %v11927_v35  ;;  %v4612_v7 = vperm.slane %v10246_v8, 0 }
 0x7f9   : > { %4197 = vrot.lane.b32.xlu1 %v4192_v26, %s7471_s27  ;;  %v4045_v45 = vpack.c.bf16 %v3737_v13, %v3733_v20  ;;  %v3637_v15 = vsel %vm1335_vm7, %v7105_v49, %v11920_v48  ;;  %v3641_v60 = vsel %vm1335_vm7, %v7110_v11, %v11921_v52  ;;  %v4613_v11 = vperm.slane %v10246_v8, 1  ;;  %v10284_v20 = vld [vmem:[%s11732_s4] sm:$0xff]  ;;  %4313 = vrot.lane.b32.xlu2 %v4309_v51, %s7473_s14 }
 0x7fa   : > { %4195 = vrot.lane.b32.xlu0 %v4191_v19, %s7471_s27  ;;  %v4041_v24 = vpack.c.bf16 %v3641_v60, %v3637_v15  ;;  %v6999_v13 = vunpack.i.l.bf16 %v9891_v21  ;;  %v4024_v15 = vpack.c.bf16 %v3336_v47, %v3332_v42  ;;  %v3549_v60 = vld [vmem:[#allocation2 + $0x10] sm:$0xff]  ;;  %v11926_v47 = vunpack.i.l.bf16 %v10186_v50 }
 0x7fb   : > { %4074 = vmatpush.bf16.msra.mxu3 %v4032_v18  ;;  %4097 = vmatpush.bf16.msra.mxu1 %v4045_v45  ;;  %v11930_v18 = vunpack.i.l.bf16 %v9930_v34  ;;  %v10290_v45 = vpop.permute.xlu2 %7167  ;;  %v4037_v4 = vpack.c.bf16 %v3553_v56, %v3549_v60  ;;  %v10303_v51 = vld [vmem:[%s11729_s1 + $0x3] ss:$8 sm:$0xf] }
 0x7fc   : > { %v3236_v56 = vsel %vm490_vm4, %v6999_v13, %v7000_v12 }
 0x7fd   : > { %v10266_v49 = vpop.permute.xlu0 %7127  ;;  %v3240_v59 = vsel %vm490_vm4, %v7040_v46, %v11930_v18  ;;  %v4369_v46 = vperm.slane %v10303_v51, 1  ;;  %v4495_v18 = vperm.slane %v10181_v27, 1 }
 0x7fe   : > { %v10271_v38 = vpop.permute.xlu1 %7132  ;;  %v7130_v19 = vunpack.i.h.bf16 %v10266_v49  ;;  %v7129_v10 = vunpack.i.l.bf16 %v10266_v49  ;;  %v4020_v60 = vpack.c.bf16 %v3240_v59, %v3236_v56  ;;  %v11929_v59 = vunpack.i.l.bf16 %v9993_v30 }
 0x7ff   : > { %v7135_v26 = vunpack.i.h.bf16 %v10271_v38  ;;  %v7134_v22 = vunpack.i.l.bf16 %v10271_v38  ;;  %4075 = vmatpush.bf16.msra.mxu3 %v4028_v16  ;;  %4098 = vmatpush.bf16.msra.mxu1 %v4041_v24  ;;  %v4062_v16 = vunpack.c.l.b16 %v10284_v20  ;;  %v7140_v24 = vunpack.i.h.bf16 %v10186_v50 }
 0x801   : > { %4618 = vrot.lane.b32.xlu1 %v4613_v11, %s7475_s21  ;;  %v3835_v0 = vsel %vm841_vm2, %v7134_v22, %v7135_v26  ;;  %v3831_v11 = vsel %vm841_vm2, %v7129_v10, %v7130_v19  ;;  %v11923_v26 = vunpack.i.h.bf16 %v10001_v54  ;;  %v4553_v19 = vperm.slane %v10199_v63, 0  ;;  %4374 = vrot.lane.b32.xlu2 %v4369_v46, %s12237_s24 }
 0x802   : > { %4201 = vrot.lane.b32.xlu0 %v4194_v28, %s7471_s27  ;;  %v4051_v48 = vpack.c.bf16 %v3835_v0, %v3831_v11  ;;  %v10326_v52 = vpack.c.b16 %v4062_v16, %v4062_v16  ;;  %v3735_v56 = vsel %vm1088_vm3, %v11926_v47, %v7140_v24  ;;  %v7015_v0 = vunpack.i.h.bf16 %v9934_v58 }
 0x803   : > { %4076 = vmatpush.bf16.msra.mxu3 %v4024_v15  ;;  %4099 = vmatpush.bf16.msra.mxu1 %v4037_v4  ;;  %v7155_v24 = vunpack.i.h.bf16 %v10215_v61  ;;  %v3433_v43 = vsel %vm1217_vm6, %v7054_v5, %v11923_v26  ;;  %v7170_v5 = vunpack.i.h.bf16 %v10290_v45  ;;  %v4436_v47 = vperm.slane %v10362_v57, 1 }
 0x805   : > { %v10319_v42 = vpop.permute.xlu0 %7142 }
 0x806   : > { %v10322_v28 = vpop.permute.xlu1 %7147  ;;  %v7145_v15 = vunpack.i.h.bf16 %v10319_v42  ;;  %v11928_v37 = vunpack.i.l.bf16 %v10319_v42  ;;  %v12240_v21 = vunpack.i.l.bf16 %v10319_v42  ;;  %v12242_v42 = vunpack.i.l.bf16 %v10186_v50 }
 0x807   : > { %v11924_v4 = vunpack.i.h.bf16 %v10322_v28  ;;  %v11925_v13 = vunpack.i.l.bf16 %v10322_v28  ;;  %4077 = vmatpush.bf16.msra.mxu3 %v4020_v60  ;;  %v7154_v60 = vunpack.i.l.bf16 %v10215_v61  ;;  %v4437_v61 = vperm.slane %v10362_v57, 2 }
 0x808   : > { %v3739_v16 = vsel %vm1088_vm3, %v11928_v37, %v7145_v15  ;;  %v7183_v15 = vpop.permute.xlu2 %7182 }
 0x809   : > { %4557 = vrot.lane.b32.xlu1 %v4553_v19, %s7476_s18  ;;  %v3525_v11 = vsel %vm1464_vm8, %v7075_v17, %v11925_v13  ;;  %v4047_v46 = vpack.c.bf16 %v3739_v16, %v3735_v56  ;;  %v7024_v17 = vunpack.i.l.bf16 %v9987_v32  ;;  %v7029_v56 = vunpack.i.l.bf16 %v9991_v3  ;;  %v10371_v16 = vld [vmem:[%s11729_s1 + $0x1] ss:$8 sm:$0xf] }
 0x80a   : > { %4078 = vmatmul.bf16.vlgmr.msra.gmra.mxu3 %v10326_v52  ;;  %4616 = vrot.lane.b32.xlu0 %v4612_v7, %s7475_s21  ;;  %v4250_v26 = vperm.slane %v10371_v16, 0  ;;  %v7185_v7 = vunpack.i.h.bf16 %v7183_v15 }
 0x80b   : > { %4148 = vmatpush.bf16.msrb.mxu3 %v4051_v48  ;;  %v3529_v48 = vsel %vm1464_vm8, %v7125_v44, %v11924_v4  ;;  %v7005_v44 = vunpack.i.h.bf16 %v9930_v34  ;;  %v3333_v2 = vsel %vm970_vm5, %v7010_v40, %v7029_v56  ;;  %v4311_v34 = vperm.slane %v10264_v29, 2 }
 0x80c   : > { %v4033_v19 = vpack.c.bf16 %v3529_v48, %v3525_v11  ;;  %v7169_v11 = vunpack.i.l.bf16 %v10290_v45  ;;  %v3429_v48 = vsel %vm1217_vm6, %v7020_v41, %v11929_v59  ;;  %v3639_v41 = vsel %vm1335_vm7, %v7154_v60, %v7155_v24  ;;  %4254 = vrot.lane.b32.xlu2 %v4250_v26, %s7472_s29 }
 0x80d   : > { %v7158_v4 = vpop.permute.xlu0 %7157  ;;  %v4029_v13 = vpack.c.bf16 %v3433_v43, %v3429_v48  ;;  %v7184_v59 = vunpack.i.l.bf16 %v7183_v15  ;;  %v3241_v40 = vsel %vm490_vm4, %v12239_v62, %v7005_v44  ;;  %v12245_v62 = vunpack.i.l.bf16 %v10217_v6 }
 0x80e   : > { %4100 = vmatpush.bf16.msra.mxu1 %v4033_v19  ;;  %v3337_v19 = vsel %vm970_vm5, %v7014_v14, %v7015_v0  ;;  %v10388_v35 = vpop.permute.xlu1 %7162  ;;  %v7160_v55 = vunpack.i.h.bf16 %v7158_v4  ;;  %v7159_v37 = vunpack.i.l.bf16 %v7158_v4  ;;  %v3929_v14 = vsel %vm595_vm1, %v7169_v11, %v7170_v5 }
 0x80f   : > { %4149 = vmatpush.bf16.msrb.mxu3 %v4047_v46  ;;  %v4063_v46 = vunpack.c.h.b16 %v10284_v20  ;;  %v7165_v43 = vunpack.i.h.bf16 %v10388_v35  ;;  %v7164_v48 = vunpack.i.l.bf16 %v10388_v35  ;;  %v3834_v20 = vsel %vm841_vm2, %v7100_v31, %v7134_v22 }
 0x810   : > { %v3830_v4 = vsel %vm841_vm2, %v7099_v25, %v7129_v10  ;;  %v3643_v24 = vsel %vm1335_vm7, %v7159_v37, %v7160_v55  ;;  %v3928_v26 = vsel %vm595_vm1, %v7185_v7, %v7169_v11  ;;  %v3237_v25 = vsel %vm490_vm4, %v7000_v12, %v7024_v17  ;;  %v3555_v10 = vld [vmem:[#allocation2 + $0x50] sm:$0xff]  ;;  %v3551_v11 = vld [vmem:[#allocation2 + $0x20] sm:$0xff] }
 0x811   : > { %v3924_v15 = vsel %vm595_vm1, %v7184_v59, %v7164_v48  ;;  %v3925_v38 = vsel %vm595_vm1, %v7164_v48, %v7165_v43  ;;  %4441 = vrot.lane.b32.xlu1 %v4436_v47, %s12238_s13  ;;  %v4043_v31 = vpack.c.bf16 %v3643_v24, %v3639_v41  ;;  %v4025_v47 = vpack.c.bf16 %v3337_v19, %v3333_v2 }
 0x812   : > { %4101 = vmatpush.bf16.msra.mxu1 %v4029_v13  ;;  %v4052_v22 = vpack.c.bf16 %v3928_v26, %v3924_v15  ;;  %v4053_v49 = vpack.c.bf16 %v3929_v14, %v3925_v38  ;;  %v10427_v13 = vpack.c.b16 %v4063_v46, %v4063_v46  ;;  %4500 = vrot.lane.b32.xlu0 %v4495_v18, %s7477_s19  ;;  %v12241_v12 = vunpack.i.h.bf16 %v10209_v33 }
 0x813   : > { %4150 = vmatpush.bf16.msrb.mxu3 %v4043_v31  ;;  %v4050_v59 = vpack.c.bf16 %v3834_v20, %v3830_v4  ;;  %v4497_v18 = vperm.slane %v10181_v27, 3  ;;  %v7070_v19 = vunpack.i.h.bf16 %v10021_v23  ;;  %v7069_v46 = vunpack.i.l.bf16 %v10021_v23 }
 0x814   : > { %4090 = vmatpush.bf16.msra.mxu0 %v4052_v22  ;;  %4116 = vmatpush.bf16.msra.mxu2 %v4053_v49  ;;  %v3738_v7 = vsel %vm1088_vm3, %v12241_v12, %v12240_v21  ;;  %v4021_v41 = vpack.c.bf16 %v3241_v40, %v3237_v25  ;;  %v4039_v48 = vpack.c.bf16 %v3555_v10, %v3551_v11  ;;  %v12243_v24 = vunpack.i.l.bf16 %v10209_v33  ;;  %v3554_v12 = vld [vmem:[#allocation2 + $0x48] sm:$0xff] }
 0x815   : > { %v7173_v55 = vpop.permute.xlu0 %7172  ;;  %v4368_v15 = vperm.slane %v10303_v51, 0  ;;  %v4435_v49 = vperm.slane %v10362_v57, 0  ;;  %v12244_v33 = vunpack.i.h.bf16 %v10217_v6  ;;  %4504 = vrot.lane.b32.xlu2 %v4497_v18, %s7477_s19  ;;  %v7035_v25 = vunpack.i.h.bf16 %v9993_v30 }
 0x816   : > { %4102 = vmatpush.bf16.msra.mxu1 %v4025_v47  ;;  %v7178_v14 = vpop.permute.xlu1 %7177  ;;  %v7175_v20 = vunpack.i.h.bf16 %v7173_v55  ;;  %v7174_v4 = vunpack.i.l.bf16 %v7173_v55  ;;  %v3734_v26 = vsel %vm1088_vm3, %v12243_v24, %v12242_v42  ;;  %v7049_v47 = vunpack.i.l.bf16 %v9997_v53 }
 0x817   : > { %v7180_v38 = vunpack.i.h.bf16 %v7178_v14  ;;  %v7179_v31 = vunpack.i.l.bf16 %v7178_v14  ;;  %6307 = vmatmul.msk.bf16.vlgmr.msra.gmra.mxu0 %vm970_vm5, %v10427_v13  ;;  %6308 = vmatmul.msk.bf16.vlgmr.msra.gmra.mxu2 %vm970_vm5, %v10427_v13  ;;  %v4046_v22 = vpack.c.bf16 %v3738_v7, %v3734_v26  ;;  %v3642_v2 = vsel %vm1335_vm7, %v12244_v33, %v7159_v37  ;;  %v3550_v7 = vld [vmem:[#allocation2 + $0x18] sm:$0xff] }
 0x818   : > { %4122 = vmatpush.bf16.msrb.mxu0 %v4050_v59  ;;  %4151 = vmatpush.bf16.msrb.mxu3 %v4039_v48  ;;  %v3527_v50 = vsel %vm1464_vm8, %v7174_v4, %v7175_v20  ;;  %v3638_v40 = vsel %vm1335_vm7, %v12245_v62, %v7154_v60  ;;  %v7065_v37 = vunpack.i.h.bf16 %v10007_v39  ;;  %v7064_v11 = vunpack.i.l.bf16 %v10007_v39 }
 0x819   : > { %v3531_v10 = vsel %vm1464_vm8, %v7179_v31, %v7180_v38  ;;  %4372 = vrot.lane.b32.xlu1 %v4368_v15, %s12237_s24  ;;  %v4042_v21 = vpack.c.bf16 %v3642_v2, %v3638_v40  ;;  %v3435_v53 = vsel %vm1217_vm6, %v7069_v46, %v7070_v19  ;;  %v7030_v6 = vunpack.i.h.bf16 %v9991_v3 }
 0x81a   : > { %4103 = vmatpush.bf16.msra.mxu1 %v4021_v41  ;;  %v4035_v59 = vpack.c.bf16 %v3531_v10, %v3527_v50  ;;  %4439 = vrot.lane.b32.xlu0 %v4435_v49, %s12238_s13  ;;  %v3431_v60 = vsel %vm1217_vm6, %v7035_v25, %v7049_v47  ;;  %v7044_v39 = vunpack.i.l.bf16 %v9989_v9  ;;  %v4038_v55 = vpack.c.bf16 %v3554_v12, %v3550_v7 }
 0x81b   : > { %v4031_v18 = vpack.c.bf16 %v3435_v53, %v3431_v60  ;;  %v4615_v41 = vperm.slane %v10246_v8, 3  ;;  %v7060_v19 = vunpack.i.h.bf16 %v9999_v1  ;;  %v7059_v48 = vunpack.i.l.bf16 %v9999_v1 }
 0x81c   : > { %4123 = vmatpush.bf16.msrb.mxu0 %v4046_v22  ;;  %4152 = vmatpush.bf16.msrb.mxu3 %v4035_v59  ;;  %v4310_v14 = vperm.slane %v10264_v29, 1  ;;  %v3339_v20 = vsel %vm970_vm5, %v7064_v11, %v7065_v37  ;;  %v12246_v42 = vunpack.i.l.bf16 %v10322_v28  ;;  %v12247_v26 = vunpack.i.h.bf16 %v10322_v28 }
 0x81d   : > { %4104 = vmatmul.bf16.vlgmr.msra.gmra.mxu1 %v10326_v52  ;;  %4443 = vrot.lane.b32.xlu2 %v4437_v61, %s12238_s13  ;;  %v7039_v15 = vunpack.i.l.bf16 %v9985_v36  ;;  %v3335_v1 = vsel %vm970_vm5, %v7030_v6, %v7044_v39  ;;  %v7025_v22 = vunpack.i.h.bf16 %v9987_v32  ;;  %v12248_v28 = vunpack.i.h.bf16 %v10001_v54 }
 0x81e   : > { %v3526_v24 = vsel %vm1464_vm8, %v12246_v42, %v7174_v4  ;;  %v3530_v9 = vsel %vm1464_vm8, %v12247_v26, %v7179_v31  ;;  %v4027_v38 = vpack.c.bf16 %v3339_v20, %v3335_v1  ;;  %v3243_v4 = vsel %vm490_vm4, %v7059_v48, %v7060_v19 }
 0x81f   : > { %v4034_v49 = vpack.c.bf16 %v3530_v9, %v3526_v24  ;;  %v3434_v36 = vsel %vm1217_vm6, %v12248_v28, %v7069_v46  ;;  %v4312_v31 = vperm.slane %v10264_v29, 3  ;;  %v3239_v50 = vsel %vm490_vm4, %v7025_v22, %v7039_v15  ;;  %v10577_v24 = vld [vmem:[#allocation2] sm:$0xff] }
 0x820   : > { %4124 = vmatpush.bf16.msrb.mxu0 %v4042_v21  ;;  %4153 = vmatpush.bf16.msrb.mxu3 %v4031_v18  ;;  %v4023_v33 = vpack.c.bf16 %v3243_v4, %v3239_v50  ;;  %v12249_v2 = vunpack.i.l.bf16 %v9993_v30  ;;  %v4496_v47 = vperm.slane %v10181_v27, 2  ;;  %v4614_v62 = vperm.slane %v10246_v8, 2 }
 0x821   : > { %4622 = vrot.lane.b32.xlu1 %v4615_v41, %s7475_s21  ;;  %v3338_v54 = vsel %vm970_vm5, %v7015_v0, %v7064_v11  ;;  %v3334_v30 = vsel %vm970_vm5, %v7029_v56, %v7030_v6  ;;  %v3242_v58 = vsel %vm490_vm4, %v7005_v44, %v7059_v48  ;;  %v4252_v27 = vperm.slane %v10371_v16, 2 }
 0x822   : > { %4315 = vrot.lane.b32.xlu0 %v4310_v14, %s7473_s14  ;;  %v3430_v10 = vsel %vm1217_vm6, %v12249_v2, %v7035_v25  ;;  %v4026_v23 = vpack.c.bf16 %v3338_v54, %v3334_v30  ;;  %v3238_v8 = vsel %vm490_vm4, %v7024_v17, %v7025_v22  ;;  %v4556_v3 = vperm.slane %v10199_v63, 3  ;;  %v10541_v25 = vpop.permute.xlu2 %4058 }
 0x823   : > { %v4030_v59 = vpack.c.bf16 %v3434_v36, %v3430_v10  ;;  %v4022_v0 = vpack.c.bf16 %v3242_v58, %v3238_v8  ;;  %v4251_v56 = vperm.slane %v10371_v16, 1  ;;  %v4555_v32 = vperm.slane %v10199_v63, 2 }
 0x824   : > { %4125 = vmatpush.bf16.msrb.mxu0 %v4038_v55  ;;  %4154 = vmatpush.bf16.msrb.mxu3 %v4027_v38  ;;  %v4438_v44 = vperm.slane %v10362_v57, 3  ;;  %v4370_v17 = vperm.slane %v10303_v51, 2  ;;  %v4371_v46 = vperm.slane %v10303_v51, 3  ;;  %v4253_v63 = vperm.slane %v10371_v16, 3 }
 0x825   : > { %4319 = vrot.lane.b32.xlu2 %v4312_v31, %s7473_s14 }
 0x828   : > { %4126 = vmatpush.bf16.msrb.mxu0 %v4034_v49  ;;  %4155 = vmatpush.bf16.msrb.mxu3 %v4023_v33 }
 0x829   : > { %4502 = vrot.lane.b32.xlu1 %v4496_v47, %s7477_s19 }
 0x82a   : > { %4620 = vrot.lane.b32.xlu0 %v4614_v62, %s7475_s21  ;;  %v10554_v6 = vpop.permute.xlu2 %4199 }
 0x82b   : > { %4156 = vmatmul.bf16.vlgmr.msrb.gmra.mxu3 %v10326_v52 }
 0x82c   : > { %4127 = vmatpush.bf16.msrb.mxu0 %v4030_v59 }
 0x82d   : > { %4258 = vrot.lane.b32.xlu2 %v4252_v27, %s7472_s29 }
 0x830   : > { %4128 = vmatpush.bf16.msrb.mxu0 %v4026_v23 }
 0x831   : > { %4563 = vrot.lane.b32.xlu1 %v4556_v3, %s7476_s18 }
 0x832   : > { %4256 = vrot.lane.b32.xlu0 %v4251_v56, %s7472_s29  ;;  %v10564_v45 = vpop.permute.xlu2 %4498 }
 0x834   : > { %4129 = vmatpush.bf16.msrb.mxu0 %v4022_v0 }
 0x837   : > { %4130 = vmatmul.bf16.vlgmr.msrb.gmra.mxu0 %v10326_v52 }
 0x839   : > { %4317 = vrot.lane.b32.xlu1 %v4311_v34, %s7473_s14 }
 0x83a   : > { %4561 = vrot.lane.b32.xlu0 %v4555_v32, %s7476_s18 }
 0x841   : > { %4378 = vrot.lane.b32.xlu1 %v4371_v46, %s12237_s24 }
 0x842   : > { %4445 = vrot.lane.b32.xlu0 %v4438_v44, %s12238_s13 }
 0x84a   : > { %4376 = vrot.lane.b32.xlu0 %v4370_v17, %s12237_s24 }
 0x84b   : > { %v10568_v18 = vpop.permute.xlu2 %4559 }
 0x852   : > { %4260 = vrot.lane.b32.xlu0 %v4253_v63, %s7472_s29 }
 0x853   : > { %v4314_v19 = vpop.permute.xlu2 %4313 }
 0x854   : > { %v4329_v36 = vmul.f32 %v4314_v19, %v10577_v24 }
 0x85b   : > { %v10574_v42 = vpop.permute.xlu2 %4374 }
 0x863   : > { %v7193_v52 = vpop.permute.xlu1 %7192 }
 0x864   : > { %v7195_v29 = vunpack.i.h.bf16 %v7193_v52  ;;  %v7194_v40 = vunpack.i.l.bf16 %v7193_v52  ;;  %v7188_v37 = vpop.permute.xlu0 %7187 }
 0x865   : > { %v7190_v57 = vunpack.i.h.bf16 %v7188_v37  ;;  %v7189_v11 = vunpack.i.l.bf16 %v7188_v37 }
 0x867   : > { %v3930_v21 = vsel %vm595_vm1, %v7170_v5, %v7190_v57  ;;  %v3931_v51 = vsel %vm595_vm1, %v7190_v57, %v7195_v29  ;;  %v3926_v53 = vsel %vm595_vm1, %v7165_v43, %v7189_v11  ;;  %v3927_v12 = vsel %vm595_vm1, %v7189_v11, %v7194_v40  ;;  %v4255_v40 = vpop.permute.xlu2 %4254 }
 0x868   : > { %v4054_v16 = vpack.c.bf16 %v3930_v21, %v3926_v53  ;;  %v4055_v61 = vpack.c.bf16 %v3931_v51, %v3927_v12  ;;  %v4270_v11 = vmul.f32 %v4255_v40, %v10577_v24 }
 0x86a   : > { %4142 = vmatpush.bf16.msrb.mxu2 %v4054_v16  ;;  %4168 = vmatpush.bf16.msrb.mxu1 %v4055_v61 }
 0x86b   : > { %v10556_v60 = vpop.permute.xlu1 %4197 }
 0x86c   : > { %v4196_v7 = vpop.permute.xlu0 %4195 }
 0x86d   : > { %6309 = vmatmul.msk.bf16.vlgmr.msrb.gmra.mxu2 %vm970_vm5, %v10427_v13  ;;  %6310 = vmatmul.msk.bf16.vlgmr.msrb.gmra.mxu1 %vm970_vm5, %v10427_v13  ;;  %v4203_v22 = vsel %vm595_vm1, %v4196_v7, %v10556_v60  ;;  %v4211_v28 = vmul.f32 %v4196_v7, %v10577_v24 }
 0x873   : > { %v10562_v35 = vpop.permute.xlu1 %4618 }
 0x874   : > { %v10566_v5 = vpop.permute.xlu0 %4201 }
 0x87b   : > { %v4558_v43 = vpop.permute.xlu1 %4557 }
 0x87c   : > { %v4617_v39 = vpop.permute.xlu0 %4616  ;;  %v4565_v3 = vsel %vm970_vm5, %v4558_v43, %v10568_v18 }
 0x87d   : > { %v4624_v0 = vsel %vm490_vm4, %v4617_v39, %v10562_v35 }
 0x883   : > { %v10570_v55 = vpop.permute.xlu1 %4441 }
 0x884   : > { %v10572_v41 = vpop.permute.xlu0 %4500 }
 0x885   : > { %v4506_v7 = vsel %vm1217_vm6, %v10564_v45, %v10572_v41 }
 0x88b   : > { %v4373_v48 = vpop.permute.xlu1 %4372 }
 0x88c   : > { %v4440_v14 = vpop.permute.xlu0 %4439  ;;  %v4380_v49 = vsel %vm1335_vm7, %v4373_v48, %v10574_v42  ;;  %v4388_v31 = vmul.f32 %v4373_v48, %v10577_v24 }
 0x88d   : > { %v4079_v20 = vpop.f32.mrf.mxu3  ;;  %v4447_v21 = vsel %vm1464_vm8, %v4440_v14, %v10570_v55 }
 0x88e   : > { %v4080_v13 = vadd.f32 %v4079_v20, %v10541_v25 }
 0x893   : > { %v10579_v9 = vpop.permute.xlu1 %4622 }
 0x894   : > { %v4092_v26 = vpop.f32.mrf.mxu0  ;;  %v4316_v1 = vpop.permute.xlu0 %4315 }
 0x895   : > { %v4093_v15 = vadd.f32 %v4092_v26, %v4080_v13  ;;  %v4081_v38 = vpop.f32.mrf.mxu3  ;;  %v4321_v4 = vsel %vm1088_vm3, %v4314_v19, %v4316_v1 }
 0x897   : > { %v10589_v50 = vmax.f32 %v4093_v15, 0.0 }
 0x899   : > { %v4330_v33 = vmul.f32 %v4321_v4, %v10589_v50  ;;  %v4389_v10 = vmul.f32 %v4380_v49, %v10589_v50  ;;  %v4212_v47 = vmul.f32 %v4203_v22, %v10589_v50  ;;  %v4573_v17 = vmul.f32 %v4558_v43, %v10589_v50 }
 0x89a   : > { %v4105_v2 = vpop.f32.mrf.mxu1  ;;  %v4118_v62 = vpop.f32.mrf.mxu2  ;;  %v4632_v52 = vmul.f32 %v4617_v39, %v10589_v50  ;;  %v4455_v43 = vmul.f32 %v4440_v14, %v10589_v50  ;;  %v4514_v38 = vmul.f32 %v10564_v45, %v10589_v50 }
 0x89b   : > { %v4106_v59 = vadd.f32 %v4105_v2, %v10541_v25  ;;  %v7201_v54 = vpack.i.bf16 %v4330_v33, %v4329_v36  ;;  %v7206_v30 = vpack.i.bf16 %v4389_v10, %v4388_v31  ;;  %v7196_v23 = vpack.i.bf16 %v4212_v47, %v4211_v28  ;;  %v10595_v27 = vpop.permute.xlu1 %4502  ;;  %v4505_v45 = vpop.permute.xlu2 %4504 }
 0x89c   : > { %v4094_v8 = vpop.f32.mrf.mxu0  ;;  %v10601_v56 = vpop.permute.xlu0 %4620 }
 0x89d   : > { %v4119_v58 = vadd.f32 %v4118_v62, %v4106_v59  ;;  %7207 = vrot.lane.b32.xlu0 %v7206_v30, %s12238_s13  ;;  %7202 = vrot.lane.b32.xlu2 %v7201_v54, %s7477_s19  ;;  %v4625_v8 = vsel %vm490_vm4, %v10562_v35, %v10601_v56  ;;  %v10671_v35 = vld [vmem:[#allocation2 + $0x28] sm:$0xff] }
 0x89e   : > { %7197 = vrot.lane.b32.xlu1 %v7196_v23, %s7475_s21  ;;  %v4204_v23 = vsel %vm595_vm1, %v10556_v60, %v10554_v6 }
 0x89f   : > { %v10605_v34 = vmax.f32 %v4119_v58, 0.0 }
 0x8a1   : > { %v4574_v32 = vmul.f32 %v4565_v3, %v10605_v34  ;;  %v4633_v44 = vmul.f32 %v4624_v0, %v10605_v34  ;;  %v4456_v16 = vmul.f32 %v4447_v21, %v10605_v34  ;;  %v4515_v13 = vmul.f32 %v4506_v7, %v10605_v34 }
 0x8a2   : > { %v4107_v46 = vpop.f32.mrf.mxu1  ;;  %v4120_v63 = vpop.f32.mrf.mxu2 }
 0x8a3   : > { %v7226_v29 = vpack.i.bf16 %v4574_v32, %v4573_v17  ;;  %v10612_v37 = vpop.permute.xlu1 %4563  ;;  %v7216_v57 = vpack.i.bf16 %v4633_v44, %v4632_v52  ;;  %v7231_v19 = vpack.i.bf16 %v4456_v16, %v4455_v43  ;;  %v7221_v22 = vpack.i.bf16 %v4515_v13, %v4514_v38  ;;  %v4444_v33 = vpop.permute.xlu2 %4443 }
 0x8a4   : > { %v10617_v51 = vpop.permute.xlu0 %4256  ;;  %v4213_v44 = vmul.f32 %v4204_v23, %v10605_v34  ;;  %v4636_v63 = vmul.f32 %v10579_v9, %v10671_v35  ;;  %v4577_v21 = vmul.f32 %v10612_v37, %v10671_v35  ;;  %v4518_v16 = vmul.f32 %v4505_v45, %v10671_v35 }
 0x8a5   : > { %7227 = vrot.lane.b32.xlu0 %v7226_v29, %s7472_s29  ;;  %v4262_v53 = vsel %vm841_vm2, %v4255_v40, %v10617_v51  ;;  %v4507_v40 = vsel %vm1217_vm6, %v10572_v41, %v10595_v27 }
 0x8a6   : > { %7217 = vrot.lane.b32.xlu1 %v7216_v57, %s7471_s27  ;;  %v4271_v12 = vmul.f32 %v4262_v53, %v10589_v50 }
 0x8a8   : > { %v7211_v61 = vpack.i.bf16 %v4271_v12, %v4270_v11 }
 0x8aa   : > { %7212 = vrot.lane.b32.xlu2 %v7211_v61, %s7476_s18 }
 0x8ab   : > { %v10630_v39 = vpop.permute.xlu1 %4317  ;;  %v4320_v58 = vpop.permute.xlu2 %4319 }
 0x8ac   : > { %v4322_v48 = vsel %vm1088_vm3, %v4316_v1, %v10630_v39  ;;  %v4562_v20 = vpop.permute.xlu0 %4561 }
 0x8ad   : > { %v4331_v26 = vmul.f32 %v4322_v48, %v10605_v34  ;;  %v4566_v3 = vsel %vm970_vm5, %v10568_v18, %v4562_v20  ;;  %v4567_v29 = vsel %vm970_vm5, %v4562_v20, %v10612_v37  ;;  %v4448_v37 = vsel %vm1464_vm8, %v10570_v55, %v4444_v33 }
 0x8ae   : > { %v4157_v15 = vpop.f32.mrf.mxu3  ;;  %7232 = vrot.lane.b32.xlu1 %v7231_v19, %s12237_s24 }
 0x8af   : > { %4343 = vrot.lane.b32.xlu0 %v4331_v26, %s7477_s19  ;;  %v4158_v10 = vadd.f32 %v4157_v15, %v10541_v25 }
 0x8b2   : > { %7222 = vrot.lane.b32.xlu2 %v7221_v22, %s7473_s14 }
 0x8b3   : > { %v4259_v53 = vpop.permute.xlu2 %4258  ;;  %v4379_v15 = vpop.permute.xlu1 %4378 }
 0x8b4   : > { %v4131_v14 = vpop.f32.mrf.mxu0  ;;  %v4446_v49 = vpop.permute.xlu0 %4445 }
 0x8b5   : > { %v4132_v47 = vadd.f32 %v4131_v14, %v10541_v25  ;;  %v4205_v25 = vsel %vm595_vm1, %v10554_v6, %v10566_v5  ;;  %v4626_v6 = vsel %vm490_vm4, %v10601_v56, %v10579_v9  ;;  %v4508_v9 = vsel %vm1217_vm6, %v10595_v27, %v4505_v45 }
 0x8b6   : > { %v4159_v4 = vpop.f32.mrf.mxu3  ;;  %v4449_v61 = vsel %vm1464_vm8, %v4444_v33, %v4446_v49  ;;  %v4323_v27 = vsel %vm1088_vm3, %v10630_v39, %v4320_v58  ;;  %v4459_v20 = vmul.f32 %v10671_v35, %v4446_v49 }
 0x8bc   : > { %v4133_v1 = vpop.f32.mrf.mxu0  ;;  %v10641_v28 = vpop.permute.xlu0 %4376 }
 0x8bd   : > { %v4381_v36 = vsel %vm1335_vm7, %v10574_v42, %v10641_v28  ;;  %v4382_v39 = vsel %vm1335_vm7, %v10641_v28, %v4379_v15 }
 0x8be   : > { %v4390_v31 = vmul.f32 %v4381_v36, %v10605_v34 }
 0x8c0   : > { %4402 = vrot.lane.b32.xlu1 %v4390_v31, %s12238_s13 }
 0x8c4   : > { %v4261_v43 = vpop.permute.xlu0 %4260 }
 0x8c5   : > { %v4264_v13 = vsel %vm841_vm2, %v4259_v53, %v4261_v43 }
 0x8ea   : > { %v4170_v2 = vpop.f32.mrf.mxu1 }
 0x8eb   : > { %v4171_v62 = vadd.f32 %v4170_v2, %v4158_v10  ;;  %v4809_v10 = vld [vmem:[%s11729_s1] ss:$8 sm:$0xf] }
 0x8ed   : > { %v10663_v0 = vmax.f32 %v4171_v62, 0.0 }
 0x8ef   : > { %v4635_v52 = vmul.f32 %v4626_v6, %v10663_v0  ;;  %v4576_v57 = vmul.f32 %v4567_v29, %v10663_v0  ;;  %v4517_v41 = vmul.f32 %v4508_v9, %v10663_v0  ;;  %v4458_v7 = vmul.f32 %v4449_v61, %v10663_v0  ;;  %v4179_v29 = vld [vmem:[%s11735_s7] sm:$0xff] }
 0x8f0   : > { %v4144_v59 = vpop.f32.mrf.mxu2  ;;  %v4274_v22 = vmul.f32 %v4261_v43, %v10663_v0  ;;  %v4333_v49 = vmul.f32 %v4320_v58, %v10663_v0  ;;  %v4392_v31 = vmul.f32 %v4379_v15, %v10663_v0 }
 0x8f1   : > { %v4145_v54 = vadd.f32 %v4144_v59, %v4132_v47  ;;  %v7241_v11 = vpack.i.bf16 %v4636_v63, %v4635_v52  ;;  %v7251_v12 = vpack.i.bf16 %v4577_v21, %v4576_v57  ;;  %v7246_v48 = vpack.i.bf16 %v4518_v16, %v4517_v41 }
 0x8f2   : > { %v4172_v30 = vpop.f32.mrf.mxu1  ;;  %v7256_v55 = vpack.i.bf16 %v4459_v20, %v4458_v7  ;;  %v4263_v47 = vsel %vm841_vm2, %v10617_v51, %v4259_v53  ;;  %v4811_v59 = vperm.slane %v4809_v10, 0  ;;  %v4215_v51 = vmul.f32 %v10566_v5, %v10663_v0 }
 0x8f3   : > { %v10653_v42 = vmax.f32 %v4145_v54, 0.0  ;;  %v4272_v62 = vmul.f32 %v4263_v47, %v10605_v34 }
 0x8f5   : > { %v4634_v32 = vmul.f32 %v4625_v8, %v10653_v42  ;;  %v4575_v60 = vmul.f32 %v4566_v3, %v10653_v42  ;;  %v4214_v17 = vmul.f32 %v4205_v25, %v10653_v42  ;;  %v4516_v56 = vmul.f32 %v4507_v40, %v10653_v42 }
 0x8f6   : > { %v4457_v19 = vmul.f32 %v4448_v37, %v10653_v42  ;;  %v4273_v38 = vmul.f32 %v4264_v13, %v10653_v42  ;;  %v4332_v14 = vmul.f32 %v4323_v27, %v10653_v42  ;;  %v4391_v4 = vmul.f32 %v4382_v39, %v10653_v42 }
 0x8f7   : > { %4646 = vrot.lane.b32.xlu0 %v4634_v32, %s7471_s27  ;;  %4587 = vrot.lane.b32.xlu1 %v4575_v60, %s7472_s29  ;;  %v7236_v46 = vpack.i.bf16 %v4214_v17, %v4213_v44  ;;  %v10705_v26 = vpop.permute.xlu2 %7202  ;;  %v4814_v60 = vperm.slane %v4809_v10, 3 }
 0x8f8   : > { %v4146_v18 = vpop.f32.mrf.mxu2  ;;  %v7271_v1 = vpack.i.bf16 %v4274_v22, %v4273_v38  ;;  %v7261_v36 = vpack.i.bf16 %v4333_v49, %v4332_v14  ;;  %v7266_v28 = vpack.i.bf16 %v4392_v31, %v4391_v4  ;;  %v7205_v9 = vunpack.i.h.bf16 %v10705_v26  ;;  %v10801_v22 = vld [vmem:[%s11734_s6] sm:$0xf] }
 0x8f9   : > { %7237 = vrot.lane.b32.xlu2 %v7236_v46, %s7475_s21  ;;  %v4812_v18 = vperm.slane %v4809_v10, 1  ;;  %v7204_v16 = vunpack.i.l.bf16 %v10705_v26  ;;  %v6326_v26 = vld [vmem:[%s11729_s1 + $0x6] ss:$8 sm:$0xf] }
 0x8fa   : > { %v5114_v14 = vperm.slane %v6326_v26, 0 }
 0x8ff   : > { %4528 = vrot.lane.b32.xlu0 %v4516_v56, %s7473_s14  ;;  %7242 = vrot.lane.b32.xlu1 %v7241_v11, %s7471_s27  ;;  %v6328_v11 = vld [vmem:[%s11729_s1 + $0x20] ss:$8 sm:$0xf] }
 0x900   : > { %v5232_v61 = vperm.slane %v6328_v11, 0  ;;  %v5233_v37 = vperm.slane %v6328_v11, 1  ;;  %v5235_v38 = vperm.slane %v6328_v11, 3  ;;  %v5234_v49 = vperm.slane %v6328_v11, 2 }
 0x901   : > { %7252 = vrot.lane.b32.xlu2 %v7251_v12, %s7472_s29 }
 0x904   : > { %v10718_v45 = vpop.permute.xlu2 %7212 }
 0x905   : > { %v7215_v27 = vunpack.i.h.bf16 %v10718_v45  ;;  %v7214_v20 = vunpack.i.l.bf16 %v10718_v45 }
 0x907   : > { %4469 = vrot.lane.b32.xlu0 %v4457_v19, %s12237_s24  ;;  %7247 = vrot.lane.b32.xlu1 %v7246_v48, %s7473_s14  ;;  %v4813_v48 = vperm.slane %v4809_v10, 2 }
 0x909   : > { %7257 = vrot.lane.b32.xlu2 %v7256_v55, %s12237_s24  ;;  %v4290_v55 = vsel %vm970_vm5, %v7214_v20, %v7215_v27 }
 0x90c   : > { %v10739_v23 = vpop.permute.xlu2 %7222 }
 0x90d   : > { %v7225_v44 = vunpack.i.h.bf16 %v10739_v23  ;;  %v7224_v17 = vunpack.i.l.bf16 %v10739_v23 }
 0x90f   : > { %v10720_v33 = vpop.permute.xlu0 %7207  ;;  %7272 = vrot.lane.b32.xlu0 %v7271_v1, %s7476_s18  ;;  %7262 = vrot.lane.b32.xlu1 %v7261_v36, %s7477_s19  ;;  %v4534_v63 = vsel %vm1088_vm3, %v7224_v17, %v7225_v44  ;;  %v6327_v1 = vld [vmem:[%s11729_s1 + $0x7] ss:$8 sm:$0xf] }
 0x910   : > { %v10722_v2 = vpop.permute.xlu1 %7197  ;;  %v7210_v21 = vunpack.i.h.bf16 %v10720_v33  ;;  %v7209_v53 = vunpack.i.l.bf16 %v10720_v33  ;;  %v5174_v10 = vperm.slane %v6327_v1, 1  ;;  %v5176_v17 = vperm.slane %v6327_v1, 3 }
 0x911   : > { %7267 = vrot.lane.b32.xlu2 %v7266_v28, %s12238_s13  ;;  %v7200_v7 = vunpack.i.h.bf16 %v10722_v2  ;;  %v7199_v43 = vunpack.i.l.bf16 %v10722_v2  ;;  %v5173_v28 = vperm.slane %v6327_v1, 0 }
 0x912   : > { %v4408_v19 = vsel %vm1464_vm8, %v7209_v53, %v7210_v21 }
 0x913   : > { %v4231_v15 = vsel %vm490_vm4, %v7199_v43, %v7200_v7 }
 0x914   : > { %v4700_v39 = vpack.c.bf16 %v4290_v55, %v4231_v15 }
 0x917   : > { %v10733_v54 = vpop.permute.xlu0 %7227  ;;  %4815 = vrot.lane.b32.xlu0 %v4811_v59, %s7471_s27  ;;  %4284 = vrot.lane.b32.xlu1 %v4272_v62, %s7476_s18  ;;  %v5115_v59 = vperm.slane %v6326_v26, 1  ;;  %v5117_v62 = vperm.slane %v6326_v26, 3 }
 0x918   : > { %v10735_v30 = vpop.permute.xlu1 %7217  ;;  %v7230_v3 = vunpack.i.h.bf16 %v10733_v54  ;;  %v7229_v25 = vunpack.i.l.bf16 %v10733_v54 }
 0x919   : > { %v7220_v58 = vunpack.i.h.bf16 %v10735_v30  ;;  %v7219_v8 = vunpack.i.l.bf16 %v10735_v30  ;;  %4229 = vrot.lane.b32.xlu2 %v4215_v51, %s7475_s21  ;;  %v5116_v51 = vperm.slane %v6326_v26, 2 }
 0x91a   : > { %v4593_v46 = vsel %vm841_vm2, %v7229_v25, %v7230_v3  ;;  %v6325_v25 = vld [vmem:[%s11729_s1 + $0x5] ss:$8 sm:$0xf] }
 0x91b   : > { %v4652_v32 = vsel %vm595_vm1, %v7219_v8, %v7220_v58  ;;  %v4712_v56 = vpack.c.bf16 %v4593_v46, %v4534_v63  ;;  %v5175_v8 = vperm.slane %v6327_v1, 2  ;;  %v5057_v46 = vperm.slane %v6325_v25, 2  ;;  %v10848_v63 = vld [vmem:[%s11729_s1 + $0x3] ss:$8 sm:$0xf] }
 0x91c   : > { %v4716_v6 = vpack.c.bf16 %v4652_v32, %v4652_v32  ;;  %v5055_v32 = vperm.slane %v6325_v25, 0  ;;  %v4990_v53 = vperm.slane %v10848_v63, 2 }
 0x91e   : > { %v4731_v5 = vsel %vm4729_vm10, %v4716_v6, 0  ;;  %v10839_v6 = vld [vmem:[%s11729_s1 + $0x2] ss:$8 sm:$0xf] }
 0x91f   : > { %4745 = vmatpush.bf16.msra.mxu2 %v4731_v5  ;;  %4821 = vrot.lane.b32.xlu0 %v4814_v60, %s7471_s27  ;;  %v5056_v60 = vperm.slane %v6325_v25, 1  ;;  %v4929_v5 = vperm.slane %v10839_v6, 0  ;;  %v4930_v11 = vperm.slane %v10839_v6, 1 }
 0x920   : > { %v10757_v52 = vpop.permute.xlu1 %7232  ;;  %4817 = vrot.lane.b32.xlu1 %v4812_v18, %s7471_s27  ;;  %v5058_v18 = vperm.slane %v6325_v25, 3 }
 0x921   : > { %v7235_v40 = vunpack.i.h.bf16 %v10757_v52  ;;  %v7234_v57 = vunpack.i.l.bf16 %v10757_v52  ;;  %4722 = vperm.xlu2 %6994, %v4179_v29   ;;  %v10805_v4 = vpop.permute.xlu0 %4343  ;;  %v4988_v29 = vperm.slane %v10848_v63, 0 }
 0x922   : > { %v10817_v31 = vsel %vm1217_vm6, %v7205_v9, %v10805_v4 }
 0x923   : > { %4746 = vmatpush.bf16.msra.mxu2 %v4712_v56  ;;  %v4475_v12 = vsel %vm1335_vm7, %v7234_v57, %v7235_v40  ;;  %v4989_v57 = vperm.slane %v10848_v63, 1 }
 0x924   : > { %v4708_v41 = vpack.c.bf16 %v4475_v12, %v10589_v50  ;;  %v4349_v50 = vsel %vm1217_vm6, %v7204_v16, %v7205_v9  ;;  %v10866_v12 = vld [vmem:[%s11729_s1 + $0x1] ss:$8 sm:$0xf] }
 0x925   : > { %v4704_v13 = vpack.c.bf16 %v4408_v19, %v4349_v50  ;;  %v4870_v16 = vperm.slane %v10866_v12, 0 }
 0x927   : > { %4747 = vmatpush.bf16.msra.mxu2 %v4708_v41  ;;  %5236 = vrot.lane.b32.xlu0 %v5232_v61, %s7475_s21  ;;  %v4871_v41 = vperm.slane %v10866_v12, 1 }
 0x928   : > { %5238 = vrot.lane.b32.xlu1 %v5233_v37, %s7475_s21 }
 0x929   : > { %4819 = vrot.lane.b32.xlu2 %v4813_v48, %s7471_s27 }
 0x92b   : > { %4748 = vmatpush.bf16.msra.mxu2 %v4704_v13 }
 0x92f   : > { %4749 = vmatpush.bf16.msra.mxu2 %v4700_v39  ;;  %5242 = vrot.lane.b32.xlu0 %v5235_v38, %s7475_s21 }
 0x930   : > { %5118 = vrot.lane.b32.xlu1 %v5114_v14, %s7477_s19 }
 0x931   : > { %5240 = vrot.lane.b32.xlu2 %v5234_v49, %s7475_s21 }
 0x932   : > { %6318 = vmatmul.msk.bf16.vlgmr.msra.gmra.mxu2 %vm4725_vm11, %v10801_v22  ;;  %v10812_v36 = vpop.permute.xlu1 %4402 }
 0x933   : > { %v10821_v33 = vsel %vm1464_vm8, %v7210_v21, %v10812_v36  ;;  %v4932_v21 = vperm.slane %v10839_v6, 3 }
 0x934   : > { %v4705_v47 = vpack.c.bf16 %v10821_v33, %v10817_v31 }
 0x937   : > { %5177 = vrot.lane.b32.xlu0 %v5173_v28, %s7476_s18 }
 0x938   : > { %5179 = vrot.lane.b32.xlu1 %v5174_v10, %s7476_s18 }
 0x939   : > { %5120 = vrot.lane.b32.xlu2 %v5115_v59, %s7477_s19 }
 0x93f   : > { %5124 = vrot.lane.b32.xlu0 %v5117_v62, %s7477_s19 }
 0x940   : > { %5181 = vrot.lane.b32.xlu1 %v5175_v8, %s7476_s18 }
 0x941   : > { %5122 = vrot.lane.b32.xlu2 %v5116_v51, %s7477_s19 }
 0x947   : > { %5059 = vrot.lane.b32.xlu0 %v5055_v32, %s12238_s13 }
 0x948   : > { %5061 = vrot.lane.b32.xlu1 %v5056_v60, %s12238_s13 }
 0x949   : > { %5183 = vrot.lane.b32.xlu2 %v5176_v17, %s7476_s18 }
 0x94f   : > { %5065 = vrot.lane.b32.xlu0 %v5058_v18, %s12238_s13 }
 0x950   : > { %4933 = vrot.lane.b32.xlu1 %v4929_v5, %s7473_s14 }
 0x951   : > { %5063 = vrot.lane.b32.xlu2 %v5057_v46, %s12238_s13 }
 0x953   : > { %v10853_v56 = vpop.permute.xlu2 %7237 }
 0x957   : > { %4992 = vrot.lane.b32.xlu0 %v4988_v29, %s12237_s24 }
 0x958   : > { %4994 = vrot.lane.b32.xlu1 %v4989_v57, %s12237_s24 }
 0x959   : > { %4935 = vrot.lane.b32.xlu2 %v4930_v11, %s7473_s14 }
 0x95b   : > { %v7253_v9 = vpop.permute.xlu2 %7252 }
 0x95c   : > { %v7254_v59 = vunpack.i.l.bf16 %v7253_v9 }
 0x95f   : > { %4939 = vrot.lane.b32.xlu0 %v4932_v21, %s7473_s14 }
 0x960   : > { %4996 = vrot.lane.b32.xlu1 %v4990_v53, %s12237_s24 }
 0x963   : > { %v7258_v61 = vpop.permute.xlu2 %7257 }
 0x964   : > { %v7260_v23 = vunpack.i.h.bf16 %v7258_v61  ;;  %v7259_v8 = vunpack.i.l.bf16 %v7258_v61 }
 0x967   : > { %4874 = vrot.lane.b32.xlu0 %v4870_v16, %s7472_s29 }
 0x968   : > { %4876 = vrot.lane.b32.xlu1 %v4871_v41, %s7472_s29 }
 0x969   : > { %v4647_v37 = vpop.permute.xlu0 %4646  ;;  %v4588_v43 = vpop.permute.xlu1 %4587 }
 0x96a   : > { %v4653_v19 = vsel %vm595_vm1, %v7220_v58, %v4647_v37  ;;  %v4594_v15 = vsel %vm841_vm2, %v7230_v3, %v4588_v43  ;;  %v7255_v3 = vunpack.i.h.bf16 %v7253_v9  ;;  %v4595_v17 = vsel %vm841_vm2, %v4588_v43, %v7254_v59 }
 0x96b   : > { %v4717_v48 = vpack.c.bf16 %v4653_v19, %v4653_v19  ;;  %v7268_v20 = vpop.permute.xlu2 %7267 }
 0x96c   : > { %v4596_v29 = vsel %vm841_vm2, %v7254_v59, %v7255_v3  ;;  %v7269_v21 = vunpack.i.l.bf16 %v7268_v20 }
 0x96d   : > { %v4734_v50 = vsel %vm4729_vm10, %v4717_v48, 0  ;;  %v4873_v48 = vperm.slane %v10866_v12, 3 }
 0x96e   : > { %4758 = vmatpush.bf16.msra.mxu0 %v4734_v50 }
 0x96f   : > { %4880 = vrot.lane.b32.xlu0 %v4873_v48, %s7472_s29 }
 0x971   : > { %v4529_v13 = vpop.permute.xlu0 %4528  ;;  %v7243_v26 = vpop.permute.xlu1 %7242 }
 0x972   : > { %v4535_v55 = vsel %vm1088_vm3, %v7225_v44, %v4529_v13  ;;  %v7245_v38 = vunpack.i.h.bf16 %v7243_v26  ;;  %v7244_v14 = vunpack.i.l.bf16 %v7243_v26 }
 0x973   : > { %v4713_v30 = vpack.c.bf16 %v4594_v15, %v4535_v55  ;;  %v4230_v39 = vpop.permute.xlu2 %4229 }
 0x974   : > { %v4654_v58 = vsel %vm595_vm1, %v4647_v37, %v7244_v14  ;;  %v4655_v49 = vsel %vm595_vm1, %v7244_v14, %v7245_v38 }
 0x975   : > { %4759 = vmatpush.bf16.msra.mxu0 %v4713_v30  ;;  %v4718_v1 = vpack.c.bf16 %v4654_v58, %v4654_v58  ;;  %v4719_v28 = vpack.c.bf16 %v4655_v49, %v4655_v49  ;;  %v4931_v49 = vperm.slane %v10839_v6, 2  ;;  %v4991_v6 = vperm.slane %v10848_v63, 3 }
 0x977   : > { %v4737_v10 = vsel %vm4729_vm10, %v4718_v1, 0  ;;  %v4740_v54 = vsel %vm4729_vm10, %v4719_v28, 0  ;;  %4937 = vrot.lane.b32.xlu2 %v4931_v49, %s7473_s14 }
 0x978   : > { %4771 = vmatpush.bf16.msra.mxu1 %v4737_v10  ;;  %4784 = vmatpush.bf16.msrb.mxu2 %v4740_v54 }
 0x979   : > { %v4470_v44 = vpop.permute.xlu0 %4469  ;;  %v7248_v62 = vpop.permute.xlu1 %7247 }
 0x97a   : > { %v4476_v51 = vsel %vm1335_vm7, %v7235_v40, %v4470_v44  ;;  %v7250_v25 = vunpack.i.h.bf16 %v7248_v62  ;;  %v7249_v32 = vunpack.i.l.bf16 %v7248_v62  ;;  %v4477_v52 = vsel %vm1335_vm7, %v4470_v44, %v7259_v8 }
 0x97b   : > { %v4709_v60 = vpack.c.bf16 %v4476_v51, %v10605_v34  ;;  %v10891_v18 = vpop.permute.xlu2 %4722  ;;  %v4478_v40 = vsel %vm1335_vm7, %v7259_v8, %v7260_v23  ;;  %v7270_v34 = vunpack.i.h.bf16 %v7268_v20  ;;  %v4710_v53 = vpack.c.bf16 %v4477_v52, %v10653_v42 }
 0x97c   : > { %v4536_v5 = vsel %vm1088_vm3, %v4529_v13, %v7249_v32  ;;  %v4537_v46 = vsel %vm1088_vm3, %v7249_v32, %v7250_v25  ;;  %v4711_v41 = vpack.c.bf16 %v4478_v40, %v10663_v0  ;;  %v4410_v42 = vsel %vm1464_vm8, %v10812_v36, %v7269_v21 }
 0x97d   : > { %4760 = vmatpush.bf16.msra.mxu0 %v4709_v60  ;;  %v4714_v57 = vpack.c.bf16 %v4595_v17, %v4536_v5  ;;  %v4715_v11 = vpack.c.bf16 %v4596_v29, %v4537_v46  ;;  %v4411_v31 = vsel %vm1464_vm8, %v7269_v21, %v7270_v34  ;;  %v7240_v0 = vunpack.i.h.bf16 %v10853_v56 }
 0x97f   : > { %4772 = vmatpush.bf16.msra.mxu1 %v4714_v57  ;;  %4785 = vmatpush.bf16.msrb.mxu2 %v4715_v11 }
 0x980   : > { %4998 = vrot.lane.b32.xlu2 %v4991_v6, %s12237_s24 }
 0x981   : > { %v7273_v9 = vpop.permute.xlu0 %7272  ;;  %v7263_v16 = vpop.permute.xlu1 %7262  ;;  %4761 = vmatpush.bf16.msra.mxu0 %v4705_v47  ;;  %v7239_v47 = vunpack.i.l.bf16 %v10853_v56 }
 0x982   : > { %v7275_v61 = vunpack.i.h.bf16 %v7273_v9  ;;  %v7274_v37 = vunpack.i.l.bf16 %v7273_v9  ;;  %v7265_v43 = vunpack.i.h.bf16 %v7263_v16  ;;  %v7264_v19 = vunpack.i.l.bf16 %v7263_v16 }
 0x983   : > { %4773 = vmatpush.bf16.msra.mxu1 %v4710_v53  ;;  %4786 = vmatpush.bf16.msrb.mxu2 %v4711_v41  ;;  %v10910_v33 = vpop.permute.xlu2 %4819  ;;  %v4233_v55 = vsel %vm490_vm4, %v7239_v47, %v7240_v0  ;;  %v4232_v30 = vsel %vm490_vm4, %v7200_v7, %v7239_v47 }
 0x984   : > { %v4351_v20 = vsel %vm1217_vm6, %v10805_v4, %v7264_v19  ;;  %v4352_v50 = vsel %vm1217_vm6, %v7264_v19, %v7265_v43  ;;  %v4293_v15 = vsel %vm970_vm5, %v7274_v37, %v7275_v61  ;;  %v4234_v4 = vsel %vm490_vm4, %v7240_v0, %v4230_v39 }
 0x985   : > { %v4706_v13 = vpack.c.bf16 %v4410_v42, %v4351_v20  ;;  %v4707_v26 = vpack.c.bf16 %v4411_v31, %v4352_v50  ;;  %v4703_v14 = vpack.c.bf16 %v4293_v15, %v4234_v4 }
 0x987   : > { %4774 = vmatpush.bf16.msra.mxu1 %v4706_v13  ;;  %4787 = vmatpush.bf16.msrb.mxu2 %v4707_v26 }
 0x989   : > { %v4816_v36 = vpop.permute.xlu0 %4815  ;;  %v4285_v38 = vpop.permute.xlu1 %4284 }
 0x98a   : > { %v4291_v56 = vsel %vm970_vm5, %v7215_v27, %v4285_v38  ;;  %v4292_v58 = vsel %vm970_vm5, %v4285_v38, %v7274_v37  ;;  %v4831_v21 = vmul.f32 %v4816_v36, %v10577_v24 }
 0x98b   : > { %v4701_v1 = vpack.c.bf16 %v4291_v56, %v4232_v30  ;;  %v4702_v28 = vpack.c.bf16 %v4292_v58, %v4233_v55  ;;  %4788 = vmatpush.bf16.msrb.mxu2 %v4703_v14  ;;  %v5241_v39 = vpop.permute.xlu2 %5240 }
 0x98d   : > { %4762 = vmatpush.bf16.msra.mxu0 %v4701_v1  ;;  %4775 = vmatpush.bf16.msra.mxu1 %v4702_v28 }
 0x98e   : > { %6321 = vmatmul.msk.bf16.vlgmr.msrb.gmra.mxu2 %vm4725_vm11, %v10801_v22 }
 0x990   : > { %6319 = vmatmul.msk.bf16.vlgmr.msra.gmra.mxu0 %vm4725_vm11, %v10801_v22  ;;  %6320 = vmatmul.msk.bf16.vlgmr.msra.gmra.mxu1 %vm4725_vm11, %v10801_v22  ;;  %v4872_v22 = vperm.slane %v10866_v12, 2 }
 0x991   : > { %v10933_v45 = vpop.permute.xlu0 %4821 }
 0x992   : > { %v4818_v2 = vpop.permute.xlu1 %4817  ;;  %4878 = vrot.lane.b32.xlu2 %v4872_v22, %s7472_s29  ;;  %v4825_v28 = vsel %vm595_vm1, %v10910_v33, %v10933_v45 }
 0x993   : > { %v10937_v7 = vsel %vm595_vm1, %v4818_v2, %v10910_v33  ;;  %v5121_v27 = vpop.permute.xlu2 %5120  ;;  %v4823_v34 = vsel %vm595_vm1, %v4816_v36, %v4818_v2 }
 0x999   : > { %v5237_v10 = vpop.permute.xlu0 %5236 }
 0x99a   : > { %v5239_v54 = vpop.permute.xlu1 %5238 }
 0x99b   : > { %v10942_v3 = vsel %vm490_vm4, %v5237_v10, %v5239_v54  ;;  %v10945_v59 = vsel %vm490_vm4, %v5239_v54, %v5241_v39  ;;  %v5123_v23 = vpop.permute.xlu2 %5122 }
 0x99c   : > { %v10949_v44 = vsel %vm1217_vm6, %v5121_v27, %v5123_v23 }
 0x9a1   : > { %v10952_v62 = vpop.permute.xlu0 %5242 }
 0x9a2   : > { %v5119_v63 = vpop.permute.xlu1 %5118  ;;  %v10956_v8 = vsel %vm490_vm4, %v5241_v39, %v10952_v62 }
 0x9a3   : > { %v5126_v51 = vsel %vm1217_vm6, %v5119_v63, %v5121_v27  ;;  %v10960_v12 = vpop.permute.xlu2 %5183 }
 0x9a9   : > { %v5178_v25 = vpop.permute.xlu0 %5177 }
 0x9aa   : > { %v5180_v32 = vpop.permute.xlu1 %5179 }
 0x9ab   : > { %v5185_v60 = vsel %vm970_vm5, %v5178_v25, %v5180_v32  ;;  %v5064_v40 = vpop.permute.xlu2 %5063 }
 0x9b1   : > { %v5125_v17 = vpop.permute.xlu0 %5124 }
 0x9b2   : > { %v5182_v5 = vpop.permute.xlu1 %5181  ;;  %v10963_v46 = vsel %vm1217_vm6, %v5123_v23, %v5125_v17 }
 0x9b3   : > { %v10966_v29 = vsel %vm970_vm5, %v5180_v32, %v5182_v5  ;;  %v10970_v57 = vsel %vm970_vm5, %v5182_v5, %v10960_v12  ;;  %v10986_v48 = vpop.permute.xlu2 %4935 }
 0x9b5   : > { %v4751_v11 = vpop.f32.mrf.mxu2 }
 0x9b6   : > { %v10973_v52 = vadd.f32 %v4751_v11, %v10891_v18 }
 0x9b8   : > { %v10978_v53 = vmax.f32 %v10973_v52, 0.0 }
 0x9b9   : > { %v5060_v9 = vpop.permute.xlu0 %5059 }
 0x9ba   : > { %v5062_v16 = vpop.permute.xlu1 %5061  ;;  %v4832_v41 = vmul.f32 %v4823_v34, %v10978_v53  ;;  %v5075_v2 = vmul.f32 %v5060_v9, %v10978_v53  ;;  %v5134_v6 = vmul.f32 %v5119_v63, %v10978_v53  ;;  %v5252_v54 = vmul.f32 %v5237_v10, %v10978_v53 }
 0x9bb   : > { %v5067_v61 = vsel %vm1464_vm8, %v5060_v9, %v5062_v16  ;;  %v10983_v37 = vsel %vm1464_vm8, %v5062_v16, %v5064_v40  ;;  %v5193_v11 = vmul.f32 %v5178_v25, %v10978_v53  ;;  %v5256_v25 = vmul.f32 %v10952_v62, %v10671_v35 }
 0x9bc   : > { %v7276_v43 = vpack.i.bf16 %v4832_v41, %v4831_v21  ;;  %v5197_v41 = vmul.f32 %v10960_v12, %v10671_v35 }
 0x9bd   : > { %v4753_v19 = vpop.f32.mrf.mxu2 }
 0x9be   : > { %7277 = vrot.lane.b32.xlu1 %v7276_v43, %s7475_s21 }
 0x9c1   : > { %v5066_v20 = vpop.permute.xlu0 %5065 }
 0x9c2   : > { %v4934_v42 = vpop.permute.xlu1 %4933  ;;  %v5069_v50 = vsel %vm1464_vm8, %v5064_v40, %v5066_v20  ;;  %v5079_v19 = vmul.f32 %v5066_v20, %v10671_v35 }
 0x9c3   : > { %v4941_v31 = vsel %vm1088_vm3, %v4934_v42, %v10986_v48  ;;  %v4949_v0 = vmul.f32 %v4934_v42, %v10577_v24 }
 0x9c4   : > { %v4950_v47 = vmul.f32 %v4941_v31, %v10978_v53 }
 0x9c6   : > { %v7281_v13 = vpack.i.bf16 %v4950_v47, %v4949_v0 }
 0x9c8   : > { %7282 = vrot.lane.b32.xlu0 %v7281_v13, %s7477_s19 }
 0x9c9   : > { %v4993_v26 = vpop.permute.xlu0 %4992 }
 0x9ca   : > { %v10994_v15 = vpop.permute.xlu1 %4994  ;;  %v5008_v4 = vmul.f32 %v4993_v26, %v10577_v24 }
 0x9cb   : > { %v5000_v36 = vsel %vm1335_vm7, %v4993_v26, %v10994_v15 }
 0x9cc   : > { %v5009_v55 = vmul.f32 %v5000_v36, %v10978_v53 }
 0x9ce   : > { %v7286_v38 = vpack.i.bf16 %v5009_v55, %v5008_v4 }
 0x9d0   : > { %7287 = vrot.lane.b32.xlu1 %v7286_v38, %s12238_s13 }
 0xa0d   : > { %v4764_v14 = vpop.f32.mrf.mxu0  ;;  %v4777_v30 = vpop.f32.mrf.mxu1 }
 0xa0e   : > { %v11002_v56 = vadd.f32 %v4764_v14, %v10891_v18  ;;  %v11005_v58 = vadd.f32 %v4777_v30, %v10891_v18 }
 0xa10   : > { %v11008_v49 = vmax.f32 %v11002_v56, 0.0  ;;  %v11011_v1 = vmax.f32 %v11005_v58, 0.0 }
 0xa11   : > { %v4790_v39 = vpop.f32.mrf.mxu2 }
 0xa12   : > { %v11018_v27 = vadd.f32 %v4790_v39, %v10891_v18  ;;  %v5076_v22 = vmul.f32 %v5067_v61, %v11008_v49  ;;  %v5135_v23 = vmul.f32 %v5126_v51, %v11008_v49  ;;  %v5253_v32 = vmul.f32 %v10942_v3, %v11008_v49 }
 0xa13   : > { %v4833_v33 = vmul.f32 %v10937_v7, %v11008_v49  ;;  %v4834_v18 = vmul.f32 %v4825_v28, %v11011_v1  ;;  %v5194_v63 = vmul.f32 %v5185_v60, %v11008_v49  ;;  %v5138_v3 = vmul.f32 %v5125_v17, %v10671_v35 }
 0xa14   : > { %v11029_v5 = vmax.f32 %v11018_v27, 0.0  ;;  %v7306_v40 = vpack.i.bf16 %v5076_v22, %v5075_v2  ;;  %v7296_v34 = vpack.i.bf16 %v5135_v23, %v5134_v6  ;;  %v7291_v21 = vpack.i.bf16 %v5253_v32, %v5252_v54 }
 0xa15   : > { %v4766_v10 = vpop.f32.mrf.mxu0  ;;  %v4779_v51 = vpop.f32.mrf.mxu1  ;;  %v7311_v9 = vpack.i.bf16 %v4834_v18, %v4833_v33  ;;  %v7301_v16 = vpack.i.bf16 %v5194_v63, %v5193_v11  ;;  %v5136_v0 = vmul.f32 %v10949_v44, %v11011_v1  ;;  %v5254_v35 = vmul.f32 %v10945_v59, %v11011_v1 }
 0xa16   : > { %7307 = vrot.lane.b32.xlu2 %v7306_v40, %s12237_s24  ;;  %7297 = vrot.lane.b32.xlu0 %v7296_v34, %s7473_s14  ;;  %v5137_v7 = vmul.f32 %v10963_v46, %v11029_v5  ;;  %v5255_v60 = vmul.f32 %v10956_v8, %v11029_v5  ;;  %v5196_v43 = vmul.f32 %v10970_v57, %v11029_v5  ;;  %v4938_v8 = vpop.permute.xlu2 %4937  ;;  %v4940_v57 = vpop.permute.xlu0 %4939  ;;  %v4799_v10 = vld [vmem:[%s11737_s9] sm:$0xf]  ;;  %v7481_v40 = vmov 2  }
 0xa17   : > { %7292 = vrot.lane.b32.xlu1 %v7291_v21, %s7471_s27  ;;  %v5078_v46 = vmul.f32 %v5069_v50, %v11029_v5  ;;  %v4942_v12 = vsel %vm1088_vm3, %v10986_v48, %v4938_v8  ;;  %v5195_v50 = vmul.f32 %v10966_v29, %v11011_v1  ;;  %v4997_v44 = vpop.permute.xlu1 %4996  ;;  %v5077_v59 = vmul.f32 %v10983_v37, %v11011_v1  ;;  %v5416_v34 = vld [vmem:[%s11738_s10] sm:$0xff] }
 0xa18   : > { %v7326_v61 = vpack.i.bf16 %v5138_v3, %v5137_v7  ;;  %v7316_v42 = vpack.i.bf16 %v5256_v25, %v5255_v60  ;;  %v7331_v31 = vpack.i.bf16 %v5197_v41, %v5196_v43  ;;  %v4951_v20 = vmul.f32 %v4942_v12, %v11008_v49  ;;  %7358 = vset.pattern.permute.xlu0 %v7481_v40  ;;  %v5417_v21 = vld [vmem:[%s11739_s11] sm:$0xff] }
 0xa19   : > { %v4792_v17 = vpop.f32.mrf.mxu2  ;;  %v7336_v62 = vpack.i.bf16 %v5079_v19, %v5078_v46  ;;  %v5001_v48 = vsel %vm1335_vm7, %v10994_v15, %v4997_v44  ;;  %v4943_v29 = vsel %vm1088_vm3, %v4938_v8, %v4940_v57  ;;  %v4953_v4 = vmul.f32 %v4940_v57, %v11029_v5  ;;  %v11121_v25 = vld [vmem:[%s11729_s1 + $0x7] ss:$8 sm:$0xf]  ;;  %v11126_v60 = vld [vmem:[%s11729_s1 + $0x6] ss:$8 sm:$0xf] }
 0xa1a   : > { %v5010_v26 = vmul.f32 %v5001_v48, %v11008_v49  ;;  %v4952_v55 = vmul.f32 %v4943_v29, %v11011_v1  ;;  %v4835_v63 = vmul.f32 %v10933_v45, %v11029_v5  ;;  %v12250_v45 = vmov 0   ;;  %v11150_v12 = vld [vmem:[%s11729_s1 + $0x5] ss:$8 sm:$0xf] }
 0xa1b   : > { %v7482_v51 = vmov 3   ;;  %v5873_v41 = vperm.slane %v11121_v25, 0  ;;  %v7483_v43 = vmov 1   ;;  %v5755_v57 = vperm.slane %v11150_v12, 0 }
 0xa1c   : > { %v7341_v14 = vpack.i.bf16 %v4953_v4, %v4952_v55 }
 0xa1e   : > { %7312 = vrot.lane.b32.xlu2 %v7311_v9, %s7475_s21  ;;  %5148 = vrot.lane.b32.xlu0 %v5136_v0, %s7473_s14  ;;  %v4999_v47 = vpop.permute.xlu2 %4998  ;;  %v4875_v13 = vpop.permute.xlu0 %4874  ;;  %v6341_v9 = vld [vmem:[%s11729_s1 + $0x20] ss:$8 sm:$0xf] }
 0xa1f   : > { %7302 = vrot.lane.b32.xlu1 %v7301_v16, %s7472_s29  ;;  %v4877_v36 = vpop.permute.xlu1 %4876  ;;  %v4890_v28 = vmul.f32 %v4875_v13, %v10577_v24  ;;  %v5002_v2 = vsel %vm1335_vm7, %v4997_v44, %v4999_v47  ;;  %v5012_v54 = vmul.f32 %v4999_v47, %v11029_v5  ;;  %v5935_v16 = vperm.slane %v6341_v9, 3 }
 0xa20   : > { %v4882_v37 = vsel %vm841_vm2, %v4875_v13, %v4877_v36  ;;  %v5011_v23 = vmul.f32 %v5002_v2, %v11011_v1  ;;  %v5933_v3 = vperm.slane %v6341_v9, 1  ;;  %v5932_v46 = vperm.slane %v6341_v9, 0 }
 0xa21   : > { %v4891_v39 = vmul.f32 %v4882_v37, %v10978_v53 }
 0xa22   : > { %v7346_v18 = vpack.i.bf16 %v5012_v54, %v5011_v23 }
 0xa23   : > { %v7321_v32 = vpack.i.bf16 %v4891_v39, %v4890_v28  ;;  %v5756_v39 = vperm.slane %v11150_v12, 1 }
 0xa26   : > { %5266 = vrot.lane.b32.xlu2 %v5254_v35, %s7471_s27  ;;  %4963 = vrot.lane.b32.xlu0 %v4951_v20, %s7477_s19  ;;  %v4881_v15 = vpop.permute.xlu0 %4880  ;;  %v4879_v38 = vpop.permute.xlu2 %4878  ;;  %v5934_v35 = vperm.slane %v6341_v9, 2  ;;  %v5875_v20 = vperm.slane %v11121_v25, 2 }
 0xa27   : > { %5207 = vrot.lane.b32.xlu1 %v5195_v50, %s7472_s29  ;;  %v4884_v30 = vsel %vm841_vm2, %v4879_v38, %v4881_v15  ;;  %v4894_v6 = vmul.f32 %v4881_v15, %v11029_v5  ;;  %v4883_v24 = vsel %vm841_vm2, %v4877_v36, %v4879_v38  ;;  %v5758_v15 = vperm.slane %v11150_v12, 3 }
 0xa28   : > { %v4893_v22 = vmul.f32 %v4884_v30, %v11011_v1  ;;  %v4892_v11 = vmul.f32 %v4883_v24, %v11008_v49  ;;  %v5815_v38 = vperm.slane %v11126_v60, 1 }
 0xa2a   : > { %v7351_v33 = vpack.i.bf16 %v4894_v6, %v4893_v22 }
 0xa2e   : > { %5089 = vrot.lane.b32.xlu2 %v5077_v59, %s12237_s24  ;;  %7327 = vrot.lane.b32.xlu0 %v7326_v61, %s7473_s14  ;;  %v5814_v61 = vperm.slane %v11126_v60, 0 }
 0xa2f   : > { %5022 = vrot.lane.b32.xlu1 %v5010_v26, %s12238_s13 }
 0xa30   : > { %v11133_v19 = vpop.permute.xlu1 %7277 }
 0xa36   : > { %7317 = vrot.lane.b32.xlu2 %v7316_v42, %s7471_s27  ;;  %7342 = vrot.lane.b32.xlu0 %v7341_v14, %s7477_s19  ;;  %v5817_v42 = vperm.slane %v11126_v60, 3 }
 0xa37   : > { %7332 = vrot.lane.b32.xlu1 %v7331_v31, %s7472_s29  ;;  %v5874_v31 = vperm.slane %v11121_v25, 1 }
 0xa3e   : > { %7352 = vrot.lane.b32.xlu0 %v7351_v33, %s7476_s18  ;;  %7322 = vrot.lane.b32.xlu2 %v7321_v32, %s7476_s18 }
 0xa3f   : > { %7347 = vrot.lane.b32.xlu1 %v7346_v18, %s12238_s13 }
 0xa42   : > { %v11141_v8 = vpop.permute.xlu1 %7287 }
 0xa46   : > { %7337 = vrot.lane.b32.xlu2 %v7336_v62, %s12237_s24  ;;  %5457 = vperm.xlu0 %7358, %v5416_v34   ;;  %v11139_v62 = vpop.permute.xlu0 %7282 }
 0xa47   : > { %4904 = vrot.lane.b32.xlu1 %v4892_v11, %s7476_s18 }
 0xa4e   : > { %4849 = vrot.lane.b32.xlu2 %v4835_v63, %s7475_s21  ;;  %7359 = vset.pattern.permute.xlu0 %v12250_v45 }
 0xa4f   : > { %5433 = vperm.xlu1 %7356, %v5417_v21   ;;  %5420 = vperm.xlu0 %7359, %v5416_v34   ;;  %v7290_v21 = vunpack.i.h.bf16 %v11141_v8 }
 0xa56   : > { %5342 = vperm.xlu2 %6994, %v4799_v10  }
 0xa57   : > { %7360 = vset.pattern.permute.xlu1 %v7482_v51  ;;  %5942 = vrot.lane.b32.xlu0 %v5935_v16, %s7475_s21 }
 0xa58   : > { %5473 = vperm.xlu1 %7360, %v5416_v34  }
 0xa5e   : > { %7357 = vset.pattern.permute.xlu2 %v7483_v43 }
 0xa5f   : > { %5877 = vrot.lane.b32.xlu0 %v5873_v41, %s7476_s18  ;;  %5441 = vperm.xlu2 %7357, %v5416_v34   ;;  %v11189_v41 = vld [vmem:[%s11729_s1 + $0x3] ss:$8 sm:$0xf] }
 0xa60   : > { %5938 = vrot.lane.b32.xlu1 %v5933_v3, %s7475_s21 }
 0xa61   : > { %7442 = vset.pattern.permute.xlu1 %v12250_v45 }
 0xa67   : > { %5824 = vrot.lane.b32.xlu0 %v5817_v42, %s7477_s19  ;;  %5936 = vrot.lane.b32.xlu2 %v5932_v46, %s7475_s21  ;;  %v5816_v42 = vperm.slane %v11126_v60, 2  ;;  %v11196_v46 = vld [vmem:[%s11729_s1 + $0x2] ss:$8 sm:$0xf] }
 0xa68   : > { %5818 = vrot.lane.b32.xlu1 %v5814_v61, %s7477_s19  ;;  %7441 = vset.pattern.permute.xlu2 %v12250_v45  ;;  %v7289_v45 = vunpack.i.l.bf16 %v11141_v8  ;;  %v5688_v61 = vperm.slane %v11189_v41, 0 }
 0xa6a   : > { %v5028_v60 = vsel %vm1464_vm8, %v7289_v45, %v7290_v21 }
 0xa6f   : > { %5759 = vrot.lane.b32.xlu0 %v5755_v57, %s12238_s13  ;;  %5940 = vrot.lane.b32.xlu2 %v5934_v35, %s7475_s21  ;;  %v5629_v35 = vperm.slane %v11196_v46, 0 }
 0xa70   : > { %v11113_v7 = vpop.permute.xlu2 %7307  ;;  %5879 = vrot.lane.b32.xlu1 %v5874_v31, %s7476_s18  ;;  %v7285_v31 = vunpack.i.h.bf16 %v11139_v62 }
 0xa71   : > { %v7310_v22 = vunpack.i.h.bf16 %v11113_v7  ;;  %v7309_v23 = vunpack.i.l.bf16 %v11113_v7 }
 0xa73   : > { %v5095_v7 = vsel %vm1335_vm7, %v7309_v23, %v7310_v22  ;;  %v11244_v23 = vld [vmem:[%s11736_s8] sm:$0x3] }
 0xa77   : > { %5765 = vrot.lane.b32.xlu0 %v5758_v15, %s12238_s13  ;;  %5820 = vrot.lane.b32.xlu2 %v5815_v38, %s7477_s19  ;;  %v5632_v38 = vperm.slane %v11196_v46, 3 }
 0xa78   : > { %v11130_v17 = vpop.permute.xlu2 %7312  ;;  %5881 = vrot.lane.b32.xlu1 %v5875_v20, %s7476_s18 }
 0xa7f   : > { %5692 = vrot.lane.b32.xlu0 %v5688_v61, %s12237_s24  ;;  %5822 = vrot.lane.b32.xlu2 %v5816_v42, %s7477_s19 }
 0xa80   : > { %v5267_v0 = vpop.permute.xlu2 %5266  ;;  %5761 = vrot.lane.b32.xlu1 %v5756_v39, %s12238_s13 }
 0xa87   : > { %5639 = vrot.lane.b32.xlu0 %v5632_v38, %s7473_s14 }
 0xa88   : > { %v11154_v50 = vpop.permute.xlu2 %5089  ;;  %v11156_v44 = vpop.permute.xlu0 %7297  ;;  %5633 = vrot.lane.b32.xlu1 %v5629_v35, %s7473_s14 }
 0xa89   : > { %v7293_v47 = vpop.permute.xlu1 %7292  ;;  %v7300_v14 = vunpack.i.h.bf16 %v11156_v44  ;;  %v7299_v37 = vunpack.i.l.bf16 %v11156_v44  ;;  %v5328_v44 = vpack.c.bf16 %v5095_v7, %v10978_v53  ;;  %v7280_v53 = vunpack.i.h.bf16 %v11133_v19 }
 0xa8a   : > { %v7295_v48 = vunpack.i.h.bf16 %v7293_v47  ;;  %v7294_v13 = vunpack.i.l.bf16 %v7293_v47 }
 0xa8b   : > { %v5154_v11 = vsel %vm1088_vm3, %v7299_v37, %v7300_v14  ;;  %v5689_v37 = vperm.slane %v11189_v41, 1 }
 0xa8c   : > { %v5272_v59 = vsel %vm595_vm1, %v7294_v13, %v7295_v48  ;;  %v5273_v26 = vsel %vm595_vm1, %v7295_v48, %v5267_v0 }
 0xa8d   : > { %v5336_v29 = vpack.c.bf16 %v5272_v59, %v5272_v59  ;;  %v5337_v4 = vpack.c.bf16 %v5273_v26, %v5273_v26  ;;  %v7279_v26 = vunpack.i.l.bf16 %v11133_v19  ;;  %v5691_v19 = vperm.slane %v11189_v41, 3 }
 0xa8f   : > { %v5349_v36 = vsel %vm4729_vm10, %v5336_v29, 0  ;;  %v5352_v55 = vsel %vm4729_vm10, %v5337_v4, 0  ;;  %v5096_v29 = vsel %vm1335_vm7, %v7310_v22, %v11154_v50  ;;  %v4851_v39 = vsel %vm490_vm4, %v7279_v26, %v7280_v53 }
 0xa90   : > { %5363 = vmatpush.bf16.msra.mxu3 %v5349_v36  ;;  %5376 = vmatpush.bf16.msrb.mxu0 %v5352_v55  ;;  %v7318_v30 = vpop.permute.xlu2 %7317  ;;  %v11169_v28 = vpop.permute.xlu0 %5148  ;;  %v5329_v15 = vpack.c.bf16 %v5096_v29, %v11008_v49 }
 0xa91   : > { %v7320_v2 = vunpack.i.h.bf16 %v7318_v30  ;;  %v7319_v6 = vunpack.i.l.bf16 %v7318_v30  ;;  %v7303_v54 = vpop.permute.xlu1 %7302  ;;  %v5155_v47 = vsel %vm1088_vm3, %v7300_v14, %v11169_v28  ;;  %v5876_v14 = vperm.slane %v11121_v25, 3  ;;  %5694 = vrot.lane.b32.xlu1 %v5689_v37, %s12237_s24  ;;  %v11239_v25 = vld [vmem:[%s11729_s1] ss:$8 sm:$0xf] }
 0xa92   : > { %v7305_v32 = vunpack.i.h.bf16 %v7303_v54  ;;  %v7304_v33 = vunpack.i.l.bf16 %v7303_v54  ;;  %v7314_v37 = vunpack.i.l.bf16 %v11130_v17 }
 0xa93   : > { %v5274_v18 = vsel %vm595_vm1, %v5267_v0, %v7319_v6  ;;  %v5275_v24 = vsel %vm595_vm1, %v7319_v6, %v7320_v2  ;;  %v7284_v0 = vunpack.i.l.bf16 %v11139_v62  ;;  %5883 = vrot.lane.b32.xlu2 %v5876_v14, %s7476_s18 }
 0xa94   : > { %v5213_v63 = vsel %vm841_vm2, %v7304_v33, %v7305_v32  ;;  %v5338_v10 = vpack.c.bf16 %v5274_v18, %v5274_v18  ;;  %v5339_v34 = vpack.c.bf16 %v5275_v24, %v5275_v24  ;;  %v5757_v33 = vperm.slane %v11150_v12, 2  ;;  %v11257_v12 = vld [vmem:[%s11729_s1 + $0x1] ss:$8 sm:$0xf] }
 0xa95   : > { %v5332_v9 = vpack.c.bf16 %v5213_v63, %v5154_v11  ;;  %v4969_v4 = vsel %vm1217_vm6, %v7284_v0, %v7285_v31  ;;  %v5690_v18 = vperm.slane %v11189_v41, 2  ;;  %v5571_v35 = vperm.slane %v11257_v12, 1 }
 0xa96   : > { %v5355_v16 = vsel %vm4729_vm10, %v5338_v10, 0  ;;  %v5358_v3 = vsel %vm4729_vm10, %v5339_v34, 0  ;;  %v5324_v36 = vpack.c.bf16 %v5028_v60, %v4969_v4  ;;  %v5514_v41 = vperm.slane %v11239_v25, 3 }
 0xa97   : > { %5364 = vmatpush.bf16.msra.mxu3 %v5332_v9  ;;  %5389 = vmatpush.bf16.msrb.mxu1 %v5355_v16 }
 0xa98   : > { %5402 = vmatpush.bf16.msra.mxu2 %v5358_v3  ;;  %v11200_v8 = vpop.permute.xlu0 %4963  ;;  %v11202_v57 = vpop.permute.xlu2 %7322 }
 0xa99   : > { %v5208_v20 = vpop.permute.xlu1 %5207  ;;  %v7325_v62 = vunpack.i.h.bf16 %v11202_v57  ;;  %v7324_v48 = vunpack.i.l.bf16 %v11202_v57  ;;  %v4970_v49 = vsel %vm1217_vm6, %v7285_v31, %v11200_v8  ;;  %5696 = vrot.lane.b32.xlu1 %v5690_v18, %s12237_s24  ;;  %v5573_v57 = vperm.slane %v11257_v12, 3 }
 0xa9a   : > { %v5214_v13 = vsel %vm841_vm2, %v7305_v32, %v5208_v20  ;;  %v5511_v32 = vperm.slane %v11239_v25, 0 }
 0xa9b   : > { %v5333_v59 = vpack.c.bf16 %v5214_v13, %v5155_v47  ;;  %5365 = vmatpush.bf16.msra.mxu3 %v5328_v44  ;;  %v4910_v55 = vsel %vm970_vm5, %v7324_v48, %v7325_v62  ;;  %5763 = vrot.lane.b32.xlu2 %v5757_v33, %s12238_s13  ;;  %v5630_v47 = vperm.slane %v11196_v46, 1  ;;  %v5512_v48 = vperm.slane %v11239_v25, 1 }
 0xa9c   : > { %v5320_v6 = vpack.c.bf16 %v4910_v55, %v4851_v39  ;;  %5515 = vrot.lane.b32.xlu0 %v5511_v32, %s7471_s27  ;;  %v5513_v32 = vperm.slane %v11239_v25, 2 }
 0xa9d   : > { %5377 = vmatpush.bf16.msrb.mxu0 %v5333_v59 }
 0xa9f   : > { %5366 = vmatpush.bf16.msra.mxu3 %v5324_v36 }
 0xaa0   : > { %v7328_v30 = vpop.permute.xlu0 %7327  ;;  %v7338_v24 = vpop.permute.xlu2 %7337 }
 0xaa1   : > { %v5023_v2 = vpop.permute.xlu1 %5022  ;;  %5378 = vmatpush.bf16.msrb.mxu0 %v5329_v15  ;;  %v7330_v11 = vunpack.i.h.bf16 %v7328_v30  ;;  %v7329_v63 = vunpack.i.l.bf16 %v7328_v30  ;;  %v7339_v45 = vunpack.i.l.bf16 %v7338_v24  ;;  %5517 = vrot.lane.b32.xlu1 %v5512_v48, %s7471_s27  ;;  %v7315_v15 = vunpack.i.h.bf16 %v11130_v17 }
 0xaa2   : > { %v5029_v54 = vsel %vm1464_vm8, %v7290_v21, %v5023_v2  ;;  %v7340_v21 = vunpack.i.h.bf16 %v7338_v24  ;;  %v4852_v17 = vsel %vm490_vm4, %v7280_v53, %v7314_v37 }
 0xaa3   : > { %v5325_v22 = vpack.c.bf16 %v5029_v54, %v4970_v49  ;;  %5367 = vmatpush.bf16.msra.mxu3 %v5320_v6  ;;  %v5156_v3 = vsel %vm1088_vm3, %v11169_v28, %v7329_v63  ;;  %v5157_v61 = vsel %vm1088_vm3, %v7329_v63, %v7330_v11  ;;  %v5097_v44 = vsel %vm1335_vm7, %v11154_v50, %v7339_v45 }
 0xaa4   : > { %v5098_v60 = vsel %vm1335_vm7, %v7339_v45, %v7340_v21  ;;  %v5330_v26 = vpack.c.bf16 %v5097_v44, %v11011_v1  ;;  %5576 = vrot.lane.b32.xlu0 %v5571_v35, %s7472_s29  ;;  %5635 = vrot.lane.b32.xlu2 %v5630_v47, %s7473_s14  ;;  %v5572_v49 = vperm.slane %v11257_v12, 2 }
 0xaa5   : > { %5379 = vmatpush.bf16.msrb.mxu0 %v5325_v22  ;;  %v5331_v29 = vpack.c.bf16 %v5098_v60, %v11029_v5  ;;  %v5631_v22 = vperm.slane %v11196_v46, 2 }
 0xaa6   : > { %6329 = vmatmul.msk.bf16.vlgmr.msra.gmra.mxu3 %vm4725_vm11, %v11244_v23 }
 0xaa8   : > { %v7343_v10 = vpop.permute.xlu0 %7342  ;;  %v4850_v30 = vpop.permute.xlu2 %4849 }
 0xaa9   : > { %v7333_v34 = vpop.permute.xlu1 %7332  ;;  %v7345_v28 = vunpack.i.h.bf16 %v7343_v10  ;;  %5519 = vrot.lane.b32.xlu1 %v5513_v32, %s7471_s27 }
 0xaaa   : > { %v7335_v9 = vunpack.i.h.bf16 %v7333_v34  ;;  %v7334_v16 = vunpack.i.l.bf16 %v7333_v34 }
 0xaac   : > { %v5215_v7 = vsel %vm841_vm2, %v5208_v20, %v7334_v16  ;;  %v5216_v42 = vsel %vm841_vm2, %v7334_v16, %v7335_v9  ;;  %v7344_v20 = vunpack.i.l.bf16 %v7343_v10  ;;  %5578 = vrot.lane.b32.xlu0 %v5572_v49, %s7472_s29  ;;  %5637 = vrot.lane.b32.xlu2 %v5631_v22, %s7473_s14 }
 0xaad   : > { %v5334_v31 = vpack.c.bf16 %v5215_v7, %v5156_v3  ;;  %v5335_v0 = vpack.c.bf16 %v5216_v42, %v5157_v61 }
 0xaae   : > { %v4971_v38 = vsel %vm1217_vm6, %v11200_v8, %v7344_v20  ;;  %v4972_v5 = vsel %vm1217_vm6, %v7344_v20, %v7345_v28  ;;  %v4854_v8 = vsel %vm490_vm4, %v7315_v15, %v4850_v30 }
 0xaaf   : > { %5390 = vmatpush.bf16.msrb.mxu1 %v5334_v31  ;;  %5403 = vmatpush.bf16.msra.mxu2 %v5335_v0 }
 0xab0   : > { %v7353_v13 = vpop.permute.xlu0 %7352  ;;  %v11310_v53 = vpop.permute.xlu2 %5342 }
 0xab1   : > { %v7348_v59 = vpop.permute.xlu1 %7347  ;;  %v7355_v4 = vunpack.i.h.bf16 %v7353_v13  ;;  %v7354_v50 = vunpack.i.l.bf16 %v7353_v13  ;;  %5580 = vrot.lane.b32.xlu1 %v5573_v57, %s7472_s29 }
 0xab2   : > { %v7350_v36 = vunpack.i.h.bf16 %v7348_v59  ;;  %v7349_v55 = vunpack.i.l.bf16 %v7348_v59 }
 0xab3   : > { %5391 = vmatpush.bf16.msrb.mxu1 %v5330_v26  ;;  %5404 = vmatpush.bf16.msra.mxu2 %v5331_v29  ;;  %v4913_v54 = vsel %vm970_vm5, %v7354_v50, %v7355_v4 }
 0xab4   : > { %v5030_v1 = vsel %vm1464_vm8, %v5023_v2, %v7349_v55  ;;  %v5031_v14 = vsel %vm1464_vm8, %v7349_v55, %v7350_v36  ;;  %v4853_v2 = vsel %vm490_vm4, %v7314_v37, %v7315_v15  ;;  %v5323_v18 = vpack.c.bf16 %v4913_v54, %v4854_v8  ;;  %5698 = vrot.lane.b32.xlu2 %v5691_v19, %s12237_s24 }
 0xab5   : > { %v5326_v39 = vpack.c.bf16 %v5030_v1, %v4971_v38  ;;  %v5327_v6 = vpack.c.bf16 %v5031_v14, %v4972_v5 }
 0xab7   : > { %5392 = vmatpush.bf16.msrb.mxu1 %v5326_v39  ;;  %5405 = vmatpush.bf16.msra.mxu2 %v5327_v6 }
 0xab8   : > { %v11313_v10 = vpop.permute.xlu0 %5457 }
 0xab9   : > { %v4905_v33 = vpop.permute.xlu1 %4904  ;;  %v11318_v21 = vpop.permute.xlu2 %5441 }
 0xaba   : > { %v4911_v46 = vsel %vm970_vm5, %v7325_v62, %v4905_v33  ;;  %v4912_v24 = vsel %vm970_vm5, %v4905_v33, %v7354_v50  ;;  %v5570_v62 = vperm.slane %v11257_v12, 0 }
 0xabb   : > { %v5321_v11 = vpack.c.bf16 %v4911_v46, %v4852_v17  ;;  %v5322_v63 = vpack.c.bf16 %v4912_v24, %v4853_v2  ;;  %5406 = vmatpush.bf16.msra.mxu2 %v5323_v18 }
 0xabc   : > { %5574 = vrot.lane.b32.xlu2 %v5570_v62, %s7472_s29 }
 0xabd   : > { %5380 = vmatpush.bf16.msrb.mxu0 %v5321_v11  ;;  %5393 = vmatpush.bf16.msrb.mxu1 %v5322_v63 }
 0xabe   : > { %6332 = vmatmul.msk.bf16.vlgmr.msra.gmra.mxu2 %vm4725_vm11, %v11244_v23 }
 0xac0   : > { %6330 = vmatmul.msk.bf16.vlgmr.msrb.gmra.mxu0 %vm4725_vm11, %v11244_v23  ;;  %6331 = vmatmul.msk.bf16.vlgmr.msrb.gmra.mxu1 %vm4725_vm11, %v11244_v23 }
 0xac1   : > { %v11315_v34 = vpop.permute.xlu1 %5433  ;;  %v11320_v23 = vpop.permute.xlu0 %5420 }
 0xac2   : > { %v11322_v45 = vpop.permute.xlu2 %5936 }
 0xac4   : > { %5521 = vrot.lane.b32.xlu2 %v5514_v41, %s7471_s27 }
 0xac9   : > { %v11326_v16 = vpop.permute.xlu0 %5942 }
 0xaca   : > { %v11324_v9 = vpop.permute.xlu1 %5473  ;;  %v5941_v12 = vpop.permute.xlu2 %5940 }
 0xacb   : > { %v11330_v25 = vsel %vm490_vm4, %v5941_v12, %v11326_v16 }
 0xad1   : > { %v11338_v61 = vpop.permute.xlu0 %5877 }
 0xad2   : > { %v11332_v3 = vpop.permute.xlu1 %5938  ;;  %v11340_v42 = vpop.permute.xlu2 %5820 }
 0xad3   : > { %v11336_v7 = vsel %vm490_vm4, %v11332_v3, %v5941_v12 }
 0xad9   : > { %v11342_v31 = vpop.permute.xlu0 %5824 }
 0xada   : > { %v11344_v0 = vpop.permute.xlu2 %5822  ;;  %v11351_v44 = vpop.permute.xlu1 %5818 }
 0xadb   : > { %v11349_v35 = vsel %vm1217_vm6, %v11344_v0, %v11342_v31 }
 0xae1   : > { %v11357_v48 = vpop.permute.xlu0 %5759 }
 0xae2   : > { %v11353_v60 = vpop.permute.xlu1 %5879 }
 0xae9   : > { %v11365_v15 = vpop.permute.xlu0 %5765 }
 0xaea   : > { %v11355_v47 = vpop.permute.xlu1 %5881 }
 0xaed   : > { %v11359_v28 = vpop.permute.xlu2 %5883 }
 0xaf1   : > { %v11381_v8 = vpop.permute.xlu0 %5692 }
 0xaf2   : > { %v11362_v59 = vpop.permute.xlu1 %5761 }
 0xaf5   : > { %v11367_v38 = vpop.permute.xlu2 %5763 }
 0xafa   : > { %v11372_v39 = vpop.permute.xlu1 %5633 }
 0xafe   : > { %v11383_v2 = vpop.permute.xlu2 %5635 }
 0xb03   : > { %v11388_v24 = vpop.permute.xlu1 %5694 }
 0xb29   : > { %v5369_v20 = vpop.f32.mrf.mxu3 }
 0xb2a   : > { %v5370_v13 = vadd.f32 %v5369_v20, %v11310_v53 }
 0xb2c   : > { %v5412_v26 = vmax.f32 %v5370_v13, 0.0 }
 0xb2e   : > { %v5423_v29 = vperm.slane %v5412_v26, 0  ;;  %v5444_v4 = vperm.slane %v5412_v26, 1  ;;  %v5460_v36 = vperm.slane %v5412_v26, 2  ;;  %v5476_v14 = vperm.slane %v5412_v26, 3 }
 0xb30   : > { %v5427_v50 = vmul.f32 %v5423_v29, %v11320_v23  ;;  %v5448_v5 = vmul.f32 %v5444_v4, %v11318_v21  ;;  %v5464_v30 = vmul.f32 %v5460_v36, %v11313_v10  ;;  %v5480_v49 = vmul.f32 %v5476_v14, %v11324_v9  ;;  %v11397_v14 = vpop.permute.xlu2 %5637 }
 0xb31   : > { %v5371_v55 = vpop.f32.mrf.mxu3 }
 0xb32   : > { %v5436_v1 = vadd.f32 %v11315_v34, %v5427_v50 }
 0xb34   : > { %v5452_v37 = vadd.f32 %v5448_v5, %v5436_v1  ;;  %v11395_v5 = vpop.permute.xlu0 %5639 }
 0xb36   : > { %v5468_v6 = vadd.f32 %v5464_v30, %v5452_v37 }
 0xb38   : > { %v5484_v54 = vadd.f32 %v5480_v49, %v5468_v6 }
 0xb3a   : > { %v11376_v22 = vadd.f32 %v5484_v54, %v10973_v52 }
 0xb3c   : > { %v11379_v32 = vmax.f32 %v11376_v22, 0.0 }
 0xb3d   : > { %v5382_v33 = vpop.f32.mrf.mxu0  ;;  %v5395_v18 = vpop.f32.mrf.mxu1 }
 0xb3e   : > { %5500 = vst [vmem:[#allocation2 + $0x8] sm:$0xff] %v11379_v32  ;;  %v5383_v17 = vadd.f32 %v5382_v33, %v11310_v53  ;;  %v5396_v46 = vadd.f32 %v5395_v18, %v11310_v53  ;;  %v11402_v18 = vpop.permute.xlu1 %5696 }
 0xb40   : > { %v5413_v11 = vmax.f32 %v5383_v17, 0.0  ;;  %v5414_v52 = vmax.f32 %v5396_v46, 0.0 }
 0xb41   : > { %v5408_v63 = vpop.f32.mrf.mxu2 }
 0xb42   : > { %v5424_v19 = vperm.slane %v5413_v11, 0  ;;  %v5445_v57 = vperm.slane %v5413_v11, 1  ;;  %v5425_v62 = vperm.slane %v5414_v52, 0  ;;  %v5446_v41 = vperm.slane %v5414_v52, 1 }
 0xb43   : > { %v5461_v20 = vperm.slane %v5413_v11, 2  ;;  %v5462_v26 = vperm.slane %v5414_v52, 2  ;;  %v5477_v55 = vperm.slane %v5413_v11, 3  ;;  %v5409_v1 = vadd.f32 %v5408_v63, %v11310_v53 }
 0xb44   : > { %v5428_v12 = vmul.f32 %v5424_v19, %v11320_v23  ;;  %v5429_v13 = vmul.f32 %v5425_v62, %v11320_v23  ;;  %v5449_v36 = vmul.f32 %v5445_v57, %v11318_v21  ;;  %v5450_v30 = vmul.f32 %v5446_v41, %v11318_v21 }
 0xb45   : > { %v5384_v29 = vpop.f32.mrf.mxu0  ;;  %v5397_v4 = vpop.f32.mrf.mxu1  ;;  %v5478_v6 = vperm.slane %v5414_v52, 3  ;;  %v5465_v54 = vmul.f32 %v5461_v20, %v11313_v10  ;;  %v5415_v33 = vmax.f32 %v5409_v1, 0.0  ;;  %v5466_v46 = vmul.f32 %v5462_v26, %v11313_v10 }
 0xb46   : > { %v5437_v50 = vadd.f32 %v11315_v34, %v5428_v12  ;;  %v5438_v37 = vadd.f32 %v11315_v34, %v5429_v13  ;;  %v5481_v63 = vmul.f32 %v5477_v55, %v11324_v9 }
 0xb47   : > { %v5426_v19 = vperm.slane %v5415_v33, 0  ;;  %v5447_v57 = vperm.slane %v5415_v33, 1  ;;  %v5482_v12 = vmul.f32 %v5478_v6, %v11324_v9  ;;  %v5463_v13 = vperm.slane %v5415_v33, 2 }
 0xb48   : > { %v5453_v49 = vadd.f32 %v5449_v36, %v5437_v50  ;;  %v5454_v17 = vadd.f32 %v5450_v30, %v5438_v37  ;;  %v5479_v50 = vperm.slane %v5415_v33, 3  ;;  %v5834_v33 = vmul.f32 %v11351_v44, %v11379_v32 }
 0xb49   : > { %v5410_v11 = vpop.f32.mrf.mxu2  ;;  %v5430_v52 = vmul.f32 %v5426_v19, %v11320_v23  ;;  %v5451_v26 = vmul.f32 %v5447_v57, %v11318_v21  ;;  %v5467_v37 = vmul.f32 %v5463_v13, %v11313_v10  ;;  %v5944_v23 = vsel %vm490_vm4, %v11322_v45, %v11332_v3  ;;  %v11429_v21 = vpop.permute.xlu2 %5698  ;;  %v5681_v57 = vld [vmem:[#allocation2] sm:$0xff] }
 0xb4a   : > { %v5469_v53 = vadd.f32 %v5465_v54, %v5453_v49  ;;  %v5470_v62 = vadd.f32 %v5466_v46, %v5454_v17  ;;  %v5483_v6 = vmul.f32 %v5479_v50, %v11324_v9  ;;  %v5952_v3 = vmul.f32 %v11322_v45, %v11379_v32  ;;  %v11440_v54 = vpop.permute.xlu1 %5517 }
 0xb4b   : > { %v5439_v4 = vadd.f32 %v11315_v34, %v5430_v52  ;;  %v5767_v34 = vsel %vm1464_vm8, %v11357_v48, %v11362_v59  ;;  %v5775_v46 = vmul.f32 %v11357_v48, %v11379_v32  ;;  %v5885_v48 = vsel %vm970_vm5, %v11338_v61, %v11353_v60 }
 0xb4c   : > { %v5485_v41 = vadd.f32 %v5481_v63, %v5469_v53  ;;  %v5486_v20 = vadd.f32 %v5482_v12, %v5470_v62  ;;  %v11448_v63 = vld [vmem:[#allocation2 + $0x28] sm:$0xff]  ;;  %v5641_v62 = vsel %vm1088_vm3, %v11372_v39, %v11383_v2 }
 0xb4d   : > { %v5455_v1 = vadd.f32 %v5451_v26, %v5439_v4  ;;  %v5650_v4 = vmul.f32 %v5641_v62, %v11379_v32 }
 0xb4e   : > { %v11409_v29 = vadd.f32 %v5485_v41, %v11002_v56  ;;  %v11414_v36 = vadd.f32 %v5486_v20, %v11005_v58  ;;  %v5826_v56 = vsel %vm1217_vm6, %v11351_v44, %v11340_v42  ;;  %v5516_v58 = vpop.permute.xlu0 %5515  ;;  %v5956_v41 = vmul.f32 %v11326_v16, %v11448_v63 }
 0xb4f   : > { %v5471_v10 = vadd.f32 %v5467_v37, %v5455_v1  ;;  %v5523_v12 = vsel %vm595_vm1, %v5516_v58, %v11440_v54  ;;  %v5649_v20 = vmul.f32 %v5681_v57, %v11372_v39  ;;  %v5531_v26 = vmul.f32 %v5681_v57, %v5516_v58 }
 0xb50   : > { %v11417_v55 = vmax.f32 %v11409_v29, 0.0  ;;  %v11432_v30 = vmax.f32 %v11414_v36, 0.0  ;;  %v5532_v50 = vmul.f32 %v5523_v12, %v11379_v32  ;;  %v5887_v1 = vsel %vm970_vm5, %v11355_v47, %v11359_v28 }
 0xb51   : > { %v5487_v9 = vadd.f32 %v5483_v6, %v5471_v10  ;;  %v5893_v16 = vmul.f32 %v11338_v61, %v11379_v32  ;;  %v5897_v37 = vmul.f32 %v11448_v63, %v11359_v28  ;;  %v5700_v61 = vsel %vm1335_vm7, %v11381_v8, %v11388_v24 }
 0xb52   : > { %5501 = vst [vmem:[#allocation2 + $0x10] sm:$0xff] %v11417_v55  ;;  %v5953_v49 = vmul.f32 %v5944_v23, %v11417_v55  ;;  %v5835_v17 = vmul.f32 %v5826_v56, %v11417_v55  ;;  %v5776_v11 = vmul.f32 %v5767_v34, %v11417_v55  ;;  %v5894_v13 = vmul.f32 %v5885_v48, %v11417_v55  ;;  %v5575_v56 = vpop.permute.xlu2 %5574 }
 0xb53   : > { %5502 = vst [vmem:[#allocation2 + $0x18] sm:$0xff] %v11432_v30  ;;  %v11454_v44 = vadd.f32 %v5487_v9, %v11018_v27  ;;  %v5838_v27 = vmul.f32 %v11448_v63, %v11342_v31  ;;  %v5708_v28 = vmul.f32 %v11381_v8, %v5681_v57  ;;  %v5827_v8 = vsel %vm1217_vm6, %v11340_v42, %v11344_v0  ;;  %v5520_v0 = vpop.permute.xlu1 %5519 }
 0xb54   : > { %v7361_v53 = vpack.i.bf16 %v5953_v49, %v5952_v3  ;;  %v7366_v45 = vpack.i.bf16 %v5835_v17, %v5834_v33  ;;  %v7376_v19 = vpack.i.bf16 %v5776_v11, %v5775_v46  ;;  %v7371_v58 = vpack.i.bf16 %v5894_v13, %v5893_v16 }
 0xb55   : > { %v11469_v52 = vmax.f32 %v11454_v44, 0.0  ;;  %v7381_v3 = vpack.i.bf16 %v5650_v4, %v5649_v20  ;;  %v5709_v33 = vmul.f32 %v5700_v61, %v11379_v32  ;;  %v5590_v17 = vmul.f32 %v5681_v57, %v5575_v56 }
 0xb56   : > { %7362 = vrot.lane.b32.xlu2 %v7361_v53, %s7471_s27  ;;  %7367 = vrot.lane.b32.xlu1 %v7366_v45, %s7473_s14  ;;  %v11487_v23 = vpop.permute.xlu0 %5576  ;;  %v5954_v53 = vmul.f32 %v11336_v7, %v11432_v30  ;;  %v5886_v45 = vsel %vm970_vm5, %v11353_v60, %v11355_v47  ;;  %v5836_v7 = vmul.f32 %v5827_v8, %v11432_v30 }
 0xb57   : > { %7377 = vrot.lane.b32.xlu0 %v7376_v19, %s12237_s24  ;;  %5503 = vst [vmem:[#allocation2 + $0x20] sm:$0xff] %v11469_v52  ;;  %v5837_v31 = vmul.f32 %v11349_v35, %v11469_v52  ;;  %v5955_v39 = vmul.f32 %v11330_v25, %v11469_v52  ;;  %v5896_v34 = vmul.f32 %v5887_v1, %v11469_v52 }
 0xb58   : > { %v7391_v35 = vpack.i.bf16 %v5532_v50, %v5531_v26  ;;  %v5582_v25 = vsel %vm841_vm2, %v5575_v56, %v11487_v23  ;;  %v7386_v11 = vpack.i.bf16 %v5709_v33, %v5708_v28  ;;  %v5642_v19 = vsel %vm1088_vm3, %v11383_v2, %v11397_v14 }
 0xb59   : > { %v7406_v10 = vpack.i.bf16 %v5838_v27, %v5837_v31  ;;  %v7401_v6 = vpack.i.bf16 %v5956_v41, %v5955_v39  ;;  %v7411_v49 = vpack.i.bf16 %v5897_v37, %v5896_v34  ;;  %v5591_v46 = vmul.f32 %v5582_v25, %v11379_v32 }
 0xb5a   : > { %v5651_v57 = vmul.f32 %v5642_v19, %v11417_v55  ;;  %v5895_v62 = vmul.f32 %v5886_v45, %v11432_v30  ;;  %v5768_v42 = vsel %vm1464_vm8, %v11362_v59, %v11367_v38  ;;  %v5769_v47 = vsel %vm1464_vm8, %v11367_v38, %v11365_v15  ;;  %v5522_v27 = vpop.permute.xlu2 %5521 }
 0xb5b   : > { %v7396_v9 = vpack.i.bf16 %v5591_v46, %v5590_v17  ;;  %v5777_v60 = vmul.f32 %v5768_v42, %v11432_v30  ;;  %v5643_v2 = vsel %vm1088_vm3, %v11397_v14, %v11395_v5  ;;  %v5778_v12 = vmul.f32 %v5769_v47, %v11469_v52  ;;  %v5581_v20 = vpop.permute.xlu1 %5580 }
 0xb5c   : > { %v5653_v59 = vmul.f32 %v11395_v5, %v11469_v52  ;;  %v5779_v48 = vmul.f32 %v11448_v63, %v11365_v15  ;;  %v5652_v41 = vmul.f32 %v5643_v2, %v11432_v30  ;;  %v5525_v38 = vsel %vm595_vm1, %v5520_v0, %v5522_v27 }
 0xb5d   : > { %v5702_v5 = vsel %vm1335_vm7, %v11402_v18, %v11429_v21  ;;  %v5535_v15 = vmul.f32 %v5522_v27, %v11469_v52  ;;  %v5594_v63 = vmul.f32 %v5581_v20, %v11469_v52  ;;  %v5712_v50 = vmul.f32 %v11429_v21, %v11469_v52  ;;  %v6347_v27 = vld [vmem:[%s11739_s11 + $0x8] sm:$0xff] }
 0xb5e   : > { %7372 = vrot.lane.b32.xlu2 %v7371_v58, %s7472_s29  ;;  %7382 = vrot.lane.b32.xlu1 %v7381_v3, %s7477_s19  ;;  %v5579_v13 = vpop.permute.xlu0 %5578  ;;  %v7416_v4 = vpack.i.bf16 %v5779_v48, %v5778_v12  ;;  %v7421_v26 = vpack.i.bf16 %v5653_v59, %v5652_v41  ;;  %v5534_v1 = vmul.f32 %v5525_v38, %v11432_v30 }
 0xb5f   : > { %7392 = vrot.lane.b32.xlu0 %v7391_v35, %s7475_s21  ;;  %v5584_v14 = vsel %vm841_vm2, %v5579_v13, %v5581_v20  ;;  %v5711_v31 = vmul.f32 %v5702_v5, %v11432_v30  ;;  %v5524_v34 = vsel %vm595_vm1, %v11440_v54, %v5520_v0  ;;  %v5583_v21 = vsel %vm841_vm2, %v11487_v23, %v5579_v13  ;;  %v11574_v54 = vld [vmem:[%s11738_s10 + $0x8] sm:$0xff] }
 0xb60   : > { %v5593_v16 = vmul.f32 %v5584_v14, %v11432_v30  ;;  %v7431_v39 = vpack.i.bf16 %v5535_v15, %v5534_v1  ;;  %v5701_v58 = vsel %vm1335_vm7, %v11388_v24, %v11402_v18  ;;  %v5592_v3 = vmul.f32 %v5583_v21, %v11417_v55 }
 0xb61   : > { %v7426_v56 = vpack.i.bf16 %v5712_v50, %v5711_v31 }
 0xb62   : > { %v7436_v37 = vpack.i.bf16 %v5594_v63, %v5593_v16 }
 0xb66   : > { %7387 = vrot.lane.b32.xlu2 %v7386_v11, %s12238_s13  ;;  %7397 = vrot.lane.b32.xlu1 %v7396_v9, %s7476_s18 }
 0xb67   : > { %5966 = vrot.lane.b32.xlu0 %v5954_v53, %s7471_s27 }
 0xb6e   : > { %5848 = vrot.lane.b32.xlu2 %v5836_v7, %s7473_s14  ;;  %5663 = vrot.lane.b32.xlu1 %v5651_v57, %s7477_s19 }
 0xb6f   : > { %5907 = vrot.lane.b32.xlu0 %v5895_v62, %s7472_s29 }
 0xb76   : > { %5789 = vrot.lane.b32.xlu2 %v5777_v60, %s12237_s24  ;;  %7407 = vrot.lane.b32.xlu1 %v7406_v10, %s7473_s14  ;;  %v5710_v10 = vmul.f32 %v5701_v58, %v11417_v55 }
 0xb77   : > { %7402 = vrot.lane.b32.xlu0 %v7401_v6, %s7471_s27  ;;  %v5533_v6 = vmul.f32 %v5524_v34, %v11417_v55 }
 0xb7e   : > { %7412 = vrot.lane.b32.xlu2 %v7411_v49, %s7472_s29  ;;  %7417 = vrot.lane.b32.xlu1 %v7416_v4, %s12237_s24 }
 0xb7f   : > { %7422 = vrot.lane.b32.xlu0 %v7421_v26, %s7477_s19 }
 0xb86   : > { %7432 = vrot.lane.b32.xlu2 %v7431_v39, %s7475_s21  ;;  %7427 = vrot.lane.b32.xlu1 %v7426_v56, %s12238_s13  ;;  %v11618_v56 = vld [vmem:[%s11736_s8 + $0x2] sm:$0x3] }
 0xb87   : > { %7437 = vrot.lane.b32.xlu0 %v7436_v37, %s7476_s18 }
 0xb8e   : > { %5722 = vrot.lane.b32.xlu2 %v5710_v10, %s12238_s13  ;;  %5604 = vrot.lane.b32.xlu1 %v5592_v3, %s7476_s18  ;;  %v6334_v3 = vld [vmem:[%s11737_s9 + $0x4] sm:$0xf] }
 0xb8f   : > { %5545 = vrot.lane.b32.xlu0 %v5533_v6, %s7475_s21 }
 0xb96   : > { %6135 = vperm.xlu1 %7442, %v6347_v27   ;;  %6042 = vperm.xlu2 %7441, %v6334_v3  }
 0xb97   : > { %6122 = vperm.xlu0 %7359, %v11574_v54  }
 0xb9e   : > { %7444 = vset.pattern.permute.xlu1 %v7481_v40  ;;  %7443 = vset.pattern.permute.xlu2 %v7483_v43 }
 0xb9f   : > { %7446 = vset.pattern.permute.xlu0 %v7482_v51  ;;  %6159 = vperm.xlu1 %7444, %v11574_v54  }
 0xba0   : > { %6143 = vperm.xlu2 %7443, %v11574_v54  }
 0xba8   : > { %7445 = vset.pattern.permute.xlu2 %v7482_v51 }
 0xba9   : > { %6175 = vperm.xlu2 %7445, %v11574_v54  }
 0xbb0   : > { %v7363_v24 = vpop.permute.xlu2 %7362 }
 0xbb1   : > { %v7365_v18 = vunpack.i.h.bf16 %v7363_v24  ;;  %v7364_v23 = vunpack.i.l.bf16 %v7363_v24 }
 0xbb3   : > { %v5972_v61 = vsel %vm595_vm1, %v7364_v23, %v7365_v18 }
 0xbb4   : > { %v6036_v35 = vpack.c.bf16 %v5972_v61, %v5972_v61 }
 0xbb6   : > { %v6049_v49 = vsel %vm4729_vm10, %v6036_v35, 0 }
 0xbb7   : > { %6063 = vmatpush.bf16.msrb.mxu3 %v6049_v49 }
 0xbb8   : > { %v7373_v25 = vpop.permute.xlu2 %7372 }
 0xbb9   : > { %v7375_v33 = vunpack.i.h.bf16 %v7373_v25  ;;  %v7374_v17 = vunpack.i.l.bf16 %v7373_v25 }
 0xbbb   : > { %v5913_v57 = vsel %vm841_vm2, %v7374_v17, %v7375_v33 }
 0xbc0   : > { %v11580_v28 = vpop.permute.xlu2 %7387 }
 0xbc1   : > { %v7390_v0 = vunpack.i.h.bf16 %v11580_v28  ;;  %v7389_v60 = vunpack.i.l.bf16 %v11580_v28 }
 0xbc3   : > { %v5728_v20 = vsel %vm1464_vm8, %v7389_v60, %v7390_v0 }
 0xbc8   : > { %v11582_v46 = vpop.permute.xlu2 %5848  ;;  %v7368_v11 = vpop.permute.xlu1 %7367 }
 0xbc9   : > { %v7378_v9 = vpop.permute.xlu0 %7377  ;;  %v7370_v53 = vunpack.i.h.bf16 %v7368_v11  ;;  %v7369_v8 = vunpack.i.l.bf16 %v7368_v11 }
 0xbca   : > { %v7380_v45 = vunpack.i.h.bf16 %v7378_v9  ;;  %v7379_v19 = vunpack.i.l.bf16 %v7378_v9 }
 0xbcb   : > { %v5854_v7 = vsel %vm1088_vm3, %v7369_v8, %v7370_v53  ;;  %v5855_v58 = vsel %vm1088_vm3, %v7370_v53, %v11582_v46 }
 0xbcc   : > { %v6032_v62 = vpack.c.bf16 %v5913_v57, %v5854_v7  ;;  %v5795_v42 = vsel %vm1335_vm7, %v7379_v19, %v7380_v45 }
 0xbcd   : > { %v6028_v59 = vpack.c.bf16 %v5795_v42, %v11379_v32 }
 0xbce   : > { %6064 = vmatpush.bf16.msrb.mxu3 %v6032_v62 }
 0xbd0   : > { %v11589_v47 = vpop.permute.xlu2 %5789  ;;  %v7383_v2 = vpop.permute.xlu1 %7382 }
 0xbd1   : > { %v11591_v12 = vpop.permute.xlu0 %7392  ;;  %v7385_v48 = vunpack.i.h.bf16 %v7383_v2  ;;  %v7384_v41 = vunpack.i.l.bf16 %v7383_v2  ;;  %v5796_v24 = vsel %vm1335_vm7, %v7380_v45, %v11589_v47 }
 0xbd2   : > { %6065 = vmatpush.bf16.msrb.mxu3 %v6028_v59  ;;  %v7395_v26 = vunpack.i.h.bf16 %v11591_v12  ;;  %v7394_v38 = vunpack.i.l.bf16 %v11591_v12 }
 0xbd3   : > { %v5669_v13 = vsel %vm1217_vm6, %v7384_v41, %v7385_v48 }
 0xbd4   : > { %v6024_v4 = vpack.c.bf16 %v5728_v20, %v5669_v13  ;;  %v5551_v16 = vsel %vm490_vm4, %v7394_v38, %v7395_v26 }
 0xbd6   : > { %6066 = vmatpush.bf16.msrb.mxu3 %v6024_v4 }
 0xbd8   : > { %v7413_v5 = vpop.permute.xlu2 %7412  ;;  %v11601_v32 = vpop.permute.xlu1 %7397 }
 0xbd9   : > { %v5967_v15 = vpop.permute.xlu0 %5966  ;;  %v7400_v14 = vunpack.i.h.bf16 %v11601_v32  ;;  %v7399_v63 = vunpack.i.l.bf16 %v11601_v32  ;;  %v7415_v8 = vunpack.i.h.bf16 %v7413_v5  ;;  %v7414_v45 = vunpack.i.l.bf16 %v7413_v5 }
 0xbda   : > { %v5973_v50 = vsel %vm595_vm1, %v7365_v18, %v5967_v15  ;;  %v6029_v18 = vpack.c.bf16 %v5796_v24, %v11417_v55 }
 0xbdb   : > { %v6037_v1 = vpack.c.bf16 %v5973_v50, %v5973_v50  ;;  %v5610_v31 = vsel %vm970_vm5, %v7399_v63, %v7400_v14  ;;  %v5916_v41 = vsel %vm841_vm2, %v7414_v45, %v7415_v8 }
 0xbdc   : > { %v6020_v37 = vpack.c.bf16 %v5610_v31, %v5551_v16 }
 0xbdd   : > { %v6052_v39 = vsel %vm4729_vm10, %v6037_v1, 0 }
 0xbde   : > { %6076 = vmatpush.bf16.msra.mxu0 %v6052_v39  ;;  %6067 = vmatpush.bf16.msrb.mxu3 %v6020_v37 }
 0xbe0   : > { %v11620_v40 = vpop.permute.xlu2 %7432  ;;  %v11622_v34 = vpop.permute.xlu1 %5663 }
 0xbe1   : > { %v5908_v21 = vpop.permute.xlu0 %5907  ;;  %6342 = vmatmul.msk.bf16.vlgmr.msrb.gmra.mxu3 %vm4725_vm11, %v11618_v56  ;;  %v5670_v61 = vsel %vm1217_vm6, %v7385_v48, %v11622_v34  ;;  %v7435_v39 = vunpack.i.h.bf16 %v11620_v40 }
 0xbe2   : > { %v5914_v10 = vsel %vm841_vm2, %v7375_v33, %v5908_v21  ;;  %v5915_v2 = vsel %vm841_vm2, %v5908_v21, %v7414_v45 }
 0xbe3   : > { %v6033_v6 = vpack.c.bf16 %v5914_v10, %v5855_v58 }
 0xbe5   : > { %6077 = vmatpush.bf16.msra.mxu0 %v6033_v6 }
 0xbe8   : > { %v5723_v23 = vpop.permute.xlu2 %5722  ;;  %v7408_v49 = vpop.permute.xlu1 %7407 }
 0xbe9   : > { %v5729_v35 = vsel %vm1464_vm8, %v7390_v0, %v5723_v23  ;;  %6078 = vmatpush.bf16.msra.mxu0 %v6029_v18  ;;  %v7403_v25 = vpop.permute.xlu0 %7402  ;;  %v7410_v11 = vunpack.i.h.bf16 %v7408_v49  ;;  %v7409_v9 = vunpack.i.l.bf16 %v7408_v49 }
 0xbea   : > { %v6025_v28 = vpack.c.bf16 %v5729_v35, %v5670_v61  ;;  %v7405_v33 = vunpack.i.h.bf16 %v7403_v25  ;;  %v7404_v17 = vunpack.i.l.bf16 %v7403_v25 }
 0xbeb   : > { %v5856_v42 = vsel %vm1088_vm3, %v11582_v46, %v7409_v9  ;;  %v5857_v43 = vsel %vm1088_vm3, %v7409_v9, %v7410_v11 }
 0xbec   : > { %v5974_v53 = vsel %vm595_vm1, %v5967_v15, %v7404_v17  ;;  %v5975_v55 = vsel %vm595_vm1, %v7404_v17, %v7405_v33  ;;  %v6034_v27 = vpack.c.bf16 %v5915_v2, %v5856_v42  ;;  %v6035_v13 = vpack.c.bf16 %v5916_v41, %v5857_v43 }
 0xbed   : > { %6079 = vmatpush.bf16.msra.mxu0 %v6025_v28  ;;  %v6038_v19 = vpack.c.bf16 %v5974_v53, %v5974_v53  ;;  %v6039_v7 = vpack.c.bf16 %v5975_v55, %v5975_v55 }
 0xbef   : > { %v6055_v57 = vsel %vm4729_vm10, %v6038_v19, 0  ;;  %v6058_v62 = vsel %vm4729_vm10, %v6039_v7, 0 }
 0xbf0   : > { %6089 = vmatpush.bf16.msra.mxu1 %v6055_v57  ;;  %6102 = vmatpush.bf16.msrb.mxu2 %v6058_v62  ;;  %v7418_v0 = vpop.permute.xlu1 %7417  ;;  %v6043_v12 = vpop.permute.xlu2 %6042 }
 0xbf1   : > { %v7423_v60 = vpop.permute.xlu0 %7422  ;;  %v7420_v59 = vunpack.i.h.bf16 %v7418_v0  ;;  %v7419_v48 = vunpack.i.l.bf16 %v7418_v0 }
 0xbf2   : > { %v7425_v5 = vunpack.i.h.bf16 %v7423_v60  ;;  %v7424_v15 = vunpack.i.l.bf16 %v7423_v60 }
 0xbf3   : > { %v5797_v20 = vsel %vm1335_vm7, %v11589_v47, %v7419_v48  ;;  %v5798_v4 = vsel %vm1335_vm7, %v7419_v48, %v7420_v59 }
 0xbf4   : > { %6090 = vmatpush.bf16.msra.mxu1 %v6034_v27  ;;  %6103 = vmatpush.bf16.msrb.mxu2 %v6035_v13  ;;  %v6030_v46 = vpack.c.bf16 %v5797_v20, %v11432_v30  ;;  %v6031_v38 = vpack.c.bf16 %v5798_v4, %v11469_v52  ;;  %v7434_v30 = vunpack.i.l.bf16 %v11620_v40  ;;  %v5671_v52 = vsel %vm1217_vm6, %v11622_v34, %v7424_v15 }
 0xbf5   : > { %v5672_v54 = vsel %vm1217_vm6, %v7424_v15, %v7425_v5 }
 0xbf6   : > { %v5554_v6 = vsel %vm490_vm4, %v7434_v30, %v7435_v39 }
 0xbf8   : > { %6091 = vmatpush.bf16.msra.mxu1 %v6030_v46  ;;  %6104 = vmatpush.bf16.msrb.mxu2 %v6031_v38  ;;  %v7428_v63 = vpop.permute.xlu1 %7427 }
 0xbf9   : > { %v7438_v50 = vpop.permute.xlu0 %7437  ;;  %v7430_v1 = vunpack.i.h.bf16 %v7428_v63  ;;  %v7429_v47 = vunpack.i.l.bf16 %v7428_v63 }
 0xbfa   : > { %v7440_v16 = vunpack.i.h.bf16 %v7438_v50  ;;  %v7439_v31 = vunpack.i.l.bf16 %v7438_v50 }
 0xbfb   : > { %v5730_v51 = vsel %vm1464_vm8, %v5723_v23, %v7429_v47  ;;  %v5731_v37 = vsel %vm1464_vm8, %v7429_v47, %v7430_v1 }
 0xbfc   : > { %v6026_v21 = vpack.c.bf16 %v5730_v51, %v5671_v52  ;;  %v6027_v58 = vpack.c.bf16 %v5731_v37, %v5672_v54  ;;  %v5613_v10 = vsel %vm970_vm5, %v7439_v31, %v7440_v16 }
 0xbfd   : > { %v6023_v40 = vpack.c.bf16 %v5613_v10, %v5554_v6 }
 0xbfe   : > { %6092 = vmatpush.bf16.msra.mxu1 %v6026_v21  ;;  %6105 = vmatpush.bf16.msrb.mxu2 %v6027_v58 }
 0xc00   : > { %v5605_v3 = vpop.permute.xlu1 %5604 }
 0xc01   : > { %v5546_v24 = vpop.permute.xlu0 %5545  ;;  %v5611_v34 = vsel %vm970_vm5, %v7400_v14, %v5605_v3  ;;  %v5612_v18 = vsel %vm970_vm5, %v5605_v3, %v7439_v31 }
 0xc02   : > { %v5552_v23 = vsel %vm490_vm4, %v7395_v26, %v5546_v24  ;;  %v5553_v61 = vsel %vm490_vm4, %v5546_v24, %v7434_v30  ;;  %6106 = vmatpush.bf16.msrb.mxu2 %v6023_v40  ;;  %v11681_v26 = vpop.permute.xlu2 %6143 }
 0xc03   : > { %v6021_v35 = vpack.c.bf16 %v5611_v34, %v5552_v23  ;;  %v6022_v49 = vpack.c.bf16 %v5612_v18, %v5553_v61 }
 0xc05   : > { %6080 = vmatpush.bf16.msra.mxu0 %v6021_v35  ;;  %6093 = vmatpush.bf16.msra.mxu1 %v6022_v49 }
 0xc06   : > { %6345 = vmatmul.msk.bf16.vlgmr.msrb.gmra.mxu2 %vm4725_vm11, %v11618_v56 }
 0xc08   : > { %6343 = vmatmul.msk.bf16.vlgmr.msra.gmra.mxu0 %vm4725_vm11, %v11618_v56  ;;  %6344 = vmatmul.msk.bf16.vlgmr.msra.gmra.mxu1 %vm4725_vm11, %v11618_v56  ;;  %v11679_v32 = vpop.permute.xlu1 %6135 }
 0xc09   : > { %v6123_v9 = vpop.permute.xlu0 %6122 }
 0xc0a   : > { %v11688_v45 = vpop.permute.xlu2 %6175 }
 0xc11   : > { %v11685_v53 = vpop.permute.xlu1 %6159 }
 0xc64   : > { %v6069_v14 = vpop.f32.mrf.mxu3 }
 0xc65   : > { %v6070_v25 = vadd.f32 %v6069_v14, %v6043_v12 }
 0xc67   : > { %v6112_v28 = vmax.f32 %v6070_v25, 0.0 }
 0xc69   : > { %v6125_v33 = vperm.slane %v6112_v28, 0  ;;  %v6146_v17 = vperm.slane %v6112_v28, 1  ;;  %v6162_v11 = vperm.slane %v6112_v28, 2  ;;  %v6178_v56 = vperm.slane %v6112_v28, 3 }
 0xc6b   : > { %v6129_v55 = vmul.f32 %v6125_v33, %v6123_v9  ;;  %v6150_v8 = vmul.f32 %v6146_v17, %v11681_v26  ;;  %v6166_v57 = vmul.f32 %v6162_v11, %v11685_v53  ;;  %v6182_v42 = vmul.f32 %v6178_v56, %v11688_v45 }
 0xc6c   : > { %v6071_v19 = vpop.f32.mrf.mxu3 }
 0xc6d   : > { %v6138_v7 = vadd.f32 %v11679_v32, %v6129_v55 }
 0xc6f   : > { %v6154_v62 = vadd.f32 %v6150_v8, %v6138_v7 }
 0xc71   : > { %v6170_v43 = vadd.f32 %v6166_v57, %v6154_v62 }
 0xc73   : > { %v6186_v0 = vadd.f32 %v6182_v42, %v6170_v43 }
 0xc75   : > { %v6190_v60 = vadd.f32 %v6186_v0, %v11376_v22 }
 0xc77   : > { %v6194_v2 = vmax.f32 %v6190_v60, 0.0 }
 0xc79   : > { %6198 = vst [vmem:[%s11697_s26] sm:$0xff] %v6194_v2 }
 0xc85   : > { %v6082_v59 = vpop.f32.mrf.mxu0  ;;  %v6095_v48 = vpop.f32.mrf.mxu1 }
 0xc86   : > { %v6083_v41 = vadd.f32 %v6082_v59, %v6043_v12  ;;  %v6096_v27 = vadd.f32 %v6095_v48, %v6043_v12 }
 0xc88   : > { %v6113_v13 = vmax.f32 %v6083_v41, 0.0  ;;  %v6114_v20 = vmax.f32 %v6096_v27, 0.0 }
 0xc89   : > { %v6108_v4 = vpop.f32.mrf.mxu2 }
 0xc8a   : > { %v6126_v46 = vperm.slane %v6113_v13, 0  ;;  %v6147_v38 = vperm.slane %v6113_v13, 1  ;;  %v6127_v5 = vperm.slane %v6114_v20, 0  ;;  %v6148_v15 = vperm.slane %v6114_v20, 1 }
 0xc8b   : > { %v6163_v63 = vperm.slane %v6113_v13, 2  ;;  %v6164_v1 = vperm.slane %v6114_v20, 2  ;;  %v6179_v30 = vperm.slane %v6113_v13, 3  ;;  %v6109_v52 = vadd.f32 %v6108_v4, %v6043_v12 }
 0xc8c   : > { %v6130_v22 = vmul.f32 %v6126_v46, %v6123_v9  ;;  %v6131_v50 = vmul.f32 %v6127_v5, %v6123_v9  ;;  %v6151_v39 = vmul.f32 %v6147_v38, %v11681_v26  ;;  %v6152_v54 = vmul.f32 %v6148_v15, %v11681_v26 }
 0xc8d   : > { %v6084_v47 = vpop.f32.mrf.mxu0  ;;  %v6097_v16 = vpop.f32.mrf.mxu1  ;;  %v6180_v37 = vperm.slane %v6114_v20, 3  ;;  %v6167_v58 = vmul.f32 %v6163_v63, %v11685_v53  ;;  %v6115_v10 = vmax.f32 %v6109_v52, 0.0  ;;  %v6168_v3 = vmul.f32 %v6164_v1, %v11685_v53 }
 0xc8e   : > { %v6139_v31 = vadd.f32 %v11679_v32, %v6130_v22  ;;  %v6140_v51 = vadd.f32 %v11679_v32, %v6131_v50  ;;  %v6183_v34 = vmul.f32 %v6179_v30, %v11688_v45 }
 0xc8f   : > { %v6128_v18 = vperm.slane %v6115_v10, 0  ;;  %v6149_v23 = vperm.slane %v6115_v10, 1  ;;  %v6184_v35 = vmul.f32 %v6180_v37, %v11688_v45  ;;  %v6165_v14 = vperm.slane %v6115_v10, 2 }
 0xc90   : > { %v6155_v21 = vadd.f32 %v6151_v39, %v6139_v31  ;;  %v6156_v6 = vadd.f32 %v6152_v54, %v6140_v51  ;;  %v6181_v11 = vperm.slane %v6115_v10, 3 }
 0xc91   : > { %v6110_v24 = vpop.f32.mrf.mxu2  ;;  %v6132_v12 = vmul.f32 %v6128_v18, %v6123_v9  ;;  %v6153_v17 = vmul.f32 %v6149_v23, %v11681_v26  ;;  %v6169_v19 = vmul.f32 %v6165_v14, %v11685_v53 }
 0xc92   : > { %v6171_v40 = vadd.f32 %v6167_v58, %v6155_v21  ;;  %v6172_v61 = vadd.f32 %v6168_v3, %v6156_v6  ;;  %v6185_v9 = vmul.f32 %v6181_v11, %v11688_v45 }
 0xc93   : > { %v6141_v33 = vadd.f32 %v11679_v32, %v6132_v12 }
 0xc94   : > { %v6187_v49 = vadd.f32 %v6183_v34, %v6171_v40  ;;  %v6188_v25 = vadd.f32 %v6184_v35, %v6172_v61 }
 0xc95   : > { %v6157_v56 = vadd.f32 %v6153_v17, %v6141_v33 }
 0xc96   : > { %v6191_v28 = vadd.f32 %v6187_v49, %v11409_v29  ;;  %v6192_v55 = vadd.f32 %v6188_v25, %v11414_v36 }
 0xc97   : > { %v6173_v57 = vadd.f32 %v6169_v19, %v6157_v56 }
 0xc98   : > { %v6195_v8 = vmax.f32 %v6191_v28, 0.0  ;;  %v6196_v7 = vmax.f32 %v6192_v55, 0.0 }
 0xc99   : > { %v6189_v62 = vadd.f32 %v6185_v9, %v6173_v57 }
 0xc9a   : > { %6199 = vst [vmem:[%s11697_s26 + $0x8] sm:$0xff] %v6195_v8 }
 0xc9b   : > { %6200 = vst [vmem:[%s11697_s26 + $0x10] sm:$0xff] %v6196_v7  ;;  %v6193_v29 = vadd.f32 %v6189_v62, %v11454_v44 }
 0xc9d   : > { %v6197_v42 = vmax.f32 %v6193_v29, 0.0 }
 0xc9f   : > { %6201 = vst [vmem:[%s11697_s26 + $0x18] sm:$0xff] %v6197_v42 }
 0xca0 PF: > { %p19_p9 = scmp.ge.s32.totalorder %s7566_s25, 4   ;;  %s12252_s21 = smov %s7465_s22 }
 0xca1   : > { %s12253_s22 = smov %s7575_s28  ;;  %s12254_s23 = smov %s7566_s25 }
 0xca2   :  { %21 = sbr.rel (!%p19_p9) target bundleno = 2 (0x2), region = 137 }

</bundles_post_ra>
